<compile_context>
chip_gen: v7x
topology: tpu7x:2x2x1
jax: 0.10.0
libtpu: 0.0.40
codegen_flags: <defaults>
</compile_context>

<pallas_src>
import functools

import jax
import jax.numpy as jnp
from jax.experimental import pallas as pl
from jax.experimental.pallas import tpu as pltpu

NUM_FEATURE_POINTS = 16
OUT_RAW = NUM_FEATURE_POINTS * 3          # 48 regressed values per image
OUT_PAD = 128                             # FC output padded to a full lane tile


# ----------------------------------------------------------------------------
# In-kernel building block: 3x3 conv (input already spatially zero-padded) as
# a single bf16 im2col matmul (f32 accumulate), then bias + ReLU + 2x2 maxpool.
# ----------------------------------------------------------------------------
def _conv_relu_pool(xp, w_ref, b_ref, Bb, H, W, Cin, Cout):
    """xp: (Bb, H+2, W+2, Cin) value.  Returns (Bb*(H//2)*(W//2), Cout) f32
    with rows ordered (batch, y, x) and channels on the lane axis."""
    xp = xp.astype(jnp.bfloat16)
    taps = []
    for ky in range(3):
        for kx in range(3):
            taps.append(xp[:, ky:ky + H, kx:kx + W, :].reshape(Bb * H * W, Cin))
    col = jnp.concatenate(taps, axis=-1)                       # (Bb*H*W, 9*Cin)
    y = jnp.dot(col, w_ref[...], preferred_element_type=jnp.float32)  # MXU, bf16
    y = jnp.maximum(y + b_ref[...], 0.0)                       # bias + ReLU (f32)
    Ho, Wo = H // 2, W // 2
    y = jnp.max(y.reshape(Bb * H * Wo, 2, Cout), axis=1)       # pool along W
    y = jnp.max(y.reshape(Bb * Ho, 2, Wo, Cout), axis=1)       # pool along H
    return y.reshape(Bb * Ho * Wo, Cout)


def _fill_padded(pad_ref, y, Bb, Hn, Wn, C):
    """Write y (Bb*Hn*Wn, C) into the interior of pad_ref; zero ONLY the
    1-pixel halo (the interior is always fully overwritten).  The halo is
    re-zeroed every step, so this is safe under megacore sharding."""
    zrow = jnp.zeros((Bb, 1, Wn + 2, C), pad_ref.dtype)
    zcol = jnp.zeros((Bb, Hn + 2, 1, C), pad_ref.dtype)
    pad_ref[:, 0:1, :, :] = zrow
    pad_ref[:, Hn + 1:Hn + 2, :, :] = zrow
    pad_ref[:, :, 0:1, :] = zcol
    pad_ref[:, :, Wn + 1:Wn + 2, :] = zcol
    pad_ref[:, 1:Hn + 1, 1:Wn + 1, :] = (
        y.reshape(Bb, Hn, Wn, C).astype(pad_ref.dtype))


# ----------------------------------------------------------------------------
# Fused kernel: conv2..conv4 (+ReLU +pool) + FC, one batch block per grid step.
# (Layer 1 is done in the wrapper; the streamed input is its padded output.)
# ----------------------------------------------------------------------------
def _fused_kernel(x1p_ref,
                  w2_ref, b2_ref, w3_ref, b3_ref, w4_ref, b4_ref,
                  wfc_ref, bfc_ref,
                  o_ref,
                  pad3_ref, pad4_ref, fcbuf_ref,
                  *, Bb, H2, W2):
    H3, W3 = H2 // 2, W2 // 2
    H4, W4 = H2 // 4, W2 // 4
    Hf, Wf = H2 // 8, W2 // 8

    # ---- layer 2: streamed input is already zero-padded & bf16 --------------
    # NOTE: for very large images the im2col below could be slab-chunked along
    # its row dimension; here the wrapper caps the batch block instead so the
    # temporaries stay well inside v7x's 64 MiB VMEM.
    y2 = _conv_relu_pool(x1p_ref[...], w2_ref, b2_ref, Bb, H2, W2, 64, 128)

    # ---- layer 3 -------------------------------------------------------------
    _fill_padded(pad3_ref, y2, Bb, H3, W3, 128)
    y3 = _conv_relu_pool(pad3_ref[...], w3_ref, b3_ref, Bb, H3, W3, 128, 256)

    # ---- layer 4 -------------------------------------------------------------
    _fill_padded(pad4_ref, y3, Bb, H4, W4, 256)
    y4 = _conv_relu_pool(pad4_ref[...], w4_ref, b4_ref, Bb, H4, W4, 256, 256)

    # ---- fused FC: ONE matmul with K = Hf*Wf*256 -----------------------------
    # Pack (b, p, c) features into a (Bb, P*256) bf16 buffer with lane-aligned
    # stores (avoids a sublane->lane value reshape), then a single MXU matmul.
    P = Hf * Wf
    y4_3d = y4.reshape(Bb, P, 256)
    for p in range(P):
        fcbuf_ref[:, p * 256:(p + 1) * 256] = y4_3d[:, p, :].astype(jnp.bfloat16)
    acc = jnp.dot(fcbuf_ref[...], wfc_ref[...], preferred_element_type=jnp.float32)
    o_ref[...] = (acc + bfc_ref[...]).reshape(Bb, 1, OUT_PAD)


# ----------------------------------------------------------------------------
# Batch-block heuristic: largest divisor of n that is <= target, preferring an
# EVEN number of grid steps (v7x's two TensorCores split the "parallel" axis),
# otherwise >= 2 steps, otherwise whatever fits.
# ----------------------------------------------------------------------------
def _pick_batch_block(n, target):
    target = max(1, min(target, n))
    divisors = [d for d in range(1, n + 1) if n % d == 0]
    even = [d for d in divisors if d <= target and (n // d) % 2 == 0]
    if even:
        return max(even)
    multi = [d for d in divisors if d <= target and (n // d) >= 2]
    if multi:
        return max(multi)
    return max(d for d in divisors if d <= target)


def _const_index_map(ndim):
    def imap(n):
        return (0,) * ndim
    return imap


# ----------------------------------------------------------------------------
# Public forward pass (NCHW input, matching MyModel.forward semantics).
# v5e/v6e (128 MiB VMEM) may pass batch_block=16..32 and a larger
# vmem_limit_bytes; the defaults are sized for v7x (64 MiB VMEM).
# ----------------------------------------------------------------------------
def keypoint_forward(params, x_nchw, *, batch_block=8,
                     vmem_limit_bytes=48 * 1024 * 1024):
    N, Cin, H, W = x_nchw.shape
    assert Cin == 3 and H % 16 == 0 and W % 16 == 0, (Cin, H, W)
    H2, W2 = H // 2, W // 2
    H3, W3 = H // 4, W // 4
    H4, W4 = H // 8, W // 8
    Hf, Wf = H // 16, W // 16

    # Cap Bb so the largest im2col temporary (layer 2: bf16 col (Bb*H2*W2, 576)
    # plus its f32 matmul output) stays comfortably inside v7x VMEM.
    col2_bytes_per_img = H2 * W2 * (9 * 64 * 2 + 128 * 4)
    bb_cap = max(1, (16 * 1024 * 1024) // col2_bytes_per_img)
    Bb = _pick_batch_block(N, min(batch_block, bb_cap))

    # ---- layer 1 in plain XLA (tiny FLOP share; K=27 is a poor MXU fit and
    # its im2col block is lane-sparse).  Output is pooled, zero-padded and
    # cast to bf16 so the kernel's streamed input is lane-dense and small. ----
    x = jnp.transpose(x_nchw.astype(jnp.float32), (0, 2, 3, 1))      # NHWC
    y1 = jax.lax.conv_general_dilated(
        x, params["w1"].astype(jnp.float32), window_strides=(1, 1),
        padding="SAME", dimension_numbers=("NHWC", "HWIO", "NHWC"))
    y1 = jnp.maximum(y1 + params["b1"].reshape(1, 1, 1, 64), 0.0)
    y1 = y1.reshape(N, H2, 2, W2, 2, 64).max(axis=(2, 4))            # 2x2 maxpool
    x1p = jnp.pad(y1, ((0, 0), (1, 1), (1, 1), (0, 0))).astype(jnp.bfloat16)

    # Conv weights: (3,3,Cin,Cout) -> (9*Cin, Cout) bf16, rows ordered
    # (ky, kx, cin) to match the in-kernel im2col column order.  Biases f32.
    w2 = params["w2"].reshape(9 * 64, 128).astype(jnp.bfloat16)
    w3 = params["w3"].reshape(9 * 128, 256).astype(jnp.bfloat16)
    w4 = params["w4"].reshape(9 * 256, 256).astype(jnp.bfloat16)
    b2 = params["b2"].reshape(1, 128)
    b3 = params["b3"].reshape(1, 256)
    b4 = params["b4"].reshape(1, 256)

    # FC weight: stored (flattened, 48) with rows in torch's (c, y, x) flatten
    # order (i.e. a torch Linear weight must be TRANSPOSED on load).  Fold the
    # flatten permutation into the weight so the kernel's (y, x, c) feature
    # order multiplies directly, pad 48 -> 128 lanes for a lane-dense store.
    wfc = params["wfc"]
    assert wfc.shape == (256 * Hf * Wf, OUT_RAW), wfc.shape
    wfc_k = wfc.reshape(256, Hf * Wf, OUT_RAW).transpose(1, 0, 2)    # (p, c, o)
    wfc_k = jnp.pad(wfc_k, ((0, 0), (0, 0), (0, OUT_PAD - OUT_RAW)))
    wfc_k = wfc_k.reshape(Hf * Wf * 256, OUT_PAD).astype(jnp.bfloat16)
    bfc = jnp.pad(params["bfc"], (0, OUT_PAD - OUT_RAW)).reshape(1, OUT_PAD)

    kernel = functools.partial(_fused_kernel, Bb=Bb, H2=H2, W2=W2)

    def _resident(shape):
        # Constant block index => fetched into VMEM once, never re-DMA'd.
        return pl.BlockSpec(shape, _const_index_map(len(shape)))

    # Advisory cost hint so XLA schedules around a long-running custom call.
    flops = 2 * N * (H2 * W2 * 576 * 128 + H3 * W3 * 1152 * 256
                     + H4 * W4 * 2304 * 256 + Hf * Wf * 256 * OUT_RAW)
    weight_bytes = sum(int(a.size) * a.dtype.itemsize
                       for a in (w2, b2, w3, b3, w4, b4, wfc_k, bfc))
    bytes_accessed = int(x1p.size) * 2 + N * OUT_PAD * 4 + weight_bytes

    out = pl.pallas_call(
        kernel,
        out_shape=jax.ShapeDtypeStruct((N, 1, OUT_PAD), jnp.float32),
        grid=(N // Bb,),
        in_specs=[
            pl.BlockSpec((Bb, H2 + 2, W2 + 2, 64), lambda n: (n, 0, 0, 0)),
            _resident((9 * 64, 128)), _resident((1, 128)),
            _resident((9 * 128, 256)), _resident((1, 256)),
            _resident((9 * 256, 256)), _resident((1, 256)),
            _resident((Hf * Wf * 256, OUT_PAD)), _resident((1, OUT_PAD)),
        ],
        out_specs=pl.BlockSpec((Bb, 1, OUT_PAD), lambda n: (n, 0, 0)),
        scratch_shapes=[
            pltpu.VMEM((Bb, H3 + 2, W3 + 2, 128), jnp.float32),  # padded l3 input
            pltpu.VMEM((Bb, H4 + 2, W4 + 2, 256), jnp.float32),  # padded l4 input
            pltpu.VMEM((Bb, Hf * Wf * 256), jnp.bfloat16),       # packed FC input
        ],
        compiler_params=pltpu.CompilerParams(
            dimension_semantics=("parallel",),
            vmem_limit_bytes=vmem_limit_bytes,
        ),
        cost_estimate=pl.CostEstimate(
            flops=flops, transcendentals=0, bytes_accessed=bytes_accessed),
    )(x1p, w2, b2, w3, b3, w4, b4, wfc_k, bfc)

    coords = out.reshape(N, OUT_PAD)[:, :OUT_RAW]
    return coords.reshape(-1, NUM_FEATURE_POINTS, 3)


# ----------------------------------------------------------------------------
# Deterministic synthetic parameters (HWIO conv weights; FC weight stored
# transposed, (flattened, 48), with rows in torch's (c, y, x) flatten order).
# ----------------------------------------------------------------------------
def init_params(H, W, key):
    keys = jax.random.split(key, 10)

    def conv_w(k, cin, cout):
        scale = 1.0 / jnp.sqrt(9.0 * cin)
        return jax.random.normal(k, (3, 3, cin, cout), jnp.float32) * scale

    flattened = 256 * (H // 16) * (W // 16)
    fc_scale = 1.0 / jnp.sqrt(float(flattened))
    return {
        "w1": conv_w(keys[0], 3, 64),
        "b1": jax.random.normal(keys[1], (64,), jnp.float32) * 0.01,
        "w2": conv_w(keys[2], 64, 128),
        "b2": jax.random.normal(keys[3], (128,), jnp.float32) * 0.01,
        "w3": conv_w(keys[4], 128, 256),
        "b3": jax.random.normal(keys[5], (256,), jnp.float32) * 0.01,
        "w4": conv_w(keys[6], 256, 256),
        "b4": jax.random.normal(keys[7], (256,), jnp.float32) * 0.01,
        "wfc": jax.random.normal(keys[8], (flattened, OUT_RAW), jnp.float32) * fc_scale,
        "bfc": jax.random.normal(keys[9], (OUT_RAW,), jnp.float32) * 0.01,
    }


if __name__ == "__main__":
    key = jax.random.PRNGKey(0)
    k_x, k_p = jax.random.split(key)

    # Small input consistent with the module (H, W divisible by 16).
    B, C, H, W = 2, 3, 32, 32
    x = jax.random.normal(k_x, (B, C, H, W), jnp.float32)
    params = init_params(H, W, k_p)

    coords = jax.jit(keypoint_forward)(params, x)
    coords = jax.block_until_ready(coords)

    assert coords.shape == (B, NUM_FEATURE_POINTS, 3), coords.shape
    assert coords.dtype == jnp.float32
    print("KERNEL_OK")
</pallas_src>

<mosaic_0001>
module attributes {stable_mosaic.version = 11 : i64} {
  func.func @_fused_kernel(%arg0: i32, %arg1: memref<1x18x18x64xbf16, #tpu.memory_space<vmem>>, %arg2: memref<576x128xbf16, #tpu.memory_space<vmem>>, %arg3: memref<1x128xf32, #tpu.memory_space<vmem>>, %arg4: memref<1152x256xbf16, #tpu.memory_space<vmem>>, %arg5: memref<1x256xf32, #tpu.memory_space<vmem>>, %arg6: memref<2304x256xbf16, #tpu.memory_space<vmem>>, %arg7: memref<1x256xf32, #tpu.memory_space<vmem>>, %arg8: memref<1024x128xbf16, #tpu.memory_space<vmem>>, %arg9: memref<1x128xf32, #tpu.memory_space<vmem>>, %arg10: memref<1x1x128xf32, #tpu.memory_space<vmem>>, %arg11: memref<1x10x10x128xf32, #tpu.memory_space<vmem>>, %arg12: memref<1x6x6x256xf32, #tpu.memory_space<vmem>>, %arg13: memref<1x1024xbf16, #tpu.memory_space<vmem>>) attributes {dimension_semantics = [#tpu.dimension_semantics<parallel>], iteration_bounds = array<i64: 2>, scalar_prefetch = 0 : i64, scratch_operands = 3 : i64, tpu.core_type = #tpu.core_type<tc>, window_params = [{transform_indices = @transform_0, window_bounds = array<i64: 1, 18, 18, 64>}, {pipeline_mode = #tpu.pipeline_mode<synchronous>, transform_indices = @transform_1, window_bounds = array<i64: 576, 128>}, {pipeline_mode = #tpu.pipeline_mode<synchronous>, transform_indices = @transform_2, window_bounds = array<i64: 1, 128>}, {pipeline_mode = #tpu.pipeline_mode<synchronous>, transform_indices = @transform_3, window_bounds = array<i64: 1152, 256>}, {pipeline_mode = #tpu.pipeline_mode<synchronous>, transform_indices = @transform_4, window_bounds = array<i64: 1, 256>}, {pipeline_mode = #tpu.pipeline_mode<synchronous>, transform_indices = @transform_5, window_bounds = array<i64: 2304, 256>}, {pipeline_mode = #tpu.pipeline_mode<synchronous>, transform_indices = @transform_6, window_bounds = array<i64: 1, 256>}, {pipeline_mode = #tpu.pipeline_mode<synchronous>, transform_indices = @transform_7, window_bounds = array<i64: 1024, 128>}, {pipeline_mode = #tpu.pipeline_mode<synchronous>, transform_indices = @transform_8, window_bounds = array<i64: 1, 128>}, {transform_indices = @transform_9, window_bounds = array<i64: 1, 1, 128>}]} {
    %c0 = arith.constant 0 : index
    %c0_0 = arith.constant 0 : index
    %c0_1 = arith.constant 0 : index
    %c0_2 = arith.constant 0 : index
    %0 = vector.load %arg1[%c0, %c0_0, %c0_1, %c0_2] : memref<1x18x18x64xbf16, #tpu.memory_space<vmem>>, vector<1x18x18x64xbf16>
    %1 = vector.extract_strided_slice %0 {offsets = [0, 0, 0, 0], sizes = [1, 16, 16, 64], strides = [1, 1, 1, 1]} : vector<1x18x18x64xbf16> to vector<1x16x16x64xbf16>
    %2 = vector.shape_cast %1 : vector<1x16x16x64xbf16> to vector<256x64xbf16>
    %3 = vector.extract_strided_slice %0 {offsets = [0, 0, 1, 0], sizes = [1, 16, 16, 64], strides = [1, 1, 1, 1]} : vector<1x18x18x64xbf16> to vector<1x16x16x64xbf16>
    %4 = vector.shape_cast %3 : vector<1x16x16x64xbf16> to vector<256x64xbf16>
    %5 = vector.extract_strided_slice %0 {offsets = [0, 0, 2, 0], sizes = [1, 16, 16, 64], strides = [1, 1, 1, 1]} : vector<1x18x18x64xbf16> to vector<1x16x16x64xbf16>
    %6 = vector.shape_cast %5 : vector<1x16x16x64xbf16> to vector<256x64xbf16>
    %7 = vector.extract_strided_slice %0 {offsets = [0, 1, 0, 0], sizes = [1, 16, 16, 64], strides = [1, 1, 1, 1]} : vector<1x18x18x64xbf16> to vector<1x16x16x64xbf16>
    %8 = vector.shape_cast %7 : vector<1x16x16x64xbf16> to vector<256x64xbf16>
    %9 = vector.extract_strided_slice %0 {offsets = [0, 1, 1, 0], sizes = [1, 16, 16, 64], strides = [1, 1, 1, 1]} : vector<1x18x18x64xbf16> to vector<1x16x16x64xbf16>
    %10 = vector.shape_cast %9 : vector<1x16x16x64xbf16> to vector<256x64xbf16>
    %11 = vector.extract_strided_slice %0 {offsets = [0, 1, 2, 0], sizes = [1, 16, 16, 64], strides = [1, 1, 1, 1]} : vector<1x18x18x64xbf16> to vector<1x16x16x64xbf16>
    %12 = vector.shape_cast %11 : vector<1x16x16x64xbf16> to vector<256x64xbf16>
    %13 = vector.extract_strided_slice %0 {offsets = [0, 2, 0, 0], sizes = [1, 16, 16, 64], strides = [1, 1, 1, 1]} : vector<1x18x18x64xbf16> to vector<1x16x16x64xbf16>
    %14 = vector.shape_cast %13 : vector<1x16x16x64xbf16> to vector<256x64xbf16>
    %15 = vector.extract_strided_slice %0 {offsets = [0, 2, 1, 0], sizes = [1, 16, 16, 64], strides = [1, 1, 1, 1]} : vector<1x18x18x64xbf16> to vector<1x16x16x64xbf16>
    %16 = vector.shape_cast %15 : vector<1x16x16x64xbf16> to vector<256x64xbf16>
    %17 = vector.extract_strided_slice %0 {offsets = [0, 2, 2, 0], sizes = [1, 16, 16, 64], strides = [1, 1, 1, 1]} : vector<1x18x18x64xbf16> to vector<1x16x16x64xbf16>
    %18 = vector.shape_cast %17 : vector<1x16x16x64xbf16> to vector<256x64xbf16>
    %19 = tpu.concatenate %2, %4, %6, %8, %10, %12, %14, %16, %18 in 1 : vector<256x64xbf16>, vector<256x64xbf16>, vector<256x64xbf16>, vector<256x64xbf16>, vector<256x64xbf16>, vector<256x64xbf16>, vector<256x64xbf16>, vector<256x64xbf16>, vector<256x64xbf16> -> vector<256x576xbf16>
    %c0_3 = arith.constant 0 : index
    %c0_4 = arith.constant 0 : index
    %20 = vector.load %arg2[%c0_3, %c0_4] : memref<576x128xbf16, #tpu.memory_space<vmem>>, vector<576x128xbf16>
    %cst = arith.constant dense<0.000000e+00> : vector<256x128xf32>
    %21 = tpu.matmul %19, %20, %cst {dimension_numbers = #tpu.dot_dimension_numbers<[1], [0], [0], [1], [0, 0, 1, 1], [], []>} : vector<256x576xbf16>, vector<576x128xbf16>, vector<256x128xf32> -> vector<256x128xf32>
    %c0_5 = arith.constant 0 : index
    %c0_6 = arith.constant 0 : index
    %22 = vector.load %arg3[%c0_5, %c0_6] : memref<1x128xf32, #tpu.memory_space<vmem>>, vector<1x128xf32>
    %23 = vector.broadcast %22 : vector<1x128xf32> to vector<256x128xf32>
    %24 = arith.addf %21, %23 : vector<256x128xf32>
    %cst_7 = arith.constant 0.000000e+00 : f32
    %25 = vector.broadcast %cst_7 : f32 to vector<256x128xf32>
    %26 = arith.maximumf %24, %25 : vector<256x128xf32>
    %27 = vector.shape_cast %26 : vector<256x128xf32> to vector<128x2x128xf32>
    %cst_8 = arith.constant dense<0xFF800000> : vector<128x128xf32>
    %28 = vector.multi_reduction <maximumf>, %27, %cst_8 [1] : vector<128x2x128xf32> to vector<128x128xf32>
    %29 = vector.shape_cast %28 : vector<128x128xf32> to vector<8x2x8x128xf32>
    %cst_9 = arith.constant dense<0xFF800000> : vector<8x8x128xf32>
    %30 = vector.multi_reduction <maximumf>, %29, %cst_9 [1] : vector<8x2x8x128xf32> to vector<8x8x128xf32>
    %31 = vector.shape_cast %30 : vector<8x8x128xf32> to vector<64x128xf32>
    %cst_10 = arith.constant 0.000000e+00 : f32
    %32 = vector.broadcast %cst_10 : f32 to vector<1x1x10x128xf32>
    %cst_11 = arith.constant 0.000000e+00 : f32
    %33 = vector.broadcast %cst_11 : f32 to vector<1x10x1x128xf32>
    %c0_12 = arith.constant 0 : index
    %c0_13 = arith.constant 0 : index
    %c0_14 = arith.constant 0 : index
    %c0_15 = arith.constant 0 : index
    %34 = vector.load %arg11[%c0_12, %c0_13, %c0_14, %c0_15] : memref<1x10x10x128xf32, #tpu.memory_space<vmem>>, vector<1x1x10x128xf32>
    tpu.vector_store %arg11[%c0_12, %c0_13, %c0_14, %c0_15], %32 {strides = array<i32>} : memref<1x10x10x128xf32, #tpu.memory_space<vmem>>, vector<1x1x10x128xf32>,
    %c0_16 = arith.constant 0 : index
    %c9 = arith.constant 9 : index
    %c0_17 = arith.constant 0 : index
    %c0_18 = arith.constant 0 : index
    %35 = vector.load %arg11[%c0_16, %c9, %c0_17, %c0_18] : memref<1x10x10x128xf32, #tpu.memory_space<vmem>>, vector<1x1x10x128xf32>
    tpu.vector_store %arg11[%c0_16, %c9, %c0_17, %c0_18], %32 {strides = array<i32>} : memref<1x10x10x128xf32, #tpu.memory_space<vmem>>, vector<1x1x10x128xf32>,
    %c0_19 = arith.constant 0 : index
    %c0_20 = arith.constant 0 : index
    %c0_21 = arith.constant 0 : index
    %c0_22 = arith.constant 0 : index
    %36 = vector.load %arg11[%c0_19, %c0_20, %c0_21, %c0_22] : memref<1x10x10x128xf32, #tpu.memory_space<vmem>>, vector<1x10x1x128xf32>
    tpu.vector_store %arg11[%c0_19, %c0_20, %c0_21, %c0_22], %33 {strides = array<i32>} : memref<1x10x10x128xf32, #tpu.memory_space<vmem>>, vector<1x10x1x128xf32>,
    %c0_23 = arith.constant 0 : index
    %c0_24 = arith.constant 0 : index
    %c9_25 = arith.constant 9 : index
    %c0_26 = arith.constant 0 : index
    %37 = vector.load %arg11[%c0_23, %c0_24, %c9_25, %c0_26] : memref<1x10x10x128xf32, #tpu.memory_space<vmem>>, vector<1x10x1x128xf32>
    tpu.vector_store %arg11[%c0_23, %c0_24, %c9_25, %c0_26], %33 {strides = array<i32>} : memref<1x10x10x128xf32, #tpu.memory_space<vmem>>, vector<1x10x1x128xf32>,
    %38 = vector.shape_cast %31 : vector<64x128xf32> to vector<1x8x8x128xf32>
    %c0_27 = arith.constant 0 : index
    %c1 = arith.constant 1 : index
    %c1_28 = arith.constant 1 : index
    %c0_29 = arith.constant 0 : index
    %39 = vector.load %arg11[%c0_27, %c1, %c1_28, %c0_29] : memref<1x10x10x128xf32, #tpu.memory_space<vmem>>, vector<1x8x8x128xf32>
    tpu.vector_store %arg11[%c0_27, %c1, %c1_28, %c0_29], %38 {strides = array<i32>} : memref<1x10x10x128xf32, #tpu.memory_space<vmem>>, vector<1x8x8x128xf32>,
    %c0_30 = arith.constant 0 : index
    %c0_31 = arith.constant 0 : index
    %c0_32 = arith.constant 0 : index
    %c0_33 = arith.constant 0 : index
    %40 = vector.load %arg11[%c0_30, %c0_31, %c0_32, %c0_33] : memref<1x10x10x128xf32, #tpu.memory_space<vmem>>, vector<1x10x10x128xf32>
    %41 = arith.truncf %40 : vector<1x10x10x128xf32> to vector<1x10x10x128xbf16>
    %42 = vector.extract_strided_slice %41 {offsets = [0, 0, 0, 0], sizes = [1, 8, 8, 128], strides = [1, 1, 1, 1]} : vector<1x10x10x128xbf16> to vector<1x8x8x128xbf16>
    %43 = vector.shape_cast %42 : vector<1x8x8x128xbf16> to vector<64x128xbf16>
    %44 = vector.extract_strided_slice %41 {offsets = [0, 0, 1, 0], sizes = [1, 8, 8, 128], strides = [1, 1, 1, 1]} : vector<1x10x10x128xbf16> to vector<1x8x8x128xbf16>
    %45 = vector.shape_cast %44 : vector<1x8x8x128xbf16> to vector<64x128xbf16>
    %46 = vector.extract_strided_slice %41 {offsets = [0, 0, 2, 0], sizes = [1, 8, 8, 128], strides = [1, 1, 1, 1]} : vector<1x10x10x128xbf16> to vector<1x8x8x128xbf16>
    %47 = vector.shape_cast %46 : vector<1x8x8x128xbf16> to vector<64x128xbf16>
    %48 = vector.extract_strided_slice %41 {offsets = [0, 1, 0, 0], sizes = [1, 8, 8, 128], strides = [1, 1, 1, 1]} : vector<1x10x10x128xbf16> to vector<1x8x8x128xbf16>
    %49 = vector.shape_cast %48 : vector<1x8x8x128xbf16> to vector<64x128xbf16>
    %50 = vector.extract_strided_slice %41 {offsets = [0, 1, 1, 0], sizes = [1, 8, 8, 128], strides = [1, 1, 1, 1]} : vector<1x10x10x128xbf16> to vector<1x8x8x128xbf16>
    %51 = vector.shape_cast %50 : vector<1x8x8x128xbf16> to vector<64x128xbf16>
    %52 = vector.extract_strided_slice %41 {offsets = [0, 1, 2, 0], sizes = [1, 8, 8, 128], strides = [1, 1, 1, 1]} : vector<1x10x10x128xbf16> to vector<1x8x8x128xbf16>
    %53 = vector.shape_cast %52 : vector<1x8x8x128xbf16> to vector<64x128xbf16>
    %54 = vector.extract_strided_slice %41 {offsets = [0, 2, 0, 0], sizes = [1, 8, 8, 128], strides = [1, 1, 1, 1]} : vector<1x10x10x128xbf16> to vector<1x8x8x128xbf16>
    %55 = vector.shape_cast %54 : vector<1x8x8x128xbf16> to vector<64x128xbf16>
    %56 = vector.extract_strided_slice %41 {offsets = [0, 2, 1, 0], sizes = [1, 8, 8, 128], strides = [1, 1, 1, 1]} : vector<1x10x10x128xbf16> to vector<1x8x8x128xbf16>
    %57 = vector.shape_cast %56 : vector<1x8x8x128xbf16> to vector<64x128xbf16>
    %58 = vector.extract_strided_slice %41 {offsets = [0, 2, 2, 0], sizes = [1, 8, 8, 128], strides = [1, 1, 1, 1]} : vector<1x10x10x128xbf16> to vector<1x8x8x128xbf16>
    %59 = vector.shape_cast %58 : vector<1x8x8x128xbf16> to vector<64x128xbf16>
    %60 = tpu.concatenate %43, %45, %47, %49, %51, %53, %55, %57, %59 in 1 : vector<64x128xbf16>, vector<64x128xbf16>, vector<64x128xbf16>, vector<64x128xbf16>, vector<64x128xbf16>, vector<64x128xbf16>, vector<64x128xbf16>, vector<64x128xbf16>, vector<64x128xbf16> -> vector<64x1152xbf16>
    %c0_34 = arith.constant 0 : index
    %c0_35 = arith.constant 0 : index
    %61 = vector.load %arg4[%c0_34, %c0_35] : memref<1152x256xbf16, #tpu.memory_space<vmem>>, vector<1152x256xbf16>
    %cst_36 = arith.constant dense<0.000000e+00> : vector<64x256xf32>
    %62 = tpu.matmul %60, %61, %cst_36 {dimension_numbers = #tpu.dot_dimension_numbers<[1], [0], [0], [1], [0, 0, 1, 1], [], []>} : vector<64x1152xbf16>, vector<1152x256xbf16>, vector<64x256xf32> -> vector<64x256xf32>
    %c0_37 = arith.constant 0 : index
    %c0_38 = arith.constant 0 : index
    %63 = vector.load %arg5[%c0_37, %c0_38] : memref<1x256xf32, #tpu.memory_space<vmem>>, vector<1x256xf32>
    %64 = vector.broadcast %63 : vector<1x256xf32> to vector<64x256xf32>
    %65 = arith.addf %62, %64 : vector<64x256xf32>
    %cst_39 = arith.constant 0.000000e+00 : f32
    %66 = vector.broadcast %cst_39 : f32 to vector<64x256xf32>
    %67 = arith.maximumf %65, %66 : vector<64x256xf32>
    %68 = vector.shape_cast %67 : vector<64x256xf32> to vector<32x2x256xf32>
    %cst_40 = arith.constant dense<0xFF800000> : vector<32x256xf32>
    %69 = vector.multi_reduction <maximumf>, %68, %cst_40 [1] : vector<32x2x256xf32> to vector<32x256xf32>
    %70 = vector.shape_cast %69 : vector<32x256xf32> to vector<4x2x4x256xf32>
    %cst_41 = arith.constant dense<0xFF800000> : vector<4x4x256xf32>
    %71 = vector.multi_reduction <maximumf>, %70, %cst_41 [1] : vector<4x2x4x256xf32> to vector<4x4x256xf32>
    %72 = vector.shape_cast %71 : vector<4x4x256xf32> to vector<16x256xf32>
    %cst_42 = arith.constant 0.000000e+00 : f32
    %73 = vector.broadcast %cst_42 : f32 to vector<1x1x6x256xf32>
    %cst_43 = arith.constant 0.000000e+00 : f32
    %74 = vector.broadcast %cst_43 : f32 to vector<1x6x1x256xf32>
    %c0_44 = arith.constant 0 : index
    %c0_45 = arith.constant 0 : index
    %c0_46 = arith.constant 0 : index
    %c0_47 = arith.constant 0 : index
    %75 = vector.load %arg12[%c0_44, %c0_45, %c0_46, %c0_47] : memref<1x6x6x256xf32, #tpu.memory_space<vmem>>, vector<1x1x6x256xf32>
    tpu.vector_store %arg12[%c0_44, %c0_45, %c0_46, %c0_47], %73 {strides = array<i32>} : memref<1x6x6x256xf32, #tpu.memory_space<vmem>>, vector<1x1x6x256xf32>,
    %c0_48 = arith.constant 0 : index
    %c5 = arith.constant 5 : index
    %c0_49 = arith.constant 0 : index
    %c0_50 = arith.constant 0 : index
    %76 = vector.load %arg12[%c0_48, %c5, %c0_49, %c0_50] : memref<1x6x6x256xf32, #tpu.memory_space<vmem>>, vector<1x1x6x256xf32>
    tpu.vector_store %arg12[%c0_48, %c5, %c0_49, %c0_50], %73 {strides = array<i32>} : memref<1x6x6x256xf32, #tpu.memory_space<vmem>>, vector<1x1x6x256xf32>,
    %c0_51 = arith.constant 0 : index
    %c0_52 = arith.constant 0 : index
    %c0_53 = arith.constant 0 : index
    %c0_54 = arith.constant 0 : index
    %77 = vector.load %arg12[%c0_51, %c0_52, %c0_53, %c0_54] : memref<1x6x6x256xf32, #tpu.memory_space<vmem>>, vector<1x6x1x256xf32>
    tpu.vector_store %arg12[%c0_51, %c0_52, %c0_53, %c0_54], %74 {strides = array<i32>} : memref<1x6x6x256xf32, #tpu.memory_space<vmem>>, vector<1x6x1x256xf32>,
    %c0_55 = arith.constant 0 : index
    %c0_56 = arith.constant 0 : index
    %c5_57 = arith.constant 5 : index
    %c0_58 = arith.constant 0 : index
    %78 = vector.load %arg12[%c0_55, %c0_56, %c5_57, %c0_58] : memref<1x6x6x256xf32, #tpu.memory_space<vmem>>, vector<1x6x1x256xf32>
    tpu.vector_store %arg12[%c0_55, %c0_56, %c5_57, %c0_58], %74 {strides = array<i32>} : memref<1x6x6x256xf32, #tpu.memory_space<vmem>>, vector<1x6x1x256xf32>,
    %79 = vector.shape_cast %72 : vector<16x256xf32> to vector<1x4x4x256xf32>
    %c0_59 = arith.constant 0 : index
    %c1_60 = arith.constant 1 : index
    %c1_61 = arith.constant 1 : index
    %c0_62 = arith.constant 0 : index
    %80 = vector.load %arg12[%c0_59, %c1_60, %c1_61, %c0_62] : memref<1x6x6x256xf32, #tpu.memory_space<vmem>>, vector<1x4x4x256xf32>
    tpu.vector_store %arg12[%c0_59, %c1_60, %c1_61, %c0_62], %79 {strides = array<i32>} : memref<1x6x6x256xf32, #tpu.memory_space<vmem>>, vector<1x4x4x256xf32>,
    %c0_63 = arith.constant 0 : index
    %c0_64 = arith.constant 0 : index
    %c0_65 = arith.constant 0 : index
    %c0_66 = arith.constant 0 : index
    %81 = vector.load %arg12[%c0_63, %c0_64, %c0_65, %c0_66] : memref<1x6x6x256xf32, #tpu.memory_space<vmem>>, vector<1x6x6x256xf32>
    %82 = arith.truncf %81 : vector<1x6x6x256xf32> to vector<1x6x6x256xbf16>
    %83 = vector.extract_strided_slice %82 {offsets = [0, 0, 0, 0], sizes = [1, 4, 4, 256], strides = [1, 1, 1, 1]} : vector<1x6x6x256xbf16> to vector<1x4x4x256xbf16>
    %84 = vector.shape_cast %83 : vector<1x4x4x256xbf16> to vector<16x256xbf16>
    %85 = vector.extract_strided_slice %82 {offsets = [0, 0, 1, 0], sizes = [1, 4, 4, 256], strides = [1, 1, 1, 1]} : vector<1x6x6x256xbf16> to vector<1x4x4x256xbf16>
    %86 = vector.shape_cast %85 : vector<1x4x4x256xbf16> to vector<16x256xbf16>
    %87 = vector.extract_strided_slice %82 {offsets = [0, 0, 2, 0], sizes = [1, 4, 4, 256], strides = [1, 1, 1, 1]} : vector<1x6x6x256xbf16> to vector<1x4x4x256xbf16>
    %88 = vector.shape_cast %87 : vector<1x4x4x256xbf16> to vector<16x256xbf16>
    %89 = vector.extract_strided_slice %82 {offsets = [0, 1, 0, 0], sizes = [1, 4, 4, 256], strides = [1, 1, 1, 1]} : vector<1x6x6x256xbf16> to vector<1x4x4x256xbf16>
    %90 = vector.shape_cast %89 : vector<1x4x4x256xbf16> to vector<16x256xbf16>
    %91 = vector.extract_strided_slice %82 {offsets = [0, 1, 1, 0], sizes = [1, 4, 4, 256], strides = [1, 1, 1, 1]} : vector<1x6x6x256xbf16> to vector<1x4x4x256xbf16>
    %92 = vector.shape_cast %91 : vector<1x4x4x256xbf16> to vector<16x256xbf16>
    %93 = vector.extract_strided_slice %82 {offsets = [0, 1, 2, 0], sizes = [1, 4, 4, 256], strides = [1, 1, 1, 1]} : vector<1x6x6x256xbf16> to vector<1x4x4x256xbf16>
    %94 = vector.shape_cast %93 : vector<1x4x4x256xbf16> to vector<16x256xbf16>
    %95 = vector.extract_strided_slice %82 {offsets = [0, 2, 0, 0], sizes = [1, 4, 4, 256], strides = [1, 1, 1, 1]} : vector<1x6x6x256xbf16> to vector<1x4x4x256xbf16>
    %96 = vector.shape_cast %95 : vector<1x4x4x256xbf16> to vector<16x256xbf16>
    %97 = vector.extract_strided_slice %82 {offsets = [0, 2, 1, 0], sizes = [1, 4, 4, 256], strides = [1, 1, 1, 1]} : vector<1x6x6x256xbf16> to vector<1x4x4x256xbf16>
    %98 = vector.shape_cast %97 : vector<1x4x4x256xbf16> to vector<16x256xbf16>
    %99 = vector.extract_strided_slice %82 {offsets = [0, 2, 2, 0], sizes = [1, 4, 4, 256], strides = [1, 1, 1, 1]} : vector<1x6x6x256xbf16> to vector<1x4x4x256xbf16>
    %100 = vector.shape_cast %99 : vector<1x4x4x256xbf16> to vector<16x256xbf16>
    %101 = tpu.concatenate %84, %86, %88, %90, %92, %94, %96, %98, %100 in 1 : vector<16x256xbf16>, vector<16x256xbf16>, vector<16x256xbf16>, vector<16x256xbf16>, vector<16x256xbf16>, vector<16x256xbf16>, vector<16x256xbf16>, vector<16x256xbf16>, vector<16x256xbf16> -> vector<16x2304xbf16>
    %c0_67 = arith.constant 0 : index
    %c0_68 = arith.constant 0 : index
    %102 = vector.load %arg6[%c0_67, %c0_68] : memref<2304x256xbf16, #tpu.memory_space<vmem>>, vector<2304x256xbf16>
    %cst_69 = arith.constant dense<0.000000e+00> : vector<16x256xf32>
    %103 = tpu.matmul %101, %102, %cst_69 {dimension_numbers = #tpu.dot_dimension_numbers<[1], [0], [0], [1], [0, 0, 1, 1], [], []>} : vector<16x2304xbf16>, vector<2304x256xbf16>, vector<16x256xf32> -> vector<16x256xf32>
    %c0_70 = arith.constant 0 : index
    %c0_71 = arith.constant 0 : index
    %104 = vector.load %arg7[%c0_70, %c0_71] : memref<1x256xf32, #tpu.memory_space<vmem>>, vector<1x256xf32>
    %105 = vector.broadcast %104 : vector<1x256xf32> to vector<16x256xf32>
    %106 = arith.addf %103, %105 : vector<16x256xf32>
    %cst_72 = arith.constant 0.000000e+00 : f32
    %107 = vector.broadcast %cst_72 : f32 to vector<16x256xf32>
    %108 = arith.maximumf %106, %107 : vector<16x256xf32>
    %109 = vector.shape_cast %108 : vector<16x256xf32> to vector<8x2x256xf32>
    %cst_73 = arith.constant dense<0xFF800000> : vector<8x256xf32>
    %110 = vector.multi_reduction <maximumf>, %109, %cst_73 [1] : vector<8x2x256xf32> to vector<8x256xf32>
    %111 = vector.shape_cast %110 : vector<8x256xf32> to vector<2x2x2x256xf32>
    %cst_74 = arith.constant dense<0xFF800000> : vector<2x2x256xf32>
    %112 = vector.multi_reduction <maximumf>, %111, %cst_74 [1] : vector<2x2x2x256xf32> to vector<2x2x256xf32>
    %113 = vector.shape_cast %112 : vector<2x2x256xf32> to vector<4x256xf32>
    %114 = vector.shape_cast %113 : vector<4x256xf32> to vector<1x4x256xf32>
    %115 = vector.extract_strided_slice %114 {offsets = [0, 0, 0], sizes = [1, 1, 256], strides = [1, 1, 1]} : vector<1x4x256xf32> to vector<1x1x256xf32>
    %116 = vector.shape_cast %115 : vector<1x1x256xf32> to vector<1x256xf32>
    %117 = arith.truncf %116 : vector<1x256xf32> to vector<1x256xbf16>
    %c0_75 = arith.constant 0 : index
    %c0_76 = arith.constant 0 : index
    %118 = vector.load %arg13[%c0_75, %c0_76] : memref<1x1024xbf16, #tpu.memory_space<vmem>>, vector<1x256xbf16>
    tpu.vector_store %arg13[%c0_75, %c0_76], %117 {strides = array<i32>} : memref<1x1024xbf16, #tpu.memory_space<vmem>>, vector<1x256xbf16>,
    %119 = vector.extract_strided_slice %114 {offsets = [0, 1, 0], sizes = [1, 1, 256], strides = [1, 1, 1]} : vector<1x4x256xf32> to vector<1x1x256xf32>
    %120 = vector.shape_cast %119 : vector<1x1x256xf32> to vector<1x256xf32>
    %121 = arith.truncf %120 : vector<1x256xf32> to vector<1x256xbf16>
    %c0_77 = arith.constant 0 : index
    %c256 = arith.constant 256 : index
    %122 = vector.load %arg13[%c0_77, %c256] : memref<1x1024xbf16, #tpu.memory_space<vmem>>, vector<1x256xbf16>
    tpu.vector_store %arg13[%c0_77, %c256], %121 {strides = array<i32>} : memref<1x1024xbf16, #tpu.memory_space<vmem>>, vector<1x256xbf16>,
    %123 = vector.extract_strided_slice %114 {offsets = [0, 2, 0], sizes = [1, 1, 256], strides = [1, 1, 1]} : vector<1x4x256xf32> to vector<1x1x256xf32>
    %124 = vector.shape_cast %123 : vector<1x1x256xf32> to vector<1x256xf32>
    %125 = arith.truncf %124 : vector<1x256xf32> to vector<1x256xbf16>
    %c0_78 = arith.constant 0 : index
    %c512 = arith.constant 512 : index
    %126 = vector.load %arg13[%c0_78, %c512] : memref<1x1024xbf16, #tpu.memory_space<vmem>>, vector<1x256xbf16>
    tpu.vector_store %arg13[%c0_78, %c512], %125 {strides = array<i32>} : memref<1x1024xbf16, #tpu.memory_space<vmem>>, vector<1x256xbf16>,
    %127 = vector.extract_strided_slice %114 {offsets = [0, 3, 0], sizes = [1, 1, 256], strides = [1, 1, 1]} : vector<1x4x256xf32> to vector<1x1x256xf32>
    %128 = vector.shape_cast %127 : vector<1x1x256xf32> to vector<1x256xf32>
    %129 = arith.truncf %128 : vector<1x256xf32> to vector<1x256xbf16>
    %c0_79 = arith.constant 0 : index
    %c768 = arith.constant 768 : index
    %130 = vector.load %arg13[%c0_79, %c768] : memref<1x1024xbf16, #tpu.memory_space<vmem>>, vector<1x256xbf16>
    tpu.vector_store %arg13[%c0_79, %c768], %129 {strides = array<i32>} : memref<1x1024xbf16, #tpu.memory_space<vmem>>, vector<1x256xbf16>,
    %c0_80 = arith.constant 0 : index
    %c0_81 = arith.constant 0 : index
    %131 = vector.load %arg13[%c0_80, %c0_81] : memref<1x1024xbf16, #tpu.memory_space<vmem>>, vector<1x1024xbf16>
    %c0_82 = arith.constant 0 : index
    %c0_83 = arith.constant 0 : index
    %132 = vector.load %arg8[%c0_82, %c0_83] : memref<1024x128xbf16, #tpu.memory_space<vmem>>, vector<1024x128xbf16>
    %cst_84 = arith.constant dense<0.000000e+00> : vector<1x128xf32>
    %133 = tpu.matmul %131, %132, %cst_84 {dimension_numbers = #tpu.dot_dimension_numbers<[1], [0], [0], [1], [0, 0, 1, 1], [], []>} : vector<1x1024xbf16>, vector<1024x128xbf16>, vector<1x128xf32> -> vector<1x128xf32>
    %c0_85 = arith.constant 0 : index
    %c0_86 = arith.constant 0 : index
    %134 = vector.load %arg9[%c0_85, %c0_86] : memref<1x128xf32, #tpu.memory_space<vmem>>, vector<1x128xf32>
    %135 = arith.addf %133, %134 : vector<1x128xf32>
    %136 = vector.shape_cast %135 : vector<1x128xf32> to vector<1x1x128xf32>
    %c0_87 = arith.constant 0 : index
    %c0_88 = arith.constant 0 : index
    %c0_89 = arith.constant 0 : index
    %137 = vector.load %arg10[%c0_87, %c0_88, %c0_89] : memref<1x1x128xf32, #tpu.memory_space<vmem>>, vector<1x1x128xf32>
    tpu.vector_store %arg10[%c0_87, %c0_88, %c0_89], %136 {strides = array<i32>} : memref<1x1x128xf32, #tpu.memory_space<vmem>>, vector<1x1x128xf32>,
    return
  }
  func.func @transform_0(%arg0: i32) -> (i32, i32, i32, i32) {
    %c0_i32 = arith.constant 0 : i32
    %c0_i32_0 = arith.constant 0 : i32
    %c0_i32_1 = arith.constant 0 : i32
    %c0_i32_2 = arith.constant 0 : i32
    return %arg0, %c0_i32, %c0_i32_0, %c0_i32_1 : i32, i32, i32, i32
  }
  func.func @transform_1(%arg0: i32) -> (i32, i32) {
    %c0_i32 = arith.constant 0 : i32
    %c0_i32_0 = arith.constant 0 : i32
    %c0_i32_1 = arith.constant 0 : i32
    return %c0_i32, %c0_i32_0 : i32, i32
  }
  func.func @transform_2(%arg0: i32) -> (i32, i32) {
    %c0_i32 = arith.constant 0 : i32
    %c0_i32_0 = arith.constant 0 : i32
    %c0_i32_1 = arith.constant 0 : i32
    return %c0_i32, %c0_i32_0 : i32, i32
  }
  func.func @transform_3(%arg0: i32) -> (i32, i32) {
    %c0_i32 = arith.constant 0 : i32
    %c0_i32_0 = arith.constant 0 : i32
    %c0_i32_1 = arith.constant 0 : i32
    return %c0_i32, %c0_i32_0 : i32, i32
  }
  func.func @transform_4(%arg0: i32) -> (i32, i32) {
    %c0_i32 = arith.constant 0 : i32
    %c0_i32_0 = arith.constant 0 : i32
    %c0_i32_1 = arith.constant 0 : i32
    return %c0_i32, %c0_i32_0 : i32, i32
  }
  func.func @transform_5(%arg0: i32) -> (i32, i32) {
    %c0_i32 = arith.constant 0 : i32
    %c0_i32_0 = arith.constant 0 : i32
    %c0_i32_1 = arith.constant 0 : i32
    return %c0_i32, %c0_i32_0 : i32, i32
  }
  func.func @transform_6(%arg0: i32) -> (i32, i32) {
    %c0_i32 = arith.constant 0 : i32
    %c0_i32_0 = arith.constant 0 : i32
    %c0_i32_1 = arith.constant 0 : i32
    return %c0_i32, %c0_i32_0 : i32, i32
  }
  func.func @transform_7(%arg0: i32) -> (i32, i32) {
    %c0_i32 = arith.constant 0 : i32
    %c0_i32_0 = arith.constant 0 : i32
    %c0_i32_1 = arith.constant 0 : i32
    return %c0_i32, %c0_i32_0 : i32, i32
  }
  func.func @transform_8(%arg0: i32) -> (i32, i32) {
    %c0_i32 = arith.constant 0 : i32
    %c0_i32_0 = arith.constant 0 : i32
    %c0_i32_1 = arith.constant 0 : i32
    return %c0_i32, %c0_i32_0 : i32, i32
  }
  func.func @transform_9(%arg0: i32) -> (i32, i32, i32) {
    %c0_i32 = arith.constant 0 : i32
    %c0_i32_0 = arith.constant 0 : i32
    %c0_i32_1 = arith.constant 0 : i32
    return %arg0, %c0_i32, %c0_i32_0 : i32, i32, i32
  }
}

</mosaic_0001>

<bundles_post_ra>
// kernel: keypoint_forward.1
= control target key start
LH: loop header
LB: loop body
LE: loop exit
PB: predicated region body
PF: predicated region fallthrough
CT: control target
= control target key end

     0   :  { %s12514_s30 = smov 0   ;;  %s17064_s0 = inlined_call_operand.vmem [shape: bf16[2,18,18,64], index: 0, kind: input, shape index: {}]   ;;  %s17065_s1 = inlined_call_operand.vmem [shape: bf16[576,128], index: 1, kind: input, shape index: {}]   ;;  %s17066_s2 = inlined_call_operand.vmem [shape: f32[1,128], index: 2, kind: input, shape index: {}]   ;;  %s17067_s3 = inlined_call_operand.vmem [shape: bf16[1152,256], index: 3, kind: input, shape index: {}]   ;;  %s17068_s4 = inlined_call_operand.vmem [shape: f32[1,256], index: 4, kind: input, shape index: {}]   ;;  %s17069_s5 = inlined_call_operand.vmem [shape: bf16[2304,256], index: 5, kind: input, shape index: {}]   ;;  %s17070_s6 = inlined_call_operand.vmem [shape: f32[1,256], index: 6, kind: input, shape index: {}]   ;;  %s17071_s7 = inlined_call_operand.vmem [shape: bf16[1024,128], index: 7, kind: input, shape index: {}]   ;;  %s17072_s8 = inlined_call_operand.vmem [shape: f32[1,128], index: 8, kind: input, shape index: {}]   ;;  %s17073_s9 = inlined_call_operand.vmem [shape: f32[2,1,128], index: 9, kind: output, shape index: {}]  }
   0x1 LB: > { %s10427_s10 = sadd.s32 4294967295, %s12457_s30   ;;  %p10431_p0 = scmp.ge.s32.totalorder %s12457_s30, 1  ;;  %s12457_s30 = sphi %s12514_s30, %s19_s30  }
   0x2   : > { %p287_p1 = scmp.lt.s32.totalorder %s12457_s30, 3 }
   0x4   : > { %p288_p2 = pnand %p10431_p0, %p287_p1 }
   0x6   : > { %291 = sbr.rel (%p288_p2) target bundleno = 2517 (0x9d5), region = 56 }
   0xd   : > { %p321_p3 = scmp.lt.s32.totalorder %s10427_s10, 1  ;;  %v11689_v0 = vld [vmem:[%s17065_s1 + $0x40] sm:$0xff]   ;;  %vm384_vm0 = vsmask.f32 3328  ;;  %vm385_vm1 = vsmask.f32 7440 }
   0xe   : > { %v11691_v1 = vld [vmem:[%s17065_s1] sm:$0xff]   ;;  %11530 = vmatprep.subr.bf16.mxu1 %v11689_v0  ;;  %v11692_v2 = vld [vmem:[%s17065_s1 + $0x48] sm:$0xff]   ;;  %11158 = vmatprep.subr.bf16.mxu0 %v11689_v0  ;;  %v11694_v4 = vld [vmem:[%s17065_s1 + $0x50] sm:$0xff]   ;;  %s12459_s27 = smov 64   ;;  %v17123_v37 = vmov 0  ;;  %vm819_vm3 = vcmask 1042432  }
   0xf   : > { %s17308_s10 = smov (!%p321_p3, %s10427_s10), 1  ;;  %11538 = vmatpush3.bf16.msra.mxu1 %v11691_v1  ;;  %v11693_v3 = vld [vmem:[%s17065_s1 + $0x8] sm:$0xff]   ;;  %11159 = vmatpush3.bf16.msra.mxu0 %v11691_v1  ;;  %v11695_v12 = vld [vmem:[%s17065_s1 + $0x10] sm:$0xff]   ;;  %vm12596_vm2 = vmor %vm384_vm0, %vm385_vm1  ;;  %vm820_vm4 = vcmask 1046532   ;;  %vm1264_vm6 = vcmask 523264   ;;  %vm3013_vm7 = vcmask 1041408  }
  0x10   : > { %s11662_s15 = smul.u32 216, %s17308_s10  ;;  %11531 = vmatprep.subr.bf16.mxu1 %v11692_v2  ;;  %11160 = vmatprep.subr.bf16.mxu0 %v11692_v2  ;;  %v17124_v37 = vsel %vm12596_vm2, 4294967295, %v17123_v37  ;;  %v11696_v53 = vld [vmem:[%s17065_s1 + $0x58] sm:$0xff]   ;;  %v11699_v0 = vld [vmem:[%s17065_s1 + $0x60] sm:$0xff]   ;;  %vm12978_vm5 = vmor %vm819_vm3, %vm820_vm4  ;;  %vm4063_vm8 = vcmask 1041409   ;;  %vm4065_vm9 = vcmask 1042434   ;;  %s328_s13 = scalar_lea.vmem %s17073_s9, %s17308_s10 }
  0x11   : > { %17125 = vst [vmem:[#allocation7_spill] sm:$0xff] %v17124_v37  ;;  %v11697_v59 = vld [vmem:[%s17065_s1 + $0x18] sm:$0xff]   ;;  %vm4067_vm10 = vcmask 1043459   ;;  %vm4069_vm11 = vcmask 1044484   ;;  %vm4071_vm12 = vcmask 1045509   ;;  %vm4073_vm13 = vcmask 1046534  }
  0x12   : > { %s12540_s22 = scalar_lea.vmem %s17064_s0, %s11662_s15  ;;  %vm4075_vm14 = vcmask 1047559   ;;  %vm6879_vm0 = vsmask.f32 1280  ;;  %vm6880_vm1 = vsmask.f32 3336 }
  0x13   : > { %v12546_v5 = vld [vmem:[%s12540_s22 + $0x24] sm:$0xf]  ;;  %v12549_v6 = vld [vmem:[%s12540_s22 + $0x28] sm:$0xf]  ;;  %v12552_v7 = vld [vmem:[%s12540_s22 + $0x18] sm:$0xf]  ;;  %11539 = vmatpush3.bf16.msra.mxu1 %v11693_v3  ;;  %11161 = vmatpush3.bf16.msra.mxu0 %v11693_v3 }
  0x14   : > { %v473_v8 = vshrl.u32 %v12549_v6, 16  ;;  %v12557_v9 = vcombine.low %v12546_v5, %v12549_v6  ;;  %v460_v10 = vshrl.u32 %v12546_v5, 16  ;;  %v12561_v11 = vld [vmem:[%s12540_s22 + $0x1c] sm:$0xf]  ;;  %v463_v13 = vshll.u32 %v12546_v5, 16  ;;  %11532 = vmatprep.subr.bf16.mxu1 %v11694_v4  ;;  %11162 = vmatprep.subr.bf16.mxu0 %v11694_v4 }
  0x15   : > { %v12568_v14 = vld [vmem:[%s12540_s22 + $0x20] sm:$0x1]  ;;  %v436_v15 = vshrl.u32 %v12552_v7, 16  ;;  %v439_v16 = vshll.u32 %v12552_v7, 16  ;;  %v445_v17 = vshll.u32 %v12561_v11, 16  ;;  %v469_v18 = vshll.u32 %v12549_v6, 16 }
  0x16   : > { %17121 = vst [vmem:[#allocation5_spill] sm:$0xff] %v12557_v9  ;;  %1185 = vrot.lane.b32.xlu0 %v12557_v9, %s12459_s27  ;;  %v462_v19 = vrot.slane %v460_v10, 4  ;;  %v449_v20 = vshrl.u32 %v12561_v11, 16  ;;  %v455_v21 = vshll.u32 %v12568_v14, 16  ;;  %v12579_v22 = vld [vmem:[%s12540_s22 + $0x30] sm:$0xf] }
  0x17   : > { %v465_v23 = vrot.slane %v463_v13, 5  ;;  %v438_v24 = vrot.slane %v436_v15, 4  ;;  %v441_v25 = vrot.slane %v439_v16, 5  ;;  %v447_v26 = vrot.slane %v445_v17, 5  ;;  %v12582_v27 = vld [vmem:[%s12540_s22 + $0x34] sm:$0xf]  ;;  %11540 = vmatpush3.bf16.msra.mxu1 %v11695_v12  ;;  %11163 = vmatpush3.bf16.msra.mxu0 %v11695_v12 }
  0x18   : > { %v475_v28 = vrot.slane %v473_v8, 4  ;;  %v451_v29 = vrot.slane %v449_v20, 4  ;;  %v457_v30 = vrot.slane %v455_v21, 5  ;;  %v497_v31 = vshrl.u32 %v12582_v27, 16  ;;  %v12586_v32 = vld [vmem:[%s12540_s22 + $0x2c] sm:$0x1]  ;;  %11533 = vmatprep.subr.bf16.mxu1 %v11696_v53  ;;  %11164 = vmatprep.subr.bf16.mxu0 %v11696_v53 }
  0x19   : > { %v442_v33 = vor.u32 %v441_v25, %v438_v24  ;;  %v12590_v34 = vcombine.low %v12579_v22, %v12582_v27  ;;  %v484_v35 = vshrl.u32 %v12579_v22, 16  ;;  %v487_v36 = vshll.u32 %v12579_v22, 16  ;;  %v12602_v42 = vld [vmem:[%s12540_s22 + $0x3c] sm:$0xf]  ;;  %v12608_v47 = vld [vmem:[%s12540_s22 + $0x40] sm:$0xf] }
  0x1a   : > { %v452_v38 = vor.u32 %v451_v29, %v447_v26  ;;  %v493_v39 = vshll.u32 %v12582_v27, 16  ;;  %v466_v40 = vor.u32 %v465_v23, %v462_v19  ;;  %v471_v41 = vrot.slane %v469_v18, 5  ;;  %v12611_v52 = vld [vmem:[%s12540_s22 + $0x38] sm:$0x1]  ;;  %v12621_v58 = vld [vmem:[%s12540_s22 + $0x48] sm:$0xf] }
  0x1b   : > { %17122 = vst [vmem:[#allocation6_spill] sm:$0xff] %v12590_v34  ;;  %v443_v43 = vrot.slane %v442_v33, 4  ;;  %1187 = vrot.lane.b32.xlu1 %v12590_v34, %s12459_s27  ;;  %v486_v44 = vrot.slane %v484_v35, 4  ;;  %v489_v45 = vrot.slane %v487_v36, 5  ;;  %v479_v46 = vshll.u32 %v12586_v32, 16  ;;  %11541 = vmatpush3.bf16.msra.mxu1 %v11697_v59  ;;  %v11700_v17 = vld [vmem:[%s17065_s1 + $0x20] sm:$0xff]  }
  0x1c   : > { %v453_v48 = vrot.slane %v452_v38, 4  ;;  %v499_v49 = vrot.slane %v497_v31, 4  ;;  %v467_v50 = vrot.slane %v466_v40, 4  ;;  %v476_v51 = vor.u32 %v475_v28, %v471_v41  ;;  %v12638_v8 = vld [vmem:[%s12540_s22 + $0x4c] sm:$0xf]  ;;  %11165 = vmatpush3.bf16.msra.mxu0 %v11697_v59  ;;  %11534 = vmatprep.subr.bf16.mxu1 %v11699_v0 }
  0x1d   : > { %v448_v54 = vsel %vm12596_vm2, %v443_v43, %v447_v26  ;;  %v481_v55 = vrot.slane %v479_v46, 5  ;;  %v508_v56 = vshrl.u32 %v12602_v42, 16  ;;  %v511_v57 = vshll.u32 %v12602_v42, 16  ;;  %v12649_v16 = vld [vmem:[%s12540_s22 + $0x44] sm:$0x1]  ;;  %11166 = vmatprep.subr.bf16.mxu0 %v11699_v0  ;;  %v11702_v38 = vld [vmem:[%s17065_s1 + $0x28] sm:$0xff]  }
  0x1e   : > { %v458_v60 = vsel %vm12596_vm2, %v453_v48, %v457_v30  ;;  %v472_v61 = vsel %vm12596_vm2, %v467_v50, %v471_v41  ;;  %v477_v62 = vrot.slane %v476_v51, 4  ;;  %v521_v63 = vshrl.u32 %v12608_v47, 16  ;;  %v12659_v23 = vld [vmem:[%s12540_s22 + $0x54] sm:$0xf]  ;;  %v12662_v24 = vld [vmem:[%s12540_s22 + $0x58] sm:$0xf] }
  0x1f   : > { %v12634_v1 = vcombine.low %v448_v54, %v458_v60  ;;  %v490_v2 = vor.u32 %v489_v45, %v486_v44  ;;  %v495_v3 = vrot.slane %v493_v39, 5  ;;  %v503_v4 = vshll.u32 %v12611_v52, 16  ;;  %v11701_v30 = vld [vmem:[%s17065_s1 + $0x68] sm:$0xff]   ;;  %11542 = vmatpush3.bf16.msra.mxu1 %v11700_v17  ;;  %v12683_v44 = vld [vmem:[%s12540_s22 + $0x50] sm:$0x1] }
  0x20   : > { %v482_v10 = vsel %vm12596_vm2, %v477_v62, %v481_v55  ;;  %v12644_v12 = vcombine.low %v12602_v42, %v12608_v47  ;;  %v532_v13 = vshrl.u32 %v12621_v58, 16  ;;  %v535_v15 = vshll.u32 %v12621_v58, 16  ;;  %11535 = vmatprep.subr.bf16.mxu1 %v11701_v30  ;;  %v11704_v45 = vld [vmem:[%s17065_s1 + $0x70] sm:$0xff]   ;;  %11167 = vmatpush3.bf16.msra.mxu0 %v11700_v17  ;;  %v12695_v51 = vld [vmem:[%s12540_s22 + $0x60] sm:$0xf] }
  0x21   : > { %17126 = vst [vmem:[#allocation8_spill] sm:$0xff] %v12634_v1  ;;  %1102 = vrot.lane.b32.xlu0 %v12634_v1, %s12459_s27  ;;  %v12656_v18 = vcombine.low %v472_v61, %v482_v10  ;;  %v491_v19 = vrot.slane %v490_v2, 4  ;;  %v500_v20 = vor.u32 %v499_v49, %v495_v3  ;;  %v505_v21 = vrot.slane %v503_v4, 5  ;;  %11168 = vmatprep.subr.bf16.mxu0 %v11701_v30  ;;  %v12702_v62 = vld [vmem:[%s12540_s22 + $0x64] sm:$0xf]  ;;  %v11705_v4 = vld [vmem:[%s17065_s1 + $0x30] sm:$0xff]  }
  0x22   : > { %17127 = vst [vmem:[#allocation9_spill] sm:$0xff] %v12644_v12  ;;  %v545_v25 = vshrl.u32 %v12638_v8, 16  ;;  %v510_v26 = vrot.slane %v508_v56, 4  ;;  %v513_v28 = vrot.slane %v511_v57, 5  ;;  %v517_v29 = vshll.u32 %v12608_v47, 16 }
  0x23   : > { %17128 = vst [vmem:[#allocation10_spill] sm:$0xff] %v12656_v18  ;;  %1104 = vrot.lane.b32.xlu1 %v12656_v18, %s12459_s27  ;;  %v496_v31 = vsel %vm12596_vm2, %v491_v19, %v495_v3  ;;  %v501_v33 = vrot.slane %v500_v20, 4  ;;  %v523_v35 = vrot.slane %v521_v63, 4  ;;  %v527_v36 = vshll.u32 %v12649_v16, 16  ;;  %11543 = vmatpush3.bf16.msra.mxu1 %v11702_v38  ;;  %v12720_v19 = vld [vmem:[%s12540_s22 + $0x5c] sm:$0x1] }
  0x24   : > { %v12679_v39 = vcombine.low %v12621_v58, %v12638_v8  ;;  %v514_v40 = vor.u32 %v513_v28, %v510_v26  ;;  %v519_v41 = vrot.slane %v517_v29, 5  ;;  %v556_v43 = vshrl.u32 %v12659_v23, 16  ;;  %11536 = vmatprep.subr.bf16.mxu1 %v11704_v45  ;;  %v11706_v20 = vld [vmem:[%s17065_s1 + $0x78] sm:$0xff]   ;;  %11169 = vmatpush3.bf16.msra.mxu0 %v11702_v38  ;;  %v12729_v29 = vld [vmem:[%s12540_s22 + $0x6c] sm:$0xf] }
  0x25   : > { %1189 = vrot.lane.b32.xlu0 %v12644_v12, %s12459_s27  ;;  %v506_v46 = vsel %vm12596_vm2, %v501_v33, %v505_v21  ;;  %v529_v48 = vrot.slane %v527_v36, 5  ;;  %v559_v49 = vshll.u32 %v12659_v23, 16  ;;  %v569_v50 = vshrl.u32 %v12662_v24, 16  ;;  %11170 = vmatprep.subr.bf16.mxu0 %v11704_v45  ;;  %v12735_v36 = vld [vmem:[%s12540_s22 + $0x70] sm:$0xf]  ;;  %v11707_v45 = vld [vmem:[%s17065_s1 + $0x38] sm:$0xff]  }
  0x26   : > { %17129 = vst [vmem:[#allocation11_spill] sm:$0xff] %v12679_v39  ;;  %v12697_v53 = vcombine.low %v496_v31, %v506_v46  ;;  %v515_v54 = vrot.slane %v514_v40, 4  ;;  %v524_v55 = vor.u32 %v523_v35, %v519_v41  ;;  %v534_v56 = vrot.slane %v532_v13, 4  ;;  %v12858_v1 = vld [vmem:[%s12540_s22 + $0xa0] sm:$0xf] }
  0x27   : > { %v537_v57 = vrot.slane %v535_v15, 5  ;;  %v541_v59 = vshll.u32 %v12638_v8, 16  ;;  %v547_v60 = vrot.slane %v545_v25, 4  ;;  %v551_v61 = vshll.u32 %v12683_v44, 16  ;;  %11544 = vmatpush3.bf16.msra.mxu1 %v11705_v4  ;;  %17143 = vst [vmem:[#allocation25_spill] sm:$0xff] %v12858_v1 }
  0x28   : > { %17130 = vst [vmem:[#allocation12_spill] sm:$0xff] %v12697_v53  ;;  %1106 = vrot.lane.b32.xlu1 %v12697_v53, %s12459_s27  ;;  %v520_v63 = vsel %vm12596_vm2, %v515_v54, %v519_v41  ;;  %v525_v0 = vrot.slane %v524_v55, 4  ;;  %v12710_v2 = vcombine.low %v12659_v23, %v12662_v24  ;;  %v580_v3 = vshrl.u32 %v12695_v51, 16  ;;  %11537 = vmatprep.subr.bf16.mxu1 %v11706_v20  ;;  %v11708_v54 = vld [vmem:[%s17065_s1 + $0xc0] sm:$0xff]   ;;  %v12914_v12 = vld [vmem:[%s12540_s22 + $0xb8] sm:$0xf] }
  0x29   : > { %1191 = vrot.lane.b32.xlu0 %v12679_v39, %s12459_s27  ;;  %v538_v10 = vor.u32 %v537_v57, %v534_v56  ;;  %v543_v13 = vrot.slane %v541_v59, 5  ;;  %v553_v15 = vrot.slane %v551_v61, 5  ;;  %v583_v17 = vshll.u32 %v12695_v51, 16  ;;  %11171 = vmatpush3.bf16.msra.mxu0 %v11705_v4  ;;  %v12887_v39 = vld [vmem:[%s12540_s22 + $0xac] sm:$0xf] }
  0x2a   : > { %17131 = vst [vmem:[#allocation13_spill] sm:$0xff] %v12710_v2  ;;  %v530_v21 = vsel %vm12596_vm2, %v525_v0, %v529_v48  ;;  %v593_v25 = vshrl.u32 %v12702_v62, 16  ;;  %v558_v26 = vrot.slane %v556_v43, 4  ;;  %v561_v28 = vrot.slane %v559_v49, 5  ;;  %11172 = vmatprep.subr.bf16.mxu0 %v11706_v20  ;;  %v12934_v9 = vld [vmem:[%s12540_s22 + $0xc0] sm:$0xf] }
  0x2b   : > { %v12731_v30 = vcombine.low %v520_v63, %v530_v21  ;;  %v539_v31 = vrot.slane %v538_v10, 4  ;;  %v548_v33 = vor.u32 %v547_v60, %v543_v13  ;;  %v565_v35 = vshll.u32 %v12662_v24, 16  ;;  %v12758_v60 = vld [vmem:[%s12540_s22 + $0x68] sm:$0x1]  ;;  %v12766_v21 = vld [vmem:[%s12540_s22 + $0x7c] sm:$0xf]  ;;  %11545 = vmatpush3.bf16.msra.mxu1 %v11707_v45 }
  0x2c   : > { %v12739_v38 = vcombine.low %v12695_v51, %v12702_v62  ;;  %v562_v40 = vor.u32 %v561_v28, %v558_v26  ;;  %v571_v41 = vrot.slane %v569_v50, 4  ;;  %v575_v43 = vshll.u32 %v12720_v19, 16  ;;  %11270 = vmatprep.subr.bf16.mxu1 %v11708_v54  ;;  %v12791_v54 = vld [vmem:[%s12540_s22 + $0x84] sm:$0xf] }
  0x2d   : > { %17132 = vst [vmem:[#allocation14_spill] sm:$0xff] %v12731_v30  ;;  %1108 = vrot.lane.b32.xlu1 %v12731_v30, %s12459_s27  ;;  %1193 = vrot.lane.b32.xlu0 %v12710_v2, %s12459_s27  ;;  %v544_v46 = vsel %vm12596_vm2, %v539_v31, %v543_v13  ;;  %v549_v48 = vrot.slane %v548_v33, 4  ;;  %v567_v49 = vrot.slane %v565_v35, 5  ;;  %v604_v50 = vshrl.u32 %v12729_v29, 16  ;;  %v12763_v13 = vld [vmem:[%s12540_s22 + $0x78] sm:$0xf] }
  0x2e   : > { %17133 = vst [vmem:[#allocation15_spill] sm:$0xff] %v12739_v38  ;;  %v563_v55 = vrot.slane %v562_v40, 4  ;;  %v577_v56 = vrot.slane %v575_v43, 5  ;;  %v607_v57 = vshll.u32 %v12729_v29, 16  ;;  %v617_v59 = vshrl.u32 %v12735_v36, 16  ;;  %11173 = vmatpush3.bf16.msra.mxu0 %v11707_v45 }
  0x2f   : > { %v554_v61 = vsel %vm12596_vm2, %v549_v48, %v553_v15  ;;  %v572_v63 = vor.u32 %v571_v41, %v567_v49  ;;  %v582_v0 = vrot.slane %v580_v3, 4  ;;  %v585_v10 = vrot.slane %v583_v17, 5  ;;  %v12786_v41 = vld [vmem:[%s12540_s22 + $0x74] sm:$0x1] }
  0x30   : > { %v12768_v26 = vcombine.low %v544_v46, %v554_v61  ;;  %v12772_v28 = vcombine.low %v12729_v29, %v12735_v36  ;;  %v589_v4 = vshll.u32 %v12702_v62, 16  ;;  %v595_v31 = vrot.slane %v593_v25, 4 }
  0x31   : > { %1195 = vrot.lane.b32.xlu0 %v12739_v38, %s12459_s27  ;;  %v568_v3 = vsel %vm12596_vm2, %v563_v55, %v567_v49  ;;  %v573_v15 = vrot.slane %v572_v63, 4  ;;  %v586_v17 = vor.u32 %v585_v10, %v582_v0  ;;  %v599_v20 = vshll.u32 %v12758_v60, 16  ;;  %v12797_v10 = vld [vmem:[%s12540_s22 + $0x88] sm:$0xf] }
  0x32   : > { %17134 = vst [vmem:[#allocation16_spill] sm:$0xff] %v12768_v26  ;;  %17135 = vst [vmem:[#allocation17_spill] sm:$0xff] %v12772_v28  ;;  %1110 = vrot.lane.b32.xlu1 %v12768_v26, %s12459_s27  ;;  %v591_v33 = vrot.slane %v589_v4, 5  ;;  %v628_v35 = vshrl.u32 %v12763_v13, 16  ;;  %v631_v25 = vshll.u32 %v12763_v13, 16  ;;  %v641_v40 = vshrl.u32 %v12766_v21, 16 }
  0x33   : > { %v578_v43 = vsel %vm12596_vm2, %v573_v15, %v577_v56  ;;  %v587_v46 = vrot.slane %v586_v17, 4  ;;  %v601_v48 = vrot.slane %v599_v20, 5  ;;  %v606_v49 = vrot.slane %v604_v50, 4  ;;  %v12815_v20 = vld [vmem:[%s12540_s22 + $0x90] sm:$0xf] }
  0x34   : > { %v12793_v55 = vcombine.low %v568_v3, %v578_v43  ;;  %v596_v61 = vor.u32 %v595_v31, %v591_v33  ;;  %v609_v63 = vrot.slane %v607_v57, 5  ;;  %v613_v0 = vshll.u32 %v12735_v36, 16  ;;  %v12809_v3 = vld [vmem:[%s12540_s22 + $0x80] sm:$0x1] }
  0x35   : > { %1197 = vrot.lane.b32.xlu0 %v12772_v28, %s12459_s27  ;;  %v592_v45 = vsel %vm12596_vm2, %v587_v46, %v591_v33  ;;  %v12805_v50 = vcombine.low %v12763_v13, %v12766_v21  ;;  %v619_v56 = vrot.slane %v617_v59, 4  ;;  %v623_v4 = vshll.u32 %v12786_v41, 16 }
  0x36   : > { %17136 = vst [vmem:[#allocation18_spill] sm:$0xff] %v12793_v55  ;;  %1112 = vrot.lane.b32.xlu1 %v12793_v55, %s12459_s27  ;;  %v597_v57 = vrot.slane %v596_v61, 4  ;;  %v610_v31 = vor.u32 %v609_v63, %v606_v49  ;;  %v615_v15 = vrot.slane %v613_v0, 5  ;;  %v652_v17 = vshrl.u32 %v12791_v54, 16 }
  0x37   : > { %17137 = vst [vmem:[#allocation19_spill] sm:$0xff] %v12805_v50  ;;  %v625_v33 = vrot.slane %v623_v4, 5  ;;  %v655_v43 = vshll.u32 %v12791_v54, 16  ;;  %v12820_v59 = vcombine.low %v12791_v54, %v12797_v10  ;;  %v630_v46 = vrot.slane %v628_v35, 4 }
  0x38   : > { %v602_v55 = vsel %vm12596_vm2, %v597_v57, %v601_v48  ;;  %v611_v61 = vrot.slane %v610_v31, 4  ;;  %v620_v49 = vor.u32 %v619_v56, %v615_v15  ;;  %v633_v63 = vrot.slane %v631_v25, 5  ;;  %v12834_v56 = vld [vmem:[%s12540_s22 + $0x94] sm:$0xf]  ;;  %v12837_v25 = vld [vmem:[%s12540_s22 + $0x8c] sm:$0x1] }
  0x39   : > { %17138 = vst [vmem:[#allocation20_spill] sm:$0xff] %v12820_v59  ;;  %v12824_v0 = vcombine.low %v592_v45, %v602_v55  ;;  %1199 = vrot.lane.b32.xlu0 %v12805_v50, %s12459_s27  ;;  %v637_v4 = vshll.u32 %v12766_v21, 16  ;;  %v643_v26 = vrot.slane %v641_v40, 4  ;;  %v647_v30 = vshll.u32 %v12809_v3, 16  ;;  %v12861_v50 = vld [vmem:[%s12540_s22 + $0x98] sm:$0x1] }
  0x3a   : > { %v616_v35 = vsel %vm12596_vm2, %v611_v61, %v615_v15  ;;  %v621_v53 = vrot.slane %v620_v49, 4  ;;  %v665_v48 = vshrl.u32 %v12797_v10, 16  ;;  %v634_v57 = vor.u32 %v633_v63, %v630_v46  ;;  %v12844_v15 = vld [vmem:[%s12540_s22 + $0x9c] sm:$0xf] }
  0x3b   : > { %17139 = vst [vmem:[#allocation21_spill] sm:$0xff] %v12824_v0  ;;  %1114 = vrot.lane.b32.xlu1 %v12824_v0, %s12459_s27  ;;  %v639_v55 = vrot.slane %v637_v4, 5  ;;  %v649_v40 = vrot.slane %v647_v30, 5  ;;  %v676_v45 = vshrl.u32 %v12815_v20, 16  ;;  %v679_v31 = vshll.u32 %v12815_v20, 16  ;;  %17140 = vst [vmem:[#allocation22_spill] sm:$0xff] %v12844_v15 }
  0x3c   : > { %v626_v46 = vsel %vm12596_vm2, %v621_v53, %v625_v33  ;;  %v635_v61 = vrot.slane %v634_v57, 4  ;;  %v12850_v49 = vcombine.low %v12815_v20, %v12834_v56  ;;  %v654_v63 = vrot.slane %v652_v17, 4 }
  0x3d   : > { %v12852_v18 = vcombine.low %v616_v35, %v626_v46  ;;  %1201 = vrot.lane.b32.xlu0 %v12820_v59, %s12459_s27  ;;  %v644_v30 = vor.u32 %v643_v26, %v639_v55  ;;  %v657_v4 = vrot.slane %v655_v43, 5  ;;  %v661_v0 = vshll.u32 %v12797_v10, 16  ;;  %v12871_v59 = vld [vmem:[%s12540_s22 + $0xa8] sm:$0xf] }
  0x3e   : > { %17141 = vst [vmem:[#allocation23_spill] sm:$0xff] %v12850_v49  ;;  %v640_v53 = vsel %vm12596_vm2, %v635_v61, %v639_v55  ;;  %v689_v33 = vshrl.u32 %v12834_v56, 16  ;;  %v667_v17 = vrot.slane %v665_v48, 4  ;;  %v671_v35 = vshll.u32 %v12837_v25, 16  ;;  %17144 = vst [vmem:[#allocation26_spill] sm:$0xff] %v12871_v59 }
  0x3f   : > { %17142 = vst [vmem:[#allocation24_spill] sm:$0xff] %v12852_v18  ;;  %1116 = vrot.lane.b32.xlu1 %v12852_v18, %s12459_s27  ;;  %v645_v57 = vrot.slane %v644_v30, 4  ;;  %v658_v26 = vor.u32 %v657_v4, %v654_v63  ;;  %v663_v43 = vrot.slane %v661_v0, 5  ;;  %v700_v46 = vshrl.u32 %v12844_v15, 16 }
  0x40   : > { %v673_v28 = vrot.slane %v671_v35, 5  ;;  %v703_v55 = vshll.u32 %v12844_v15, 16  ;;  %v12876_v48 = vcombine.low %v12844_v15, %v12858_v1  ;;  %v678_v61 = vrot.slane %v676_v45, 4  ;;  %v12890_v45 = vld [vmem:[%s12540_s22 + $0xa4] sm:$0x1] }
  0x41   : > { %v650_v30 = vsel %vm12596_vm2, %v645_v57, %v649_v40  ;;  %1203 = vrot.lane.b32.xlu0 %v12850_v49, %s12459_s27  ;;  %v659_v0 = vrot.slane %v658_v26, 4  ;;  %v668_v63 = vor.u32 %v667_v17, %v663_v43  ;;  %v681_v4 = vrot.slane %v679_v31, 5  ;;  %17147 = vst [vmem:[#allocation29_spill] sm:$0xff] %v12890_v45  ;;  %v12896_v17 = vld [vmem:[%s12540_s22 + $0xb4] sm:$0xf] }
  0x42   : > { %17145 = vst [vmem:[#allocation27_spill] sm:$0xff] %v12876_v48  ;;  %v12882_v18 = vcombine.low %v640_v53, %v650_v30  ;;  %v685_v35 = vshll.u32 %v12834_v56, 16  ;;  %v691_v38 = vrot.slane %v689_v33, 4  ;;  %v695_v2 = vshll.u32 %v12861_v50, 16  ;;  %17148 = vst [vmem:[#allocation30_spill] sm:$0xff] %v12896_v17 }
  0x43   : > { %v664_v40 = vsel %vm12596_vm2, %v659_v0, %v663_v43  ;;  %v669_v57 = vrot.slane %v668_v63, 4  ;;  %v713_v49 = vshrl.u32 %v12858_v1, 16  ;;  %v682_v26 = vor.u32 %v681_v4, %v678_v61 }
  0x44   : > { %17146 = vst [vmem:[#allocation28_spill] sm:$0xff] %v12882_v18  ;;  %1118 = vrot.lane.b32.xlu1 %v12882_v18, %s12459_s27  ;;  %v687_v31 = vrot.slane %v685_v35, 5  ;;  %v697_v53 = vrot.slane %v695_v2, 5  ;;  %v724_v33 = vshrl.u32 %v12871_v59, 16  ;;  %v727_v30 = vshll.u32 %v12871_v59, 16 }
  0x45   : > { %v674_v43 = vsel %vm12596_vm2, %v669_v57, %v673_v28  ;;  %1205 = vrot.lane.b32.xlu0 %v12876_v48, %s12459_s27  ;;  %v683_v61 = vrot.slane %v682_v26, 4  ;;  %v12908_v0 = vcombine.low %v12871_v59, %v12887_v39  ;;  %v702_v63 = vrot.slane %v700_v46, 4  ;;  %v12917_v28 = vld [vmem:[%s12540_s22 + $0xb0] sm:$0x1] }
  0x46   : > { %v12910_v4 = vcombine.low %v664_v40, %v674_v43  ;;  %v692_v2 = vor.u32 %v691_v38, %v687_v31  ;;  %v705_v35 = vrot.slane %v703_v55, 5  ;;  %v709_v18 = vshll.u32 %v12858_v1, 16 }
  0x47   : > { %17149 = vst [vmem:[#allocation31_spill] sm:$0xff] %v12908_v0  ;;  %v688_v57 = vsel %vm12596_vm2, %v683_v61, %v687_v31  ;;  %v737_v26 = vshrl.u32 %v12887_v39, 16  ;;  %v715_v48 = vrot.slane %v713_v49, 4  ;;  %v719_v46 = vshll.u32 %v12890_v45, 16  ;;  %v12949_v45 = vld [vmem:[%s12540_s22 + $0xc] sm:$0xf] }
  0x48   : > { %17150 = vst [vmem:[#allocation32_spill] sm:$0xff] %v12910_v4  ;;  %1120 = vrot.lane.b32.xlu1 %v12910_v4, %s12459_s27  ;;  %v693_v38 = vrot.slane %v692_v2, 4  ;;  %v706_v55 = vor.u32 %v705_v35, %v702_v63  ;;  %v711_v40 = vrot.slane %v709_v18, 5  ;;  %v748_v43 = vshrl.u32 %v12896_v17, 16  ;;  %v12937_v63 = vld [vmem:[%s12540_s22 + $0xc4] sm:$0xf] }
  0x49   : > { %1207 = vrot.lane.b32.xlu0 %v12908_v0, %s12459_s27  ;;  %v721_v34 = vrot.slane %v719_v46, 5  ;;  %v751_v31 = vshll.u32 %v12896_v17, 16  ;;  %v12931_v49 = vcombine.low %v12896_v17, %v12914_v12  ;;  %v726_v61 = vrot.slane %v724_v33, 4  ;;  %v12946_v33 = vld [vmem:[%s12540_s22 + $0xbc] sm:$0x1] }
  0x4a   : > { %v698_v18 = vsel %vm12596_vm2, %v693_v38, %v697_v53  ;;  %v707_v2 = vrot.slane %v706_v55, 4  ;;  %v716_v35 = vor.u32 %v715_v48, %v711_v40  ;;  %v729_v4 = vrot.slane %v727_v30, 5  ;;  %17153 = vst [vmem:[#allocation35_spill] sm:$0xff] %v12946_v33  ;;  %v12955_v30 = vld [vmem:[%s12540_s22 + $0x10] sm:$0xf] }
  0x4b   : > { %17151 = vst [vmem:[#allocation33_spill] sm:$0xff] %v12931_v49  ;;  %v12941_v0 = vcombine.low %v688_v57, %v698_v18  ;;  %v733_v46 = vshll.u32 %v12887_v39, 16  ;;  %v739_v59 = vrot.slane %v737_v26, 4  ;;  %v743_v17 = vshll.u32 %v12917_v28, 16  ;;  %v12963_v55 = vld [vmem:[%s12540_s22 + $0x14] sm:$0x1] }
  0x4c   : > { %v712_v15 = vsel %vm12596_vm2, %v707_v2, %v711_v40  ;;  %v717_v1 = vrot.slane %v716_v35, 4  ;;  %v761_v53 = vshrl.u32 %v12914_v12, 16  ;;  %v730_v48 = vor.u32 %v729_v4, %v726_v61 }
  0x4d   : > { %17152 = vst [vmem:[#allocation34_spill] sm:$0xff] %v12941_v0  ;;  %1122 = vrot.lane.b32.xlu1 %v12941_v0, %s12459_s27  ;;  %1209 = vrot.lane.b32.xlu0 %v12931_v49, %s12459_s27  ;;  %v735_v57 = vrot.slane %v733_v46, 5  ;;  %v745_v26 = vrot.slane %v743_v17, 5  ;;  %v12969_v4 = vcombine.low %v12934_v9, %v12937_v63  ;;  %v750_v61 = vrot.slane %v748_v43, 4 }
  0x4e   : > { %v722_v40 = vsel %vm12596_vm2, %v717_v1, %v721_v34  ;;  %v731_v18 = vrot.slane %v730_v48, 4  ;;  %v753_v0 = vrot.slane %v751_v31, 5  ;;  %v757_v17 = vshll.u32 %v12914_v12, 16 }
  0x4f   : > { %17154 = vst [vmem:[#allocation36_spill] sm:$0xff] %v12969_v4  ;;  %v12971_v2 = vcombine.low %v712_v15, %v722_v40  ;;  %v740_v35 = vor.u32 %v739_v59, %v735_v57  ;;  %v763_v38 = vrot.slane %v761_v53, 4  ;;  %v767_v49 = vshll.u32 %v12946_v33, 16 }
  0x50   : > { %v736_v46 = vsel %vm12596_vm2, %v731_v18, %v735_v57  ;;  %v17155_v34 = vmov 0  ;;  %v10434_v1 = vrot.slane %v12949_v45, 9  ;;  %v754_v15 = vor.u32 %v753_v0, %v750_v61 }
  0x51   : > { %v17156_v34 = vsel %vm12978_vm5, 4294967295, %v17155_v34  ;;  %1124 = vrot.lane.b32.xlu1 %v12971_v2, %s12459_s27  ;;  %v741_v59 = vrot.slane %v740_v35, 4  ;;  %1211 = vrot.lane.b32.xlu0 %v12969_v4, %s12459_s27  ;;  %v759_v43 = vrot.slane %v757_v17, 5  ;;  %v831_v31 = vrot.slane %v12955_v30, 5 }
  0x52   : > { %17157 = vst [vmem:[#allocation37_spill] sm:$0xff] %v17156_v34  ;;  %v769_v53 = vrot.slane %v767_v49, 5  ;;  %v834_v48 = vrot.slane %v12963_v55, 5  ;;  %v10435_v57 = vrot.slane %v12552_v7, 9  ;;  %v838_v40 = vrot.slane %v12561_v11, 5 }
  0x53   : > { %v746_v18 = vsel %vm12596_vm2, %v741_v59, %v745_v26  ;;  %v755_v33 = vrot.slane %v754_v15, 4  ;;  %v764_v35 = vor.u32 %v763_v38, %v759_v43  ;;  %v832_v4 = vsel %vm12978_vm5, %v10434_v1, %v831_v31 }
  0x54   : > { %v12995_v0 = vcombine.low %v736_v46, %v746_v18  ;;  %v833_v61 = vrot.slane %v831_v31, 4  ;;  %v839_v49 = vsel %vm12978_vm5, %v10435_v57, %v838_v40  ;;  %v840_v17 = vrot.slane %v838_v40, 4  ;;  %v13011_v31 = vld [vmem:[%s12540_s22] sm:$0xf]  ;;  %v13021_v57 = vld [vmem:[%s12540_s22 + $0x4] sm:$0xf] }
  0x55   : > { %v760_v7 = vsel %vm12596_vm2, %v755_v33, %v759_v43  ;;  %v765_v11 = vrot.slane %v764_v35, 4  ;;  %v841_v26 = vrot.slane %v12568_v14, 5  ;;  %v10436_v38 = vrot.slane %v12546_v5, 9 }
  0x56   : > { %1126 = vrot.lane.b32.xlu1 %v12995_v0, %s12459_s27  ;;  %v835_v46 = vsel %vm12978_vm5, %v833_v61, %v834_v48  ;;  %v845_v1 = vrot.slane %v12549_v6, 5  ;;  %v848_v59 = vrot.slane %v12586_v32, 5  ;;  %v10437_v15 = vrot.slane %v12579_v22, 9  ;;  %v13028_v32 = vld [vmem:[%s12540_s22 + $0x8] sm:$0x1] }
  0x57   : > { %v770_v14 = vsel %vm12596_vm2, %v765_v11, %v769_v53  ;;  %v13015_v33 = vcombine.low %v832_v4, %v835_v46  ;;  %v842_v5 = vsel %vm12978_vm5, %v840_v17, %v841_v26  ;;  %v852_v43 = vrot.slane %v12582_v27, 5 }
  0x58   : > { %v13023_v48 = vcombine.low %v760_v7, %v770_v14  ;;  %v846_v6 = vsel %vm12978_vm5, %v10436_v38, %v845_v1  ;;  %v847_v22 = vrot.slane %v845_v1, 4  ;;  %v855_v40 = vrot.slane %v12611_v52, 5 }
  0x59   : > { %1219 = vrot.lane.b32.xlu0 %v13015_v33, %s12459_s27  ;;  %v853_v4 = vsel %vm12978_vm5, %v10437_v15, %v852_v43  ;;  %v854_v53 = vrot.slane %v852_v43, 4  ;;  %v10438_v27 = vrot.slane %v12602_v42, 9  ;;  %v13038_v18 = vcombine.low %v839_v49, %v842_v5 }
  0x5a   : > { %1128 = vrot.lane.b32.xlu1 %v13023_v48, %s12459_s27  ;;  %v849_v35 = vsel %vm12978_vm5, %v847_v22, %v848_v59  ;;  %v859_v61 = vrot.slane %v12608_v47, 5  ;;  %v862_v17 = vrot.slane %v12649_v16, 5  ;;  %v388_v52 = vshrl.u32 %v13011_v31, 16 }
  0x5b   : > { %v13044_v7 = vcombine.low %v846_v6, %v849_v35  ;;  %v856_v11 = vsel %vm12978_vm5, %v854_v53, %v855_v40  ;;  %v391_v42 = vshll.u32 %v13011_v31, 16  ;;  %v397_v46 = vshll.u32 %v13021_v57, 16 }
  0x5c   : > { %v13050_v26 = vcombine.low %v853_v4, %v856_v11  ;;  %v860_v49 = vsel %vm12978_vm5, %v10438_v27, %v859_v61  ;;  %v861_v38 = vrot.slane %v859_v61, 4  ;;  %v390_v47 = vrot.slane %v388_v52, 4 }
  0x5d   : > { %1223 = vrot.lane.b32.xlu0 %v13044_v7, %s12459_s27  ;;  %v393_v16 = vrot.slane %v391_v42, 5  ;;  %v401_v1 = vshrl.u32 %v13021_v57, 16  ;;  %v407_v59 = vshll.u32 %v13028_v32, 16  ;;  %v399_v14 = vrot.slane %v397_v46, 5 }
  0x5e   : > { %1221 = vrot.lane.b32.xlu1 %v13038_v18, %s12459_s27  ;;  %v863_v15 = vsel %vm12978_vm5, %v861_v38, %v862_v17  ;;  %v10439_v5 = vrot.slane %v12621_v58, 9  ;;  %v866_v43 = vrot.slane %v12638_v8, 5  ;;  %v13069_v22 = vcombine.low %v12949_v45, %v12955_v30 }
  0x5f   : > { %v13065_v6 = vcombine.low %v860_v49, %v863_v15  ;;  %v394_v4 = vor.u32 %v393_v16, %v390_v47  ;;  %v403_v53 = vrot.slane %v401_v1, 4  ;;  %v409_v40 = vrot.slane %v407_v59, 5 }
  0x60   : > { %v867_v27 = vsel %vm12978_vm5, %v10439_v5, %v866_v43  ;;  %v868_v35 = vrot.slane %v866_v43, 4  ;;  %v869_v61 = vrot.slane %v12683_v44, 5  ;;  %v412_v17 = vshrl.u32 %v12949_v45, 16 }
  0x61   : > { %1227 = vrot.lane.b32.xlu0 %v13065_v6, %s12459_s27  ;;  %v395_v58 = vrot.slane %v394_v4, 4  ;;  %v404_v8 = vor.u32 %v403_v53, %v399_v14  ;;  %v415_v11 = vshll.u32 %v12949_v45, 16  ;;  %v421_v42 = vshll.u32 %v12955_v30, 16 }
  0x62   : > { %1225 = vrot.lane.b32.xlu1 %v13050_v26, %s12459_s27  ;;  %v870_v52 = vsel %vm12978_vm5, %v868_v35, %v869_v61  ;;  %v425_v49 = vshrl.u32 %v12955_v30, 16  ;;  %v431_v44 = vshll.u32 %v12963_v55, 16  ;;  %v414_v45 = vrot.slane %v412_v17, 4  ;;  %v12443_v35 = vld [vmem:[%s12540_s22 + $0x18] sm:$0xf] }
  0x63   : > { %v400_v38 = vsel %vm12596_vm2, %v395_v58, %v399_v14  ;;  %v405_v46 = vrot.slane %v404_v8, 4  ;;  %v13087_v47 = vcombine.low %v867_v27, %v870_v52  ;;  %v417_v16 = vrot.slane %v415_v11, 5  ;;  %v12444_v61 = vld [vmem:[%s12540_s22 + $0x1c] sm:$0xf] }
  0x64   : > { %v423_v1 = vrot.slane %v421_v42, 5  ;;  %v427_v59 = vrot.slane %v425_v49, 4  ;;  %v433_v15 = vrot.slane %v431_v44, 5  ;;  %v10440_v30 = vrot.slane %v12659_v23, 9 }
  0x65   : > { %v410_v5 = vsel %vm12596_vm2, %v405_v46, %v409_v40  ;;  %v873_v55 = vrot.slane %v12662_v24, 5  ;;  %v876_v43 = vrot.slane %v12720_v19, 5  ;;  %v418_v4 = vor.u32 %v417_v16, %v414_v45 }
  0x66   : > { %1181 = vrot.lane.b32.xlu1 %v13069_v22, %s12459_s27  ;;  %v10467_v14 = vcombine.low %v400_v38, %v410_v5  ;;  %v428_v53 = vor.u32 %v427_v59, %v423_v1  ;;  %v10441_v27 = vrot.slane %v12695_v51, 9  ;;  %v13099_v58 = vcombine.low %v12443_v35, %v12444_v61  ;;  %v17159_v61 = vld [vmem:[#allocation22_spill] sm:$0xff] }
  0x67   : > { %v875_v8 = vrot.slane %v873_v55, 4  ;;  %v880_v40 = vrot.slane %v12702_v62, 5  ;;  %v883_v23 = vrot.slane %v12758_v60, 5  ;;  %v419_v24 = vrot.slane %v418_v4, 4 }
  0x68   : > { %1098 = vrot.lane.b32.xlu0 %v10467_v14, %s12459_s27  ;;  %v429_v19 = vrot.slane %v428_v53, 4  ;;  %v10442_v17 = vrot.slane %v12729_v29, 9  ;;  %v887_v11 = vrot.slane %v12735_v36, 5  ;;  %v938_v52 = vshll.u32 %v12934_v9, 16 }
  0x69   : > { %v882_v51 = vrot.slane %v880_v40, 4  ;;  %v890_v42 = vrot.slane %v12786_v41, 5  ;;  %v424_v62 = vsel %vm12596_vm2, %v419_v24, %v423_v1  ;;  %v874_v49 = vsel %vm12978_vm5, %v10440_v30, %v873_v55  ;;  %v17160_v24 = vld [vmem:[#allocation29_spill] sm:$0xff] }
  0x6a   : > { %1229 = vrot.lane.b32.xlu1 %v13087_v47, %s12459_s27  ;;  %v434_v60 = vsel %vm12596_vm2, %v429_v19, %v433_v15  ;;  %v877_v29 = vsel %vm12978_vm5, %v875_v8, %v876_v43  ;;  %v881_v41 = vsel %vm12978_vm5, %v10441_v27, %v880_v40  ;;  %v888_v44 = vsel %vm12978_vm5, %v10442_v17, %v887_v11  ;;  %v17158_v27 = vld [vmem:[#allocation25_spill] sm:$0xff]  ;;  %v17161_v17 = vld [vmem:[#allocation26_spill] sm:$0xff] }
  0x6b   : > { %v13118_v36 = vcombine.low %v424_v62, %v434_v60  ;;  %v889_v38 = vrot.slane %v887_v11, 4  ;;  %v884_v46 = vsel %vm12978_vm5, %v882_v51, %v883_v23  ;;  %v10443_v45 = vrot.slane %v12763_v13, 9 }
  0x6c   : > { %1183 = vrot.lane.b32.xlu0 %v13099_v58, %s12459_s27  ;;  %v894_v16 = vrot.slane %v12766_v21, 5  ;;  %v897_v1 = vrot.slane %v12809_v3, 5  ;;  %v10444_v15 = vrot.slane %v12791_v54, 9  ;;  %v901_v5 = vrot.slane %v12797_v10, 5 }
  0x6d   : > { %v891_v59 = vsel %vm12978_vm5, %v889_v38, %v890_v42  ;;  %v10445_v30 = vrot.slane %v12815_v20, 9  ;;  %v13138_v55 = vcombine.low %v874_v49, %v877_v29  ;;  %v904_v13 = vrot.slane %v12837_v25, 5 }
  0x6e   : > { %1100 = vrot.lane.b32.xlu1 %v13118_v36, %s12459_s27  ;;  %v896_v43 = vrot.slane %v894_v16, 4  ;;  %v908_v21 = vrot.slane %v12834_v56, 5  ;;  %v948_v3 = vshrl.u32 %v12937_v63, 16  ;;  %v13143_v14 = vcombine.low %v881_v41, %v884_v46 }
  0x6f   : > { %v903_v4 = vrot.slane %v901_v5, 4  ;;  %v911_v54 = vrot.slane %v12861_v50, 5  ;;  %v13148_v10 = vcombine.low %v888_v44, %v891_v59  ;;  %v895_v20 = vsel %vm12978_vm5, %v10443_v45, %v894_v16 }
  0x70   : > { %1231 = vrot.lane.b32.xlu0 %v13138_v55, %s12459_s27  ;;  %v910_v53 = vrot.slane %v908_v21, 4  ;;  %v915_v25 = vrot.slane %v17158_v27, 5  ;;  %v898_v56 = vsel %vm12978_vm5, %v896_v43, %v897_v1  ;;  %v902_v35 = vsel %vm12978_vm5, %v10444_v15, %v901_v5  ;;  %v17162_v15 = vld [vmem:[#allocation30_spill] sm:$0xff] }
  0x71   : > { %v909_v50 = vsel %vm12978_vm5, %v10445_v30, %v908_v21  ;;  %v10446_v8 = vrot.slane %v17159_v61, 9  ;;  %v905_v40 = vsel %vm12978_vm5, %v903_v4, %v904_v13  ;;  %v918_v19 = vrot.slane %v17160_v24, 5 }
  0x72   : > { %1233 = vrot.lane.b32.xlu1 %v13143_v14, %s12459_s27  ;;  %v917_v23 = vrot.slane %v915_v25, 4  ;;  %v10447_v11 = vrot.slane %v17161_v17, 9  ;;  %v912_v51 = vsel %vm12978_vm5, %v910_v53, %v911_v54  ;;  %v922_v42 = vrot.slane %v12887_v39, 5 }
  0x73   : > { %v925_v62 = vrot.slane %v12917_v28, 5  ;;  %v10433_v60 = vrot.slane %v13011_v31, 9  ;;  %v13173_v49 = vcombine.low %v895_v20, %v898_v56  ;;  %v824_v29 = vrot.slane %v13021_v57, 5  ;;  %v13185_v28 = vld [vmem:[%s17065_s1 + $0x100] sm:$0xff]   ;;  %v380_v20 = vld [vmem:[%s12540_s22 + $0xc8] sm:$0x1] }
  0x74   : > { %1235 = vrot.lane.b32.xlu0 %v13148_v10, %s12459_s27  ;;  %v827_v41 = vrot.slane %v13028_v32, 5  ;;  %v929_v44 = vrot.slane %v12914_v12, 5  ;;  %v13178_v38 = vcombine.low %v902_v35, %v905_v40  ;;  %v916_v39 = vsel %vm12978_vm5, %v10446_v8, %v915_v25  ;;  %11490 = vmatprep.subr.bf16.mxu0 %v13185_v28 }
  0x75   : > { %v924_v46 = vrot.slane %v922_v42, 4  ;;  %v10451_v45 = vcombine.low %v13011_v31, %v13021_v57  ;;  %v13191_v32 = vcombine.low %v909_v50, %v912_v51  ;;  %v919_v12 = vsel %vm12978_vm5, %v917_v23, %v918_v19  ;;  %v11728_v57 = vld [vmem:[%s17065_s1 + $0x118] sm:$0xff]  }
  0x76   : > { %1237 = vrot.lane.b32.xlu1 %v13173_v49, %s12459_s27  ;;  %v13197_v16 = vsel %vm12978_vm5, %v10433_v60, %v824_v29  ;;  %v826_v1 = vrot.slane %v824_v29, 4  ;;  %v923_v59 = vsel %vm12978_vm5, %v10447_v11, %v922_v42  ;;  %v10448_v5 = vrot.slane %v17162_v15, 9  ;;  %v382_v11 = vld [vmem:[%s12540_s22 + $0xd0] sm:$0xf]  ;;  %v13243_v15 = vld [vmem:[%s12540_s22 + $0xd4] sm:$0x1] }
  0x77   : > { %v17163_v30 = vshrl.u32 %v12934_v9, 16  ;;  %v940_v13 = vrot.slane %v938_v52, 5  ;;  %v926_v21 = vsel %vm12978_vm5, %v924_v46, %v925_v62  ;;  %v931_v54 = vrot.slane %v929_v44, 4  ;;  %v17164_v52 = vld [vmem:[#allocation35_spill] sm:$0xff] }
  0x78   : > { %1239 = vrot.lane.b32.xlu0 %v13178_v38, %s12459_s27  ;;  %v13213_v4 = vsel %vm12978_vm5, %v826_v1, %v827_v41  ;;  %v944_v53 = vshll.u32 %v12937_v63, 16  ;;  %v932_v25 = vrot.slane %v17164_v52, 5  ;;  %v950_v35 = vrot.slane %v948_v3, 4  ;;  %v381_v3 = vld [vmem:[%s12540_s22 + $0xcc] sm:$0xf] }
  0x79   : > { %v937_v43 = vrot.slane %v17163_v30, 4  ;;  %v10483_v27 = vcombine.low %v13197_v16, %v13213_v4  ;;  %v13222_v50 = vcombine.low %v916_v39, %v919_v12  ;;  %v954_v8 = vshll.u32 %v380_v20, 16  ;;  %v11727_v16 = vld [vmem:[%s17065_s1 + $0x110] sm:$0xff]  }
  0x7a   : > { %1241 = vrot.lane.b32.xlu1 %v13191_v32, %s12459_s27  ;;  %v946_v61 = vrot.slane %v944_v53, 5  ;;  %v13226_v23 = vcombine.low %v923_v59, %v926_v21  ;;  %v930_v24 = vsel %vm12978_vm5, %v10448_v5, %v929_v44  ;;  %v933_v51 = vsel %vm12978_vm5, %v931_v54, %v932_v25 }
  0x7b   : > { %v941_v56 = vor.u32 %v940_v13, %v937_v43  ;;  %v956_v17 = vrot.slane %v954_v8, 5  ;;  %v969_v42 = vshrl.u32 %v381_v3, 16  ;;  %v972_v62 = vshll.u32 %v381_v3, 16 }
  0x7c   : > { %1243 = vrot.lane.b32.xlu0 %v13222_v50, %s12459_s27  ;;  %v951_v19 = vor.u32 %v950_v35, %v946_v61  ;;  %v978_v60 = vshll.u32 %v382_v11, 16  ;;  %v982_v39 = vshrl.u32 %v382_v11, 16  ;;  %v13238_v1 = vcombine.low %v930_v24, %v933_v51  ;;  %v11710_v51 = vld [vmem:[%s17065_s1 + $0xc8] sm:$0xff]  }
  0x7d   : > { %v942_v40 = vrot.slane %v941_v56, 4  ;;  %v971_v44 = vrot.slane %v969_v42, 4  ;;  %v974_v46 = vrot.slane %v972_v62, 5  ;;  %v988_v13 = vshll.u32 %v13243_v15, 16 }
  0x7e   : > { %1245 = vrot.lane.b32.xlu1 %v13226_v23, %s12459_s27  ;;  %v952_v41 = vrot.slane %v951_v19, 4  ;;  %v980_v12 = vrot.slane %v978_v60, 5  ;;  %v984_v5 = vrot.slane %v982_v39, 4  ;;  %v963_v54 = vrot.slane %v12937_v63, 5 }
  0x7f   : > { %v947_v29 = vsel %vm12596_vm2, %v942_v40, %v946_v61  ;;  %v975_v43 = vor.u32 %v974_v46, %v971_v44  ;;  %v990_v52 = vrot.slane %v988_v13, 5  ;;  %v10449_v56 = vrot.slane %v12934_v9, 9  ;;  %v11714_v46 = vld [vmem:[%s17065_s1 + $0xd8] sm:$0xff]  }
  0x80   : > { %v957_v59 = vsel %vm12596_vm2, %v952_v41, %v956_v17  ;;  %v985_v21 = vor.u32 %v984_v5, %v980_v12  ;;  %v965_v35 = vrot.slane %v963_v54, 4  ;;  %v966_v61 = vrot.slane %v380_v20, 5  ;;  %v11709_v20 = vld [vmem:[%s17065_s1 + $0x80] sm:$0xff]   ;;  %v11712_v41 = vld [vmem:[%s17065_s1 + $0xd0] sm:$0xff]   ;;  %v11715_v13 = vld [vmem:[%s17065_s1 + $0x98] sm:$0xff]  }
  0x81   : > { %v13245_v30 = vcombine.low %v947_v29, %v957_v59  ;;  %v976_v53 = vrot.slane %v975_v43, 4  ;;  %v964_v63 = vsel %vm12978_vm5, %v10449_v56, %v963_v54  ;;  %v11711_v29 = vld [vmem:[%s17065_s1 + $0x88] sm:$0xff]   ;;  %v17166_v56 = vld [vmem:[#allocation6_spill] sm:$0xff]  ;;  %vm6882_vm3 = vsmask.f32 5392 }
  0x82   : > { %1247 = vrot.lane.b32.xlu1 %v13238_v1, %s12459_s27  ;;  %v986_v25 = vrot.slane %v985_v21, 4  ;;  %v967_v24 = vsel %vm12978_vm5, %v965_v35, %v966_v61  ;;  %v11716_v21 = vld [vmem:[%s17065_s1 + $0xe0] sm:$0xff]  }
  0x83   : > { %1257 = vrot.lane.b32.xlu0 %v13245_v30, %s12459_s27  ;;  %v981_v8 = vsel %vm12596_vm2, %v976_v53, %v980_v12  ;;  %v13262_v17 = vcombine.low %v964_v63, %v967_v24  ;;  %v17165_v12 = vld [vmem:[#allocation5_spill] sm:$0xff]  ;;  %v11720_v24 = vld [vmem:[%s17065_s1 + $0xf0] sm:$0xff]  }
  0x84   : > { %v991_v40 = vsel %vm12596_vm2, %v986_v25, %v990_v52  ;;  %v11717_v52 = vld [vmem:[%s17065_s1 + $0xa0] sm:$0xff]   ;;  %v11718_v25 = vld [vmem:[%s17065_s1 + $0xe8] sm:$0xff]  }
  0x85   : > { %v10503_v19 = vcombine.low %v981_v8, %v991_v40  ;;  %v11719_v63 = vld [vmem:[%s17065_s1 + $0xa8] sm:$0xff]  }
  0x86   : > { %1249 = vrot.lane.b32.xlu1 %v13262_v17, %s12459_s27 }
  0x87   : > { %1259 = vrot.lane.b32.xlu0 %v10503_v19, %s12459_s27 }
  0x88   : > { %v1186_v3 = vpop.permute.xlu0 %1185 }
  0x89   : > { %v1339_v9 = vsel %vm1264_vm6, %v13038_v18, %v1186_v3 }
  0x8a   : > { %1842 = vmatprep.mubr.bf16.mxu1 %v1339_v9  ;;  %v11721_v9 = vld [vmem:[%s17065_s1 + $0xb0] sm:$0xff]  }
  0x8d   : > { %v1188_v11 = vpop.permute.xlu1 %1187 }
  0x8e   : > { %v1343_v62 = vsel %vm1264_vm6, %v13044_v7, %v1188_v11  ;;  %v17167_v11 = vld [vmem:[#allocation9_spill] sm:$0xff] }
  0x93   : > { %v1103_v42 = vpop.permute.xlu0 %1102 }
  0x94   : > { %v13279_v60 = vsel %vm1264_vm6, %v13099_v58, %v1103_v42  ;;  %v11713_v58 = vld [vmem:[%s17065_s1 + $0x90] sm:$0xff]  }
  0x95   : > { %1843 = vmatmul.mubr.bf16.vlgmr.msra.gmra.mrb[0].mxu1 %v13279_v60  ;;  %v1105_v39 = vpop.permute.xlu1 %1104 }
  0x96   : > { %11271 = vmatpush3.bf16.msra.mxu1 %v11709_v20  ;;  %1850 = vmatprep.mubr.bf16.mxu1 %v1343_v62  ;;  %v13296_v59 = vsel %vm1264_vm6, %v17165_v12, %v1105_v39  ;;  %v11722_v20 = vld [vmem:[%s17065_s1 + $0xf8] sm:$0xff]  }
  0x97   : > { %v1190_v44 = vpop.permute.xlu0 %1189  ;;  %11272 = vmatprep.subr.bf16.mxu1 %v11710_v51 }
  0x98   : > { %v1347_v5 = vsel %vm1264_vm6, %v13050_v26, %v1190_v44 }
  0x9a   : > { %11273 = vmatpush3.bf16.msra.mxu1 %v11711_v29  ;;  %v1107_v54 = vpop.permute.xlu1 %1106 }
  0x9b   : > { %v1192_v43 = vpop.permute.xlu0 %1191  ;;  %11274 = vmatprep.subr.bf16.mxu1 %v11712_v41  ;;  %v13315_v35 = vsel %vm1264_vm6, %v17166_v56, %v1107_v54  ;;  %v11723_v41 = vld [vmem:[%s17065_s1 + $0xb8] sm:$0xff]   ;;  %v17169_v54 = vld [vmem:[#allocation13_spill] sm:$0xff] }
  0x9c   : > { %v1351_v8 = vsel %vm1264_vm6, %v13065_v6, %v1192_v43 }
  0x9d   : > { %1851 = vmatmul.mubr.bf16.gmra.mrb[4].mxu1 %v13296_v59 }
  0x9e   : > { %1858 = vmatprep.mubr.bf16.mxu1 %v1347_v5  ;;  %11275 = vmatpush3.bf16.msra.mxu1 %v11713_v58  ;;  %v17168_v58 = vld [vmem:[#allocation11_spill] sm:$0xff] }
  0x9f   : > { %v1194_v53 = vpop.permute.xlu0 %1193  ;;  %11276 = vmatprep.subr.bf16.mxu1 %v11714_v46  ;;  %v1109_v61 = vpop.permute.xlu1 %1108 }
  0xa0   : > { %v13334_v51 = vsel %vm1264_vm6, %v17167_v11, %v1109_v61  ;;  %v1355_v62 = vsel %vm1264_vm6, %v13087_v47, %v1194_v53 }
  0xa2   : > { %11277 = vmatpush3.bf16.msra.mxu1 %v11715_v13 }
  0xa3   : > { %v1196_v40 = vpop.permute.xlu0 %1195  ;;  %11278 = vmatprep.subr.bf16.mxu1 %v11716_v21 }
  0xa4   : > { %v1111_v19 = vpop.permute.xlu1 %1110  ;;  %v1359_v5 = vsel %vm1264_vm6, %v13138_v55, %v1196_v40  ;;  %v17170_v40 = vld [vmem:[#allocation15_spill] sm:$0xff] }
  0xa5   : > { %1859 = vmatmul.mubr.bf16.gmra.mrb[8].mxu1 %v13315_v35  ;;  %v13344_v46 = vsel %vm1264_vm6, %v17168_v58, %v1111_v19  ;;  %v17172_v58 = vld [vmem:[#allocation19_spill] sm:$0xff] }
  0xa6   : > { %1866 = vmatprep.mubr.bf16.mxu1 %v1351_v8  ;;  %11279 = vmatpush3.bf16.msra.mxu1 %v11717_v52 }
  0xa7   : > { %v1198_v3 = vpop.permute.xlu0 %1197  ;;  %11280 = vmatprep.subr.bf16.mxu1 %v11718_v25 }
  0xa8   : > { %v1113_v42 = vpop.permute.xlu1 %1112  ;;  %v1363_v25 = vsel %vm1264_vm6, %v13143_v14, %v1198_v3  ;;  %v17171_v3 = vld [vmem:[#allocation17_spill] sm:$0xff] }
  0xa9   : > { %v13351_v53 = vsel %vm1264_vm6, %v17169_v54, %v1113_v42 }
  0xaa   : > { %11281 = vmatpush3.bf16.msra.mxu1 %v11719_v63 }
  0xab   : > { %v1200_v29 = vpop.permute.xlu0 %1199  ;;  %11282 = vmatprep.subr.bf16.mxu1 %v11720_v24 }
  0xac   : > { %v1367_v24 = vsel %vm1264_vm6, %v13148_v10, %v1200_v29 }
  0xad   : > { %1867 = vmatmul.mubr.bf16.gmra.mrb[12].mxu1 %v13334_v51  ;;  %v1115_v39 = vpop.permute.xlu1 %1114 }
  0xae   : > { %1874 = vmatprep.mubr.bf16.mxu1 %v1355_v62  ;;  %11283 = vmatpush3.bf16.msra.mxu1 %v11721_v9  ;;  %v13358_v63 = vsel %vm1264_vm6, %v17170_v40, %v1115_v39  ;;  %v11726_v40 = vld [vmem:[%s17065_s1 + $0x108] sm:$0xff]  }
  0xaf   : > { %v1202_v44 = vpop.permute.xlu0 %1201  ;;  %11284 = vmatprep.subr.bf16.mxu1 %v11722_v20 }
  0xb0   : > { %v1371_v42 = vsel %vm1264_vm6, %v13173_v49, %v1202_v44 }
  0xb1   : > { %v1117_v12 = vpop.permute.xlu1 %1116 }
  0xb2   : > { %11285 = vmatpush3.bf16.msra.mxu1 %v11723_v41  ;;  %v13365_v11 = vsel %vm1264_vm6, %v17171_v3, %v1117_v12 }
  0xb3   : > { %v1204_v43 = vpop.permute.xlu0 %1203 }
  0xb4   : > { %v1375_v12 = vsel %vm1264_vm6, %v13178_v38, %v1204_v43 }
  0xb5   : > { %1875 = vmatmul.mubr.bf16.gmra.mrb[16].mxu1 %v13344_v46 }
  0xb6   : > { %1882 = vmatprep.mubr.bf16.mxu1 %v1359_v5  ;;  %v1119_v13 = vpop.permute.xlu1 %1118 }
  0xb7   : > { %v1206_v21 = vpop.permute.xlu0 %1205  ;;  %v13378_v5 = vsel %vm1264_vm6, %v17172_v58, %v1119_v13 }
  0xba   : > { %v1121_v52 = vpop.permute.xlu1 %1120 }
  0xbb   : > { %v1208_v56 = vpop.permute.xlu0 %1207 }
  0xbd   : > { %1883 = vmatmul.mubr.bf16.gmra.mrb[20].mxu1 %v13351_v53 }
  0xbe   : > { %1890 = vmatprep.mubr.bf16.mxu1 %v1363_v25 }
  0xbf   : > { %v1123_v61 = vpop.permute.xlu1 %1122  ;;  %v1210_v8 = vpop.permute.xlu0 %1209 }
  0xc3   : > { %v1125_v19 = vpop.permute.xlu1 %1124  ;;  %v1212_v9 = vpop.permute.xlu0 %1211 }
  0xc5   : > { %1891 = vmatmul.mubr.bf16.gmra.mrb[24].mxu1 %v13358_v63 }
  0xc6   : > { %1898 = vmatprep.mubr.bf16.mxu1 %v1367_v24  ;;  %v17173_v24 = vld [vmem:[#allocation20_spill] sm:$0xff] }
  0xc7   : > { %v13396_v43 = vsel %vm1264_vm6, %v17173_v24, %v1121_v52  ;;  %v11735_v24 = vld [vmem:[%s17067_s3 + $0x14] ss:$8 sps:$4 sm:$0xff]  }
  0xc8   : > { %v1127_v20 = vpop.permute.xlu1 %1126 }
  0xcb   : > { %v13369_v62 = vpop.permute.xlu0 %1219 }
  0xcc   : > { %v1129_v41 = vpop.permute.xlu1 %1128 }
  0xcd   : > { %1899 = vmatmul.mubr.bf16.gmra.mrb[28].mxu1 %v13365_v11 }
  0xce   : > { %1906 = vmatprep.mubr.bf16.mxu1 %v1371_v42  ;;  %v1379_v42 = vsel %vm1264_vm6, %v13191_v32, %v1206_v21  ;;  %v17174_v21 = vld [vmem:[#allocation23_spill] sm:$0xff] }
  0xcf   : > { %v13372_v29 = vpop.permute.xlu0 %1223  ;;  %v13420_v52 = vsel %vm1264_vm6, %v17174_v21, %v1123_v61  ;;  %v1387_v61 = vsel %vm1264_vm6, %v13226_v23, %v1210_v8  ;;  %v1391_v8 = vsel %vm1264_vm6, %v13238_v1, %v1212_v9  ;;  %v17184_v9 = vld [vmem:[#allocation21_spill] sm:$0xff] }
  0xd0   : > { %v13374_v39 = vpop.permute.xlu1 %1221 }
  0xd3   : > { %v13384_v44 = vpop.permute.xlu0 %1227 }
  0xd4   : > { %v13382_v54 = vpop.permute.xlu1 %1225 }
  0xd5   : > { %1907 = vmatmul.mubr.bf16.gmra.mrb[32].mxu1 %v13378_v5 }
  0xd6   : > { %1914 = vmatprep.mubr.bf16.mxu1 %v1375_v12 }
  0xd8   : > { %v1182_v25 = vpop.permute.xlu1 %1181 }
  0xd9   : > { %v1331_v13 = vsel %vm1264_vm6, %v10483_v27, %v1182_v25  ;;  %v1000_v25 = vrot.slane %v13243_v15, 5  ;;  %v17177_v15 = vld [vmem:[#allocation33_spill] sm:$0xff] }
  0xda   : > { %v1099_v3 = vpop.permute.xlu0 %1098  ;;  %1826 = vmatprep.mubr.bf16.mxu0 %v1331_v13 }
  0xdb   : > { %v1267_v58 = vsel %vm1264_vm6, %v10451_v45, %v1099_v3 }
  0xdc   : > { %1827 = vmatmul.mubr.bf16.vlgmr.msra.gmra.mrb[0].mxu0 %v1267_v58  ;;  %v13404_v12 = vpop.permute.xlu1 %1229  ;;  %v11736_v58 = vld [vmem:[%s17067_s3 + $0x20] ss:$8 sps:$4 sm:$0xff]  }
  0xdd   : > { %1915 = vmatmul.mubr.bf16.gmra.mrb[36].mxu1 %v13396_v43  ;;  %11491 = vmatpush3.bf16.msra.mxu0 %v13185_v28  ;;  %v1383_v28 = vsel %vm1264_vm6, %v13222_v50, %v1208_v56  ;;  %v17176_v56 = vld [vmem:[#allocation31_spill] sm:$0xff] }
  0xde   : > { %1922 = vmatprep.mubr.bf16.mxu1 %v1379_v42  ;;  %11492 = vmatprep.subr.bf16.mxu0 %v11726_v40  ;;  %v1184_v4 = vpop.permute.xlu0 %1183 }
  0xdf   : > { %v1335_v27 = vsel %vm1264_vm6, %v13015_v33, %v1184_v4  ;;  %v17175_v33 = vld [vmem:[#allocation27_spill] sm:$0xff]  ;;  %v17188_v4 = vld [vmem:[#allocation34_spill] sm:$0xff] }
  0xe0   : > { %v1101_v31 = vpop.permute.xlu1 %1100  ;;  %1834 = vmatprep.mubr.bf16.mxu0 %v1335_v27 }
  0xe1   : > { %11493 = vmatpush3.bf16.msra.mxu0 %v11726_v40  ;;  %v1271_v45 = vsel %vm1264_vm6, %v13069_v22, %v1101_v31  ;;  %v13429_v22 = vsel %vm1264_vm6, %v17175_v33, %v1125_v19  ;;  %v13444_v19 = vld [vmem:[%s12540_s22 + $0xd0] sm:$0xf] }
  0xe2   : > { %11494 = vmatprep.subr.bf16.mxu0 %v11727_v16  ;;  %v997_v40 = vrot.slane %v13444_v19, 5  ;;  %v11739_v31 = vld [vmem:[%s17067_s3 + $0x30] ss:$8 sps:$4 sm:$0xff]  }
  0xe4   : > { %1835 = vmatmul.mubr.bf16.gmra.mrb[4].mxu0 %v1271_v45  ;;  %v999_v13 = vrot.slane %v997_v40, 4 }
  0xe5   : > { %1923 = vmatmul.mubr.bf16.gmra.mrb[40].mxu1 %v13420_v52  ;;  %11495 = vmatpush3.bf16.msra.mxu0 %v11727_v16 }
  0xe6   : > { %1930 = vmatprep.mubr.bf16.mxu1 %v1383_v28  ;;  %11496 = vmatprep.subr.bf16.mxu0 %v11728_v57 }
  0xe7   : > { %11498 = vmatprep.mubr.msk.bf16.mxu0 %vm1264_vm6, %v13038_v18  ;;  %v13440_v18 = vsel %vm1264_vm6, %v17176_v56, %v1127_v20  ;;  %v13460_v20 = vsel %vm1264_vm6, %v17177_v15, %v1129_v41  ;;  %v17185_v41 = vld [vmem:[#allocation24_spill] sm:$0xff] }
  0xe9   : > { %11497 = vmatpush3.bf16.msra.mxu0 %v11728_v57  ;;  %v11741_v57 = vld [vmem:[%s17067_s3 + $0x34] ss:$8 sps:$4 sm:$0xff]  }
  0xec   : > { %11499 = vmatmul.mubr.msk.bf16.vlgmr.msra.gmra.mrb[8].mxu0 %vm1264_vm6, %v13044_v7  ;;  %v13452_v7 = vld [vmem:[%s12540_s22 + $0xcc] sm:$0xf] }
  0xed   : > { %1931 = vmatmul.mubr.bf16.gmra.mrb[44].mxu1 %v13429_v22  ;;  %11502 = vmatprep.mubr.msk.bf16.mxu0 %vm1264_vm6, %v13050_v26  ;;  %v10450_v26 = vrot.slane %v13452_v7, 9 }
  0xee   : > { %1938 = vmatprep.mubr.bf16.mxu1 %v1387_v61 }
  0xf4   : > { %11503 = vmatmul.mubr.msk.bf16.gmra.mrb[12].mxu0 %vm1264_vm6, %v13065_v6  ;;  %v1395_v6 = vsel %vm1264_vm6, %v13118_v36, %v13369_v62  ;;  %v17179_v36 = vld [vmem:[#allocation10_spill] sm:$0xff] }
  0xf5   : > { %1939 = vmatmul.mubr.bf16.gmra.mrb[48].mxu1 %v13440_v18  ;;  %11506 = vmatprep.mubr.msk.bf16.mxu0 %vm1264_vm6, %v13087_v47  ;;  %v17178_v47 = vld [vmem:[#allocation8_spill] sm:$0xff] }
  0xf6   : > { %1946 = vmatprep.mubr.bf16.mxu1 %v1391_v8 }
  0xfc   : > { %11507 = vmatmul.mubr.msk.bf16.gmra.mrb[16].mxu0 %vm1264_vm6, %v13138_v55  ;;  %v1399_v55 = vsel %vm1264_vm6, %v17178_v47, %v13374_v39  ;;  %v11732_v39 = vld [vmem:[%s17067_s3 + $0x4] ss:$8 sps:$4 sm:$0xff]  }
  0xfd   : > { %1947 = vmatmul.mubr.bf16.gmra.mrb[52].mxu1 %v13460_v20  ;;  %11510 = vmatprep.mubr.msk.bf16.mxu0 %vm1264_vm6, %v13143_v14  ;;  %v1403_v14 = vsel %vm1264_vm6, %v17179_v36, %v13372_v29 }
  0xfe   : > { %1987 = vmatprep.mubr.bf16.mxu1 %v13279_v60  ;;  %5353 = vmatprep.subr.bf16.mxu1 %v11732_v39 }
 0x104   : > { %11511 = vmatmul.mubr.msk.bf16.gmra.mrb[20].mxu0 %vm1264_vm6, %v13148_v10  ;;  %v17180_v10 = vld [vmem:[#allocation12_spill] sm:$0xff] }
 0x105   : > { %1988 = vmatmul.mubr.bf16.vlgmr.msra.gmra.mrb[56].mxu1 %v1395_v6  ;;  %11514 = vmatprep.mubr.msk.bf16.mxu0 %vm1264_vm6, %v13173_v49  ;;  %v1407_v49 = vsel %vm1264_vm6, %v17180_v10, %v13382_v54  ;;  %v17186_v54 = vld [vmem:[#allocation28_spill] sm:$0xff] }
 0x106   : > { %1995 = vmatprep.mubr.bf16.mxu1 %v13296_v59  ;;  %v1232_v59 = vpop.permute.xlu0 %1231  ;;  %v11744_v10 = vld [vmem:[%s17067_s3 + $0x44] ss:$8 sps:$4 sm:$0xff]  }
 0x10c   : > { %11515 = vmatmul.mubr.msk.bf16.gmra.mrb[24].mxu0 %vm1264_vm6, %v13178_v38  ;;  %v998_v38 = vsel %vm12978_vm5, %v10450_v26, %v997_v40 }
 0x10d   : > { %1996 = vmatmul.mubr.bf16.gmra.mrb[60].mxu1 %v1399_v55  ;;  %11518 = vmatprep.mubr.msk.bf16.mxu0 %vm1264_vm6, %v13191_v32  ;;  %v1001_v32 = vsel %vm12978_vm5, %v999_v13, %v1000_v25  ;;  %v10502_v13 = vcombine.low %v13452_v7, %v13444_v19  ;;  %v11742_v19 = vld [vmem:[%s17067_s3 + $0x40] ss:$8 sps:$4 sm:$0xff]  }
 0x10e   : > { %2003 = vmatprep.mubr.bf16.mxu1 %v13315_v35  ;;  %v17183_v35 = vld [vmem:[#allocation18_spill] sm:$0xff] }
 0x114   : > { %11519 = vmatmul.mubr.msk.bf16.gmra.mrb[28].mxu0 %vm1264_vm6, %v13222_v50  ;;  %v10504_v50 = vcombine.low %v998_v38, %v1001_v32 }
 0x115   : > { %2004 = vmatmul.mubr.bf16.gmra.mrb[64].mxu1 %v1403_v14  ;;  %11522 = vmatprep.mubr.msk.bf16.mxu0 %vm1264_vm6, %v13226_v23  ;;  %v17181_v23 = vld [vmem:[#allocation14_spill] sm:$0xff] }
 0x116   : > { %2011 = vmatprep.mubr.bf16.mxu1 %v13334_v51  ;;  %v1411_v60 = vsel %vm1264_vm6, %v17181_v23, %v13384_v44  ;;  %v1419_v51 = vsel %vm1264_vm6, %v17183_v35, %v1232_v59  ;;  %v11733_v44 = vld [vmem:[%s17067_s3 + $0x10] ss:$8 sps:$4 sm:$0xff]  }
 0x117   : > { %v11745_v59 = vld [vmem:[%s17067_s3 + $0x50] ss:$8 sps:$4 sm:$0xff]  }
 0x11c   : > { %11523 = vmatmul.mubr.msk.bf16.gmra.mrb[32].mxu0 %vm1264_vm6, %v13238_v1  ;;  %v17182_v1 = vld [vmem:[#allocation16_spill] sm:$0xff] }
 0x11d   : > { %2012 = vmatmul.mubr.bf16.gmra.mrb[68].mxu1 %v1407_v49  ;;  %11526 = vmatprep.mubr.msk.bf16.mxu0 %vm1264_vm6, %v13262_v17  ;;  %v1415_v17 = vsel %vm1264_vm6, %v17182_v1, %v13404_v12  ;;  %v11738_v12 = vld [vmem:[%s17067_s3 + $0x24] ss:$8 sps:$4 sm:$0xff]  }
 0x11e   : > { %2019 = vmatprep.mubr.bf16.mxu1 %v13344_v46  ;;  %v1234_v46 = vpop.permute.xlu1 %1233 }
 0x11f   : > { %v1423_v62 = vsel %vm1264_vm6, %v17184_v9, %v1234_v46 }
 0x124   : > { %11527 = vmatmul.mubr.msk.bf16.gmra.mrb[36].mxu0 %vm1264_vm6, %v10504_v50 }
 0x125   : > { %2020 = vmatmul.mubr.bf16.gmra.mrb[72].mxu1 %v1411_v60 }
 0x126   : > { %2027 = vmatprep.mubr.bf16.mxu1 %v13351_v53  ;;  %v1236_v53 = vpop.permute.xlu0 %1235 }
 0x127   : > { %v1427_v29 = vsel %vm1264_vm6, %v17185_v41, %v1236_v53 }
 0x12a   : > { %v1240_v3 = vpop.permute.xlu0 %1239 }
 0x12d   : > { %2028 = vmatmul.mubr.bf16.gmra.mrb[76].mxu1 %v1415_v17  ;;  %v11747_v17 = vld [vmem:[%s17067_s3 + $0x54] ss:$8 sps:$4 sm:$0xff]  }
 0x12e   : > { %2035 = vmatprep.mubr.bf16.mxu1 %v13358_v63  ;;  %v11730_v63 = vld [vmem:[%s17067_s3] ss:$8 sps:$4 sm:$0xff]   ;;  %v1244_v45 = vpop.permute.xlu0 %1243 }
 0x12f   : > { %5354 = vmatpush1.bf16.msra.mxu1 %v11730_v63  ;;  %v1443_v21 = vsel %vm1264_vm6, %v12971_v2, %v1244_v45  ;;  %v11753_v45 = vld [vmem:[%s17067_s3 + $0x74] ss:$8 sps:$4 sm:$0xff]  }
 0x130   : > { %5355 = vmatprep.subr.bf16.mxu1 %v11735_v24 }
 0x132   : > { %v1258_v33 = vpop.permute.xlu0 %1257 }
 0x133   : > { %5356 = vmatpush1.bf16.msra.mxu1 %v11733_v44 }
 0x134   : > { %5357 = vmatprep.subr.bf16.mxu1 %v11738_v12 }
 0x135   : > { %2036 = vmatmul.mubr.bf16.gmra.mrb[80].mxu1 %v1419_v51 }
 0x136   : > { %2043 = vmatprep.mubr.bf16.mxu1 %v13365_v11  ;;  %v1238_v11 = vpop.permute.xlu1 %1237 }
 0x137   : > { %5358 = vmatpush1.bf16.msra.mxu1 %v11736_v58  ;;  %v11748_v58 = vld [vmem:[%s17067_s3 + $0x60] ss:$8 sps:$4 sm:$0xff]  }
 0x138   : > { %5359 = vmatprep.subr.bf16.mxu1 %v11741_v57 }
 0x13a   : > { %v1242_v16 = vpop.permute.xlu1 %1241 }
 0x13b   : > { %v1439_v27 = vsel %vm1264_vm6, %v17188_v4, %v1242_v16  ;;  %5360 = vmatpush1.bf16.msra.mxu1 %v11739_v31 }
 0x13c   : > { %5361 = vmatprep.subr.bf16.mxu1 %v11744_v10 }
 0x13d   : > { %2044 = vmatmul.mubr.bf16.gmra.mrb[84].mxu1 %v1423_v62 }
 0x13e   : > { %2051 = vmatprep.mubr.bf16.mxu1 %v13378_v5  ;;  %v1431_v5 = vsel %vm1264_vm6, %v17186_v54, %v1238_v11 }
 0x13f   : > { %5362 = vmatpush1.bf16.msra.mxu1 %v11742_v19 }
 0x140   : > { %5363 = vmatprep.subr.bf16.mxu1 %v11747_v17 }
 0x143   : > { %5364 = vmatpush1.bf16.msra.mxu1 %v11745_v59 }
 0x145   : > { %2052 = vmatmul.mubr.bf16.gmra.mrb[88].mxu1 %v1427_v29 }
 0x146   : > { %2059 = vmatprep.mubr.bf16.mxu1 %v13396_v43  ;;  %v17187_v43 = vld [vmem:[#allocation32_spill] sm:$0xff] }
 0x147   : > { %v1435_v42 = vsel %vm1264_vm6, %v17187_v43, %v1240_v3 }
 0x14d   : > { %2060 = vmatmul.mubr.bf16.gmra.mrb[92].mxu1 %v1431_v5 }
 0x14e   : > { %2067 = vmatprep.mubr.bf16.mxu1 %v13420_v52  ;;  %v1246_v52 = vpop.permute.xlu1 %1245 }
 0x14f   : > { %v1447_v25 = vsel %vm1264_vm6, %v12995_v0, %v1246_v52 }
 0x152   : > { %v1248_v2 = vpop.permute.xlu1 %1247 }
 0x153   : > { %v1451_v0 = vsel %vm1264_vm6, %v13023_v48, %v1248_v2 }
 0x155   : > { %2068 = vmatmul.mubr.bf16.gmra.mrb[96].mxu1 %v1435_v42  ;;  %v11750_v42 = vld [vmem:[%s17067_s3 + $0x64] ss:$8 sps:$4 sm:$0xff]  }
 0x156   : > { %2075 = vmatprep.mubr.bf16.mxu1 %v13429_v22  ;;  %v1250_v7 = vpop.permute.xlu1 %1249  ;;  %5365 = vmatprep.subr.bf16.mxu1 %v11750_v42 }
 0x157   : > { %v1455_v23 = vsel %vm1264_vm6, %v13245_v30, %v1250_v7  ;;  %5366 = vmatpush1.bf16.msra.mxu1 %v11748_v58 }
 0x158   : > { %5367 = vmatprep.subr.bf16.mxu1 %v11753_v45 }
 0x15d   : > { %2076 = vmatmul.mubr.bf16.gmra.mrb[100].mxu1 %v1439_v27 }
 0x15e   : > { %2083 = vmatprep.mubr.bf16.mxu1 %v13440_v18  ;;  %v17189_v18 = vld [vmem:[#allocation36_spill] sm:$0xff] }
 0x15f   : > { %v1459_v8 = vsel %vm1264_vm6, %v17189_v18, %v1258_v33 }
 0x165   : > { %2084 = vmatmul.mubr.bf16.gmra.mrb[104].mxu1 %v1443_v21  ;;  %v11751_v21 = vld [vmem:[%s17067_s3 + $0x70] ss:$8 sps:$4 sm:$0xff]  }
 0x166   : > { %2091 = vmatprep.mubr.bf16.mxu1 %v13460_v20  ;;  %v1260_v20 = vpop.permute.xlu0 %1259  ;;  %5368 = vmatpush1.bf16.msra.mxu1 %v11751_v21 }
 0x167   : > { %v1463_v14 = vsel %vm1264_vm6, %v10502_v13, %v1260_v20 }
 0x168   : > { %v11186_v28 = vpop.f32.mrb[0].mxu1 }
 0x169   : > { %v11187_v22 = vpop.f32.mrb[1].mxu1 }
 0x16a   : > { %v13558_v61 = vadd.f32 %v11187_v22, %v11186_v28  ;;  %v11189_v56 = vpop.f32.mrb[2].mxu1  ;;  %v11756_v28 = vld [vmem:[%s17067_s3 + $0x84] ss:$8 sps:$4 sm:$0xff]   ;;  %v11754_v22 = vld [vmem:[%s17067_s3 + $0x80] ss:$8 sps:$4 sm:$0xff]  }
 0x16b   : > { %v11190_v40 = vpop.f32.mrb[3].mxu1  ;;  %5369 = vmatprep.subr.bf16.mxu1 %v11756_v28 }
 0x16c   : > { %v13564_v26 = vadd.f32 %v11190_v40, %v11189_v56  ;;  %5370 = vmatpush1.bf16.msra.mxu1 %v11754_v22 }
 0x16d   : > { %2092 = vmatmul.mubr.bf16.gmra.mrb[108].mxu1 %v1447_v25 }
 0x16e   : > { %2099 = vmatprep.mubr.bf16.mxu1 %v1459_v8 }
 0x170   : > { %v11192_v15 = vpop.f32.mrb[4].mxu1 }
 0x171   : > { %v11193_v6 = vpop.f32.mrb[5].mxu1 }
 0x172   : > { %v13568_v47 = vadd.f32 %v11193_v6, %v11192_v15  ;;  %v11195_v55 = vpop.f32.mrb[6].mxu1  ;;  %v11759_v6 = vld [vmem:[%s17067_s3 + $0x94] ss:$8 sps:$4 sm:$0xff]  }
 0x173   : > { %v11196_v36 = vpop.f32.mrb[7].mxu1  ;;  %5371 = vmatprep.subr.bf16.mxu1 %v11759_v6 }
 0x174   : > { %v13576_v49 = vadd.f32 %v11196_v36, %v11195_v55 }
 0x175   : > { %2100 = vmatmul.mubr.bf16.gmra.mrb[112].mxu1 %v1451_v0  ;;  %v11757_v0 = vld [vmem:[%s17067_s3 + $0x90] ss:$8 sps:$4 sm:$0xff]  }
 0x176   : > { %2107 = vmatprep.mubr.bf16.mxu1 %v1463_v14  ;;  %5372 = vmatpush1.bf16.msra.mxu1 %v11757_v0  ;;  %v11768_v0 = vld [vmem:[%s17067_s3 + $0xc4] ss:$8 sps:$4 sm:$0xff]  }
 0x178   : > { %v11198_v38 = vpop.f32.mrb[8].mxu1 }
 0x179   : > { %v11199_v48 = vpop.f32.mrb[9].mxu1 }
 0x17a   : > { %v13581_v32 = vadd.f32 %v11199_v48, %v11198_v38  ;;  %v11201_v50 = vpop.f32.mrb[10].mxu1 }
 0x17b   : > { %v11202_v60 = vpop.f32.mrb[11].mxu1 }
 0x17c   : > { %v13585_v1 = vadd.f32 %v11202_v60, %v11201_v50 }
 0x17d   : > { %2108 = vmatmul.mubr.bf16.gmra.mrb[116].mxu1 %v1455_v23 }
 0x180   : > { %v11204_v35 = vpop.f32.mrb[12].mxu1 }
 0x181   : > { %v11205_v51 = vpop.f32.mrb[13].mxu1 }
 0x182   : > { %v13593_v46 = vadd.f32 %v11205_v51, %v11204_v35  ;;  %v11207_v9 = vpop.f32.mrb[14].mxu1 }
 0x183   : > { %v11208_v30 = vpop.f32.mrb[15].mxu1 }
 0x184   : > { %v13595_v62 = vadd.f32 %v11208_v30, %v11207_v9 }
 0x188   : > { %v11210_v53 = vpop.f32.mrb[16].mxu1 }
 0x189   : > { %v11211_v41 = vpop.f32.mrb[17].mxu1 }
 0x18a   : > { %v13597_v29 = vadd.f32 %v11211_v41, %v11210_v53  ;;  %v11213_v63 = vpop.f32.mrb[18].mxu1 }
 0x18b   : > { %v11214_v39 = vpop.f32.mrb[19].mxu1 }
 0x18c   : > { %v13599_v11 = vadd.f32 %v11214_v39, %v11213_v63  ;;  %v11762_v63 = vld [vmem:[%s17067_s3 + $0xa4] ss:$8 sps:$4 sm:$0xff]  }
 0x18d   : > { %5373 = vmatprep.subr.bf16.mxu1 %v11762_v63 }
 0x190   : > { %v11216_v54 = vpop.f32.mrb[20].mxu1 }
 0x191   : > { %v11217_v5 = vpop.f32.mrb[21].mxu1 }
 0x192   : > { %v13601_v44 = vadd.f32 %v11217_v5, %v11216_v54  ;;  %v11219_v24 = vpop.f32.mrb[22].mxu1 }
 0x193   : > { %v11220_v3 = vpop.f32.mrb[23].mxu1 }
 0x194   : > { %v13603_v43 = vadd.f32 %v11220_v3, %v11219_v24  ;;  %v11760_v24 = vld [vmem:[%s17067_s3 + $0xa0] ss:$8 sps:$4 sm:$0xff]  }
 0x195   : > { %5374 = vmatpush1.bf16.msra.mxu1 %v11760_v24 }
 0x198   : > { %v11222_v12 = vpop.f32.mrb[24].mxu1 }
 0x199   : > { %v11223_v16 = vpop.f32.mrb[25].mxu1 }
 0x19a   : > { %v13611_v4 = vadd.f32 %v11223_v16, %v11222_v12  ;;  %v11225_v27 = vpop.f32.mrb[26].mxu1 }
 0x19b   : > { %v11226_v31 = vpop.f32.mrb[27].mxu1 }
 0x19c   : > { %v13613_v57 = vadd.f32 %v11226_v31, %v11225_v27 }
 0x1a0   : > { %v11228_v52 = vpop.f32.mrb[28].mxu1 }
 0x1a1   : > { %v11229_v33 = vpop.f32.mrb[29].mxu1 }
 0x1a2   : > { %v13627_v56 = vadd.f32 %v11229_v33, %v11228_v52  ;;  %v11231_v25 = vpop.f32.mrb[30].mxu1 }
 0x1a3   : > { %v11232_v40 = vpop.f32.mrb[31].mxu1 }
 0x1a4   : > { %v13629_v18 = vadd.f32 %v11232_v40, %v11231_v25  ;;  %v11765_v25 = vld [vmem:[%s17067_s3 + $0xb4] ss:$8 sps:$4 sm:$0xff]   ;;  %v11763_v40 = vld [vmem:[%s17067_s3 + $0xb0] ss:$8 sps:$4 sm:$0xff]  }
 0x1a5   : > { %5375 = vmatprep.subr.bf16.mxu1 %v11765_v25  ;;  %v13720_v25 = vld [vmem:[%s17066_s2] ss:$0 sm:$0xff] }
 0x1a6   : > { %5376 = vmatpush1.bf16.msra.mxu1 %v11763_v40 }
 0x1a7   : > { %5377 = vmatprep.subr.bf16.mxu1 %v11768_v0 }
 0x1a8   : > { %v11234_v8 = vpop.f32.mrb[32].mxu1 }
 0x1a9   : > { %v11235_v2 = vpop.f32.mrb[33].mxu1 }
 0x1aa   : > { %v13631_v13 = vadd.f32 %v11235_v2, %v11234_v8  ;;  %v11237_v15 = vpop.f32.mrb[34].mxu1 }
 0x1ab   : > { %v11238_v20 = vpop.f32.mrb[35].mxu1 }
 0x1ac   : > { %v13636_v55 = vadd.f32 %v11238_v20, %v11237_v15 }
 0x1af   : > { %v11174_v36 = vpop.f32.mrb[0].mxu0 }
 0x1b0   : > { %v11240_v14 = vpop.f32.mrb[36].mxu1  ;;  %v11175_v10 = vpop.f32.mrb[1].mxu0 }
 0x1b1   : > { %v11241_v19 = vpop.f32.mrb[37].mxu1  ;;  %v13641_v7 = vadd.f32 %v11175_v10, %v11174_v36  ;;  %v11177_v38 = vpop.f32.mrb[2].mxu0 }
 0x1b2   : > { %v13643_v48 = vadd.f32 %v11241_v19, %v11240_v14  ;;  %v11243_v50 = vpop.f32.mrb[38].mxu1  ;;  %v11178_v23 = vpop.f32.mrb[3].mxu0  ;;  %v11766_v19 = vld [vmem:[%s17067_s3 + $0xc0] ss:$8 sps:$4 sm:$0xff]  }
 0x1b3   : > { %v11244_v60 = vpop.f32.mrb[39].mxu1  ;;  %v13645_v17 = vadd.f32 %v11178_v23, %v11177_v38  ;;  %5378 = vmatpush1.bf16.msra.mxu1 %v11766_v19 }
 0x1b4   : > { %v13647_v59 = vadd.f32 %v11244_v60, %v11243_v50 }
 0x1b7   : > { %v11180_v35 = vpop.f32.mrb[4].mxu0 }
 0x1b8   : > { %v11246_v51 = vpop.f32.mrb[40].mxu1  ;;  %v11181_v9 = vpop.f32.mrb[5].mxu0 }
 0x1b9   : > { %v11247_v30 = vpop.f32.mrb[41].mxu1  ;;  %v13649_v53 = vadd.f32 %v11181_v9, %v11180_v35  ;;  %v11183_v41 = vpop.f32.mrb[6].mxu0  ;;  %v12460_v9 = vmov 1983009808  }
 0x1ba   : > { %v13654_v39 = vadd.f32 %v11247_v30, %v11246_v51  ;;  %v11249_v54 = vpop.f32.mrb[42].mxu1  ;;  %v11184_v5 = vpop.f32.mrb[7].mxu0  ;;  %v2343_v30 = vunpack.c.l.s4 %v12460_v9  ;;  %v13742_v9 = vadd.f32 %v13564_v26, %v13720_v25 }
 0x1bb   : > { %v11250_v3 = vpop.f32.mrb[43].mxu1  ;;  %v13659_v42 = vadd.f32 %v11184_v5, %v11183_v41  ;;  %v17107_v41 = vlaneseq }
 0x1bc   : > { %v13661_v58 = vadd.f32 %v11250_v3, %v11249_v54 }
 0x1bf   : > { %v13663_v12 = vpop.f32.mrb[8].mxu0 }
 0x1c0   : > { %v11252_v16 = vpop.f32.mrb[44].mxu1  ;;  %v13665_v27 = vpop.f32.mrb[9].mxu0 }
 0x1c1   : > { %v11253_v31 = vpop.f32.mrb[45].mxu1  ;;  %v13667_v45 = vpop.f32.mrb[10].mxu0 }
 0x1c2   : > { %v13669_v21 = vadd.f32 %v11253_v31, %v11252_v16  ;;  %v11255_v52 = vpop.f32.mrb[46].mxu1  ;;  %v13671_v28 = vpop.f32.mrb[11].mxu0  ;;  %v2344_v31 = vunpack.c.0.s8 %v2343_v30 }
 0x1c3   : > { %v11256_v33 = vpop.f32.mrb[47].mxu1 }
 0x1c4   : > { %v13673_v22 = vadd.f32 %v11256_v33, %v11255_v52  ;;  %v13712_v52 = vshrl.u32 %v17107_v41, 7  ;;  %v11771_v33 = vld [vmem:[%s17067_s3 + $0xd4] ss:$8 sps:$4 sm:$0xff]  }
 0x1c5   : > { %5379 = vmatprep.subr.bf16.mxu1 %v11771_v33  ;;  %v13754_v33 = vadd.f32 %v13576_v49, %v13720_v25  ;;  %v13794_v49 = vadd.f32 %v13595_v62, %v13720_v25  ;;  %v13814_v62 = vadd.f32 %v13603_v43, %v13720_v25  ;;  %v13835_v43 = vadd.f32 %v13631_v13, %v13720_v25 }
 0x1c6   : > { %17193 = vst [vmem:[#allocation26_spill] sm:$0xff] %v13712_v52  ;;  %v13852_v13 = vadd.f32 %v13654_v39, %v13720_v25  ;;  %v13867_v39 = vadd.f32 %v13669_v21, %v13720_v25 }
 0x1c7   : > { %v13681_v8 = vpop.f32.mrb[12].mxu0  ;;  %17196 = vst [vmem:[#allocation5_spill] sm:$0xff] %v13814_v62  ;;  %17201 = vst [vmem:[#allocation15_spill] sm:$0xff] %v13835_v43 }
 0x1c8   : > { %v11258_v2 = vpop.f32.mrb[48].mxu1  ;;  %v13683_v15 = vpop.f32.mrb[13].mxu0  ;;  %17205 = vst [vmem:[#allocation23_spill] sm:$0xff] %v13852_v13  ;;  %17207 = vst [vmem:[#allocation31_spill] sm:$0xff] %v13867_v39 }
 0x1c9   : > { %v11259_v20 = vpop.f32.mrb[49].mxu1  ;;  %v13685_v6 = vpop.f32.mrb[14].mxu0 }
 0x1ca   : > { %v13690_v36 = vadd.f32 %v11259_v20, %v11258_v2  ;;  %v11261_v14 = vpop.f32.mrb[50].mxu1  ;;  %v13692_v10 = vpop.f32.mrb[15].mxu0  ;;  %v11769_v2 = vld [vmem:[%s17067_s3 + $0xd0] ss:$8 sps:$4 sm:$0xff]   ;;  %v1829_v20 = vadd.f32 %v13641_v7, %v13720_v25  ;;  %v1832_v7 = vadd.f32 %v13645_v17, %v13720_v25  ;;  %v13762_v17 = vadd.f32 %v13585_v1, %v13720_v25 }
 0x1cb   : > { %v11262_v38 = vpop.f32.mrb[51].mxu1  ;;  %5380 = vmatpush1.bf16.msra.mxu1 %v11769_v2  ;;  %v13766_v2 = vadd.f32 %v13593_v46, %v13720_v25  ;;  %v13802_v1 = vadd.f32 %v13599_v11, %v13720_v25  ;;  %v13806_v46 = vadd.f32 %v13601_v44, %v13720_v25 }
 0x1cc   : > { %v13697_v50 = vadd.f32 %v11262_v38, %v11261_v14  ;;  %v13732_v38 = vsub.s32 %v2344_v31, %v13712_v52  ;;  %v13750_v31 = vadd.f32 %v13568_v47, %v13720_v25 }
 0x1ce   : > { %17190 = vst [vmem:[#allocation25_spill] sm:$0xff] %v13697_v50 }
 0x1cf   : > { %v13699_v23 = vpop.f32.mrb[16].mxu0 }
 0x1d0   : > { %v11264_v60 = vpop.f32.mrb[52].mxu1  ;;  %v13701_v35 = vpop.f32.mrb[17].mxu0 }
 0x1d1   : > { %v11265_v51 = vpop.f32.mrb[53].mxu1  ;;  %v13703_v63 = vpop.f32.mrb[18].mxu0 }
 0x1d2   : > { %v13705_v54 = vadd.f32 %v11265_v51, %v11264_v60  ;;  %v11267_v5 = vpop.f32.mrb[54].mxu1  ;;  %v13707_v24 = vpop.f32.mrb[19].mxu0  ;;  %v13738_v51 = vadd.f32 %v13558_v61, %v13720_v25  ;;  %v13758_v61 = vadd.f32 %v13581_v32, %v13720_v25  ;;  %v13798_v32 = vadd.f32 %v13597_v29, %v13720_v25 }
 0x1d3   : > { %v11268_v3 = vpop.f32.mrb[55].mxu1  ;;  %v13818_v29 = vadd.f32 %v13611_v4, %v13720_v25  ;;  %v13839_v4 = vadd.f32 %v13636_v55, %v13720_v25  ;;  %v1837_v55 = vadd.f32 %v13649_v53, %v13720_v25  ;;  %v13871_v53 = vadd.f32 %v13673_v22, %v13720_v25  ;;  %v11772_v22 = vld [vmem:[%s17067_s3 + $0xe0] ss:$8 sps:$4 sm:$0xff]  }
 0x1d4   : > { %17191 = vst [vmem:[#allocation22_spill] sm:$0xff] %v13705_v54  ;;  %v13709_v16 = vadd.f32 %v11268_v3, %v11267_v5 }
 0x1d5   : > { %17197 = vst [vmem:[#allocation6_spill] sm:$0xff] %v13818_v29  ;;  %17202 = vst [vmem:[#allocation17_spill] sm:$0xff] %v13839_v4 }
 0x1d6   : > { %17192 = vst [vmem:[#allocation29_spill] sm:$0xff] %v13709_v16  ;;  %17208 = vst [vmem:[#allocation33_spill] sm:$0xff] %v13871_v53 }
 0x1d7   : > { %v13722_v40 = vpop.f32.mrb[20].mxu0 }
 0x1d8   : > { %17194 = vst [vmem:[#allocation30_spill] sm:$0xff] %v13722_v40  ;;  %v11286_v0 = vpop.f32.mrb[56].mxu1  ;;  %v13729_v14 = vpop.f32.mrb[21].mxu0 }
 0x1d9   : > { %v11287_v19 = vpop.f32.mrb[57].mxu1  ;;  %v13734_v60 = vpop.f32.mrb[22].mxu0 }
 0x1da   : > { %17195 = vst [vmem:[#allocation35_spill] sm:$0xff] %v13734_v60  ;;  %v11288_v30 = vadd.f32 %v11287_v19, %v11286_v0  ;;  %v11289_v5 = vpop.f32.mrb[58].mxu1  ;;  %v13746_v3 = vpop.f32.mrb[23].mxu0  ;;  %v17105_v19 = vmov 0.0  }
 0x1db   : > { %v11290_v26 = vpop.f32.mrb[59].mxu1  ;;  %3974 = vst [vmem:[#allocation2] sm:$0xff] %v17105_v19  ;;  %3975 = vst [vmem:[#allocation2 + $0x8] sm:$0x3] %v17105_v19 }
 0x1dc   : > { %v11291_v0 = vadd.f32 %v11290_v26, %v11289_v5  ;;  %v1990_v47 = vadd.f32 %v11288_v30, %v1829_v20  ;;  %3980 = vst [vmem:[#allocation2 + $0x10] sm:$0x1] %v17105_v19  ;;  %3990 = vst [vmem:[#allocation2 + $0x19] sm:$0x1] %v17105_v19  ;;  %v13823_v20 = vadd.f32 %v13613_v57, %v13720_v25 }
 0x1dd   : > { %3977 = vst [vmem:[#allocation2 + $0x90] sm:$0xff] %v17105_v19  ;;  %3978 = vst [vmem:[#allocation2 + $0x98] sm:$0x3] %v17105_v19  ;;  %v13827_v30 = vadd.f32 %v13627_v56, %v13720_v25  ;;  %v13831_v5 = vadd.f32 %v13629_v18, %v13720_v25  ;;  %v13843_v57 = vadd.f32 %v13643_v48, %v13720_v25 }
 0x1de   : > { %3981 = vst [vmem:[#allocation2 + $0x20] sm:$0x1] %v17105_v19  ;;  %3982 = vst [vmem:[#allocation2 + $0x30] sm:$0x1] %v17105_v19  ;;  %v2151_v11 = vadd.f32 %v13665_v27, %v1990_v47  ;;  %v1993_v44 = vadd.f32 %v11291_v0, %v1832_v7  ;;  %v13848_v18 = vadd.f32 %v13647_v59, %v13720_v25 }
 0x1df   : > { %3983 = vst [vmem:[#allocation2 + $0x40] sm:$0x1] %v17105_v19  ;;  %3984 = vst [vmem:[#allocation2 + $0x50] sm:$0x1] %v17105_v19  ;;  %v13858_v26 = vadd.f32 %v13659_v42, %v13720_v25  ;;  %v13863_v59 = vadd.f32 %v13661_v58, %v13720_v25  ;;  %v13875_v42 = vadd.f32 %v13690_v36, %v13720_v25 }
 0x1e0   : > { %3985 = vst [vmem:[#allocation2 + $0x60] sm:$0x1] %v17105_v19  ;;  %3986 = vst [vmem:[#allocation2 + $0x70] sm:$0x1] %v17105_v19  ;;  %v2277_v27 = vmax.f32 %v2151_v11, 0.0  ;;  %v2154_v56 = vadd.f32 %v13671_v28, %v1993_v44  ;;  %v11292_v7 = vpop.f32.mrb[60].mxu1 }
 0x1e1   : > { %3987 = vst [vmem:[#allocation2 + $0x80] sm:$0x1] %v17105_v19  ;;  %3991 = vst [vmem:[#allocation2 + $0x29] sm:$0x1] %v17105_v19  ;;  %v11293_v48 = vpop.f32.mrb[61].mxu1 }
 0x1e2   : > { %3992 = vst [vmem:[#allocation2 + $0x39] sm:$0x1] %v17105_v19  ;;  %3993 = vst [vmem:[#allocation2 + $0x49] sm:$0x1] %v17105_v19  ;;  %v2341_v0 = vcombine.high %v2277_v27, %v2277_v27  ;;  %v2348_v28 = vrot.slane %v2277_v27, %v13732_v38  ;;  %v2278_v47 = vmax.f32 %v2154_v56, 0.0  ;;  %v11294_v11 = vadd.f32 %v11293_v48, %v11292_v7  ;;  %v11295_v44 = vpop.f32.mrb[62].mxu1 }
 0x1e3   : > { %3994 = vst [vmem:[#allocation2 + $0x59] sm:$0x1] %v17105_v19  ;;  %3995 = vst [vmem:[#allocation2 + $0x69] sm:$0x1] %v17105_v19  ;;  %v11296_v27 = vpop.f32.mrb[63].mxu1 }
 0x1e4   : > { %3996 = vst [vmem:[#allocation2 + $0x79] sm:$0x1] %v17105_v19  ;;  %3997 = vst [vmem:[#allocation2 + $0x89] sm:$0x1] %v17105_v19  ;;  %v11774_v56 = vld [vmem:[%s17067_s3 + $0xe4] ss:$8 sps:$4 sm:$0xff]   ;;  %v2355_v58 = vrot.slane %v2341_v0, %v13732_v38  ;;  %v2356_v7 = vcombine.high %v2348_v28, %v2348_v28  ;;  %v2358_v21 = vcombine.high %v2278_v47, %v2278_v47 }
 0x1e5   : > { %6694 = vst [vmem:[#allocation3] sm:$0x3f] %v17105_v19  ;;  %6695 = vst [vmem:[#allocation3 + $0x8] sm:$0x3f] %v17105_v19  ;;  %v3014_v48 = vsel %vm3013_vm7, %v2348_v28, -inf  ;;  %v2365_v41 = vrot.slane %v2278_v47, %v13732_v38  ;;  %v1998_v36 = vadd.f32 %v11294_v11, %v1837_v55  ;;  %v13886_v25 = vadd.f32 %v11296_v27, %v11295_v44 }
 0x1e6   : > { %6697 = vst [vmem:[#allocation3 + $0x50] sm:$0x3f] %v17105_v19  ;;  %6698 = vst [vmem:[#allocation3 + $0x58] sm:$0x3f] %v17105_v19  ;;  %5381 = vmatprep.subr.bf16.mxu1 %v11774_v56  ;;  %v2357_v52 = vcombine.high %v2355_v58, %v2355_v58  ;;  %v3021_v34 = vsel %vm3013_vm7, %v2356_v7, -inf  ;;  %v3028_v0 = vsel %vm3013_vm7, %v2355_v58, -inf }
 0x1e7   : > { %3979 = vst [vmem:[#allocation2] sm:$0x1] %v17105_v19  ;;  %3989 = vst [vmem:[#allocation2 + $0x9] sm:$0x1] %v17105_v19  ;;  %5382 = vmatpush1.bf16.msra.mxu1 %v11772_v22  ;;  %v3022_v53 = vrot.slane %v3021_v34, 4  ;;  %v3029_v39 = vrot.slane %v3028_v0, 4 }
 0x1e8   : > { %3988 = vst [vmem:[#allocation2 + $0x90] sm:$0x1] %v17105_v19  ;;  %3998 = vst [vmem:[#allocation2 + $0x99] sm:$0x1] %v17105_v19  ;;  %v3015_v19 = vrot.slane %v3014_v48, 4  ;;  %v3035_v13 = vsel %vm3013_vm7, %v2357_v52, -inf }
 0x1e9   : > { %17198 = vst [vmem:[#allocation9_spill] sm:$0xff] %v13823_v20  ;;  %17199 = vst [vmem:[#allocation11_spill] sm:$0xff] %v13827_v30  ;;  %v3042_v55 = vsel %vm3013_vm7, %v2365_v41, -inf  ;;  %v11298_v11 = vpop.f32.mrb[64].mxu1  ;;  %v3023_v27 = vmax.f32 %v3021_v34, %v3022_v53  ;;  %v3030_v56 = vmax.f32 %v3028_v0, %v3029_v39  ;;  %v3036_v7 = vrot.slane %v3035_v13, 4 }
 0x1ea   : > { %17200 = vst [vmem:[#allocation13_spill] sm:$0xff] %v13831_v5  ;;  %17203 = vst [vmem:[#allocation19_spill] sm:$0xff] %v13843_v57  ;;  %v3016_v28 = vmax.f32 %v3014_v48, %v3015_v19  ;;  %v11299_v58 = vpop.f32.mrb[65].mxu1  ;;  %v3043_v16 = vrot.slane %v3042_v55, 4 }
 0x1eb   : > { %17204 = vst [vmem:[#allocation20_spill] sm:$0xff] %v13848_v18  ;;  %17206 = vst [vmem:[#allocation27_spill] sm:$0xff] %v13863_v59  ;;  %v2373_v59 = vcombine.high %v2365_v41, %v2365_v41  ;;  %v11301_v22 = vpop.f32.mrb[66].mxu1  ;;  %v3024_v52 = vrot.slane %v3023_v27, 2  ;;  %v3031_v4 = vrot.slane %v3030_v56, 2  ;;  %v3037_v43 = vmax.f32 %v3035_v13, %v3036_v7 }
 0x1ec   : > { %17209 = vst [vmem:[#allocation8_spill] sm:$0xff] %v13875_v42  ;;  %v2372_v42 = vrot.slane %v2358_v21, %v13732_v38  ;;  %v3017_v44 = vrot.slane %v3016_v28, 2  ;;  %v11302_v41 = vpop.f32.mrb[67].mxu1  ;;  %v3044_v5 = vmax.f32 %v3042_v55, %v3043_v16  ;;  %v11775_v13 = vld [vmem:[%s17067_s3 + $0xf0] ss:$8 sps:$4 sm:$0xff]  }
 0x1ed   : > { %v3049_v21 = vsel %vm3013_vm7, %v2373_v59, -inf  ;;  %v3025_v39 = vmax.f32 %v3023_v27, %v3024_v52  ;;  %v3032_v53 = vmax.f32 %v3030_v56, %v3031_v4  ;;  %v3038_v0 = vrot.slane %v3037_v43, 2  ;;  %v11777_v59 = vld [vmem:[%s17067_s3 + $0xf4] ss:$8 sps:$4 sm:$0xff]  }
 0x1ee   : > { %v2374_v18 = vcombine.high %v2372_v42, %v2372_v42  ;;  %v3056_v47 = vsel %vm3013_vm7, %v2372_v42, -inf  ;;  %v3018_v57 = vmax.f32 %v3016_v28, %v3017_v44  ;;  %v3050_v42 = vrot.slane %v3049_v21, 4  ;;  %5383 = vmatprep.subr.bf16.mxu1 %v11777_v59 }
 0x1ef   : > { %v3057_v19 = vrot.slane %v3056_v47, 4  ;;  %v3045_v37 = vrot.slane %v3044_v5, 2  ;;  %v3026_v55 = vrot.slane %v3025_v39, 1  ;;  %v3039_v44 = vmax.f32 %v3037_v43, %v3038_v0  ;;  %5384 = vmatpush1.bf16.msra.mxu1 %v11775_v13 }
 0x1f0   : > { %v3063_v48 = vsel %vm3013_vm7, %v2374_v18, -inf  ;;  %v3019_v34 = vrot.slane %v3018_v57, 1  ;;  %v3051_v18 = vmax.f32 %v3049_v21, %v3050_v42  ;;  %v11303_v13 = vadd.f32 %v11302_v41, %v11301_v22 }
 0x1f1   : > { %v3058_v30 = vmax.f32 %v3056_v47, %v3057_v19  ;;  %v3064_v20 = vrot.slane %v3063_v48, 4  ;;  %v3033_v47 = vrot.slane %v3032_v53, 1  ;;  %v3046_v4 = vmax.f32 %v3044_v5, %v3045_v37  ;;  %v11304_v19 = vpop.f32.mrb[68].mxu1 }
 0x1f2   : > { %v13902_v16 = vmax.f32 %v3018_v57, %v3019_v34  ;;  %v3052_v27 = vrot.slane %v3051_v18, 2  ;;  %v13904_v52 = vmax.f32 %v3025_v39, %v3026_v55  ;;  %v11305_v42 = vpop.f32.mrb[69].mxu1  ;;  %v11300_v5 = vadd.f32 %v11299_v58, %v11298_v11 }
 0x1f3   : > { %v3059_v29 = vrot.slane %v3058_v30, 2  ;;  %v3065_v28 = vmax.f32 %v3063_v48, %v3064_v20  ;;  %v13906_v21 = vmax.f32 %v3032_v53, %v3033_v47  ;;  %v3040_v20 = vrot.slane %v3039_v44, 1  ;;  %v13909_v43 = vpop.f32.mrb[70].mxu1 }
 0x1f4   : > { %v2159_v48 = vadd.f32 %v13663_v12, %v1998_v36  ;;  %v3047_v57 = vrot.slane %v3046_v4, 1  ;;  %v3053_v34 = vmax.f32 %v3051_v18, %v3052_v27  ;;  %v13915_v39 = vpop.f32.mrb[71].mxu1 }
 0x1f5   : > { %v3060_v56 = vmax.f32 %v3058_v30, %v3059_v29  ;;  %v3066_v7 = vrot.slane %v3065_v28, 2  ;;  %v13911_v37 = vmax.f32 %v3039_v44, %v3040_v20  ;;  %v2001_v30 = vadd.f32 %v13886_v25, %v13858_v26 }
 0x1f6   : > { %v2279_v29 = vmax.f32 %v2159_v48, 0.0  ;;  %v13917_v53 = vmax.f32 %v3046_v4, %v3047_v57  ;;  %v3054_v0 = vrot.slane %v3053_v34, 1  ;;  %v2006_v26 = vadd.f32 %v11300_v5, %v13738_v51 }
 0x1f7   : > { %v3061_v54 = vrot.slane %v3060_v56, 1  ;;  %v3067_v50 = vmax.f32 %v3065_v28, %v3066_v7  ;;  %v2162_v28 = vadd.f32 %v13667_v45, %v2001_v30  ;;  %v11306_v25 = vadd.f32 %v11305_v42, %v11304_v19 }
 0x1f8   : > { %v2375_v59 = vcombine.high %v2279_v29, %v2279_v29  ;;  %v2382_v18 = vrot.slane %v2279_v29, %v13732_v38  ;;  %v13923_v55 = vmax.f32 %v3053_v34, %v3054_v0  ;;  %v2167_v27 = vadd.f32 %v13683_v15, %v2006_v26  ;;  %v13935_v22 = vpop.f32.mrb[72].mxu1 }
 0x1f9   : > { %v13919_v12 = vmax.f32 %v3060_v56, %v3061_v54  ;;  %v3068_v36 = vrot.slane %v3067_v50, 1  ;;  %v2280_v44 = vmax.f32 %v2162_v28, 0.0  ;;  %v2009_v56 = vadd.f32 %v11303_v13, %v13742_v9  ;;  %v13939_v19 = vpop.f32.mrb[73].mxu1 }
 0x1fa   : > { %v2389_v11 = vrot.slane %v2375_v59, %v13732_v38  ;;  %v2390_v58 = vcombine.high %v2382_v18, %v2382_v18  ;;  %v3070_v54 = vsel %vm3013_vm7, %v2382_v18, -inf  ;;  %v13933_v45 = vadd.f32 %v11306_v25, %v13750_v31  ;;  %v13942_v57 = vpop.f32.mrb[74].mxu1 }
 0x1fb   : > { %v13925_v47 = vmax.f32 %v3067_v50, %v3068_v36  ;;  %v3071_v4 = vrot.slane %v3070_v54, 4  ;;  %v2392_v7 = vcombine.high %v2280_v44, %v2280_v44  ;;  %v2399_v15 = vrot.slane %v2280_v44, %v13732_v38  ;;  %v13951_v30 = vpop.f32.mrb[75].mxu1 }
 0x1fc   : > { %v2391_v50 = vcombine.high %v2389_v11, %v2389_v11  ;;  %v3077_v51 = vsel %vm3013_vm7, %v2390_v58, -inf  ;;  %v3084_v41 = vsel %vm3013_vm7, %v2389_v11, -inf  ;;  %v13946_v34 = vmax.f32 %v2167_v27, 0.0 }
 0x1fd   : > { %v3072_v20 = vmax.f32 %v3070_v54, %v3071_v4  ;;  %v3078_v48 = vrot.slane %v3077_v51, 4  ;;  %v3085_v42 = vrot.slane %v3084_v41, 4  ;;  %v2406_v31 = vrot.slane %v2392_v7, %v13732_v38 }
 0x1fe   : > { %v3091_v9 = vsel %vm3013_vm7, %v2391_v50, -inf  ;;  %v13949_v29 = vadd.f32 %v13692_v10, %v2009_v56  ;;  %v2407_v18 = vcombine.high %v2399_v15, %v2399_v15  ;;  %v3098_v13 = vsel %vm3013_vm7, %v2399_v15, -inf }
 0x1ff   : > { %v3073_v5 = vrot.slane %v3072_v20, 2  ;;  %v3079_v0 = vmax.f32 %v3077_v51, %v3078_v48  ;;  %v3086_v36 = vmax.f32 %v3084_v41, %v3085_v42  ;;  %v3092_v59 = vrot.slane %v3091_v9, 4 }
 0x200   : > { %v2408_v28 = vcombine.high %v2406_v31, %v2406_v31  ;;  %v3112_v26 = vsel %vm3013_vm7, %v2406_v31, -inf  ;;  %v3099_v10 = vrot.slane %v3098_v13, 4  ;;  %v3105_v44 = vsel %vm3013_vm7, %v2407_v18, -inf  ;;  %v13957_v7 = vpop.f32.mrb[76].mxu1 }
 0x201   : > { %v3074_v25 = vmax.f32 %v3072_v20, %v3073_v5  ;;  %v3080_v11 = vrot.slane %v3079_v0, 2  ;;  %v3087_v58 = vrot.slane %v3086_v36, 2  ;;  %v3093_v54 = vmax.f32 %v3091_v9, %v3092_v59  ;;  %v13959_v31 = vpop.f32.mrb[77].mxu1 }
 0x202   : > { %v3113_v4 = vrot.slane %v3112_v26, 4  ;;  %v3119_v27 = vsel %vm3013_vm7, %v2408_v28, -inf  ;;  %v3100_v48 = vmax.f32 %v3098_v13, %v3099_v10  ;;  %v3106_v42 = vrot.slane %v3105_v44, 4  ;;  %v13961_v60 = vpop.f32.mrb[78].mxu1 }
 0x203   : > { %v3075_v56 = vrot.slane %v3074_v25, 1  ;;  %v3081_v50 = vmax.f32 %v3079_v0, %v3080_v11  ;;  %v3088_v51 = vmax.f32 %v3086_v36, %v3087_v58  ;;  %v3094_v41 = vrot.slane %v3093_v54, 2  ;;  %v13963_v11 = vpop.f32.mrb[79].mxu1 }
 0x204   : > { %v3114_v20 = vmax.f32 %v3112_v26, %v3113_v4  ;;  %v3120_v15 = vrot.slane %v3119_v27, 4  ;;  %v3101_v28 = vrot.slane %v3100_v48, 2  ;;  %v3107_v62 = vmax.f32 %v3105_v44, %v3106_v42 }
 0x205   : > { %v3076_v9 = vmax.f32 %v3074_v25, %v3075_v56  ;;  %v3082_v5 = vrot.slane %v3081_v50, 1  ;;  %v3089_v59 = vrot.slane %v3088_v51, 1  ;;  %v3095_v18 = vmax.f32 %v3093_v54, %v3094_v41 }
 0x206   : > { %v3115_v0 = vrot.slane %v3114_v20, 2  ;;  %v3121_v36 = vmax.f32 %v3119_v27, %v3120_v15  ;;  %v3102_v4 = vmax.f32 %v3100_v48, %v3101_v28  ;;  %v3108_v25 = vrot.slane %v3107_v62, 2 }
 0x207   : > { %v3083_v58 = vmax.f32 %v3081_v50, %v3082_v5  ;;  %v3090_v13 = vmax.f32 %v3088_v51, %v3089_v59  ;;  %v3096_v10 = vrot.slane %v3095_v18, 1  ;;  %v3910_v26 = vmax.f32 %v13902_v16, %v3076_v9 }
 0x208   : > { %v3116_v56 = vmax.f32 %v3114_v20, %v3115_v0  ;;  %v3122_v40 = vrot.slane %v3121_v36, 2  ;;  %v2409_v27 = vcombine.high %v13946_v34, %v13946_v34  ;;  %v3103_v50 = vrot.slane %v3102_v4, 1 }
 0x209   : > { %v3097_v54 = vmax.f32 %v3095_v18, %v3096_v10  ;;  %v3911_v41 = vmax.f32 %v13904_v52, %v3083_v58  ;;  %v3912_v44 = vmax.f32 %v13906_v21, %v3090_v13  ;;  %v3109_v51 = vmax.f32 %v3107_v62, %v3108_v25  ;;  %v13975_v52 = vpop.f32.mrb[80].mxu1 }
 0x20a   : > { %v3117_v42 = vrot.slane %v3116_v56, 1  ;;  %v3123_v15 = vmax.f32 %v3121_v36, %v3122_v40  ;;  %v2416_v20 = vrot.slane %v13946_v34, %v13732_v38  ;;  %v2423_v9 = vrot.slane %v2409_v27, %v13732_v38  ;;  %v13978_v28 = vpop.f32.mrb[81].mxu1 }
 0x20b   : > { %v3913_v16 = vmax.f32 %v13911_v37, %v3097_v54  ;;  %v4064_v48 = vsel %vm4063_vm8, %v3911_v41, %v3910_v26  ;;  %v3104_v5 = vmax.f32 %v3102_v4, %v3103_v50  ;;  %v3110_v59 = vrot.slane %v3109_v51, 1  ;;  %v13981_v36 = vpop.f32.mrb[82].mxu1 }
 0x20c   : > { %v4066_v21 = vsel %vm4065_vm9, %v3912_v44, %v4064_v48  ;;  %v3118_v18 = vmax.f32 %v3116_v56, %v3117_v42  ;;  %v3124_v62 = vrot.slane %v3123_v15, 1  ;;  %v2424_v37 = vcombine.high %v2416_v20, %v2416_v20  ;;  %v13986_v26 = vpop.f32.mrb[83].mxu1 }
 0x20d   : > { %v4068_v40 = vsel %vm4067_vm10, %v3913_v16, %v4066_v21  ;;  %v2425_v0 = vcombine.high %v2423_v9, %v2423_v9  ;;  %v3111_v58 = vmax.f32 %v3109_v51, %v3110_v59  ;;  %v3914_v34 = vmax.f32 %v13917_v53, %v3104_v5 }
 0x20e   : > { %v3916_v13 = vmax.f32 %v13919_v12, %v3118_v18  ;;  %v3126_v10 = vsel %vm3013_vm7, %v2416_v20, -inf  ;;  %v3125_v4 = vmax.f32 %v3123_v15, %v3124_v62  ;;  %v3133_v56 = vsel %vm3013_vm7, %v2424_v37, -inf }
 0x20f   : > { %v3127_v25 = vrot.slane %v3126_v10, 4  ;;  %v3140_v54 = vsel %vm3013_vm7, %v2423_v9, -inf  ;;  %v3915_v41 = vmax.f32 %v13923_v55, %v3111_v58  ;;  %v4070_v44 = vsel %vm4069_vm11, %v3914_v34, %v4068_v40 }
 0x210   : > { %v3134_v27 = vrot.slane %v3133_v56, 4  ;;  %v3141_v50 = vrot.slane %v3140_v54, 4  ;;  %v3917_v53 = vmax.f32 %v13925_v47, %v3125_v4  ;;  %v3147_v12 = vsel %vm3013_vm7, %v2425_v0, -inf  ;;  %v13998_v59 = vpop.f32.mrb[84].mxu1 }
 0x211   : > { %v3128_v51 = vmax.f32 %v3126_v10, %v3127_v25  ;;  %v2282_v42 = vmax.f32 %v13949_v29, 0.0  ;;  %v4072_v15 = vsel %vm4071_vm12, %v3915_v41, %v4070_v44  ;;  %v3148_v20 = vrot.slane %v3147_v12, 4  ;;  %v14001_v37 = vpop.f32.mrb[85].mxu1  ;;  %v14007_v10 = vpop.f32.mrb[24].mxu0 }
 0x212   : > { %v3135_v16 = vmax.f32 %v3133_v56, %v3134_v27  ;;  %v3142_v48 = vmax.f32 %v3140_v54, %v3141_v50  ;;  %v4074_v9 = vsel %vm4073_vm13, %v3916_v13, %v4072_v15  ;;  %v14005_v13 = vpop.f32.mrb[86].mxu1  ;;  %17210 = vst [vmem:[#allocation10_spill] sm:$0xff] %v14007_v10  ;;  %v14011_v44 = vpop.f32.mrb[25].mxu0 }
 0x213   : > { %v3129_v21 = vrot.slane %v3128_v51, 2  ;;  %v2426_v55 = vcombine.high %v2282_v42, %v2282_v42  ;;  %v2433_v5 = vrot.slane %v2282_v42, %v13732_v38  ;;  %v4076_v47 = vsel %vm4075_vm14, %v3917_v53, %v4074_v9  ;;  %v14009_v41 = vpop.f32.mrb[87].mxu1  ;;  %17211 = vst [vmem:[#allocation12_spill] sm:$0xff] %v14011_v44 }
 0x214   : > { %v3136_v18 = vrot.slane %v3135_v16, 2  ;;  %v3143_v62 = vrot.slane %v3142_v48, 2  ;;  %v3149_v40 = vmax.f32 %v3147_v12, %v3148_v20  ;;  %4135 = vst [vmem:[#allocation2 + $0x11] sm:$0xff] %v4076_v47 }
 0x215   : > { %v3130_v29 = vmax.f32 %v3128_v51, %v3129_v21  ;;  %v2440_v0 = vrot.slane %v2426_v55, %v13732_v38  ;;  %v2441_v58 = vcombine.high %v2433_v5, %v2433_v5  ;;  %v3154_v34 = vsel %vm3013_vm7, %v2433_v5, -inf }
 0x216   : > { %v3137_v4 = vmax.f32 %v3135_v16, %v3136_v18  ;;  %v3144_v25 = vmax.f32 %v3142_v48, %v3143_v62  ;;  %v3150_v56 = vrot.slane %v3149_v40, 2  ;;  %v3155_v54 = vrot.slane %v3154_v34, 4 }
 0x217   : > { %v3131_v27 = vrot.slane %v3130_v29, 1  ;;  %v2442_v50 = vcombine.high %v2440_v0, %v2440_v0  ;;  %v3161_v53 = vsel %vm3013_vm7, %v2441_v58, -inf  ;;  %v3168_v51 = vsel %vm3013_vm7, %v2440_v0, -inf }
 0x218   : > { %v3138_v12 = vrot.slane %v3137_v4, 1  ;;  %v3145_v42 = vrot.slane %v3144_v25, 1  ;;  %v3151_v15 = vmax.f32 %v3149_v40, %v3150_v56  ;;  %v3156_v20 = vmax.f32 %v3154_v34, %v3155_v54  ;;  %v14024_v40 = vpop.f32.mrb[88].mxu1 }
 0x219   : > { %v14015_v9 = vmax.f32 %v3130_v29, %v3131_v27  ;;  %v3162_v16 = vrot.slane %v3161_v53, 4  ;;  %v3169_v48 = vrot.slane %v3168_v51, 4  ;;  %v3175_v21 = vsel %vm3013_vm7, %v2442_v50, -inf  ;;  %17212 = vst [vmem:[#allocation14_spill] sm:$0xff] %v14024_v40 }
 0x21a   : > { %v14018_v55 = vmax.f32 %v3137_v4, %v3138_v12  ;;  %v14020_v5 = vmax.f32 %v3144_v25, %v3145_v42  ;;  %v3152_v47 = vrot.slane %v3151_v15, 1  ;;  %v3157_v18 = vrot.slane %v3156_v20, 2  ;;  %v14032_v25 = vpop.f32.mrb[89].mxu1 }
 0x21b   : > { %v3163_v62 = vmax.f32 %v3161_v53, %v3162_v16  ;;  %v3170_v58 = vmax.f32 %v3168_v51, %v3169_v48  ;;  %v3176_v10 = vrot.slane %v3175_v21, 4  ;;  %v2175_v0 = vadd.f32 %v13681_v8, %v13933_v45  ;;  %17213 = vst [vmem:[#allocation16_spill] sm:$0xff] %v14032_v25  ;;  %v14034_v51 = vpop.f32.mrb[90].mxu1 }
 0x21c   : > { %v14026_v29 = vmax.f32 %v3151_v15, %v3152_v47  ;;  %v3158_v34 = vmax.f32 %v3156_v20, %v3157_v18  ;;  %v11309_v56 = vadd.f32 %v13915_v39, %v13909_v43  ;;  %v11312_v4 = vadd.f32 %v13939_v19, %v13935_v22  ;;  %17214 = vst [vmem:[#allocation18_spill] sm:$0xff] %v14034_v51  ;;  %v14042_v39 = vpop.f32.mrb[91].mxu1  ;;  %v14044_v22 = vpop.f32.mrb[26].mxu0 }
 0x21d   : > { %v3164_v54 = vrot.slane %v3163_v62, 2  ;;  %v3171_v27 = vrot.slane %v3170_v58, 2  ;;  %v3177_v50 = vmax.f32 %v3175_v21, %v3176_v10  ;;  %v2283_v53 = vmax.f32 %v2175_v0, 0.0  ;;  %17215 = vst [vmem:[#allocation21_spill] sm:$0xff] %v14042_v39  ;;  %17216 = vst [vmem:[#allocation24_spill] sm:$0xff] %v14044_v22  ;;  %v14046_v20 = vpop.f32.mrb[27].mxu0 }
 0x21e   : > { %v3159_v8 = vrot.slane %v3158_v34, 1  ;;  %v2017_v45 = vadd.f32 %v11309_v56, %v13754_v33  ;;  %v14039_v12 = vadd.f32 %v13951_v30, %v13942_v57  ;;  %v2022_v43 = vadd.f32 %v11312_v4, %v13758_v61  ;;  %17217 = vst [vmem:[#allocation28_spill] sm:$0xff] %v14046_v20 }
 0x21f   : > { %v3165_v19 = vmax.f32 %v3163_v62, %v3164_v54  ;;  %v3172_v42 = vmax.f32 %v3170_v58, %v3171_v27  ;;  %v3178_v15 = vrot.slane %v3177_v50, 2  ;;  %v2443_v10 = vcombine.high %v2283_v53, %v2283_v53 }
 0x220   : > { %v14048_v16 = vmax.f32 %v3158_v34, %v3159_v8  ;;  %v2450_v33 = vrot.slane %v2283_v53, %v13732_v38  ;;  %v2178_v48 = vadd.f32 %v13685_v6, %v2017_v45  ;;  %v2183_v57 = vadd.f32 %v13701_v35, %v2022_v43  ;;  %v14061_v6 = vpop.f32.mrb[92].mxu1 }
 0x221   : > { %v3166_v30 = vrot.slane %v3165_v19, 1  ;;  %v3173_v61 = vrot.slane %v3172_v42, 1  ;;  %v3179_v21 = vmax.f32 %v3177_v50, %v3178_v15  ;;  %v2457_v47 = vrot.slane %v2443_v10, %v13732_v38  ;;  %17218 = vst [vmem:[#allocation32_spill] sm:$0xff] %v14061_v6  ;;  %v14065_v8 = vpop.f32.mrb[93].mxu1 }
 0x222   : > { %v2458_v18 = vcombine.high %v2450_v33, %v2450_v33  ;;  %v3182_v62 = vsel %vm3013_vm7, %v2450_v33, -inf  ;;  %v2284_v58 = vmax.f32 %v2178_v48, 0.0  ;;  %v14055_v0 = vmax.f32 %v2183_v57, 0.0  ;;  %17219 = vst [vmem:[#allocation34_spill] sm:$0xff] %v14065_v8 }
 0x223   : > { %v14057_v56 = vmax.f32 %v3165_v19, %v3166_v30  ;;  %v14059_v34 = vmax.f32 %v3172_v42, %v3173_v61  ;;  %v3180_v4 = vrot.slane %v3179_v21, 1  ;;  %v2459_v54 = vcombine.high %v2457_v47, %v2457_v47  ;;  %v14070_v42 = vpop.f32.mrb[94].mxu1 }
 0x224   : > { %v3183_v35 = vrot.slane %v3182_v62, 4  ;;  %v3189_v27 = vsel %vm3013_vm7, %v2458_v18, -inf  ;;  %v3196_v50 = vsel %vm3013_vm7, %v2457_v47, -inf  ;;  %v2460_v53 = vcombine.high %v2284_v58, %v2284_v58  ;;  %17220 = vst [vmem:[#allocation36_spill] sm:$0xff] %v14070_v42  ;;  %v14074_v30 = vpop.f32.mrb[95].mxu1 }
 0x225   : > { %v14067_v45 = vmax.f32 %v3179_v21, %v3180_v4  ;;  %v3190_v43 = vrot.slane %v3189_v27, 4  ;;  %v3197_v15 = vrot.slane %v3196_v50, 4  ;;  %v3203_v19 = vsel %vm3013_vm7, %v2459_v54, -inf  ;;  %17221 = vst [vmem:[#allocation38_spill] sm:$0xff] %v14074_v30 }
 0x226   : > { %v3184_v10 = vmax.f32 %v3182_v62, %v3183_v35  ;;  %v3204_v33 = vrot.slane %v3203_v19, 4  ;;  %v2467_v48 = vrot.slane %v2284_v58, %v13732_v38  ;;  %v2474_v57 = vrot.slane %v2460_v53, %v13732_v38 }
 0x227   : > { %v3191_v61 = vmax.f32 %v3189_v27, %v3190_v43  ;;  %v3198_v47 = vmax.f32 %v3196_v50, %v3197_v15  ;;  %v2477_v21 = vcombine.high %v14055_v0, %v14055_v0  ;;  %v14080_v18 = vrot.slane %v14055_v0, %v13732_v38 }
 0x228   : > { %v3185_v4 = vrot.slane %v3184_v10, 2  ;;  %v3205_v54 = vmax.f32 %v3203_v19, %v3204_v33  ;;  %v2475_v22 = vcombine.high %v2467_v48, %v2467_v48  ;;  %v2476_v62 = vcombine.high %v2474_v57, %v2474_v57  ;;  %v14085_v8 = vpop.f32.mrb[96].mxu1 }
 0x229   : > { %v3192_v35 = vrot.slane %v3191_v61, 2  ;;  %v3199_v20 = vrot.slane %v3198_v47, 2  ;;  %v3210_v58 = vsel %vm3013_vm7, %v2467_v48, -inf  ;;  %v3224_v53 = vsel %vm3013_vm7, %v2474_v57, -inf  ;;  %17222 = vst [vmem:[#allocation39_spill] sm:$0xff] %v14085_v8  ;;  %v14088_v51 = vpop.f32.mrb[97].mxu1 }
 0x22a   : > { %v3186_v30 = vmax.f32 %v3184_v10, %v3185_v4  ;;  %v3206_v27 = vrot.slane %v3205_v54, 2  ;;  %v3211_v50 = vrot.slane %v3210_v58, 4  ;;  %v3217_v43 = vsel %vm3013_vm7, %v2475_v22, -inf  ;;  %17223 = vst [vmem:[#allocation40_spill] sm:$0xff] %v14088_v51  ;;  %v14090_v48 = vpop.f32.mrb[28].mxu0  ;;  %v14092_v22 = vpop.f32.mrb[98].mxu1 }
 0x22b   : > { %v3193_v15 = vmax.f32 %v3191_v61, %v3192_v35  ;;  %v3200_v42 = vmax.f32 %v3198_v47, %v3199_v20  ;;  %v3218_v44 = vrot.slane %v3217_v43, 4  ;;  %v3225_v0 = vrot.slane %v3224_v53, 4  ;;  %17224 = vst [vmem:[#allocation41_spill] sm:$0xff] %v14090_v48  ;;  %v14094_v20 = vpop.f32.mrb[29].mxu0 }
 0x22c   : > { %v3187_v19 = vrot.slane %v3186_v30, 1  ;;  %v3207_v33 = vmax.f32 %v3205_v54, %v3206_v27  ;;  %v3212_v6 = vmax.f32 %v3210_v58, %v3211_v50  ;;  %v3231_v39 = vsel %vm3013_vm7, %v2476_v62, -inf  ;;  %17225 = vst [vmem:[#allocation42_spill] sm:$0xff] %v14094_v20  ;;  %v14096_v54 = vpop.f32.mrb[99].mxu1 }
 0x22d   : > { %v3194_v10 = vrot.slane %v3193_v15, 1  ;;  %v3201_v57 = vrot.slane %v3200_v42, 1  ;;  %v3219_v4 = vmax.f32 %v3217_v43, %v3218_v44  ;;  %v3226_v25 = vmax.f32 %v3224_v53, %v3225_v0  ;;  %v14099_v53 = vpop.f32.mrb[30].mxu0 }
 0x22e   : > { %v3188_v61 = vmax.f32 %v3186_v30, %v3187_v19  ;;  %v3208_v47 = vrot.slane %v3207_v33, 1  ;;  %v3213_v35 = vrot.slane %v3212_v6, 2  ;;  %v3232_v8 = vrot.slane %v3231_v39, 4  ;;  %v14103_v20 = vpop.f32.mrb[31].mxu0 }
 0x22f   : > { %v3195_v58 = vmax.f32 %v3193_v15, %v3194_v10  ;;  %v3202_v62 = vmax.f32 %v3200_v42, %v3201_v57  ;;  %v3220_v27 = vrot.slane %v3219_v4, 2  ;;  %v3227_v50 = vrot.slane %v3226_v25, 2 }
 0x230   : > { %v3209_v51 = vmax.f32 %v3207_v33, %v3208_v47  ;;  %v3918_v48 = vmax.f32 %v14015_v9, %v3188_v61  ;;  %v3214_v40 = vmax.f32 %v3212_v6, %v3213_v35  ;;  %v3233_v44 = vmax.f32 %v3231_v39, %v3232_v8 }
 0x231   : > { %v3919_v43 = vmax.f32 %v14018_v55, %v3195_v58  ;;  %v3920_v30 = vmax.f32 %v14020_v5, %v3202_v62  ;;  %v3221_v0 = vmax.f32 %v3219_v4, %v3220_v27  ;;  %v3228_v19 = vmax.f32 %v3226_v25, %v3227_v50 }
 0x232   : > { %v3921_v15 = vmax.f32 %v14026_v29, %v3209_v51  ;;  %v3215_v42 = vrot.slane %v3214_v40, 1  ;;  %v3234_v10 = vrot.slane %v3233_v44, 2  ;;  %v2491_v33 = vrot.slane %v2477_v21, %v13732_v38 }
 0x233   : > { %v4077_v9 = vsel %vm4063_vm8, %v3919_v43, %v3918_v48  ;;  %v3222_v6 = vrot.slane %v3221_v0, 1  ;;  %v3229_v39 = vrot.slane %v3228_v19, 1  ;;  %v2492_v8 = vcombine.high %v14080_v18, %v14080_v18 }
 0x234   : > { %v4078_v55 = vsel %vm4065_vm9, %v3920_v30, %v4077_v9  ;;  %v3216_v5 = vmax.f32 %v3214_v40, %v3215_v42  ;;  %v3235_v57 = vmax.f32 %v3233_v44, %v3234_v10  ;;  %v2493_v25 = vcombine.high %v2491_v33, %v2491_v33 }
 0x235   : > { %v3223_v4 = vmax.f32 %v3221_v0, %v3222_v6  ;;  %v3230_v61 = vmax.f32 %v3228_v19, %v3229_v39  ;;  %v4079_v29 = vsel %vm4067_vm10, %v3921_v15, %v4078_v55  ;;  %v3238_v51 = vsel %vm3013_vm7, %v14080_v18, -inf }
 0x236   : > { %v3236_v21 = vrot.slane %v3235_v57, 1  ;;  %v3922_v48 = vmax.f32 %v14048_v16, %v3216_v5  ;;  %v3239_v47 = vrot.slane %v3238_v51, 4  ;;  %v3245_v35 = vsel %vm3013_vm7, %v2492_v8, -inf }
 0x237   : > { %v3923_v58 = vmax.f32 %v14057_v56, %v3223_v4  ;;  %v3924_v62 = vmax.f32 %v14059_v34, %v3230_v61  ;;  %v3246_v40 = vrot.slane %v3245_v35, 4  ;;  %v3252_v27 = vsel %vm3013_vm7, %v2491_v33, -inf }
 0x238   : > { %v3237_v50 = vmax.f32 %v3235_v57, %v3236_v21  ;;  %v4080_v44 = vsel %vm4069_vm11, %v3922_v48, %v4079_v29  ;;  %v3240_v43 = vmax.f32 %v3238_v51, %v3239_v47  ;;  %v3253_v30 = vrot.slane %v3252_v27, 4 }
 0x239   : > { %v4081_v18 = vsel %vm4071_vm12, %v3923_v58, %v4080_v44  ;;  %v3247_v0 = vmax.f32 %v3245_v35, %v3246_v40  ;;  %v3259_v16 = vsel %vm3013_vm7, %v2493_v25, -inf  ;;  %v2025_v19 = vadd.f32 %v14039_v12, %v13762_v17  ;;  %v14132_v12 = vpop.f32.mrb[100].mxu1 }
 0x23a   : > { %v3925_v56 = vmax.f32 %v14067_v45, %v3237_v50  ;;  %v4082_v34 = vsel %vm4073_vm13, %v3924_v62, %v4081_v18  ;;  %v3241_v15 = vrot.slane %v3240_v43, 2  ;;  %v3254_v42 = vmax.f32 %v3252_v27, %v3253_v30  ;;  %v14135_v4 = vpop.f32.mrb[101].mxu1 }
 0x23b   : > { %v3248_v10 = vrot.slane %v3247_v0, 2  ;;  %v3260_v33 = vrot.slane %v3259_v16, 4  ;;  %v2186_v9 = vadd.f32 %v13707_v24, %v2025_v19  ;;  %v11318_v6 = vadd.f32 %v13959_v31, %v13957_v7  ;;  %v14142_v29 = vpop.f32.mrb[102].mxu1 }
 0x23c   : > { %v4083_v39 = vsel %vm4075_vm14, %v3925_v56, %v4082_v34  ;;  %v3242_v8 = vmax.f32 %v3240_v43, %v3241_v15  ;;  %v3255_v55 = vrot.slane %v3254_v42, 2  ;;  %v11321_v17 = vadd.f32 %v13963_v11, %v13961_v60  ;;  %v14145_v48 = vpop.f32.mrb[103].mxu1 }
 0x23d   : > { %4136 = vst [vmem:[#allocation2 + $0x21] sm:$0xff] %v4083_v39  ;;  %v3249_v45 = vmax.f32 %v3247_v0, %v3248_v10  ;;  %v3261_v5 = vmax.f32 %v3259_v16, %v3260_v33  ;;  %v2286_v57 = vmax.f32 %v2186_v9, 0.0  ;;  %v2030_v25 = vadd.f32 %v11318_v6, %v13766_v2 }
 0x23e   : > { %v3243_v24 = vrot.slane %v3242_v8, 1  ;;  %v3256_v61 = vmax.f32 %v3254_v42, %v3255_v55  ;;  %v2033_v7 = vadd.f32 %v11321_v17, %v13794_v49  ;;  %v14140_v31 = vadd.f32 %v13978_v28, %v13975_v52 }
 0x23f   : > { %v3250_v60 = vrot.slane %v3249_v45, 1  ;;  %v3262_v11 = vrot.slane %v3261_v5, 2  ;;  %v2494_v51 = vcombine.high %v2286_v57, %v2286_v57  ;;  %v2501_v21 = vrot.slane %v2286_v57, %v13732_v38 }
 0x240   : > { %v14147_v2 = vmax.f32 %v3242_v8, %v3243_v24  ;;  %v3257_v47 = vrot.slane %v3256_v61, 1  ;;  %v2191_v35 = vadd.f32 %v13699_v23, %v2030_v25  ;;  %v2194_v49 = vadd.f32 %v13703_v63, %v2033_v7 }
 0x241   : > { %v14151_v58 = vmax.f32 %v3249_v45, %v3250_v60  ;;  %v3263_v52 = vmax.f32 %v3261_v5, %v3262_v11  ;;  %v2508_v28 = vrot.slane %v2494_v51, %v13732_v38  ;;  %v2509_v62 = vcombine.high %v2501_v21, %v2501_v21 }
 0x242   : > { %v14154_v40 = vmax.f32 %v3256_v61, %v3257_v47  ;;  %v3266_v27 = vsel %vm3013_vm7, %v2501_v21, -inf  ;;  %v2287_v50 = vmax.f32 %v2191_v35, 0.0  ;;  %v2288_v44 = vmax.f32 %v2194_v49, 0.0 }
 0x243   : > { %v3264_v43 = vrot.slane %v3263_v52, 1  ;;  %v2510_v30 = vcombine.high %v2508_v28, %v2508_v28  ;;  %v3267_v18 = vrot.slane %v3266_v27, 4  ;;  %v3273_v0 = vsel %vm3013_vm7, %v2509_v62, -inf }
 0x244   : > { %v3274_v23 = vrot.slane %v3273_v0, 4  ;;  %v3280_v63 = vsel %vm3013_vm7, %v2508_v28, -inf  ;;  %v2511_v16 = vcombine.high %v2287_v50, %v2287_v50  ;;  %v2518_v19 = vrot.slane %v2287_v50, %v13732_v38 }
 0x245   : > { %v14160_v56 = vmax.f32 %v3263_v52, %v3264_v43  ;;  %v3268_v34 = vmax.f32 %v3266_v27, %v3267_v18  ;;  %v3281_v15 = vrot.slane %v3280_v63, 4  ;;  %v3287_v42 = vsel %vm3013_vm7, %v2510_v30, -inf }
 0x246   : > { %v3275_v10 = vmax.f32 %v3273_v0, %v3274_v23  ;;  %v3288_v33 = vrot.slane %v3287_v42, 4  ;;  %v2525_v9 = vrot.slane %v2511_v16, %v13732_v38  ;;  %v2526_v6 = vcombine.high %v2518_v19, %v2518_v19 }
 0x247   : > { %v3269_v39 = vrot.slane %v3268_v34, 2  ;;  %v3282_v8 = vmax.f32 %v3280_v63, %v3281_v15  ;;  %v3294_v55 = vsel %vm3013_vm7, %v2518_v19, -inf  ;;  %v2528_v17 = vcombine.high %v2288_v44, %v2288_v44 }
 0x248   : > { %v3276_v45 = vrot.slane %v3275_v10, 2  ;;  %v3289_v5 = vmax.f32 %v3287_v42, %v3288_v33  ;;  %v2527_v57 = vcombine.high %v2525_v9, %v2525_v9  ;;  %v3295_v25 = vrot.slane %v3294_v55, 4 }
 0x249   : > { %v3270_v24 = vmax.f32 %v3268_v34, %v3269_v39  ;;  %v3283_v61 = vrot.slane %v3282_v8, 2  ;;  %v3301_v7 = vsel %vm3013_vm7, %v2526_v6, -inf  ;;  %v3308_v60 = vsel %vm3013_vm7, %v2525_v9, -inf }
 0x24a   : > { %v3277_v11 = vmax.f32 %v3275_v10, %v3276_v45  ;;  %v3290_v51 = vrot.slane %v3289_v5, 2  ;;  %v3296_v21 = vmax.f32 %v3294_v55, %v3295_v25  ;;  %v3302_v47 = vrot.slane %v3301_v7, 4 }
 0x24b   : > { %v3271_v35 = vrot.slane %v3270_v24, 1  ;;  %v3284_v49 = vmax.f32 %v3282_v8, %v3283_v61  ;;  %v3309_v52 = vrot.slane %v3308_v60, 4  ;;  %v3315_v28 = vsel %vm3013_vm7, %v2527_v57, -inf }
 0x24c   : > { %v3278_v62 = vrot.slane %v3277_v11, 1  ;;  %v3291_v27 = vmax.f32 %v3289_v5, %v3290_v51  ;;  %v3297_v50 = vrot.slane %v3296_v21, 2  ;;  %v3303_v43 = vmax.f32 %v3301_v7, %v3302_v47 }
 0x24d   : > { %v14168_v30 = vmax.f32 %v3270_v24, %v3271_v35  ;;  %v3285_v18 = vrot.slane %v3284_v49, 1  ;;  %v3310_v0 = vmax.f32 %v3308_v60, %v3309_v52  ;;  %v3316_v23 = vrot.slane %v3315_v28, 4 }
 0x24e   : > { %v14170_v63 = vmax.f32 %v3277_v11, %v3278_v62  ;;  %v3292_v16 = vrot.slane %v3291_v27, 1  ;;  %v3298_v19 = vmax.f32 %v3296_v21, %v3297_v50  ;;  %v3304_v34 = vrot.slane %v3303_v43, 2  ;;  %v14181_v21 = vpop.f32.mrb[104].mxu1 }
 0x24f   : > { %v14172_v15 = vmax.f32 %v3284_v49, %v3285_v18  ;;  %v3311_v42 = vrot.slane %v3310_v0, 2  ;;  %v3317_v10 = vmax.f32 %v3315_v28, %v3316_v23  ;;  %v2535_v33 = vrot.slane %v2288_v44, %v13732_v38  ;;  %v14184_v52 = vpop.f32.mrb[105].mxu1 }
 0x250   : > { %v14175_v9 = vmax.f32 %v3291_v27, %v3292_v16  ;;  %v3299_v6 = vrot.slane %v3298_v19, 1  ;;  %v3305_v39 = vmax.f32 %v3303_v43, %v3304_v34  ;;  %v2542_v8 = vrot.slane %v2528_v17, %v13732_v38 }
 0x251   : > { %v3312_v55 = vmax.f32 %v3310_v0, %v3311_v42  ;;  %v3318_v45 = vrot.slane %v3317_v10, 2  ;;  %v2543_v5 = vcombine.high %v2535_v33, %v2535_v33  ;;  %v3322_v57 = vsel %vm3013_vm7, %v2535_v33, -inf }
 0x252   : > { %v3300_v25 = vmax.f32 %v3298_v19, %v3299_v6  ;;  %v3306_v24 = vrot.slane %v3305_v39, 1  ;;  %v2544_v61 = vcombine.high %v2542_v8, %v2542_v8  ;;  %v3323_v7 = vrot.slane %v3322_v57, 4 }
 0x253   : > { %v3313_v60 = vrot.slane %v3312_v55, 1  ;;  %v3319_v11 = vmax.f32 %v3317_v10, %v3318_v45  ;;  %v3329_v51 = vsel %vm3013_vm7, %v2543_v5, -inf  ;;  %v3336_v44 = vsel %vm3013_vm7, %v2542_v8, -inf }
 0x254   : > { %v3307_v47 = vmax.f32 %v3305_v39, %v3306_v24  ;;  %v3926_v17 = vmax.f32 %v14147_v2, %v3300_v25  ;;  %v3324_v35 = vmax.f32 %v3322_v57, %v3323_v7  ;;  %v3330_v49 = vrot.slane %v3329_v51, 4 }
 0x255   : > { %v3314_v28 = vmax.f32 %v3312_v55, %v3313_v60  ;;  %v3320_v62 = vrot.slane %v3319_v11, 1  ;;  %v3337_v27 = vrot.slane %v3336_v44, 4  ;;  %v3343_v50 = vsel %vm3013_vm7, %v2544_v61, -inf }
 0x256   : > { %v3927_v43 = vmax.f32 %v14151_v58, %v3307_v47  ;;  %v3325_v18 = vrot.slane %v3324_v35, 2  ;;  %v3331_v0 = vmax.f32 %v3329_v51, %v3330_v49  ;;  %v3344_v23 = vrot.slane %v3343_v50, 4 }
 0x257   : > { %v3321_v16 = vmax.f32 %v3319_v11, %v3320_v62  ;;  %v3928_v19 = vmax.f32 %v14154_v40, %v3314_v28  ;;  %v3338_v34 = vmax.f32 %v3336_v44, %v3337_v27  ;;  %v11327_v2 = vadd.f32 %v13986_v26, %v13981_v36 }
 0x258   : > { %v4084_v42 = vsel %vm4063_vm8, %v3927_v43, %v3926_v17  ;;  %v3326_v10 = vmax.f32 %v3324_v35, %v3325_v18  ;;  %v3332_v33 = vrot.slane %v3331_v0, 2  ;;  %v3345_v6 = vmax.f32 %v3343_v50, %v3344_v23  ;;  %v17226_v35 = vld [vmem:[#allocation30_spill] sm:$0xff] }
 0x259   : > { %v3929_v39 = vmax.f32 %v14160_v56, %v3321_v16  ;;  %v4085_v8 = vsel %vm4065_vm9, %v3928_v19, %v4084_v42  ;;  %v3339_v58 = vrot.slane %v3338_v34, 2  ;;  %v2038_v55 = vadd.f32 %v14140_v31, %v13798_v32 }
 0x25a   : > { %v3327_v45 = vrot.slane %v3326_v10, 1  ;;  %v3333_v5 = vmax.f32 %v3331_v0, %v3332_v33  ;;  %v3346_v40 = vrot.slane %v3345_v6, 2  ;;  %v2041_v57 = vadd.f32 %v11327_v2, %v13802_v1 }
 0x25b   : > { %v3340_v25 = vmax.f32 %v3338_v34, %v3339_v58  ;;  %v4086_v36 = vsel %vm4067_vm10, %v3929_v39, %v4085_v8  ;;  %v2199_v26 = vadd.f32 %v13729_v14, %v2038_v55  ;;  %v11330_v24 = vadd.f32 %v14001_v37, %v13998_v59 }
 0x25c   : > { %v3328_v56 = vmax.f32 %v3326_v10, %v3327_v45  ;;  %v3334_v61 = vrot.slane %v3333_v5, 1  ;;  %v3347_v7 = vmax.f32 %v3345_v6, %v3346_v40  ;;  %v2202_v60 = vadd.f32 %v13746_v3, %v2041_v57 }
 0x25d   : > { %v3341_v11 = vrot.slane %v3340_v25, 1  ;;  %v2289_v32 = vmax.f32 %v2199_v26, 0.0  ;;  %v2046_v31 = vadd.f32 %v11330_v24, %v13806_v46  ;;  %v14205_v1 = vadd.f32 %v14009_v41, %v14005_v13 }
 0x25e   : > { %v3335_v51 = vmax.f32 %v3333_v5, %v3334_v61  ;;  %v3348_v44 = vrot.slane %v3347_v7, 1  ;;  %v3930_v14 = vmax.f32 %v14168_v30, %v3328_v56  ;;  %v2290_v47 = vmax.f32 %v2202_v60, 0.0 }
 0x25f   : > { %v3342_v17 = vmax.f32 %v3340_v25, %v3341_v11  ;;  %v2545_v59 = vcombine.high %v2289_v32, %v2289_v32  ;;  %v2552_v37 = vrot.slane %v2289_v32, %v13732_v38  ;;  %v2207_v49 = vadd.f32 %v17226_v35, %v2046_v31 }
 0x260   : > { %v3349_v3 = vmax.f32 %v3347_v7, %v3348_v44  ;;  %v3931_v28 = vmax.f32 %v14170_v63, %v3335_v51  ;;  %v4087_v46 = vsel %vm4069_vm11, %v3930_v14, %v4086_v36  ;;  %v2562_v62 = vcombine.high %v2290_v47, %v2290_v47 }
 0x261   : > { %v3932_v13 = vmax.f32 %v14172_v15, %v3342_v17  ;;  %v2559_v41 = vrot.slane %v2545_v59, %v13732_v38  ;;  %v2560_v27 = vcombine.high %v2552_v37, %v2552_v37  ;;  %v3350_v30 = vsel %vm3013_vm7, %v2552_v37, -inf }
 0x262   : > { %v3933_v50 = vmax.f32 %v14175_v9, %v3349_v3  ;;  %v4088_v43 = vsel %vm4071_vm12, %v3931_v28, %v4087_v46  ;;  %v3351_v18 = vrot.slane %v3350_v30, 4  ;;  %v2569_v0 = vrot.slane %v2290_v47, %v13732_v38 }
 0x263   : > { %v4089_v23 = vsel %vm4073_vm13, %v3932_v13, %v4088_v43  ;;  %v2561_v63 = vcombine.high %v2559_v41, %v2559_v41  ;;  %v3357_v16 = vsel %vm3013_vm7, %v2560_v27, -inf  ;;  %v3364_v19 = vsel %vm3013_vm7, %v2559_v41, -inf  ;;  %v14230_v41 = vpop.f32.mrb[106].mxu1  ;;  %v14232_v27 = vpop.f32.mrb[32].mxu0 }
 0x264   : > { %v4090_v15 = vsel %vm4075_vm14, %v3933_v50, %v4089_v23  ;;  %v3352_v34 = vmax.f32 %v3350_v30, %v3351_v18  ;;  %v3358_v2 = vrot.slane %v3357_v16, 4  ;;  %v3365_v42 = vrot.slane %v3364_v19, 4  ;;  %v14240_v23 = vpop.f32.mrb[33].mxu0 }
 0x265   : > { %4137 = vst [vmem:[#allocation2 + $0x31] sm:$0xff] %v4090_v15  ;;  %v3371_v9 = vsel %vm3013_vm7, %v2561_v63, -inf  ;;  %v2576_v10 = vrot.slane %v2562_v62, %v13732_v38  ;;  %v2577_v33 = vcombine.high %v2569_v0, %v2569_v0  ;;  %v3378_v6 = vsel %vm3013_vm7, %v2569_v0, -inf  ;;  %v14238_v0 = vpop.f32.mrb[107].mxu1 }
 0x266   : > { %v3353_v39 = vrot.slane %v3352_v34, 2  ;;  %v3359_v8 = vmax.f32 %v3357_v16, %v3358_v2  ;;  %v3366_v58 = vmax.f32 %v3364_v19, %v3365_v42  ;;  %v3372_v55 = vrot.slane %v3371_v9, 4 }
 0x267   : > { %v2578_v45 = vcombine.high %v2576_v10, %v2576_v10  ;;  %v3379_v5 = vrot.slane %v3378_v6, 4  ;;  %v3385_v40 = vsel %vm3013_vm7, %v2577_v33, -inf  ;;  %v3392_v57 = vsel %vm3013_vm7, %v2576_v10, -inf }
 0x268   : > { %v3354_v25 = vmax.f32 %v3352_v34, %v3353_v39  ;;  %v3360_v36 = vrot.slane %v3359_v8, 2  ;;  %v3367_v26 = vrot.slane %v3366_v58, 2  ;;  %v3373_v24 = vmax.f32 %v3371_v9, %v3372_v55  ;;  %v17227_v9 = vld [vmem:[#allocation5_spill] sm:$0xff] }
 0x269   : > { %v3380_v56 = vmax.f32 %v3378_v6, %v3379_v5  ;;  %v3386_v61 = vrot.slane %v3385_v40, 4  ;;  %v3393_v7 = vrot.slane %v3392_v57, 4  ;;  %v3399_v60 = vsel %vm3013_vm7, %v2578_v45, -inf  ;;  %v17228_v45 = vld [vmem:[#allocation35_spill] sm:$0xff] }
 0x26a   : > { %v3355_v11 = vrot.slane %v3354_v25, 1  ;;  %v3361_v32 = vmax.f32 %v3359_v8, %v3360_v36  ;;  %v3368_v31 = vmax.f32 %v3366_v58, %v3367_v26  ;;  %v3374_v51 = vrot.slane %v3373_v24, 2 }
 0x26b   : > { %v3381_v44 = vrot.slane %v3380_v56, 2  ;;  %v3387_v14 = vmax.f32 %v3385_v40, %v3386_v61  ;;  %v3394_v47 = vmax.f32 %v3392_v57, %v3393_v7  ;;  %v3400_v17 = vrot.slane %v3399_v60, 4  ;;  %v14258_v61 = vpop.f32.mrb[34].mxu0 }
 0x26c   : > { %v14228_v59 = vmax.f32 %v3354_v25, %v3355_v11  ;;  %v3362_v37 = vrot.slane %v3361_v32, 1  ;;  %v3369_v35 = vrot.slane %v3368_v31, 1  ;;  %v3375_v3 = vmax.f32 %v3373_v24, %v3374_v51  ;;  %v14264_v51 = vpop.f32.mrb[35].mxu0 }
 0x26d   : > { %v3382_v28 = vmax.f32 %v3380_v56, %v3381_v44  ;;  %v3388_v46 = vrot.slane %v3387_v14, 2  ;;  %v3395_v62 = vrot.slane %v3394_v47, 2  ;;  %v3401_v13 = vmax.f32 %v3399_v60, %v3400_v17  ;;  %v11780_v44 = vld [vmem:[%s17067_s3 + $0x104] ss:$8 sps:$4 sm:$0xff]  }
 0x26e   : > { %v14234_v30 = vmax.f32 %v3361_v32, %v3362_v37  ;;  %v14236_v50 = vmax.f32 %v3368_v31, %v3369_v35  ;;  %v3376_v43 = vrot.slane %v3375_v3, 1  ;;  %v2291_v18 = vmax.f32 %v2207_v49, 0.0  ;;  %v14262_v31 = vld [vmem:[#allocation2] sm:$0xff]  ;;  %v17229_v37 = vld [vmem:[#allocation14_spill] sm:$0xff]  ;;  %5426 = vmatprep.subr.bf16.mxu1 %v11780_v44 }
 0x26f   : > { %v3383_v63 = vrot.slane %v3382_v28, 1  ;;  %v3389_v16 = vmax.f32 %v3387_v14, %v3388_v46  ;;  %v3396_v19 = vmax.f32 %v3394_v47, %v3395_v62  ;;  %v3402_v15 = vrot.slane %v3401_v13, 2  ;;  %v17230_v35 = vld [vmem:[#allocation16_spill] sm:$0xff] }
 0x270   : > { %v14242_v34 = vmax.f32 %v3375_v3, %v3376_v43  ;;  %v2579_v2 = vcombine.high %v2291_v18, %v2291_v18  ;;  %v2586_v42 = vrot.slane %v2291_v18, %v13732_v38  ;;  %v2049_v10 = vadd.f32 %v14205_v1, %v17227_v9 }
 0x271   : > { %v14247_v33 = vmax.f32 %v3382_v28, %v3383_v63  ;;  %v3390_v6 = vrot.slane %v3389_v16, 1  ;;  %v3397_v49 = vrot.slane %v3396_v19, 1  ;;  %v3403_v39 = vmax.f32 %v3401_v13, %v3402_v15  ;;  %v14275_v28 = vpop.f32.mrb[108].mxu1 }
 0x272   : > { %v2593_v8 = vrot.slane %v2579_v2, %v13732_v38  ;;  %v2594_v58 = vcombine.high %v2586_v42, %v2586_v42  ;;  %v3406_v55 = vsel %vm3013_vm7, %v2586_v42, -inf  ;;  %v2210_v5 = vadd.f32 %v17228_v45, %v2049_v10  ;;  %v14277_v18 = vpop.f32.mrb[109].mxu1 }
 0x273   : > { %v14252_v40 = vmax.f32 %v3389_v16, %v3390_v6  ;;  %v14254_v57 = vmax.f32 %v3396_v19, %v3397_v49  ;;  %v3404_v25 = vrot.slane %v3403_v39, 1  ;;  %v3407_v36 = vrot.slane %v3406_v55, 4  ;;  %v14285_v2 = vpop.f32.mrb[110].mxu1 }
 0x274   : > { %v2595_v26 = vcombine.high %v2593_v8, %v2593_v8  ;;  %v3413_v1 = vsel %vm3013_vm7, %v2594_v58, -inf  ;;  %v3420_v24 = vsel %vm3013_vm7, %v2593_v8, -inf  ;;  %v2292_v56 = vmax.f32 %v2210_v5, 0.0  ;;  %v14287_v49 = vpop.f32.mrb[111].mxu1 }
 0x275   : > { %v14260_v7 = vmax.f32 %v3403_v39, %v3404_v25  ;;  %v3408_v60 = vmax.f32 %v3406_v55, %v3407_v36  ;;  %v3414_v11 = vrot.slane %v3413_v1, 4  ;;  %v3421_v32 = vrot.slane %v3420_v24, 4 }
 0x276   : > { %v3427_v14 = vsel %vm3013_vm7, %v2595_v26, -inf  ;;  %v2596_v47 = vcombine.high %v2292_v56, %v2292_v56  ;;  %v2603_v17 = vrot.slane %v2292_v56, %v13732_v38  ;;  %v14273_v3 = vadd.f32 %v17230_v35, %v17229_v37  ;;  %v4144_v35 = vld [vmem:[#allocation2 + $0x8] sm:$0x3] }
 0x277   : > { %v3409_v46 = vrot.slane %v3408_v60, 2  ;;  %v3415_v62 = vmax.f32 %v3413_v1, %v3414_v11  ;;  %v3422_v13 = vmax.f32 %v3420_v24, %v3421_v32  ;;  %v3428_v43 = vrot.slane %v3427_v14, 4 }
 0x278   : > { %v2610_v63 = vrot.slane %v2596_v47, %v13732_v38  ;;  %v2611_v16 = vcombine.high %v2603_v17, %v2603_v17  ;;  %v3434_v19 = vsel %vm3013_vm7, %v2603_v17, -inf  ;;  %v14283_v15 = vpack.c.bf16 %v14262_v31, %v14262_v31 }
 0x279   : > { %v3410_v42 = vmax.f32 %v3408_v60, %v3409_v46  ;;  %v3416_v9 = vrot.slane %v3415_v62, 2  ;;  %v3423_v10 = vrot.slane %v3422_v13, 2  ;;  %v3429_v6 = vmax.f32 %v3427_v14, %v3428_v43  ;;  %v14292_v46 = vpop.f32.mrb[112].mxu1 }
 0x27a   : > { %17231 = vst [vmem:[#allocation30_spill] sm:$0xff] %v14283_v15  ;;  %v2612_v39 = vcombine.high %v2610_v63, %v2610_v63  ;;  %v3435_v8 = vrot.slane %v3434_v19, 4  ;;  %v3441_v58 = vsel %vm3013_vm7, %v2611_v16, -inf  ;;  %v3448_v55 = vsel %vm3013_vm7, %v2610_v63, -inf  ;;  %v14295_v16 = vpop.f32.mrb[113].mxu1 }
 0x27b   : > { %v3411_v45 = vrot.slane %v3410_v42, 1  ;;  %v3417_v5 = vmax.f32 %v3415_v62, %v3416_v9  ;;  %v3424_v25 = vmax.f32 %v3422_v13, %v3423_v10  ;;  %v3430_v36 = vrot.slane %v3429_v6, 2 }
 0x27c   : > { %v3436_v26 = vmax.f32 %v3434_v19, %v3435_v8  ;;  %v3442_v1 = vrot.slane %v3441_v58, 4  ;;  %v3449_v24 = vrot.slane %v3448_v55, 4  ;;  %v3455_v56 = vsel %vm3013_vm7, %v2612_v39, -inf  ;;  %v14297_v39 = vld [vmem:[#allocation2 + $0x10] sm:$0xff]  ;;  %v14299_v8 = vpop.f32.mrb[114].mxu1 }
 0x27d   : > { %v3412_v60 = vmax.f32 %v3410_v42, %v3411_v45  ;;  %v3418_v11 = vrot.slane %v3417_v5, 1  ;;  %v3425_v32 = vrot.slane %v3424_v25, 1  ;;  %v3431_v44 = vmax.f32 %v3429_v6, %v3430_v36  ;;  %v4146_v6 = vld [vmem:[#allocation2 + $0x18] sm:$0x3] }
 0x27e   : > { %v3437_v14 = vrot.slane %v3436_v26, 2  ;;  %v3443_v47 = vmax.f32 %v3441_v58, %v3442_v1  ;;  %v3450_v17 = vmax.f32 %v3448_v55, %v3449_v24  ;;  %v3456_v37 = vrot.slane %v3455_v56, 4  ;;  %v14307_v24 = vpop.f32.mrb[36].mxu0 }
 0x27f   : > { %v3419_v43 = vmax.f32 %v3417_v5, %v3418_v11  ;;  %v3426_v62 = vmax.f32 %v3424_v25, %v3425_v32  ;;  %v3432_v13 = vrot.slane %v3431_v44, 1  ;;  %v3934_v63 = vmax.f32 %v14228_v59, %v3412_v60  ;;  %v14305_v25 = vpop.f32.mrb[115].mxu1  ;;  %17233 = vst [vmem:[#allocation35_spill] sm:$0xff] %v14307_v24 }
 0x280   : > { %v3438_v19 = vmax.f32 %v3436_v26, %v3437_v14  ;;  %v3444_v9 = vrot.slane %v3443_v47, 2  ;;  %v3451_v42 = vrot.slane %v3450_v17, 2  ;;  %v3457_v10 = vmax.f32 %v3455_v56, %v3456_v37 }
 0x281   : > { %v3433_v58 = vmax.f32 %v3431_v44, %v3432_v13  ;;  %v3935_v55 = vmax.f32 %v14234_v30, %v3419_v43  ;;  %v3936_v45 = vmax.f32 %v14236_v50, %v3426_v62  ;;  %v14303_v5 = vpack.c.bf16 %v4144_v35, %v4144_v35  ;;  %v14317_v50 = vpop.f32.mrb[37].mxu0 }
 0x282   : > { %v3439_v59 = vrot.slane %v3438_v19, 1  ;;  %v3445_v36 = vmax.f32 %v3443_v47, %v3444_v9  ;;  %v3452_v26 = vmax.f32 %v3450_v17, %v3451_v42  ;;  %v3458_v1 = vrot.slane %v3457_v10, 2 }
 0x283   : > { %17232 = vst [vmem:[#allocation5_spill] sm:$0xff] %v14303_v5  ;;  %v3937_v56 = vmax.f32 %v14242_v34, %v3433_v58  ;;  %v4091_v60 = vsel %vm4063_vm8, %v3935_v55, %v3934_v63  ;;  %v14313_v11 = vpack.c.bf16 %v14297_v39, %v14297_v39  ;;  %v14315_v30 = vpack.c.bf16 %v4146_v6, %v4146_v6 }
 0x284   : > { %v4092_v32 = vsel %vm4065_vm9, %v3936_v45, %v4091_v60  ;;  %v3440_v44 = vmax.f32 %v3438_v19, %v3439_v59  ;;  %v3446_v14 = vrot.slane %v3445_v36, 1  ;;  %v3453_v47 = vrot.slane %v3452_v26, 1  ;;  %v14329_v59 = vpop.f32.mrb[38].mxu0  ;;  %v17237_v60 = vld [vmem:[#allocation25_spill] sm:$0xff] }
 0x285   : > { %17234 = vst [vmem:[#allocation14_spill] sm:$0xff] %v14313_v11  ;;  %17235 = vst [vmem:[#allocation16_spill] sm:$0xff] %v14315_v30  ;;  %v3459_v17 = vmax.f32 %v3457_v10, %v3458_v1  ;;  %v4093_v37 = vsel %vm4067_vm10, %v3937_v56, %v4092_v32  ;;  %v4214_v34 = vshrl.u32 %v14283_v15, 16  ;;  %v4217_v35 = vshll.u32 %v14283_v15, 16  ;;  %v14335_v56 = vld [vmem:[%s17066_s2] ss:$0 sm:$0xff] }
 0x286   : > { %v3447_v43 = vmax.f32 %v3445_v36, %v3446_v14  ;;  %v3454_v62 = vmax.f32 %v3452_v26, %v3453_v47  ;;  %v3938_v13 = vmax.f32 %v14247_v33, %v3440_v44  ;;  %v4223_v63 = vshll.u32 %v14303_v5, 16  ;;  %17236 = vst [vmem:[#allocation43_spill] sm:$0xff] %v14329_v59 }
 0x287   : > { %v3460_v9 = vrot.slane %v3459_v17, 1  ;;  %v4216_v42 = vrot.slane %v4214_v34, 4  ;;  %v4219_v6 = vrot.slane %v4217_v35, 5  ;;  %v4228_v19 = vshrl.u32 %v14313_v11, 16 }
 0x288   : > { %v3939_v58 = vmax.f32 %v14252_v40, %v3447_v43  ;;  %v3940_v10 = vmax.f32 %v14254_v57, %v3454_v62  ;;  %v4094_v55 = vsel %vm4069_vm11, %v3938_v13, %v4093_v37  ;;  %v4225_v45 = vrot.slane %v4223_v63, 5  ;;  %v17238_v57 = vld [vmem:[#allocation22_spill] sm:$0xff]  ;;  %v17241_v13 = vld [vmem:[#allocation21_spill] sm:$0xff] }
 0x289   : > { %v3461_v36 = vmax.f32 %v3459_v17, %v3460_v9  ;;  %v4220_v26 = vor.u32 %v4219_v6, %v4216_v42  ;;  %v4230_v1 = vrot.slane %v4228_v19, 4  ;;  %v4231_v33 = vshll.u32 %v14313_v11, 16  ;;  %v17240_v62 = vld [vmem:[#allocation18_spill] sm:$0xff] }
 0x28a   : > { %v14339_v40 = vadd.f32 %v14335_v56, %v17237_v60  ;;  %v14343_v32 = vadd.f32 %v14335_v56, %v17238_v57  ;;  %v4095_v44 = vsel %vm4071_vm12, %v3939_v58, %v4094_v55  ;;  %v4237_v14 = vshll.u32 %v14315_v30, 16  ;;  %v17242_v9 = vld [vmem:[#allocation6_spill] sm:$0xff]  ;;  %v17244_v55 = vld [vmem:[#allocation32_spill] sm:$0xff] }
 0x28b   : > { %v3941_v47 = vmax.f32 %v14260_v7, %v3461_v36  ;;  %v4096_v17 = vsel %vm4073_vm13, %v3940_v10, %v4095_v44  ;;  %v4221_v37 = vrot.slane %v4220_v26, 4  ;;  %v4233_v34 = vrot.slane %v4231_v33, 5  ;;  %v17245_v10 = vld [vmem:[#allocation34_spill] sm:$0xff]  ;;  %v14360_v26 = vpop.f32.mrb[39].mxu0  ;;  %v17247_v33 = vld [vmem:[#allocation12_spill] sm:$0xff] }
 0x28c   : > { %17239 = vst [vmem:[#allocation25_spill] sm:$0xff] %v14343_v32  ;;  %v4239_v35 = vrot.slane %v4237_v14, 5  ;;  %v11149_v43 = vpack.c.bf16 %v14297_v39, %v14262_v31  ;;  %v11339_v63 = vadd.f32 %v17241_v13, %v17240_v62  ;;  %v2054_v42 = vadd.f32 %v14273_v3, %v17242_v9  ;;  %17246 = vst [vmem:[#allocation22_spill] sm:$0xff] %v14360_v26  ;;  %v17248_v39 = vld [vmem:[#allocation9_spill] sm:$0xff]  ;;  %v17249_v57 = vld [vmem:[#allocation36_spill] sm:$0xff] }
 0x28d   : > { %v4097_v6 = vsel %vm4075_vm14, %v3941_v47, %v4096_v17  ;;  %v4226_v58 = vsel %vm12596_vm2, %v4221_v37, %v4225_v45  ;;  %v4234_v7 = vor.u32 %v4233_v34, %v4230_v1  ;;  %v11342_v36 = vadd.f32 %v17245_v10, %v17244_v55  ;;  %v17250_v44 = vld [vmem:[#allocation38_spill] sm:$0xff]  ;;  %v17251_v3 = vld [vmem:[#allocation39_spill] sm:$0xff]  ;;  %v17252_v62 = vld [vmem:[#allocation40_spill] sm:$0xff] }
 0x28e   : > { %4138 = vst [vmem:[#allocation2 + $0x41] sm:$0xff] %v4097_v6  ;;  %v2215_v31 = vadd.f32 %v17247_v33, %v2054_v42  ;;  %v2057_v60 = vadd.f32 %v11339_v63, %v17248_v39  ;;  %v11345_v14 = vadd.f32 %v17250_v44, %v17249_v57  ;;  %v11348_v47 = vadd.f32 %v17252_v62, %v17251_v3  ;;  %v17253_v13 = vld [vmem:[#allocation11_spill] sm:$0xff]  ;;  %v17254_v9 = vld [vmem:[#allocation28_spill] sm:$0xff]  ;;  %v17255_v6 = vld [vmem:[#allocation13_spill] sm:$0xff] }
 0x28f   : > { %v4235_v17 = vrot.slane %v4234_v7, 4  ;;  %v2062_v45 = vadd.f32 %v11342_v36, %v17253_v13  ;;  %v11351_v1 = vadd.f32 %v14096_v54, %v14092_v22  ;;  %v11354_v37 = vadd.f32 %v14135_v4, %v14132_v12  ;;  %v17256_v55 = vld [vmem:[#allocation15_spill] sm:$0xff]  ;;  %v17258_v7 = vld [vmem:[#allocation10_spill] sm:$0xff]  ;;  %v17259_v36 = vld [vmem:[#allocation17_spill] sm:$0xff]  ;;  %v14404_v13 = vpop.f32.mrb[116].mxu1 }
 0x290   : > { %v2293_v34 = vmax.f32 %v2215_v31, 0.0  ;;  %v2218_v42 = vadd.f32 %v17254_v9, %v2057_v60  ;;  %v2065_v63 = vadd.f32 %v11345_v14, %v17255_v6  ;;  %v2070_v10 = vadd.f32 %v11348_v47, %v17256_v55  ;;  %v17260_v44 = vld [vmem:[#allocation19_spill] sm:$0xff]  ;;  %v11778_v60 = vld [vmem:[%s17067_s3 + $0x100] ss:$8 sps:$4 sm:$0xff]   ;;  %v17262_v62 = vld [vmem:[#allocation42_spill] sm:$0xff]  ;;  %17263 = vst [vmem:[#allocation21_spill] sm:$0xff] %v14404_v13 }
 0x291   : > { %v14378_v33 = vsel %vm12596_vm2, %v4235_v17, %v4239_v35  ;;  %v2223_v39 = vadd.f32 %v17258_v7, %v2062_v45  ;;  %v2073_v57 = vadd.f32 %v11351_v1, %v17259_v36  ;;  %v14383_v22 = vadd.f32 %v11354_v37, %v17260_v44  ;;  %v17261_v35 = vld [vmem:[#allocation24_spill] sm:$0xff]  ;;  %v14408_v9 = vpop.f32.mrb[117].mxu1  ;;  %v11937_v19 = vld [vmem:[%s17067_s3 + $0x450] ss:$8 sps:$4 sm:$0xff]  }
 0x292   : > { %17257 = vst [vmem:[#allocation18_spill] sm:$0xff] %v14378_v33  ;;  %v10592_v54 = vcombine.low %v4226_v58, %v14378_v33  ;;  %v2613_v12 = vcombine.high %v2293_v34, %v2293_v34  ;;  %v2620_v4 = vrot.slane %v2293_v34, %v13732_v38  ;;  %v2294_v31 = vmax.f32 %v2218_v42, 0.0  ;;  %v11783_v58 = vld [vmem:[%s17067_s3 + $0x114] ss:$8 sps:$4 sm:$0xff]   ;;  %17264 = vst [vmem:[#allocation6_spill] sm:$0xff] %v14408_v9  ;;  %v14423_v36 = vpop.f32.mrb[118].mxu1 }
 0x293   : > { %v14390_v14 = vmax.f32 %v2223_v39, 0.0  ;;  %v14393_v3 = vadd.f32 %v17261_v35, %v2065_v63  ;;  %v14396_v47 = vadd.f32 %v17262_v62, %v2070_v10  ;;  %v14399_v17 = vadd.f32 %v14103_v20, %v2073_v57  ;;  %17265 = vst [vmem:[#allocation7_spill] sm:$0xff] %v14423_v36 }
 0x294   : > { %5385 = vmatprep.mubr.bf16.mxu1 %v10592_v54  ;;  %v2627_v45 = vrot.slane %v2613_v12, %v13732_v38  ;;  %v2628_v1 = vcombine.high %v2620_v4, %v2620_v4  ;;  %v3462_v37 = vsel %vm3013_vm7, %v2620_v4, -inf  ;;  %v2630_v34 = vcombine.high %v2294_v31, %v2294_v31  ;;  %v11786_v4 = vld [vmem:[%s17067_s3 + $0x124] ss:$8 sps:$4 sm:$0xff]  }
 0x295   : > { %5386 = vmatmul.mubr.bf16.vlgmr.msra.gmra.mrb[120].mxu1 %v11149_v43  ;;  %v3463_v42 = vrot.slane %v3462_v37, 4  ;;  %v2637_v20 = vrot.slane %v2294_v31, %v13732_v38  ;;  %v14415_v63 = vrot.slane %v14390_v14, %v13732_v38  ;;  %v11781_v43 = vld [vmem:[%s17067_s3 + $0x110] ss:$8 sps:$4 sm:$0xff]   ;;  %v14428_v31 = vpop.f32.mrb[119].mxu1 }
 0x296   : > { %v2629_v55 = vcombine.high %v2627_v45, %v2627_v45  ;;  %v3469_v10 = vsel %vm3013_vm7, %v2628_v1, -inf  ;;  %v3476_v7 = vsel %vm3013_vm7, %v2627_v45, -inf  ;;  %v2644_v39 = vrot.slane %v2630_v34, %v13732_v38  ;;  %5427 = vmatpush1.bf16.msra.mxu1 %v11778_v60  ;;  %17266 = vst [vmem:[#allocation32_spill] sm:$0xff] %v14428_v31 }
 0x297   : > { %v3464_v57 = vmax.f32 %v3462_v37, %v3463_v42  ;;  %v3470_v44 = vrot.slane %v3469_v10, 4  ;;  %v3477_v54 = vrot.slane %v3476_v7, 4  ;;  %v2645_v12 = vcombine.high %v2637_v20, %v2637_v20  ;;  %5428 = vmatprep.subr.bf16.mxu1 %v11783_v58 }
 0x298   : > { %v3483_v35 = vsel %vm3013_vm7, %v2629_v55, -inf  ;;  %v2646_v60 = vcombine.high %v2644_v39, %v2644_v39  ;;  %v3490_v62 = vsel %vm3013_vm7, %v2637_v20, -inf  ;;  %v3504_v45 = vsel %vm3013_vm7, %v2644_v39, -inf  ;;  %v11784_v55 = vld [vmem:[%s17067_s3 + $0x120] ss:$8 sps:$4 sm:$0xff]  }
 0x299   : > { %v3465_v1 = vrot.slane %v3464_v57, 2  ;;  %v3471_v34 = vmax.f32 %v3469_v10, %v3470_v44  ;;  %v3478_v37 = vmax.f32 %v3476_v7, %v3477_v54  ;;  %v3484_v42 = vrot.slane %v3483_v35, 4  ;;  %v11789_v10 = vld [vmem:[%s17067_s3 + $0x134] ss:$8 sps:$4 sm:$0xff]  }
 0x29a   : > { %v3491_v6 = vrot.slane %v3490_v62, 4  ;;  %v3497_v58 = vsel %vm3013_vm7, %v2645_v12, -inf  ;;  %v3505_v33 = vrot.slane %v3504_v45, 4  ;;  %v3511_v11 = vsel %vm3013_vm7, %v2646_v60, -inf  ;;  %5429 = vmatpush1.bf16.msra.mxu1 %v11781_v43 }
 0x29b   : > { %v3466_v15 = vmax.f32 %v3464_v57, %v3465_v1  ;;  %v3472_v59 = vrot.slane %v3471_v34, 2  ;;  %v3479_v20 = vrot.slane %v3478_v37, 2  ;;  %v3485_v30 = vmax.f32 %v3483_v35, %v3484_v42  ;;  %5430 = vmatprep.subr.bf16.mxu1 %v11786_v4  ;;  %v11787_v4 = vld [vmem:[%s17067_s3 + $0x130] ss:$8 sps:$4 sm:$0xff]  }
 0x29c   : > { %v3492_v7 = vmax.f32 %v3490_v62, %v3491_v6  ;;  %v3498_v39 = vrot.slane %v3497_v58, 4  ;;  %v3506_v44 = vmax.f32 %v3504_v45, %v3505_v33  ;;  %v3512_v54 = vrot.slane %v3511_v11, 4 }
 0x29d   : > { %v3467_v12 = vrot.slane %v3466_v15, 1  ;;  %v3473_v60 = vmax.f32 %v3471_v34, %v3472_v59  ;;  %v3480_v43 = vmax.f32 %v3478_v37, %v3479_v20  ;;  %v3486_v24 = vrot.slane %v3485_v30, 2  ;;  %v11792_v59 = vld [vmem:[%s17067_s3 + $0x144] ss:$8 sps:$4 sm:$0xff]  }
 0x29e   : > { %v3493_v5 = vrot.slane %v3492_v7, 2  ;;  %v3499_v32 = vmax.f32 %v3497_v58, %v3498_v39  ;;  %v3507_v31 = vrot.slane %v3506_v44, 2  ;;  %v3513_v57 = vmax.f32 %v3511_v11, %v3512_v54  ;;  %5431 = vmatpush1.bf16.msra.mxu1 %v11784_v55 }
 0x29f   : > { %v14444_v35 = vmax.f32 %v3466_v15, %v3467_v12  ;;  %v3474_v1 = vrot.slane %v3473_v60, 1  ;;  %v3481_v6 = vrot.slane %v3480_v43, 1  ;;  %v3487_v62 = vmax.f32 %v3485_v30, %v3486_v24  ;;  %5432 = vmatprep.subr.bf16.mxu1 %v11789_v10 }
 0x2a0   : > { %v3494_v33 = vmax.f32 %v3492_v7, %v3493_v5  ;;  %v3500_v45 = vrot.slane %v3499_v32, 2  ;;  %v3508_v34 = vmax.f32 %v3506_v44, %v3507_v31  ;;  %v3514_v37 = vrot.slane %v3513_v57, 2  ;;  %v11790_v5 = vld [vmem:[%s17067_s3 + $0x140] ss:$8 sps:$4 sm:$0xff]  }
 0x2a1   : > { %v14449_v11 = vmax.f32 %v3473_v60, %v3474_v1  ;;  %v14451_v42 = vmax.f32 %v3480_v43, %v3481_v6  ;;  %v3488_v58 = vrot.slane %v3487_v62, 1  ;;  %v17267_v15 = vcombine.high %v14390_v14, %v14390_v14 }
 0x2a2   : > { %v3495_v24 = vrot.slane %v3494_v33, 1  ;;  %v3501_v30 = vmax.f32 %v3499_v32, %v3500_v45  ;;  %v3509_v20 = vrot.slane %v3508_v34, 1  ;;  %v3515_v10 = vmax.f32 %v3513_v57, %v3514_v37  ;;  %5433 = vmatpush1.bf16.msra.mxu1 %v11787_v4  ;;  %v11795_v32 = vld [vmem:[%s17067_s3 + $0x154] ss:$8 sps:$4 sm:$0xff]  }
 0x2a3   : > { %v2661_v55 = vrot.slane %v17267_v15, %v13732_v38  ;;  %v14460_v31 = vmax.f32 %v3487_v62, %v3488_v58  ;;  %v2662_v7 = vcombine.high %v14415_v63, %v14415_v63  ;;  %v3518_v44 = vsel %vm3013_vm7, %v14415_v63, -inf  ;;  %5434 = vmatprep.subr.bf16.mxu1 %v11792_v59 }
 0x2a4   : > { %v14469_v14 = vmax.f32 %v3494_v33, %v3495_v24  ;;  %v3502_v54 = vrot.slane %v3501_v30, 1  ;;  %v14471_v12 = vmax.f32 %v3508_v34, %v3509_v20  ;;  %v3516_v60 = vrot.slane %v3515_v10, 1  ;;  %v11793_v33 = vld [vmem:[%s17067_s3 + $0x150] ss:$8 sps:$4 sm:$0xff]  }
 0x2a5   : > { %v2663_v39 = vcombine.high %v2661_v55, %v2661_v55  ;;  %v3519_v43 = vrot.slane %v3518_v44, 4  ;;  %v3525_v57 = vsel %vm3013_vm7, %v2662_v7, -inf  ;;  %v3532_v4 = vsel %vm3013_vm7, %v2661_v55, -inf }
 0x2a6   : > { %v14476_v6 = vmax.f32 %v3501_v30, %v3502_v54  ;;  %v14478_v63 = vmax.f32 %v3515_v10, %v3516_v60  ;;  %v3526_v62 = vrot.slane %v3525_v57, 4  ;;  %v3533_v59 = vrot.slane %v3532_v4, 4  ;;  %5435 = vmatpush1.bf16.msra.mxu1 %v11790_v5  ;;  %v17268_v30 = vld [vmem:[#allocation41_spill] sm:$0xff] }
 0x2a7   : > { %v3539_v1 = vsel %vm3013_vm7, %v2663_v39, -inf  ;;  %v3520_v45 = vmax.f32 %v3518_v44, %v3519_v43  ;;  %v2296_v37 = vmax.f32 %v14393_v3, 0.0  ;;  %v2297_v58 = vmax.f32 %v14396_v47, 0.0  ;;  %5436 = vmatprep.subr.bf16.mxu1 %v11795_v32 }
 0x2a8   : > { %v3540_v34 = vrot.slane %v3539_v1, 4  ;;  %v3527_v15 = vmax.f32 %v3525_v57, %v3526_v62  ;;  %v3534_v55 = vmax.f32 %v3532_v4, %v3533_v59  ;;  %v14486_v24 = vmax.f32 %v14399_v17, 0.0 }
 0x2a9   : > { %v14490_v20 = vadd.f32 %v17268_v30, %v14383_v22  ;;  %v3521_v10 = vrot.slane %v3520_v45, 2  ;;  %v2664_v7 = vcombine.high %v2296_v37, %v2296_v37  ;;  %v2671_v39 = vrot.slane %v2296_v37, %v13732_v38 }
 0x2aa   : > { %v3541_v5 = vmax.f32 %v3539_v1, %v3540_v34  ;;  %v3528_v44 = vrot.slane %v3527_v15, 2  ;;  %v3535_v54 = vrot.slane %v3534_v55, 2  ;;  %v2681_v3 = vcombine.high %v2297_v58, %v2297_v58  ;;  %5437 = vmatpush1.bf16.msra.mxu1 %v11793_v33 }
 0x2ab   : > { %v2688_v47 = vrot.slane %v2297_v58, %v13732_v38  ;;  %v3522_v32 = vmax.f32 %v3520_v45, %v3521_v10  ;;  %v2678_v17 = vrot.slane %v2664_v7, %v13732_v38  ;;  %v2679_v43 = vcombine.high %v2671_v39, %v2671_v39 }
 0x2ac   : > { %v3542_v60 = vrot.slane %v3541_v5, 2  ;;  %v3529_v57 = vmax.f32 %v3527_v15, %v3528_v44  ;;  %v3536_v4 = vmax.f32 %v3534_v55, %v3535_v54  ;;  %v3546_v22 = vsel %vm3013_vm7, %v2671_v39, -inf }
 0x2ad   : > { %v2695_v1 = vrot.slane %v2681_v3, %v13732_v38  ;;  %v3523_v62 = vrot.slane %v3522_v32, 1  ;;  %v2680_v34 = vcombine.high %v2678_v17, %v2678_v17  ;;  %v3547_v37 = vrot.slane %v3546_v22, 4 }
 0x2ae   : > { %v3543_v59 = vmax.f32 %v3541_v5, %v3542_v60  ;;  %v3530_v30 = vrot.slane %v3529_v57, 1  ;;  %v3537_v36 = vrot.slane %v3536_v4, 1  ;;  %v3553_v58 = vsel %vm3013_vm7, %v2679_v43, -inf }
 0x2af   : > { %v3560_v33 = vsel %vm3013_vm7, %v2678_v17, -inf  ;;  %v3524_v45 = vmax.f32 %v3522_v32, %v3523_v62  ;;  %v3548_v7 = vmax.f32 %v3546_v22, %v3547_v37  ;;  %v3554_v9 = vrot.slane %v3553_v58, 4 }
 0x2b0   : > { %v3544_v10 = vrot.slane %v3543_v59, 1  ;;  %v3531_v15 = vmax.f32 %v3529_v57, %v3530_v30  ;;  %v3538_v55 = vmax.f32 %v3536_v4, %v3537_v36  ;;  %v3561_v44 = vrot.slane %v3560_v33, 4 }
 0x2b1   : > { %v3567_v39 = vsel %vm3013_vm7, %v2680_v34, -inf  ;;  %v3942_v5 = vmax.f32 %v14444_v35, %v3524_v45  ;;  %v3549_v3 = vrot.slane %v3548_v7, 2  ;;  %v3555_v60 = vmax.f32 %v3553_v58, %v3554_v9 }
 0x2b2   : > { %v3545_v54 = vmax.f32 %v3543_v59, %v3544_v10  ;;  %v3943_v13 = vmax.f32 %v14449_v11, %v3531_v15  ;;  %v3944_v43 = vmax.f32 %v14451_v42, %v3538_v55  ;;  %v3562_v26 = vmax.f32 %v3560_v33, %v3561_v44 }
 0x2b3   : > { %v3568_v17 = vrot.slane %v3567_v39, 4  ;;  %v3550_v22 = vmax.f32 %v3548_v7, %v3549_v3  ;;  %v3556_v62 = vrot.slane %v3555_v60, 2  ;;  %v2696_v57 = vcombine.high %v2688_v47, %v2688_v47 }
 0x2b4   : > { %v3945_v32 = vmax.f32 %v14460_v31, %v3545_v54  ;;  %v4098_v36 = vsel %vm4063_vm8, %v3943_v13, %v3942_v5  ;;  %v3563_v4 = vrot.slane %v3562_v26, 2  ;;  %v2697_v59 = vcombine.high %v2695_v1, %v2695_v1 }
 0x2b5   : > { %v3569_v34 = vmax.f32 %v3567_v39, %v3568_v17  ;;  %v4099_v35 = vsel %vm4065_vm9, %v3944_v43, %v4098_v36  ;;  %v3551_v37 = vrot.slane %v3550_v22, 1  ;;  %v3557_v9 = vmax.f32 %v3555_v60, %v3556_v62 }
 0x2b6   : > { %v3574_v11 = vsel %vm3013_vm7, %v2688_v47, -inf  ;;  %v3564_v30 = vmax.f32 %v3562_v26, %v3563_v4  ;;  %v4100_v58 = vsel %vm4067_vm10, %v3945_v32, %v4099_v35  ;;  %v3581_v10 = vsel %vm3013_vm7, %v2696_v57, -inf }
 0x2b7   : > { %v3570_v42 = vrot.slane %v3569_v34, 2  ;;  %v3575_v33 = vrot.slane %v3574_v11, 4  ;;  %v3552_v31 = vmax.f32 %v3550_v22, %v3551_v37  ;;  %v3558_v45 = vrot.slane %v3557_v9, 1 }
 0x2b8   : > { %v3588_v13 = vsel %vm3013_vm7, %v2695_v1, -inf  ;;  %v3565_v7 = vrot.slane %v3564_v30, 1  ;;  %v3582_v44 = vrot.slane %v3581_v10, 4  ;;  %v3595_v26 = vsel %vm3013_vm7, %v2697_v59, -inf }
 0x2b9   : > { %v3571_v15 = vmax.f32 %v3569_v34, %v3570_v42  ;;  %v3576_v55 = vmax.f32 %v3574_v11, %v3575_v33  ;;  %v3559_v39 = vmax.f32 %v3557_v9, %v3558_v45  ;;  %v3946_v54 = vmax.f32 %v14469_v14, %v3552_v31  ;;  %v17269_v33 = vld [vmem:[#allocation29_spill] sm:$0xff] }
 0x2ba   : > { %v3589_v5 = vrot.slane %v3588_v13, 4  ;;  %v3566_v47 = vmax.f32 %v3564_v30, %v3565_v7  ;;  %v3583_v43 = vmax.f32 %v3581_v10, %v3582_v44  ;;  %v3596_v1 = vrot.slane %v3595_v26, 4 }
 0x2bb   : > { %v3572_v3 = vrot.slane %v3571_v15, 1  ;;  %v3577_v60 = vrot.slane %v3576_v55, 2  ;;  %v3947_v17 = vmax.f32 %v14476_v6, %v3559_v39  ;;  %v4101_v32 = vsel %vm4069_vm11, %v3946_v54, %v4100_v58 }
 0x2bc   : > { %v3590_v22 = vmax.f32 %v3588_v13, %v3589_v5  ;;  %v3948_v57 = vmax.f32 %v14471_v12, %v3566_v47  ;;  %v3584_v4 = vrot.slane %v3583_v43, 2  ;;  %v3597_v35 = vmax.f32 %v3595_v26, %v3596_v1 }
 0x2bd   : > { %v3573_v62 = vmax.f32 %v3571_v15, %v3572_v3  ;;  %v3578_v36 = vmax.f32 %v3576_v55, %v3577_v60  ;;  %v4102_v14 = vsel %vm4071_vm12, %v3947_v17, %v4101_v32  ;;  %v2698_v59 = vcombine.high %v14486_v24, %v14486_v24 }
 0x2be   : > { %v3591_v34 = vrot.slane %v3590_v22, 2  ;;  %v4103_v6 = vsel %vm4073_vm13, %v3948_v57, %v4102_v14  ;;  %v3585_v11 = vmax.f32 %v3583_v43, %v3584_v4  ;;  %v3598_v42 = vrot.slane %v3597_v35, 2  ;;  %v11799_v4 = vld [vmem:[%s17067_s3 + $0x170] ss:$8 sps:$4 sm:$0xff]  }
 0x2bf   : > { %v3949_v37 = vmax.f32 %v14478_v63, %v3573_v62  ;;  %v3579_v9 = vrot.slane %v3578_v36, 1  ;;  %v2705_v12 = vrot.slane %v14486_v24, %v13732_v38  ;;  %v2712_v58 = vrot.slane %v2698_v59, %v13732_v38 }
 0x2c0   : > { %v3592_v30 = vmax.f32 %v3590_v22, %v3591_v34  ;;  %v14525_v31 = vadd.f32 %v14335_v56, %v17269_v33  ;;  %v3586_v10 = vrot.slane %v3585_v11, 1  ;;  %v2299_v63 = vmax.f32 %v14490_v20, 0.0  ;;  %v11796_v56 = vld [vmem:[%s17067_s3 + $0x160] ss:$8 sps:$4 sm:$0xff]   ;;  %v11798_v20 = vld [vmem:[%s17067_s3 + $0x164] ss:$8 sps:$4 sm:$0xff]  }
 0x2c1   : > { %v4104_v45 = vsel %vm4075_vm14, %v3949_v37, %v4103_v6  ;;  %v3599_v7 = vmax.f32 %v3597_v35, %v3598_v42  ;;  %v2713_v15 = vcombine.high %v2705_v12, %v2705_v12  ;;  %v2714_v55 = vcombine.high %v2712_v58, %v2712_v58  ;;  %5438 = vmatprep.subr.bf16.mxu1 %v11798_v20  ;;  %v11801_v22 = vld [vmem:[%s17067_s3 + $0x174] ss:$8 sps:$4 sm:$0xff]   ;;  %v11804_v37 = vld [vmem:[%s17067_s3 + $0x184] ss:$8 sps:$4 sm:$0xff]  }
 0x2c2   : > { %4139 = vst [vmem:[#allocation2 + $0x51] sm:$0xff] %v4104_v45  ;;  %v3593_v13 = vrot.slane %v3592_v30, 1  ;;  %v14529_v44 = vmax.f32 %v3578_v36, %v3579_v9  ;;  %v3602_v24 = vsel %vm3013_vm7, %v2705_v12, -inf  ;;  %v3616_v39 = vsel %vm3013_vm7, %v2712_v58, -inf  ;;  %5439 = vmatpush1.bf16.msra.mxu1 %v11796_v56  ;;  %v11807_v56 = vld [vmem:[%s17067_s3 + $0x194] ss:$8 sps:$4 sm:$0xff]  }
 0x2c3   : > { %v2715_v54 = vcombine.high %v2299_v63, %v2299_v63  ;;  %v14539_v5 = vmax.f32 %v3585_v11, %v3586_v10  ;;  %v3603_v47 = vrot.slane %v3602_v24, 4  ;;  %v3609_v3 = vsel %vm3013_vm7, %v2713_v15, -inf  ;;  %5440 = vmatprep.subr.bf16.mxu1 %v11801_v22  ;;  %v11802_v15 = vld [vmem:[%s17067_s3 + $0x180] ss:$8 sps:$4 sm:$0xff]  }
 0x2c4   : > { %v14541_v26 = vmax.f32 %v3592_v30, %v3593_v13  ;;  %v3610_v60 = vrot.slane %v3609_v3, 4  ;;  %v3617_v43 = vrot.slane %v3616_v39, 4  ;;  %v3623_v17 = vsel %vm3013_vm7, %v2714_v55, -inf }
 0x2c5   : > { %v2722_v32 = vrot.slane %v2299_v63, %v13732_v38  ;;  %v3600_v1 = vrot.slane %v3599_v7, 1  ;;  %v3604_v62 = vmax.f32 %v3602_v24, %v3603_v47  ;;  %v3624_v57 = vrot.slane %v3623_v17, 4 }
 0x2c6   : > { %v2729_v36 = vrot.slane %v2715_v54, %v13732_v38  ;;  %v3611_v14 = vmax.f32 %v3609_v3, %v3610_v60  ;;  %v3618_v34 = vmax.f32 %v3616_v39, %v3617_v43  ;;  %5441 = vmatpush1.bf16.msra.mxu1 %v11799_v4 }
 0x2c7   : > { %v2730_v35 = vcombine.high %v2722_v32, %v2722_v32  ;;  %v3630_v59 = vsel %vm3013_vm7, %v2722_v32, -inf  ;;  %v3605_v6 = vrot.slane %v3604_v62, 2  ;;  %v3625_v9 = vmax.f32 %v3623_v17, %v3624_v57  ;;  %5442 = vmatprep.subr.bf16.mxu1 %v11804_v37 }
 0x2c8   : > { %v2731_v11 = vcombine.high %v2729_v36, %v2729_v36  ;;  %v3631_v30 = vrot.slane %v3630_v59, 4  ;;  %v3612_v42 = vrot.slane %v3611_v14, 2  ;;  %v3619_v12 = vrot.slane %v3618_v34, 2 }
 0x2c9   : > { %v3637_v58 = vsel %vm3013_vm7, %v2730_v35, -inf  ;;  %v3644_v33 = vsel %vm3013_vm7, %v2729_v36, -inf  ;;  %v3606_v45 = vmax.f32 %v3604_v62, %v3605_v6  ;;  %v3626_v10 = vrot.slane %v3625_v9, 2 }
 0x2ca   : > { %v3632_v63 = vmax.f32 %v3630_v59, %v3631_v30  ;;  %v3638_v13 = vrot.slane %v3637_v58, 4  ;;  %v3613_v55 = vmax.f32 %v3611_v14, %v3612_v42  ;;  %v3620_v24 = vmax.f32 %v3618_v34, %v3619_v12  ;;  %v14568_v14 = vld [vmem:[#allocation2 + $0x20] sm:$0xff]  ;;  %5443 = vmatpush1.bf16.msra.mxu1 %v11802_v15  ;;  %v11805_v34 = vld [vmem:[%s17067_s3 + $0x190] ss:$8 sps:$4 sm:$0xff]   ;;  %v4148_v42 = vld [vmem:[#allocation2 + $0x28] sm:$0x3] }
 0x2cb   : > { %v3645_v39 = vrot.slane %v3644_v33, 4  ;;  %v3651_v54 = vsel %vm3013_vm7, %v2731_v11, -inf  ;;  %v3607_v20 = vrot.slane %v3606_v45, 1  ;;  %v3627_v47 = vmax.f32 %v3625_v9, %v3626_v10  ;;  %5444 = vmatprep.subr.bf16.mxu1 %v11807_v56  ;;  %v14584_v12 = vld [vmem:[#allocation2 + $0x30] sm:$0xff] }
 0x2cc   : > { %v3633_v3 = vrot.slane %v3632_v63, 2  ;;  %v3639_v60 = vmax.f32 %v3637_v58, %v3638_v13  ;;  %v3614_v43 = vrot.slane %v3613_v55, 1  ;;  %v3621_v17 = vrot.slane %v3620_v24, 1  ;;  %v11813_v56 = vld [vmem:[%s17067_s3 + $0x1b4] ss:$8 sps:$4 sm:$0xff]  }
 0x2cd   : > { %v3646_v32 = vmax.f32 %v3644_v33, %v3645_v39  ;;  %v3652_v22 = vrot.slane %v3651_v54, 4  ;;  %v14566_v62 = vmax.f32 %v3599_v7, %v3600_v1  ;;  %v3628_v57 = vrot.slane %v3627_v47, 1  ;;  %v11810_v7 = vld [vmem:[%s17067_s3 + $0x1a4] ss:$8 sps:$4 sm:$0xff]  }
 0x2ce   : > { %v3634_v36 = vmax.f32 %v3632_v63, %v3633_v3  ;;  %v3640_v4 = vrot.slane %v3639_v60, 2  ;;  %v14573_v35 = vmax.f32 %v3606_v45, %v3607_v20  ;;  %v14575_v59 = vmax.f32 %v3613_v55, %v3614_v43  ;;  %v17270_v55 = vld [vmem:[#allocation20_spill] sm:$0xff]  ;;  %5445 = vmatpush1.bf16.msra.mxu1 %v11805_v34 }
 0x2cf   : > { %v3647_v37 = vrot.slane %v3646_v32, 2  ;;  %v3653_v6 = vmax.f32 %v3651_v54, %v3652_v22  ;;  %v14580_v1 = vmax.f32 %v3620_v24, %v3621_v17  ;;  %v11357_v30 = vadd.f32 %v14145_v48, %v14142_v29  ;;  %v4150_v29 = vld [vmem:[#allocation2 + $0x38] sm:$0x3]  ;;  %v11808_v48 = vld [vmem:[%s17067_s3 + $0x1a0] ss:$8 sps:$4 sm:$0xff]   ;;  %5446 = vmatprep.subr.bf16.mxu1 %v11810_v7 }
 0x2d0   : > { %v3635_v9 = vrot.slane %v3634_v36, 1  ;;  %v3641_v11 = vmax.f32 %v3639_v60, %v3640_v4  ;;  %v14588_v45 = vadd.f32 %v14184_v52, %v14181_v21  ;;  %v14592_v10 = vpack.c.bf16 %v14568_v14, %v14568_v14 }
 0x2d1   : > { %v3648_v58 = vmax.f32 %v3646_v32, %v3647_v37  ;;  %v3654_v33 = vrot.slane %v3653_v6, 2  ;;  %v14594_v63 = vmax.f32 %v3627_v47, %v3628_v57  ;;  %v2081_v24 = vadd.f32 %v11357_v30, %v17270_v55 }
 0x2d2   : > { %v3636_v13 = vmax.f32 %v3634_v36, %v3635_v9  ;;  %v3642_v15 = vrot.slane %v3641_v11, 1  ;;  %v14600_v21 = vpack.c.bf16 %v4148_v42, %v4148_v42  ;;  %v14604_v52 = vpack.c.bf16 %v14584_v12, %v14584_v12  ;;  %5447 = vmatpush1.bf16.msra.mxu1 %v11808_v48  ;;  %v11814_v48 = vld [vmem:[%s17067_s3 + $0x1c0] ss:$8 sps:$4 sm:$0xff]  }
 0x2d3   : > { %v3649_v39 = vrot.slane %v3648_v58, 1  ;;  %v3655_v54 = vmax.f32 %v3653_v6, %v3654_v33  ;;  %v2242_v3 = vadd.f32 %v14099_v53, %v2081_v24  ;;  %v4242_v60 = vshrl.u32 %v14592_v10, 16  ;;  %5448 = vmatprep.subr.bf16.mxu1 %v11813_v56 }
 0x2d4   : > { %v3643_v20 = vmax.f32 %v3641_v11, %v3642_v15  ;;  %v3950_v47 = vmax.f32 %v14529_v44, %v3636_v13  ;;  %v14612_v32 = vpack.c.bf16 %v4150_v29, %v4150_v29  ;;  %v4245_v22 = vshll.u32 %v14592_v10, 16  ;;  %v11811_v44 = vld [vmem:[%s17067_s3 + $0x1b0] ss:$8 sps:$4 sm:$0xff]  }
 0x2d5   : > { %v3650_v43 = vmax.f32 %v3648_v58, %v3649_v39  ;;  %v3656_v17 = vrot.slane %v3655_v54, 1  ;;  %v2300_v36 = vmax.f32 %v2242_v3, 0.0  ;;  %v4244_v4 = vrot.slane %v4242_v60, 4 }
 0x2d6   : > { %v3951_v57 = vmax.f32 %v14539_v5, %v3643_v20  ;;  %v4256_v34 = vshrl.u32 %v14604_v52, 16  ;;  %v4247_v6 = vrot.slane %v4245_v22, 5  ;;  %v4251_v7 = vshll.u32 %v14600_v21, 16  ;;  %v11816_v5 = vld [vmem:[%s17067_s3 + $0x1c4] ss:$8 sps:$4 sm:$0xff]   ;;  %5449 = vmatpush1.bf16.msra.mxu1 %v11811_v44 }
 0x2d7   : > { %v3657_v53 = vmax.f32 %v3655_v54, %v3656_v17  ;;  %v3952_v37 = vmax.f32 %v14541_v26, %v3650_v43  ;;  %v2732_v11 = vcombine.high %v2300_v36, %v2300_v36  ;;  %v2739_v30 = vrot.slane %v2300_v36, %v13732_v38  ;;  %5450 = vmatprep.subr.bf16.mxu1 %v11816_v5  ;;  %v11819_v20 = vld [vmem:[%s17067_s3 + $0x1d4] ss:$8 sps:$4 sm:$0xff]  }
 0x2d8   : > { %v4105_v9 = vsel %vm4063_vm8, %v3951_v57, %v3950_v47  ;;  %v4258_v42 = vrot.slane %v4256_v34, 4  ;;  %v4248_v13 = vor.u32 %v4247_v6, %v4244_v4  ;;  %v4259_v26 = vshll.u32 %v14604_v52, 16 }
 0x2d9   : > { %v3953_v58 = vmax.f32 %v14566_v62, %v3657_v53  ;;  %v4106_v33 = vsel %vm4065_vm9, %v3952_v37, %v4105_v9  ;;  %v2746_v15 = vrot.slane %v2732_v11, %v13732_v38  ;;  %v2747_v55 = vcombine.high %v2739_v30, %v2739_v30  ;;  %v11817_v37 = vld [vmem:[%s17067_s3 + $0x1d0] ss:$8 sps:$4 sm:$0xff]   ;;  %v11822_v11 = vld [vmem:[%s17067_s3 + $0x1e4] ss:$8 sps:$4 sm:$0xff]  }
 0x2da   : > { %v3658_v24 = vsel %vm3013_vm7, %v2739_v30, -inf  ;;  %v4265_v29 = vshll.u32 %v14612_v32, 16  ;;  %v4249_v54 = vrot.slane %v4248_v13, 4  ;;  %v4261_v56 = vrot.slane %v4259_v26, 5  ;;  %5451 = vmatpush1.bf16.msra.mxu1 %v11814_v48 }
 0x2db   : > { %v3659_v39 = vrot.slane %v3658_v24, 4  ;;  %v14637_v62 = vsel %vm4067_vm10, %v3953_v58, %v4106_v33  ;;  %v2748_v47 = vcombine.high %v2746_v15, %v2746_v15  ;;  %v3665_v3 = vsel %vm3013_vm7, %v2747_v55, -inf  ;;  %5452 = vmatprep.subr.bf16.mxu1 %v11819_v20 }
 0x2dc   : > { %v3672_v60 = vsel %vm3013_vm7, %v2746_v15, -inf  ;;  %v4253_v43 = vrot.slane %v4251_v7, 5  ;;  %v3666_v22 = vrot.slane %v3665_v3, 4  ;;  %v4267_v36 = vrot.slane %v4265_v29, 5  ;;  %v17272_v29 = vld [vmem:[#allocation27_spill] sm:$0xff] }
 0x2dd   : > { %v3660_v17 = vmax.f32 %v3658_v24, %v3659_v39  ;;  %v3673_v57 = vrot.slane %v3672_v60, 4  ;;  %v3679_v4 = vsel %vm3013_vm7, %v2748_v47, -inf  ;;  %v4262_v44 = vor.u32 %v4261_v56, %v4258_v42  ;;  %v17273_v39 = vld [vmem:[#allocation31_spill] sm:$0xff] }
 0x2de   : > { %v14647_v34 = vsel %vm12596_vm2, %v4249_v54, %v4253_v43  ;;  %v14651_v53 = vpack.c.bf16 %v14584_v12, %v14568_v14  ;;  %v3667_v7 = vmax.f32 %v3665_v3, %v3666_v22  ;;  %v3680_v9 = vrot.slane %v3679_v4, 4  ;;  %v17271_v14 = vld [vmem:[#allocation23_spill] sm:$0xff]  ;;  %5453 = vmatpush1.bf16.msra.mxu1 %v11817_v37 }
 0x2df   : > { %v3661_v6 = vrot.slane %v3660_v17, 2  ;;  %v3674_v5 = vmax.f32 %v3672_v60, %v3673_v57  ;;  %v4263_v30 = vrot.slane %v4262_v44, 4  ;;  %v11363_v42 = vadd.f32 %v14238_v0, %v14230_v41  ;;  %v11820_v0 = vld [vmem:[%s17067_s3 + $0x1e0] ss:$8 sps:$4 sm:$0xff]   ;;  %5454 = vmatprep.subr.bf16.mxu1 %v11822_v11  ;;  %v11825_v56 = vld [vmem:[%s17067_s3 + $0x1f4] ss:$8 sps:$4 sm:$0xff]  }
 0x2e0   : > { %v2086_v12 = vadd.f32 %v14588_v45, %v17271_v14  ;;  %v11366_v58 = vadd.f32 %v14277_v18, %v14275_v28  ;;  %v3668_v13 = vrot.slane %v3667_v7, 2  ;;  %v3681_v15 = vmax.f32 %v3679_v4, %v3680_v9  ;;  %v11823_v37 = vld [vmem:[%s17067_s3 + $0x1f0] ss:$8 sps:$4 sm:$0xff]  }
 0x2e1   : > { %v3662_v33 = vmax.f32 %v3660_v17, %v3661_v6  ;;  %v3675_v26 = vrot.slane %v3674_v5, 2  ;;  %v14667_v55 = vsel %vm12596_vm2, %v4263_v30, %v4267_v36  ;;  %v2089_v48 = vadd.f32 %v11363_v42, %v17272_v29 }
 0x2e2   : > { %v2247_v24 = vadd.f32 %v14240_v23, %v2086_v12  ;;  %v2094_v41 = vadd.f32 %v11366_v58, %v17273_v39  ;;  %v3669_v18 = vmax.f32 %v3667_v7, %v3668_v13  ;;  %v3682_v54 = vrot.slane %v3681_v15, 2  ;;  %5455 = vmatpush1.bf16.msra.mxu1 %v11820_v0 }
 0x2e3   : > { %v3663_v28 = vrot.slane %v3662_v33, 1  ;;  %v3676_v45 = vmax.f32 %v3674_v5, %v3675_v26  ;;  %v14680_v23 = vcombine.low %v14647_v34, %v14667_v55  ;;  %v2250_v47 = vadd.f32 %v14264_v51, %v2089_v48  ;;  %5456 = vmatprep.subr.bf16.mxu1 %v11825_v56  ;;  %v11828_v5 = vld [vmem:[%s17067_s3 + $0x204] ss:$8 sps:$4 sm:$0xff]  }
 0x2e4   : > { %v2301_v20 = vmax.f32 %v2247_v24, 0.0  ;;  %v2255_v3 = vadd.f32 %v14232_v27, %v2094_v41  ;;  %v3670_v43 = vrot.slane %v3669_v18, 1  ;;  %v3683_v22 = vmax.f32 %v3681_v15, %v3682_v54 }
 0x2e5   : > { %v3664_v60 = vmax.f32 %v3662_v33, %v3663_v28  ;;  %v3677_v17 = vrot.slane %v3676_v45, 1  ;;  %5395 = vmatprep.mubr.bf16.mxu1 %v14680_v23  ;;  %v2302_v4 = vmax.f32 %v2250_v47, 0.0 }
 0x2e6   : > { %v2749_v57 = vcombine.high %v2301_v20, %v2301_v20  ;;  %v2756_v36 = vrot.slane %v2301_v20, %v13732_v38  ;;  %v14686_v44 = vmax.f32 %v2255_v3, 0.0  ;;  %v3671_v51 = vmax.f32 %v3669_v18, %v3670_v43  ;;  %5396 = vmatmul.mubr.bf16.gmra.mrb[124].mxu1 %v14651_v53 }
 0x2e7   : > { %v3678_v6 = vmax.f32 %v3676_v45, %v3677_v17  ;;  %v3684_v27 = vrot.slane %v3683_v22, 1  ;;  %v3954_v7 = vmax.f32 %v14573_v35, %v3664_v60  ;;  %v2766_v42 = vcombine.high %v2302_v4, %v2302_v4  ;;  %5457 = vmatpush1.bf16.msra.mxu1 %v11823_v37 }
 0x2e8   : > { %v2763_v9 = vrot.slane %v2749_v57, %v13732_v38  ;;  %v2764_v11 = vcombine.high %v2756_v36, %v2756_v36  ;;  %v3686_v30 = vsel %vm3013_vm7, %v2756_v36, -inf  ;;  %v3955_v12 = vmax.f32 %v14575_v59, %v3671_v51  ;;  %5499 = vmatprep.subr.bf16.mxu1 %v11828_v5 }
 0x2e9   : > { %v3685_v14 = vmax.f32 %v3683_v22, %v3684_v27  ;;  %v3956_v58 = vmax.f32 %v14580_v1, %v3678_v6  ;;  %v4108_v35 = vsel %vm4069_vm11, %v3954_v7, %v14637_v62  ;;  %v3687_v13 = vrot.slane %v3686_v30, 4 }
 0x2ea   : > { %v2765_v33 = vcombine.high %v2763_v9, %v2763_v9  ;;  %v3693_v26 = vsel %vm3013_vm7, %v2764_v11, -inf  ;;  %v3700_v15 = vsel %vm3013_vm7, %v2763_v9, -inf  ;;  %v4109_v29 = vsel %vm4071_vm12, %v3955_v12, %v4108_v35 }
 0x2eb   : > { %v3957_v24 = vmax.f32 %v14594_v63, %v3685_v14  ;;  %v3694_v48 = vrot.slane %v3693_v26, 4  ;;  %v3701_v39 = vrot.slane %v3700_v15, 4  ;;  %v4110_v59 = vsel %vm4073_vm13, %v3956_v58, %v4109_v29 }
 0x2ec   : > { %v3688_v1 = vmax.f32 %v3686_v30, %v3687_v13  ;;  %v3707_v41 = vsel %vm3013_vm7, %v2765_v33, -inf  ;;  %v2773_v62 = vrot.slane %v2302_v4, %v13732_v38  ;;  %v2780_v63 = vrot.slane %v2766_v42, %v13732_v38 }
 0x2ed   : > { %v4111_v0 = vsel %vm4075_vm14, %v3957_v24, %v4110_v59  ;;  %v3695_v28 = vmax.f32 %v3693_v26, %v3694_v48  ;;  %v3702_v18 = vmax.f32 %v3700_v15, %v3701_v39  ;;  %v3708_v45 = vrot.slane %v3707_v41, 4 }
 0x2ee   : > { %4140 = vst [vmem:[#allocation2 + $0x61] sm:$0xff] %v4111_v0  ;;  %v3689_v54 = vrot.slane %v3688_v1, 2  ;;  %v2781_v56 = vcombine.high %v2773_v62, %v2773_v62  ;;  %v3714_v20 = vsel %vm3013_vm7, %v2773_v62, -inf  ;;  %v2782_v22 = vcombine.high %v2780_v63, %v2780_v63 }
 0x2ef   : > { %v3696_v47 = vrot.slane %v3695_v28, 2  ;;  %v3703_v3 = vrot.slane %v3702_v18, 2  ;;  %v3709_v60 = vmax.f32 %v3707_v41, %v3708_v45  ;;  %v3715_v43 = vrot.slane %v3714_v20, 4 }
 0x2f0   : > { %v3690_v17 = vmax.f32 %v3688_v1, %v3689_v54  ;;  %v3721_v57 = vsel %vm3013_vm7, %v2781_v56, -inf  ;;  %v3728_v36 = vsel %vm3013_vm7, %v2780_v63, -inf  ;;  %v3735_v9 = vsel %vm3013_vm7, %v2782_v22, -inf }
 0x2f1   : > { %v3697_v4 = vmax.f32 %v3695_v28, %v3696_v47  ;;  %v3704_v37 = vmax.f32 %v3702_v18, %v3703_v3  ;;  %v3710_v51 = vrot.slane %v3709_v60, 2  ;;  %v3716_v6 = vmax.f32 %v3714_v20, %v3715_v43  ;;  %v17274_v47 = vld [vmem:[#allocation33_spill] sm:$0xff] }
 0x2f2   : > { %v3691_v27 = vrot.slane %v3690_v17, 1  ;;  %v3722_v7 = vrot.slane %v3721_v57, 4  ;;  %v3729_v5 = vrot.slane %v3728_v36, 4  ;;  %v3736_v33 = vrot.slane %v3735_v9, 4 }
 0x2f3   : > { %v3698_v11 = vrot.slane %v3697_v4, 1  ;;  %v3705_v30 = vrot.slane %v3704_v37, 1  ;;  %v3711_v42 = vmax.f32 %v3709_v60, %v3710_v51  ;;  %v3717_v14 = vrot.slane %v3716_v6, 2 }
 0x2f4   : > { %v14715_v12 = vmax.f32 %v3690_v17, %v3691_v27  ;;  %v3723_v58 = vmax.f32 %v3721_v57, %v3722_v7  ;;  %v3730_v35 = vmax.f32 %v3728_v36, %v3729_v5  ;;  %v3737_v39 = vmax.f32 %v3735_v9, %v3736_v33 }
 0x2f5   : > { %v14717_v13 = vmax.f32 %v3697_v4, %v3698_v11  ;;  %v14719_v26 = vmax.f32 %v3704_v37, %v3705_v30  ;;  %v3712_v15 = vrot.slane %v3711_v42, 1  ;;  %v3718_v24 = vmax.f32 %v3716_v6, %v3717_v14 }
 0x2f6   : > { %v3724_v29 = vrot.slane %v3723_v58, 2  ;;  %v3731_v48 = vrot.slane %v3730_v35, 2  ;;  %v2783_v59 = vcombine.high %v14686_v44, %v14686_v44  ;;  %v2790_v62 = vrot.slane %v14686_v44, %v13732_v38 }
 0x2f7   : > { %v14723_v1 = vmax.f32 %v3711_v42, %v3712_v15  ;;  %v3719_v41 = vrot.slane %v3718_v24, 1  ;;  %v11369_v0 = vadd.f32 %v14287_v49, %v14285_v2  ;;  %v3738_v45 = vrot.slane %v3737_v39, 2 }
 0x2f8   : > { %v3725_v28 = vmax.f32 %v3723_v58, %v3724_v29  ;;  %v3732_v18 = vmax.f32 %v3730_v35, %v3731_v48  ;;  %v2797_v54 = vrot.slane %v2783_v59, %v13732_v38  ;;  %v2798_v56 = vcombine.high %v2790_v62, %v2790_v62  ;;  %v17275_v29 = vld [vmem:[#allocation8_spill] sm:$0xff] }
 0x2f9   : > { %v14730_v63 = vmax.f32 %v3718_v24, %v3719_v41  ;;  %v3742_v20 = vsel %vm3013_vm7, %v2790_v62, -inf  ;;  %v2097_v3 = vadd.f32 %v11369_v0, %v17274_v47  ;;  %v3739_v17 = vmax.f32 %v3737_v39, %v3738_v45 }
 0x2fa   : > { %v3726_v60 = vrot.slane %v3725_v28, 1  ;;  %v3733_v43 = vrot.slane %v3732_v18, 1  ;;  %v2799_v22 = vcombine.high %v2797_v54, %v2797_v54  ;;  %v3743_v44 = vrot.slane %v3742_v20, 4 }
 0x2fb   : > { %v3749_v57 = vsel %vm3013_vm7, %v2798_v56, -inf  ;;  %v3756_v2 = vsel %vm3013_vm7, %v2797_v54, -inf  ;;  %v2258_v49 = vadd.f32 %v14258_v61, %v2097_v3  ;;  %v3740_v37 = vrot.slane %v3739_v17, 1 }
 0x2fc   : > { %v14737_v36 = vmax.f32 %v3725_v28, %v3726_v60  ;;  %v14739_v4 = vmax.f32 %v3732_v18, %v3733_v43  ;;  %v3750_v51 = vrot.slane %v3749_v57, 4  ;;  %v3744_v6 = vmax.f32 %v3742_v20, %v3743_v44 }
 0x2fd   : > { %v3757_v27 = vrot.slane %v3756_v2, 4  ;;  %v3763_v7 = vsel %vm3013_vm7, %v2799_v22, -inf  ;;  %v2304_v5 = vmax.f32 %v2258_v49, 0.0  ;;  %v14742_v9 = vmax.f32 %v3739_v17, %v3740_v37 }
 0x2fe   : > { %v3751_v11 = vmax.f32 %v3749_v57, %v3750_v51  ;;  %v3764_v30 = vrot.slane %v3763_v7, 4  ;;  %v11372_v42 = vadd.f32 %v14295_v16, %v14292_v46  ;;  %v3745_v14 = vrot.slane %v3744_v6, 2 }
 0x2ff   : > { %v3758_v61 = vmax.f32 %v3756_v2, %v3757_v27  ;;  %v2800_v58 = vcombine.high %v2304_v5, %v2304_v5  ;;  %v2807_v35 = vrot.slane %v2304_v5, %v13732_v38  ;;  %v11375_v24 = vadd.f32 %v14305_v25, %v14299_v8 }
 0x300   : > { %v3752_v33 = vrot.slane %v3751_v11, 2  ;;  %v3765_v15 = vmax.f32 %v3763_v7, %v3764_v30  ;;  %v2102_v48 = vadd.f32 %v11372_v42, %v17275_v29  ;;  %v3746_v39 = vmax.f32 %v3744_v6, %v3745_v14 }
 0x301   : > { %v3759_v59 = vrot.slane %v3758_v61, 2  ;;  %v2814_v41 = vrot.slane %v2800_v58, %v13732_v38  ;;  %v2815_v62 = vcombine.high %v2807_v35, %v2807_v35  ;;  %v3770_v46 = vsel %vm3013_vm7, %v2807_v35, -inf }
 0x302   : > { %v3753_v0 = vmax.f32 %v3751_v11, %v3752_v33  ;;  %v3766_v28 = vrot.slane %v3765_v15, 2  ;;  %v2263_v16 = vadd.f32 %v14317_v50, %v2102_v48  ;;  %v3747_v18 = vrot.slane %v3746_v39, 1 }
 0x303   : > { %v3760_v45 = vmax.f32 %v3758_v61, %v3759_v59  ;;  %v2816_v54 = vcombine.high %v2814_v41, %v2814_v41  ;;  %v3771_v56 = vrot.slane %v3770_v46, 4  ;;  %v3777_v8 = vsel %vm3013_vm7, %v2815_v62, -inf }
 0x304   : > { %v3754_v20 = vrot.slane %v3753_v0, 1  ;;  %v3767_v47 = vmax.f32 %v3765_v15, %v3766_v28  ;;  %v3784_v25 = vsel %vm3013_vm7, %v2814_v41, -inf  ;;  %v3748_v3 = vmax.f32 %v3746_v39, %v3747_v18 }
 0x305   : > { %v3761_v60 = vrot.slane %v3760_v45, 1  ;;  %v3772_v43 = vmax.f32 %v3770_v46, %v3771_v56  ;;  %v3778_v17 = vrot.slane %v3777_v8, 4  ;;  %v3785_v57 = vrot.slane %v3784_v25, 4 }
 0x306   : > { %v3755_v22 = vmax.f32 %v3753_v0, %v3754_v20  ;;  %v3768_v44 = vrot.slane %v3767_v47, 1  ;;  %v3791_v2 = vsel %vm3013_vm7, %v2816_v54, -inf  ;;  %v3958_v49 = vmax.f32 %v14715_v12, %v3748_v3 }
 0x307   : > { %v3762_v50 = vmax.f32 %v3760_v45, %v3761_v60  ;;  %v3773_v37 = vrot.slane %v3772_v43, 2  ;;  %v3779_v51 = vmax.f32 %v3777_v8, %v3778_v17  ;;  %v3786_v7 = vmax.f32 %v3784_v25, %v3785_v57 }
 0x308   : > { %v3769_v6 = vmax.f32 %v3767_v47, %v3768_v44  ;;  %v3959_v27 = vmax.f32 %v14717_v13, %v3755_v22  ;;  %v3792_v5 = vrot.slane %v3791_v2, 4  ;;  %v2305_v14 = vmax.f32 %v2263_v16, 0.0 }
 0x309   : > { %v3960_v11 = vmax.f32 %v14719_v26, %v3762_v50  ;;  %v3774_v30 = vmax.f32 %v3772_v43, %v3773_v37  ;;  %v3780_v42 = vrot.slane %v3779_v51, 2  ;;  %v3787_v35 = vrot.slane %v3786_v7, 2 }
 0x30a   : > { %v3961_v61 = vmax.f32 %v14723_v1, %v3769_v6  ;;  %v4112_v58 = vsel %vm4063_vm8, %v3959_v27, %v3958_v49  ;;  %v3793_v33 = vmax.f32 %v3791_v2, %v3792_v5  ;;  %v2817_v48 = vcombine.high %v2305_v14, %v2305_v14  ;;  %v17276_v6 = vld [vmem:[#allocation22_spill] sm:$0xff] }
 0x30b   : > { %v4113_v12 = vsel %vm4065_vm9, %v3960_v11, %v4112_v58  ;;  %v3775_v15 = vrot.slane %v3774_v30, 1  ;;  %v3781_v29 = vmax.f32 %v3779_v51, %v3780_v42  ;;  %v3788_v39 = vmax.f32 %v3786_v7, %v3787_v35  ;;  %v17279_v35 = vld [vmem:[#allocation7_spill] sm:$0xff] }
 0x30c   : > { %v3794_v13 = vrot.slane %v3793_v33, 2  ;;  %v4114_v59 = vsel %vm4067_vm10, %v3961_v61, %v4113_v12  ;;  %v2824_v26 = vrot.slane %v2305_v14, %v13732_v38  ;;  %v2831_v0 = vrot.slane %v2817_v48, %v13732_v38  ;;  %v17281_v48 = vld [vmem:[#allocation25_spill] sm:$0xff] }
 0x30d   : > { %v3776_v41 = vmax.f32 %v3774_v30, %v3775_v15  ;;  %v3782_v62 = vrot.slane %v3781_v29, 1  ;;  %v2105_v1 = vadd.f32 %v11375_v24, %v14339_v40  ;;  %v3789_v28 = vrot.slane %v3788_v39, 1  ;;  %v17277_v30 = vld [vmem:[#allocation21_spill] sm:$0xff] }
 0x30e   : > { %v3795_v46 = vmax.f32 %v3793_v33, %v3794_v13  ;;  %v2832_v16 = vcombine.high %v2824_v26, %v2824_v26  ;;  %v3798_v18 = vsel %vm3013_vm7, %v2824_v26, -inf  ;;  %v2833_v56 = vcombine.high %v2831_v0, %v2831_v0  ;;  %v17280_v33 = vld [vmem:[#allocation32_spill] sm:$0xff] }
 0x30f   : > { %v3783_v45 = vmax.f32 %v3781_v29, %v3782_v62  ;;  %v3962_v54 = vmax.f32 %v14730_v63, %v3776_v41  ;;  %v3799_v20 = vrot.slane %v3798_v18, 4  ;;  %v3790_v47 = vmax.f32 %v3788_v39, %v3789_v28  ;;  %v17282_v62 = vld [vmem:[#allocation5_spill] sm:$0xff]  ;;  %v17283_v28 = vld [vmem:[#allocation35_spill] sm:$0xff] }
 0x310   : > { %v3796_v8 = vrot.slane %v3795_v46, 1  ;;  %v3805_v25 = vsel %vm3013_vm7, %v2832_v16, -inf  ;;  %v3812_v3 = vsel %vm3013_vm7, %v2831_v0, -inf  ;;  %v3819_v63 = vsel %vm3013_vm7, %v2833_v56, -inf  ;;  %v17284_v16 = vld [vmem:[#allocation16_spill] sm:$0xff] }
 0x311   : > { %v3963_v60 = vmax.f32 %v14737_v36, %v3783_v45  ;;  %v4115_v40 = vsel %vm4069_vm11, %v3962_v54, %v4114_v59  ;;  %v3800_v24 = vmax.f32 %v3798_v18, %v3799_v20  ;;  %v3806_v43 = vrot.slane %v3805_v25, 4 }
 0x312   : > { %v3797_v17 = vmax.f32 %v3795_v46, %v3796_v8  ;;  %v3964_v22 = vmax.f32 %v14739_v4, %v3790_v47  ;;  %v3813_v44 = vrot.slane %v3812_v3, 4  ;;  %v3820_v49 = vrot.slane %v3819_v63, 4  ;;  %v17278_v4 = vld [vmem:[#allocation6_spill] sm:$0xff] }
 0x313   : > { %v4116_v57 = vsel %vm4071_vm12, %v3963_v60, %v4115_v40  ;;  %v3801_v2 = vrot.slane %v3800_v24, 2  ;;  %v3807_v50 = vmax.f32 %v3805_v25, %v3806_v43  ;;  %v2266_v27 = vadd.f32 %v17276_v6, %v2105_v1 }
 0x314   : > { %v3965_v37 = vmax.f32 %v14742_v9, %v3797_v17  ;;  %v4117_v51 = vsel %vm4073_vm13, %v3964_v22, %v4116_v57  ;;  %v3814_v36 = vmax.f32 %v3812_v3, %v3813_v44  ;;  %v3821_v11 = vmax.f32 %v3819_v63, %v3820_v49 }
 0x315   : > { %v3802_v7 = vmax.f32 %v3800_v24, %v3801_v2  ;;  %v3808_v5 = vrot.slane %v3807_v50, 2  ;;  %v11378_v42 = vadd.f32 %v17278_v4, %v17277_v30  ;;  %v2306_v58 = vmax.f32 %v2266_v27, 0.0  ;;  %v17285_v2 = vld [vmem:[#allocation43_spill] sm:$0xff] }
 0x316   : > { %v4118_v14 = vsel %vm4075_vm14, %v3965_v37, %v4117_v51  ;;  %v3815_v61 = vrot.slane %v3814_v36, 2  ;;  %v11381_v12 = vadd.f32 %v17280_v33, %v17279_v35  ;;  %v3822_v29 = vrot.slane %v3821_v11, 2 }
 0x317   : > { %4141 = vst [vmem:[#allocation2 + $0x71] sm:$0xff] %v4118_v14  ;;  %v3803_v9 = vrot.slane %v3802_v7, 1  ;;  %v3809_v15 = vmax.f32 %v3807_v50, %v3808_v5  ;;  %v2110_v39 = vadd.f32 %v11378_v42, %v17281_v48  ;;  %v2834_v59 = vcombine.high %v2306_v58, %v2306_v58 }
 0x318   : > { %v3816_v13 = vmax.f32 %v3814_v36, %v3815_v61  ;;  %v2841_v26 = vrot.slane %v2306_v58, %v13732_v38  ;;  %v2113_v41 = vadd.f32 %v11381_v12, %v14525_v31  ;;  %v4327_v0 = vrot.slane %v17282_v62, 5 }
 0x319   : > { %v3823_v1 = vmax.f32 %v3821_v11, %v3822_v29  ;;  %v2271_v46 = vadd.f32 %v17283_v28, %v2110_v39  ;;  %v4331_v18 = vrot.slane %v17284_v16, 5  ;;  %v2848_v45 = vrot.slane %v2834_v59, %v13732_v38 }
 0x31a   : > { %v2849_v54 = vcombine.high %v2841_v26, %v2841_v26  ;;  %v3826_v56 = vsel %vm3013_vm7, %v2841_v26, -inf  ;;  %v14791_v20 = vmax.f32 %v3802_v7, %v3803_v9  ;;  %v3810_v47 = vrot.slane %v3809_v15, 1 }
 0x31b   : > { %v3827_v8 = vrot.slane %v3826_v56, 4  ;;  %v2307_v25 = vmax.f32 %v2271_v46, 0.0  ;;  %v3817_v3 = vrot.slane %v3816_v13, 1  ;;  %v2850_v60 = vcombine.high %v2848_v45, %v2848_v45 }
 0x31c   : > { %v3833_v31 = vsel %vm3013_vm7, %v2849_v54, -inf  ;;  %v3840_v40 = vsel %vm3013_vm7, %v2848_v45, -inf  ;;  %v3824_v24 = vrot.slane %v3823_v1, 1  ;;  %v2274_v50 = vadd.f32 %v17285_v2, %v2113_v41 }
 0x31d   : > { %v3828_v43 = vmax.f32 %v3826_v56, %v3827_v8  ;;  %v3834_v17 = vrot.slane %v3833_v31, 4  ;;  %v3841_v22 = vrot.slane %v3840_v40, 4  ;;  %v3847_v44 = vsel %vm3013_vm7, %v2850_v60, -inf }
 0x31e   : > { %v2851_v63 = vcombine.high %v2307_v25, %v2307_v25  ;;  %v2858_v57 = vrot.slane %v2307_v25, %v13732_v38  ;;  %v3848_v36 = vrot.slane %v3847_v44, 4  ;;  %v2308_v5 = vmax.f32 %v2274_v50, 0.0 }
 0x31f   : > { %v3829_v49 = vrot.slane %v3828_v43, 2  ;;  %v3835_v37 = vmax.f32 %v3833_v31, %v3834_v17  ;;  %v3842_v51 = vmax.f32 %v3840_v40, %v3841_v22  ;;  %v3811_v41 = vmax.f32 %v3809_v15, %v3810_v47 }
 0x320   : > { %v2865_v6 = vrot.slane %v2851_v63, %v13732_v38  ;;  %v2866_v27 = vcombine.high %v2858_v57, %v2858_v57  ;;  %v3854_v7 = vsel %vm3013_vm7, %v2858_v57, -inf  ;;  %v3849_v42 = vmax.f32 %v3847_v44, %v3848_v36 }
 0x321   : > { %v3830_v11 = vmax.f32 %v3828_v43, %v3829_v49  ;;  %v3836_v30 = vrot.slane %v3835_v37, 2  ;;  %v3843_v4 = vrot.slane %v3842_v51, 2  ;;  %v3855_v61 = vrot.slane %v3854_v7, 4 }
 0x322   : > { %v2867_v14 = vcombine.high %v2865_v6, %v2865_v6  ;;  %v3861_v58 = vsel %vm3013_vm7, %v2866_v27, -inf  ;;  %v3868_v35 = vsel %vm3013_vm7, %v2865_v6, -inf  ;;  %v3850_v29 = vrot.slane %v3849_v42, 2 }
 0x323   : > { %v3831_v33 = vrot.slane %v3830_v11, 1  ;;  %v14802_v12 = vmax.f32 %v3835_v37, %v3836_v30  ;;  %v3844_v9 = vmax.f32 %v3842_v51, %v3843_v4  ;;  %v3856_v48 = vmax.f32 %v3854_v7, %v3855_v61 }
 0x324   : > { %v3862_v39 = vrot.slane %v3861_v58, 4  ;;  %v3869_v59 = vrot.slane %v3868_v35, 4  ;;  %v3875_v26 = vsel %vm3013_vm7, %v2867_v14, -inf  ;;  %v3818_v28 = vmax.f32 %v3816_v13, %v3817_v3 }
 0x325   : > { %v3845_v46 = vrot.slane %v3844_v9, 1  ;;  %v14805_v45 = vmax.f32 %v3849_v42, %v3850_v29  ;;  %v3857_v54 = vrot.slane %v3856_v48, 2  ;;  %v3876_v25 = vrot.slane %v3875_v26, 4  ;;  %v14819_v42 = vld [vmem:[#allocation2 + $0x40] sm:$0xff] }
 0x326   : > { %v3863_v56 = vmax.f32 %v3861_v58, %v3862_v39  ;;  %v3870_v8 = vmax.f32 %v3868_v35, %v3869_v59  ;;  %v3825_v60 = vmax.f32 %v3823_v1, %v3824_v24  ;;  %v14807_v31 = vmax.f32 %v3830_v11, %v3831_v33  ;;  %v4152_v39 = vld [vmem:[#allocation2 + $0x48] sm:$0x3]  ;;  %v14822_v59 = vld [vmem:[#allocation2 + $0x50] sm:$0xff] }
 0x327   : > { %v3838_v40 = vrot.slane %v14802_v12, 1  ;;  %v2868_v43 = vcombine.high %v2308_v5, %v2308_v5  ;;  %v3858_v17 = vmax.f32 %v3856_v48, %v3857_v54  ;;  %v3877_v63 = vmax.f32 %v3875_v26, %v3876_v25 }
 0x328   : > { %v3864_v22 = vrot.slane %v3863_v56, 2  ;;  %v3871_v44 = vrot.slane %v3870_v8, 2  ;;  %v14810_v57 = vmax.f32 %v3844_v9, %v3845_v46  ;;  %v3852_v15 = vrot.slane %v14805_v45, 1 }
 0x329   : > { %v2875_v13 = vrot.slane %v2308_v5, %v13732_v38  ;;  %v2882_v47 = vrot.slane %v2868_v43, %v13732_v38  ;;  %v3859_v3 = vrot.slane %v3858_v17, 1  ;;  %v3878_v24 = vrot.slane %v3877_v63, 2 }
 0x32a   : > { %v3865_v2 = vmax.f32 %v3863_v56, %v3864_v22  ;;  %v3872_v1 = vmax.f32 %v3870_v8, %v3871_v44  ;;  %v14826_v56 = vpack.c.bf16 %v14819_v42, %v14819_v42  ;;  %v4154_v44 = vld [vmem:[#allocation2 + $0x58] sm:$0x3] }
 0x32b   : > { %v2883_v50 = vcombine.high %v2875_v13, %v2875_v13  ;;  %v2884_v49 = vcombine.high %v2882_v47, %v2882_v47  ;;  %v3882_v37 = vsel %vm3013_vm7, %v2875_v13, -inf  ;;  %v3896_v51 = vsel %vm3013_vm7, %v2882_v47, -inf }
 0x32c   : > { %v3860_v36 = vmax.f32 %v3858_v17, %v3859_v3  ;;  %v3866_v6 = vrot.slane %v3865_v2, 1  ;;  %v3873_v27 = vrot.slane %v3872_v1, 1  ;;  %v3879_v7 = vmax.f32 %v3877_v63, %v3878_v24 }
 0x32d   : > { %v3883_v11 = vrot.slane %v3882_v37, 4  ;;  %v3889_v30 = vsel %vm3013_vm7, %v2883_v50, -inf  ;;  %v3897_v5 = vrot.slane %v3896_v51, 4  ;;  %v3903_v4 = vsel %vm3013_vm7, %v2884_v49, -inf }
 0x32e   : > { %v3867_v14 = vmax.f32 %v3865_v2, %v3866_v6  ;;  %v3874_v61 = vmax.f32 %v3872_v1, %v3873_v27  ;;  %v3880_v58 = vrot.slane %v3879_v7, 1  ;;  %v3966_v35 = vmax.f32 %v14791_v20, %v3860_v36 }
 0x32f   : > { %v3884_v33 = vmax.f32 %v3882_v37, %v3883_v11  ;;  %v3890_v9 = vrot.slane %v3889_v30, 4  ;;  %v3898_v29 = vmax.f32 %v3896_v51, %v3897_v5  ;;  %v3904_v48 = vrot.slane %v3903_v4, 4 }
 0x330   : > { %v3881_v26 = vmax.f32 %v3879_v7, %v3880_v58  ;;  %v3967_v46 = vmax.f32 %v3811_v41, %v3867_v14  ;;  %v3968_v54 = vmax.f32 %v3818_v28, %v3874_v61  ;;  %v14829_v63 = vpack.c.bf16 %v4152_v39, %v4152_v39 }
 0x331   : > { %v3885_v8 = vrot.slane %v3884_v33, 2  ;;  %v3891_v25 = vmax.f32 %v3889_v30, %v3890_v9  ;;  %v3899_v43 = vrot.slane %v3898_v29, 2  ;;  %v3905_v17 = vmax.f32 %v3903_v4, %v3904_v48 }
 0x332   : > { %v3969_v22 = vmax.f32 %v3825_v60, %v3881_v26  ;;  %v4119_v20 = vsel %vm4063_vm8, %v3967_v46, %v3966_v35  ;;  %v14833_v13 = vpack.c.bf16 %v14822_v59, %v14822_v59  ;;  %v4270_v24 = vshrl.u32 %v14826_v56, 16  ;;  %v4156_v26 = vld [vmem:[#allocation2 + $0x68] sm:$0x3] }
 0x333   : > { %v4120_v41 = vsel %vm4065_vm9, %v3968_v54, %v4119_v20  ;;  %v3886_v28 = vmax.f32 %v3884_v33, %v3885_v8  ;;  %v3892_v47 = vrot.slane %v3891_v25, 2  ;;  %v3900_v3 = vmax.f32 %v3898_v29, %v3899_v43  ;;  %v14844_v33 = vld [vmem:[#allocation2 + $0x60] sm:$0xff]  ;;  %v14855_v43 = vld [vmem:[#allocation2 + $0x70] sm:$0xff] }
 0x334   : > { %v3906_v2 = vrot.slane %v3905_v17, 2  ;;  %v4121_v1 = vsel %vm4067_vm10, %v3969_v22, %v4120_v41  ;;  %v4273_v60 = vshll.u32 %v14826_v56, 16  ;;  %v14839_v51 = vpack.c.bf16 %v4154_v44, %v4154_v44 }
 0x335   : > { %v3887_v50 = vrot.slane %v3886_v28, 1  ;;  %v3893_v49 = vmax.f32 %v3891_v25, %v3892_v47  ;;  %v3901_v37 = vrot.slane %v3900_v3, 1  ;;  %v4272_v6 = vrot.slane %v4270_v24, 4 }
 0x336   : > { %v3907_v36 = vmax.f32 %v3905_v17, %v3906_v2  ;;  %v4275_v27 = vrot.slane %v4273_v60, 5  ;;  %v4284_v7 = vshrl.u32 %v14833_v13, 16  ;;  %v4279_v4 = vshll.u32 %v14829_v63, 16  ;;  %v4158_v17 = vld [vmem:[#allocation2 + $0x78] sm:$0x3] }
 0x337   : > { %v3888_v11 = vmax.f32 %v3886_v28, %v3887_v50  ;;  %v3894_v30 = vrot.slane %v3893_v49, 1  ;;  %v3902_v5 = vmax.f32 %v3900_v3, %v3901_v37  ;;  %v4287_v35 = vshll.u32 %v14833_v13, 16 }
 0x338   : > { %v3908_v14 = vrot.slane %v3907_v36, 1  ;;  %v4276_v61 = vor.u32 %v4275_v27, %v4272_v6  ;;  %v4286_v58 = vrot.slane %v4284_v7, 4  ;;  %v3839_v9 = vmax.f32 %v14802_v12, %v3838_v40 }
 0x339   : > { %v3895_v29 = vmax.f32 %v3893_v49, %v3894_v30  ;;  %v3970_v48 = vmax.f32 %v14807_v31, %v3888_v11  ;;  %v3972_v39 = vmax.f32 %v14810_v57, %v3902_v5  ;;  %v3853_v46 = vmax.f32 %v14805_v45, %v3852_v15 }
 0x33a   : > { %v3909_v54 = vmax.f32 %v3907_v36, %v3908_v14  ;;  %v4289_v8 = vrot.slane %v4287_v35, 5  ;;  %v4293_v25 = vshll.u32 %v14839_v51, 16  ;;  %v4281_v40 = vrot.slane %v4279_v4, 5 }
 0x33b   : > { %v3971_v22 = vmax.f32 %v3839_v9, %v3895_v29  ;;  %v4122_v12 = vsel %vm4069_vm11, %v3970_v48, %v4121_v1  ;;  %v14860_v31 = vpack.c.bf16 %v14844_v33, %v14844_v33  ;;  %v4277_v20 = vrot.slane %v4276_v61, 4  ;;  %v17287_v29 = vld [vmem:[#allocation14_spill] sm:$0xff] }
 0x33c   : > { %v3973_v57 = vmax.f32 %v3853_v46, %v3909_v54  ;;  %v4290_v44 = vor.u32 %v4289_v8, %v4286_v58  ;;  %v14862_v41 = vpack.c.bf16 %v4156_v26, %v4156_v26  ;;  %v14867_v15 = vpack.c.bf16 %v14855_v43, %v14855_v43  ;;  %v17286_v58 = vld [vmem:[#allocation30_spill] sm:$0xff] }
 0x33d   : > { %v4123_v45 = vsel %vm4071_vm12, %v3971_v22, %v4122_v12  ;;  %v14869_v28 = vpack.c.bf16 %v4158_v17, %v4158_v17  ;;  %v4298_v47 = vshrl.u32 %v14860_v31, 16  ;;  %v4295_v1 = vrot.slane %v4293_v25, 5  ;;  %v11951_v26 = vld [vmem:[%s17069_s5 + $0x14] ss:$8 sps:$4 sm:$0xff]  }
 0x33e   : > { %v4124_v3 = vsel %vm4073_vm13, %v3972_v39, %v4123_v45  ;;  %v4291_v2 = vrot.slane %v4290_v44, 4  ;;  %v4301_v24 = vshll.u32 %v14860_v31, 16  ;;  %v4312_v49 = vshrl.u32 %v14867_v15, 16  ;;  %v11826_v44 = vld [vmem:[%s17067_s3 + $0x200] ss:$8 sps:$4 sm:$0xff]  }
 0x33f   : > { %v4125_v60 = vsel %vm4075_vm14, %v3973_v57, %v4124_v3  ;;  %v4300_v50 = vrot.slane %v4298_v47, 4  ;;  %v4315_v37 = vshll.u32 %v14867_v15, 16  ;;  %v14879_v36 = vsel %vm12596_vm2, %v4277_v20, %v4281_v40  ;;  %v12449_v40 = vld [vmem:[#allocation2 + $0x20] sm:$0xff]  ;;  %v11831_v45 = vld [vmem:[%s17067_s3 + $0x214] ss:$8 sps:$4 sm:$0xff]  }
 0x340   : > { %4142 = vst [vmem:[#allocation2 + $0x81] sm:$0xff] %v4125_v60  ;;  %v14883_v6 = vsel %vm12596_vm2, %v4291_v2, %v4295_v1  ;;  %v4303_v27 = vrot.slane %v4301_v24, 5  ;;  %v4307_v7 = vshll.u32 %v14862_v41, 16  ;;  %v4314_v30 = vrot.slane %v4312_v49, 4  ;;  %v12450_v47 = vld [vmem:[#allocation2 + $0x30] sm:$0xff] }
 0x341   : > { %v14888_v11 = vcombine.low %v14879_v36, %v14883_v6  ;;  %v4317_v5 = vrot.slane %v4315_v37, 5  ;;  %v4321_v4 = vshll.u32 %v14869_v28, 16  ;;  %v14893_v14 = vpack.c.bf16 %v14822_v59, %v14819_v42  ;;  %v11829_v24 = vld [vmem:[%s17067_s3 + $0x210] ss:$8 sps:$4 sm:$0xff]  }
 0x342   : > { %v4304_v61 = vor.u32 %v4303_v27, %v4300_v50  ;;  %v10574_v35 = vrot.slane %v17286_v58, 9  ;;  %v10575_v48 = vrot.slane %v17287_v29, 9  ;;  %v4309_v54 = vrot.slane %v4307_v7, 5  ;;  %v11841_v29 = vld [vmem:[%s17067_s3 + $0x250] ss:$8 sps:$4 sm:$0xff]  }
 0x343   : > { %5405 = vmatprep.mubr.bf16.mxu1 %v14888_v11  ;;  %v4318_v9 = vor.u32 %v4317_v5, %v4314_v30  ;;  %v4323_v25 = vrot.slane %v4321_v4, 5  ;;  %v14925_v16 = vpack.c.bf16 %v14855_v43, %v14844_v33  ;;  %v11154_v3 = vpack.c.bf16 %v14819_v42, %v12450_v47  ;;  %v11834_v42 = vld [vmem:[%s17067_s3 + $0x224] ss:$8 sps:$4 sm:$0xff]   ;;  %v11835_v30 = vld [vmem:[%s17067_s3 + $0x230] ss:$8 sps:$4 sm:$0xff]  }
 0x344   : > { %5406 = vmatmul.mubr.bf16.gmra.mrb[128].mxu1 %v14893_v14  ;;  %v4305_v39 = vrot.slane %v4304_v61, 4  ;;  %v4328_v46 = vsel %vm12978_vm5, %v10574_v35, %v4327_v0  ;;  %v14907_v17 = vsel %vm12978_vm5, %v10575_v48, %v4331_v18  ;;  %v12448_v18 = vld [vmem:[#allocation2 + $0x10] sm:$0xff]  ;;  %v10577_v2 = vrot.slane %v14604_v52, 9  ;;  %v11864_v47 = vld [vmem:[%s17067_s3 + $0x2c4] ss:$8 sps:$4 sm:$0xff]  }
 0x345   : > { %v4319_v8 = vrot.slane %v4318_v9, 4  ;;  %v10596_v22 = vcombine.low %v4328_v46, %v14907_v17  ;;  %v11153_v57 = vpack.c.bf16 %v12449_v40, %v12448_v18  ;;  %v4339_v1 = vrot.slane %v14612_v32, 5  ;;  %v11832_v32 = vld [vmem:[%s17067_s3 + $0x220] ss:$8 sps:$4 sm:$0xff]   ;;  %v11843_v61 = vld [vmem:[%s17067_s3 + $0x254] ss:$8 sps:$4 sm:$0xff]  }
 0x346   : > { %v14912_v12 = vsel %vm12596_vm2, %v4305_v39, %v4309_v54  ;;  %v10576_v60 = vrot.slane %v14592_v10, 9  ;;  %v4335_v50 = vrot.slane %v14600_v21, 5  ;;  %v11837_v21 = vld [vmem:[%s17067_s3 + $0x234] ss:$8 sps:$4 sm:$0xff]   ;;  %v11155_v37 = vpack.c.bf16 %v14844_v33, %v14822_v59  ;;  %v11840_v59 = vld [vmem:[%s17067_s3 + $0x244] ss:$8 sps:$4 sm:$0xff]  }
 0x347   : > { %v14916_v62 = vsel %vm12596_vm2, %v4319_v8, %v4323_v25  ;;  %v10606_v20 = vcombine.low %v14883_v6, %v14912_v12  ;;  %v14949_v52 = vsel %vm12978_vm5, %v10577_v2, %v4339_v1  ;;  %v10579_v27 = vrot.slane %v14833_v13, 9  ;;  %v11838_v33 = vld [vmem:[%s17067_s3 + $0x240] ss:$8 sps:$4 sm:$0xff]   ;;  %v11847_v8 = vld [vmem:[%s17067_s3 + $0x270] ss:$8 sps:$4 sm:$0xff]  }
 0x348   : > { %v14920_v0 = vcombine.low %v14912_v12, %v14916_v62  ;;  %v4336_v49 = vsel %vm12978_vm5, %v10576_v60, %v4335_v50  ;;  %v4347_v7 = vrot.slane %v14839_v51, 5  ;;  %v10578_v5 = vrot.slane %v14826_v56, 9  ;;  %v14979_v51 = vld [vmem:[#allocation2 + $0x80] sm:$0xff]  ;;  %v11853_v18 = vld [vmem:[%s17067_s3 + $0x290] ss:$8 sps:$4 sm:$0xff]  }
 0x349   : > { %v14957_v10 = vcombine.low %v4336_v49, %v14949_v52  ;;  %v4343_v4 = vrot.slane %v14829_v63, 5  ;;  %v11156_v58 = vpack.c.bf16 %v14979_v51, %v14855_v43  ;;  %v10581_v35 = vrot.slane %v14867_v15, 9  ;;  %v11846_v43 = vld [vmem:[%s17067_s3 + $0x264] ss:$8 sps:$4 sm:$0xff]   ;;  %v11867_v2 = vld [vmem:[%s17067_s3 + $0x2d4] ss:$8 sps:$4 sm:$0xff]  }
 0x34a   : > { %5415 = vmatprep.mubr.bf16.mxu1 %v14920_v0  ;;  %v14977_v13 = vsel %vm12978_vm5, %v10579_v27, %v4347_v7  ;;  %v4355_v9 = vrot.slane %v14869_v28, 5  ;;  %v10580_v48 = vrot.slane %v14860_v31, 9  ;;  %v4351_v39 = vrot.slane %v14862_v41, 5  ;;  %v11844_v28 = vld [vmem:[%s17067_s3 + $0x260] ss:$8 sps:$4 sm:$0xff]  }
 0x34b   : > { %v14986_v56 = vsel %vm12978_vm5, %v10578_v5, %v4343_v4  ;;  %v11849_v41 = vld [vmem:[%s17067_s3 + $0x274] ss:$8 sps:$4 sm:$0xff]   ;;  %v10608_v54 = vcombine.low %v14907_v17, %v4336_v49  ;;  %v11852_v25 = vld [vmem:[%s17067_s3 + $0x284] ss:$8 sps:$4 sm:$0xff]   ;;  %v11865_v1 = vld [vmem:[%s17067_s3 + $0x2d0] ss:$8 sps:$4 sm:$0xff]   ;;  %v11145_v7 = vpack.c.bf16 %v14979_v51, %v14979_v51 }
 0x34c   : > { %5416 = vmatmul.mubr.bf16.gmra.mrb[132].mxu1 %v14925_v16  ;;  %v14990_v63 = vcombine.low %v14986_v56, %v14977_v13  ;;  %v15010_v15 = vsel %vm12978_vm5, %v10581_v35, %v4355_v9  ;;  %v15017_v46 = vsel %vm12978_vm5, %v10580_v48, %v4351_v39  ;;  %v11855_v17 = vld [vmem:[%s17067_s3 + $0x294] ss:$8 sps:$4 sm:$0xff]   ;;  %v11858_v40 = vld [vmem:[%s17067_s3 + $0x2a4] ss:$8 sps:$4 sm:$0xff]   ;;  %v11868_v60 = vld [vmem:[%s17067_s3 + $0x2e0] ss:$8 sps:$4 sm:$0xff]  }
 0x34d   : > { %5458 = vmatprep.mubr.bf16.mxu1 %v11153_v57  ;;  %v15021_v31 = vcombine.low %v15017_v46, %v15010_v15  ;;  %v11856_v57 = vld [vmem:[%s17067_s3 + $0x2a0] ss:$8 sps:$4 sm:$0xff]   ;;  %v11873_v50 = vld [vmem:[%s17067_s3 + $0x2f4] ss:$8 sps:$4 sm:$0xff]   ;;  %v11877_v5 = vld [vmem:[%s17067_s3 + $0x310] ss:$8 sps:$4 sm:$0xff]   ;;  %v10610_v35 = vcombine.low %v14977_v13, %v15017_v46 }
 0x34e   : > { %v11874_v49 = vld [vmem:[%s17067_s3 + $0x300] ss:$8 sps:$4 sm:$0xff]   ;;  %v11879_v27 = vld [vmem:[%s17067_s3 + $0x314] ss:$8 sps:$4 sm:$0xff]   ;;  %v10584_v48 = vrot.slane %v11145_v7, 9 }
 0x34f   : > { %v4160_v4 = vld [vmem:[#allocation2 + $0x88] sm:$0x3] }
 0x350   : > { %v11892_v6 = vld [vmem:[%s17067_s3 + $0x360] ss:$8 sps:$4 sm:$0xff]  }
 0x354   : > { %5459 = vmatmul.mubr.bf16.vlgmr.msra.gmra.mrb[120].mxu1 %v10596_v22  ;;  %v11850_v22 = vld [vmem:[%s17067_s3 + $0x280] ss:$8 sps:$4 sm:$0xff]  }
 0x355   : > { %5500 = vmatpush1.bf16.msra.mxu1 %v11826_v44  ;;  %5468 = vmatprep.mubr.bf16.mxu1 %v11154_v3  ;;  %v11861_v44 = vld [vmem:[%s17067_s3 + $0x2b4] ss:$8 sps:$4 sm:$0xff]   ;;  %v11862_v3 = vld [vmem:[%s17067_s3 + $0x2c0] ss:$8 sps:$4 sm:$0xff]  }
 0x356   : > { %5501 = vmatprep.subr.bf16.mxu1 %v11831_v45  ;;  %v11859_v45 = vld [vmem:[%s17067_s3 + $0x2b0] ss:$8 sps:$4 sm:$0xff]  }
 0x359   : > { %5502 = vmatpush1.bf16.msra.mxu1 %v11829_v24  ;;  %v11870_v24 = vld [vmem:[%s17067_s3 + $0x2e4] ss:$8 sps:$4 sm:$0xff]  }
 0x35a   : > { %5503 = vmatprep.subr.bf16.mxu1 %v11834_v42  ;;  %v11871_v42 = vld [vmem:[%s17067_s3 + $0x2f0] ss:$8 sps:$4 sm:$0xff]  }
 0x35c   : > { %5469 = vmatmul.mubr.bf16.gmra.mrb[124].mxu1 %v14957_v10 }
 0x35d   : > { %5504 = vmatpush1.bf16.msra.mxu1 %v11832_v32  ;;  %5478 = vmatprep.mubr.bf16.mxu1 %v11155_v37  ;;  %v11876_v32 = vld [vmem:[%s17067_s3 + $0x304] ss:$8 sps:$4 sm:$0xff]  }
 0x35e   : > { %5505 = vmatprep.subr.bf16.mxu1 %v11837_v21  ;;  %v17289_v21 = vld [vmem:[#allocation18_spill] sm:$0xff] }
 0x35f   : > { %v10604_v37 = vcombine.low %v17289_v21, %v14647_v34  ;;  %v11882_v34 = vld [vmem:[%s17067_s3 + $0x324] ss:$8 sps:$4 sm:$0xff]  }
 0x361   : > { %5506 = vmatpush1.bf16.msra.mxu1 %v11835_v30  ;;  %v10609_v30 = vcombine.low %v14949_v52, %v14986_v56  ;;  %v11880_v52 = vld [vmem:[%s17067_s3 + $0x320] ss:$8 sps:$4 sm:$0xff]   ;;  %v10605_v56 = vcombine.low %v14667_v55, %v14879_v36  ;;  %v11888_v55 = vld [vmem:[%s17067_s3 + $0x344] ss:$8 sps:$4 sm:$0xff]  }
 0x362   : > { %5507 = vmatprep.subr.bf16.mxu1 %v11840_v59  ;;  %v4363_v59 = vshrl.u32 %v11145_v7, 16 }
 0x364   : > { %5479 = vmatmul.mubr.bf16.gmra.mrb[128].mxu1 %v14990_v63  ;;  %v4365_v9 = vrot.slane %v4363_v59, 4 }
 0x365   : > { %5508 = vmatpush1.bf16.msra.mxu1 %v11838_v33  ;;  %5488 = vmatprep.mubr.bf16.mxu1 %v11156_v58  ;;  %v4366_v33 = vshll.u32 %v11145_v7, 16  ;;  %v11885_v58 = vld [vmem:[%s17067_s3 + $0x334] ss:$8 sps:$4 sm:$0xff]  }
 0x366   : > { %5509 = vmatprep.subr.bf16.mxu1 %v11843_v61  ;;  %v11146_v61 = vpack.c.bf16 %v4160_v4, %v4160_v4  ;;  %v11927_v4 = vld [vmem:[%s17067_s3 + $0x414] ss:$8 sps:$4 sm:$0xff]  }
 0x368   : > { %v4378_v39 = vrot.slane %v11146_v61, 5  ;;  %v4372_v46 = vshll.u32 %v11146_v61, 16  ;;  %v11925_v61 = vld [vmem:[%s17067_s3 + $0x410] ss:$8 sps:$4 sm:$0xff]  }
 0x369   : > { %5510 = vmatpush1.bf16.msra.mxu1 %v11841_v29  ;;  %v4368_v29 = vrot.slane %v4366_v33, 5 }
 0x36a   : > { %5511 = vmatprep.subr.bf16.mxu1 %v11846_v43  ;;  %v11883_v43 = vld [vmem:[%s17067_s3 + $0x330] ss:$8 sps:$4 sm:$0xff]   ;;  %v15118_v13 = vsel %vm12978_vm5, %v10584_v48, %v4378_v39  ;;  %v11936_v39 = vld [vmem:[%s17067_s3 + $0x444] ss:$8 sps:$4 sm:$0xff]  }
 0x36b   : > { %v4369_v36 = vor.u32 %v4368_v29, %v4365_v9  ;;  %v11931_v48 = vld [vmem:[%s17067_s3 + $0x430] ss:$8 sps:$4 sm:$0xff]  }
 0x36c   : > { %5489 = vmatmul.mubr.bf16.gmra.mrb[132].mxu1 %v15021_v31 }
 0x36d   : > { %5512 = vmatpush1.bf16.msra.mxu1 %v11844_v28  ;;  %5531 = vmatprep.mubr.bf16.mxu1 %v10608_v54  ;;  %v11886_v28 = vld [vmem:[%s17067_s3 + $0x340] ss:$8 sps:$4 sm:$0xff]   ;;  %v10611_v54 = vcombine.low %v15010_v15, %v15118_v13 }
 0x36e   : > { %5513 = vmatprep.subr.bf16.mxu1 %v11849_v41  ;;  %v11891_v41 = vld [vmem:[%s17067_s3 + $0x354] ss:$8 sps:$4 sm:$0xff]  }
 0x371   : > { %5514 = vmatpush1.bf16.msra.mxu1 %v11847_v8  ;;  %v4370_v8 = vrot.slane %v4369_v36, 4  ;;  %v11942_v36 = vld [vmem:[%s17067_s3 + $0x464] ss:$8 sps:$4 sm:$0xff]  }
 0x372   : > { %5515 = vmatprep.subr.bf16.mxu1 %v11852_v25  ;;  %v11889_v25 = vld [vmem:[%s17067_s3 + $0x350] ss:$8 sps:$4 sm:$0xff]  }
 0x375   : > { %5516 = vmatpush1.bf16.msra.mxu1 %v11850_v22  ;;  %v4374_v22 = vrot.slane %v4372_v46, 5 }
 0x376   : > { %5517 = vmatprep.subr.bf16.mxu1 %v11855_v17  ;;  %v11894_v17 = vld [vmem:[%s17067_s3 + $0x364] ss:$8 sps:$4 sm:$0xff]  }
 0x377   : > { %v15139_v15 = vsel %vm12596_vm2, %v4370_v8, %v4374_v22 }
 0x378   : > { %v10607_v12 = vcombine.low %v14916_v62, %v15139_v15  ;;  %v11898_v62 = vld [vmem:[%s17067_s3 + $0x380] ss:$8 sps:$4 sm:$0xff]  }
 0x379   : > { %5518 = vmatpush1.bf16.msra.mxu1 %v11853_v18  ;;  %v11895_v18 = vld [vmem:[%s17067_s3 + $0x370] ss:$8 sps:$4 sm:$0xff]  }
 0x37a   : > { %5519 = vmatprep.subr.bf16.mxu1 %v11858_v40  ;;  %v11900_v40 = vld [vmem:[%s17067_s3 + $0x384] ss:$8 sps:$4 sm:$0xff]  }
 0x37d   : > { %5520 = vmatpush1.bf16.msra.mxu1 %v11856_v57  ;;  %v11903_v57 = vld [vmem:[%s17067_s3 + $0x394] ss:$8 sps:$4 sm:$0xff]  }
 0x37e   : > { %5521 = vmatprep.subr.bf16.mxu1 %v11861_v44  ;;  %v11906_v44 = vld [vmem:[%s17067_s3 + $0x3a4] ss:$8 sps:$4 sm:$0xff]  }
 0x381   : > { %5522 = vmatpush1.bf16.msra.mxu1 %v11859_v45  ;;  %v11904_v45 = vld [vmem:[%s17067_s3 + $0x3a0] ss:$8 sps:$4 sm:$0xff]  }
 0x382   : > { %5523 = vmatprep.subr.bf16.mxu1 %v11864_v47  ;;  %v11909_v47 = vld [vmem:[%s17067_s3 + $0x3b4] ss:$8 sps:$4 sm:$0xff]  }
 0x385   : > { %5524 = vmatpush1.bf16.msra.mxu1 %v11862_v3  ;;  %v11907_v3 = vld [vmem:[%s17067_s3 + $0x3b0] ss:$8 sps:$4 sm:$0xff]  }
 0x386   : > { %5525 = vmatprep.subr.bf16.mxu1 %v11867_v2  ;;  %v11912_v2 = vld [vmem:[%s17067_s3 + $0x3c4] ss:$8 sps:$4 sm:$0xff]  }
 0x389   : > { %5526 = vmatpush1.bf16.msra.mxu1 %v11865_v1  ;;  %v11910_v1 = vld [vmem:[%s17067_s3 + $0x3c0] ss:$8 sps:$4 sm:$0xff]  }
 0x38a   : > { %5527 = vmatprep.subr.bf16.mxu1 %v11870_v24  ;;  %v11915_v24 = vld [vmem:[%s17067_s3 + $0x3d4] ss:$8 sps:$4 sm:$0xff]  }
 0x38d   : > { %5528 = vmatpush1.bf16.msra.mxu1 %v11868_v60  ;;  %v11913_v60 = vld [vmem:[%s17067_s3 + $0x3d0] ss:$8 sps:$4 sm:$0xff]  }
 0x38e   : > { %5529 = vmatprep.subr.bf16.mxu1 %v11873_v50  ;;  %v11918_v50 = vld [vmem:[%s17067_s3 + $0x3e4] ss:$8 sps:$4 sm:$0xff]  }
 0x391   : > { %5530 = vmatpush1.bf16.msra.mxu1 %v11871_v42  ;;  %v11916_v42 = vld [vmem:[%s17067_s3 + $0x3e0] ss:$8 sps:$4 sm:$0xff]  }
 0x392   : > { %5572 = vmatprep.subr.bf16.mxu1 %v11876_v32  ;;  %v4161_v32 = vld [vmem:[#allocation2 + $0x90] sm:$0xff] }
 0x393   : > { %v15198_v21 = vpack.c.bf16 %v4161_v32, %v4161_v32  ;;  %v11157_v46 = vpack.c.bf16 %v4161_v32, %v14979_v51 }
 0x394   : > { %5532 = vmatmul.mubr.bf16.vlgmr.msra.gmra.mrb[120].mxu1 %v10604_v37  ;;  %v11919_v37 = vld [vmem:[%s17067_s3 + $0x3f0] ss:$8 sps:$4 sm:$0xff]  }
 0x395   : > { %5541 = vmatprep.mubr.bf16.mxu1 %v10609_v30  ;;  %5573 = vmatpush1.bf16.msra.mxu1 %v11874_v49  ;;  %v11921_v49 = vld [vmem:[%s17067_s3 + $0x3f4] ss:$8 sps:$4 sm:$0xff]   ;;  %v4386_v7 = vshrl.u32 %v15198_v21, 16  ;;  %v4389_v30 = vshll.u32 %v15198_v21, 16  ;;  %v10587_v51 = vrot.slane %v15198_v21, 9 }
 0x396   : > { %5574 = vmatprep.subr.bf16.mxu1 %v11879_v27  ;;  %v11924_v27 = vld [vmem:[%s17067_s3 + $0x404] ss:$8 sps:$4 sm:$0xff]  }
 0x397   : > { %v4388_v59 = vrot.slane %v4386_v7, 4  ;;  %v4391_v33 = vrot.slane %v4389_v30, 5 }
 0x399   : > { %5575 = vmatpush1.bf16.msra.mxu1 %v11877_v5  ;;  %v11922_v5 = vld [vmem:[%s17067_s3 + $0x400] ss:$8 sps:$4 sm:$0xff]  }
 0x39a   : > { %5576 = vmatprep.subr.bf16.mxu1 %v11882_v34  ;;  %v4162_v34 = vld [vmem:[#allocation2 + $0x98] sm:$0x3] }
 0x39c   : > { %5542 = vmatmul.mubr.bf16.gmra.mrb[124].mxu1 %v10605_v56  ;;  %v11148_v56 = vpack.c.bf16 %v4162_v34, %v4162_v34 }
 0x39d   : > { %5551 = vmatprep.mubr.bf16.mxu1 %v10610_v35  ;;  %5577 = vmatpush1.bf16.msra.mxu1 %v11880_v52  ;;  %v11930_v52 = vld [vmem:[%s17067_s3 + $0x424] ss:$8 sps:$4 sm:$0xff]  }
 0x39e   : > { %5578 = vmatprep.subr.bf16.mxu1 %v11885_v58  ;;  %v4392_v58 = vor.u32 %v4391_v33, %v4388_v59  ;;  %v4395_v35 = vshll.u32 %v11148_v56, 16  ;;  %v4401_v8 = vrot.slane %v11148_v56, 5 }
 0x3a0   : > { %v4393_v9 = vrot.slane %v4392_v58, 4  ;;  %v4397_v29 = vrot.slane %v4395_v35, 5 }
 0x3a1   : > { %5579 = vmatpush1.bf16.msra.mxu1 %v11883_v43 }
 0x3a2   : > { %5580 = vmatprep.subr.bf16.mxu1 %v11888_v55  ;;  %v4398_v43 = vsel %vm12596_vm2, %v4393_v9, %v4397_v29  ;;  %vm15814_vm2 = vmor %vm6879_vm0, %vm6880_vm1 }
 0x3a3   : > { %v10613_v55 = vcombine.low %v15139_v15, %v4398_v43  ;;  %v11955_v15 = vld [vmem:[%s17069_s5 + $0x30] ss:$8 sps:$4 sm:$0xff]   ;;  %vm15831_vm4 = vmor %vm15814_vm2, %vm6882_vm3 }
 0x3a4   : > { %5552 = vmatmul.mubr.bf16.gmra.mrb[128].mxu1 %v10606_v20  ;;  %v11897_v20 = vld [vmem:[%s17067_s3 + $0x374] ss:$8 sps:$4 sm:$0xff]  }
 0x3a5   : > { %5561 = vmatprep.mubr.bf16.mxu1 %v10611_v54  ;;  %5581 = vmatpush1.bf16.msra.mxu1 %v11886_v28  ;;  %v11940_v28 = vld [vmem:[%s17067_s3 + $0x460] ss:$8 sps:$4 sm:$0xff]   ;;  %v12462_v54 = vmov 0  }
 0x3a6   : > { %5582 = vmatprep.subr.bf16.mxu1 %v11891_v41  ;;  %v11943_v41 = vld [vmem:[%s17067_s3 + $0x470] ss:$8 sps:$4 sm:$0xff]  }
 0x3a9   : > { %5583 = vmatpush1.bf16.msra.mxu1 %v11889_v25  ;;  %v4402_v25 = vsel %vm12978_vm5, %v10587_v51, %v4401_v8  ;;  %vm6884_vm5 = vsmask.f32 7448 }
 0x3aa   : > { %5584 = vmatprep.subr.bf16.mxu1 %v11894_v17  ;;  %v10614_v22 = vcombine.low %v15118_v13, %v4402_v25  ;;  %v11952_v13 = vld [vmem:[%s17069_s5 + $0x20] ss:$8 sps:$4 sm:$0xff]   ;;  %v11954_v17 = vld [vmem:[%s17069_s5 + $0x24] ss:$8 sps:$4 sm:$0xff]   ;;  %vm15845_vm6 = vmor %vm15831_vm4, %vm6884_vm5 }
 0x3ac   : > { %5562 = vmatmul.mubr.bf16.gmra.mrb[132].mxu1 %v10607_v12  ;;  %v11960_v12 = vld [vmem:[%s17069_s5 + $0x44] ss:$8 sps:$4 sm:$0xff]  }
 0x3ad   : > { %5585 = vmatpush1.bf16.msra.mxu1 %v11892_v6  ;;  %5604 = vmatprep.mubr.bf16.mxu1 %v14680_v23  ;;  %v11901_v23 = vld [vmem:[%s17067_s3 + $0x390] ss:$8 sps:$4 sm:$0xff]   ;;  %v11957_v6 = vld [vmem:[%s17069_s5 + $0x34] ss:$8 sps:$4 sm:$0xff]  }
 0x3ae   : > { %5586 = vmatprep.subr.bf16.mxu1 %v11897_v20  ;;  %v11958_v20 = vld [vmem:[%s17069_s5 + $0x40] ss:$8 sps:$4 sm:$0xff]  }
 0x3b1   : > { %5587 = vmatpush1.bf16.msra.mxu1 %v11895_v18  ;;  %v17290_v18 = vld [vmem:[#allocation26_spill] sm:$0xff] }
 0x3b2   : > { %5588 = vmatprep.subr.bf16.mxu1 %v11900_v40  ;;  %v4625_v40 = vsub.s32 0, %v17290_v18 }
 0x3b5   : > { %5589 = vmatpush1.bf16.msra.mxu1 %v11898_v62  ;;  %v4621_v62 = vld [vmem:[%s17068_s4] sm:$0x3] }
 0x3b6   : > { %5590 = vmatprep.subr.bf16.mxu1 %v11903_v57  ;;  %v4629_v57 = vsub.s32 1, %v17290_v18 }
 0x3b9   : > { %5591 = vmatpush1.bf16.msra.mxu1 %v11901_v23  ;;  %v11963_v23 = vld [vmem:[%s17069_s5 + $0x54] ss:$8 sps:$4 sm:$0xff]  }
 0x3ba   : > { %5592 = vmatprep.subr.bf16.mxu1 %v11906_v44  ;;  %v11961_v44 = vld [vmem:[%s17069_s5 + $0x50] ss:$8 sps:$4 sm:$0xff]  }
 0x3bd   : > { %5593 = vmatpush1.bf16.msra.mxu1 %v11904_v45  ;;  %v15312_v45 = vrot.slane %v4621_v62, %v4625_v40 }
 0x3be   : > { %5594 = vmatprep.subr.bf16.mxu1 %v11909_v47  ;;  %v15316_v47 = vrot.slane %v4621_v62, %v4629_v57 }
 0x3c1   : > { %5595 = vmatpush1.bf16.msra.mxu1 %v11907_v3 }
 0x3c2   : > { %5596 = vmatprep.subr.bf16.mxu1 %v11912_v2 }
 0x3c5   : > { %5597 = vmatpush1.bf16.msra.mxu1 %v11910_v1 }
 0x3c6   : > { %5598 = vmatprep.subr.bf16.mxu1 %v11915_v24 }
 0x3c9   : > { %5599 = vmatpush1.bf16.msra.mxu1 %v11913_v60 }
 0x3ca   : > { %5600 = vmatprep.subr.bf16.mxu1 %v11918_v50 }
 0x3cd   : > { %5601 = vmatpush1.bf16.msra.mxu1 %v11916_v42 }
 0x3ce   : > { %5602 = vmatprep.subr.bf16.mxu1 %v11921_v49 }
 0x3d1   : > { %5603 = vmatpush1.bf16.msra.mxu1 %v11919_v37 }
 0x3d2   : > { %5645 = vmatprep.subr.bf16.mxu1 %v11924_v27 }
 0x3d4   : > { %5605 = vmatmul.mubr.bf16.vlgmr.msra.gmra.mrb[120].mxu1 %v14651_v53  ;;  %v11928_v53 = vld [vmem:[%s17067_s3 + $0x420] ss:$8 sps:$4 sm:$0xff]  }
 0x3d5   : > { %5614 = vmatprep.mubr.bf16.mxu1 %v14888_v11  ;;  %5646 = vmatpush1.bf16.msra.mxu1 %v11922_v5  ;;  %v11933_v11 = vld [vmem:[%s17067_s3 + $0x434] ss:$8 sps:$4 sm:$0xff]  }
 0x3d6   : > { %5647 = vmatprep.subr.bf16.mxu1 %v11927_v4 }
 0x3d9   : > { %5648 = vmatpush1.bf16.msra.mxu1 %v11925_v61 }
 0x3da   : > { %5649 = vmatprep.subr.bf16.mxu1 %v11930_v52 }
 0x3dc   : > { %5615 = vmatmul.mubr.bf16.gmra.mrb[124].mxu1 %v14893_v14  ;;  %v11934_v14 = vld [vmem:[%s17067_s3 + $0x440] ss:$8 sps:$4 sm:$0xff]  }
 0x3dd   : > { %5624 = vmatprep.mubr.bf16.mxu1 %v14920_v0  ;;  %5650 = vmatpush1.bf16.msra.mxu1 %v11928_v53  ;;  %v11939_v0 = vld [vmem:[%s17067_s3 + $0x454] ss:$8 sps:$4 sm:$0xff]  }
 0x3de   : > { %5651 = vmatprep.subr.bf16.mxu1 %v11933_v11 }
 0x3e1   : > { %5652 = vmatpush1.bf16.msra.mxu1 %v11931_v48 }
 0x3e2   : > { %5653 = vmatprep.subr.bf16.mxu1 %v11936_v39 }
 0x3e4   : > { %5625 = vmatmul.mubr.bf16.gmra.mrb[128].mxu1 %v14925_v16  ;;  %v11945_v16 = vld [vmem:[%s17067_s3 + $0x474] ss:$8 sps:$4 sm:$0xff]  }
 0x3e5   : > { %5634 = vmatprep.mubr.bf16.mxu1 %v10613_v55  ;;  %5654 = vmatpush1.bf16.msra.mxu1 %v11934_v14 }
 0x3e6   : > { %5655 = vmatprep.subr.bf16.mxu1 %v11939_v0 }
 0x3e9   : > { %5656 = vmatpush1.bf16.msra.mxu1 %v11937_v19 }
 0x3ea   : > { %5657 = vmatprep.subr.bf16.mxu1 %v11942_v36 }
 0x3ec   : > { %5635 = vmatmul.mubr.bf16.gmra.mrb[132].mxu1 %v11157_v46 }
 0x3ed   : > { %5658 = vmatpush1.bf16.msra.mxu1 %v11940_v28  ;;  %5677 = vmatprep.mubr.bf16.mxu1 %v12462_v54 }
 0x3ee   : > { %5659 = vmatprep.subr.bf16.mxu1 %v11945_v16 }
 0x3f1   : > { %5660 = vmatpush1.bf16.msra.mxu1 %v11943_v41 }
 0x3f4   : > { %5678 = vmatmul.mubr.bf16.vlgmr.msra.gmra.mrb[120].mxu1 %v14957_v10  ;;  %v11946_v10 = vld [vmem:[%s17069_s5] ss:$8 sps:$4 sm:$0xff]  }
 0x3f5   : > { %5687 = vmatprep.mubr.bf16.mxu1 %v12462_v54 }
 0x3fc   : > { %5688 = vmatmul.mubr.bf16.gmra.mrb[124].mxu1 %v14990_v63  ;;  %v11948_v63 = vld [vmem:[%s17069_s5 + $0x4] ss:$8 sps:$4 sm:$0xff]  }
 0x3fd   : > { %5697 = vmatprep.mubr.bf16.mxu1 %v12462_v54  ;;  %8919 = vmatprep.subr.bf16.mxu0 %v11948_v63 }
 0x3fe   : > { %8920 = vmatpush1.bf16.msra.mxu0 %v11946_v10 }
 0x3ff   : > { %8921 = vmatprep.subr.bf16.mxu0 %v11951_v26 }
 0x404   : > { %5698 = vmatmul.mubr.bf16.gmra.mrb[128].mxu1 %v15021_v31  ;;  %v11949_v31 = vld [vmem:[%s17069_s5 + $0x10] ss:$8 sps:$4 sm:$0xff]  }
 0x405   : > { %5707 = vmatprep.mubr.bf16.mxu1 %v12462_v54  ;;  %8922 = vmatpush1.bf16.msra.mxu0 %v11949_v31 }
 0x406   : > { %8923 = vmatprep.subr.bf16.mxu0 %v11954_v17 }
 0x409   : > { %8924 = vmatpush1.bf16.msra.mxu0 %v11952_v13 }
 0x40a   : > { %8925 = vmatprep.subr.bf16.mxu0 %v11957_v6 }
 0x40c   : > { %5708 = vmatmul.mubr.bf16.gmra.mrb[132].mxu1 %v10614_v22 }
 0x40d   : > { %8926 = vmatpush1.bf16.msra.mxu0 %v11955_v15 }
 0x40e   : > { %8927 = vmatprep.subr.bf16.mxu0 %v11960_v12 }
 0x411   : > { %8928 = vmatpush1.bf16.msra.mxu0 %v11958_v20 }
 0x412   : > { %8929 = vmatprep.subr.bf16.mxu0 %v11963_v23 }
 0x415   : > { %8930 = vmatpush1.bf16.msra.mxu0 %v11961_v44 }
 0x4c7   : > { %v5679_v3 = vpop.f32.mrb[120].mxu1 }
 0x4c8   : > { %v11546_v2 = vadd.f32 %v5679_v3, %v15312_v45  ;;  %v5681_v1 = vpop.f32.mrb[121].mxu1 }
 0x4c9   : > { %v11547_v24 = vadd.f32 %v5681_v1, %v15316_v47  ;;  %v5683_v60 = vpop.f32.mrb[122].mxu1 }
 0x4ca   : > { %v5718_v50 = vmax.f32 %v11546_v2, 0.0  ;;  %v11548_v42 = vadd.f32 %v5683_v60, %v15312_v45  ;;  %v5685_v32 = vpop.f32.mrb[123].mxu1 }
 0x4cb   : > { %v5719_v49 = vmax.f32 %v11547_v24, 0.0  ;;  %v11549_v21 = vadd.f32 %v5685_v32, %v15316_v47 }
 0x4cc   : > { %v5720_v37 = vmax.f32 %v11548_v42, 0.0 }
 0x4cd   : > { %v5750_v27 = vcombine.low %v5718_v50, %v5719_v49  ;;  %v5751_v7 = vcombine.high %v5718_v50, %v5719_v49  ;;  %v5721_v30 = vmax.f32 %v11549_v21, 0.0  ;;  %v11966_v21 = vld [vmem:[%s17069_s5 + $0x64] ss:$8 sps:$4 sm:$0xff]  }
 0x4ce   : > { %8931 = vmatprep.subr.bf16.mxu0 %v11966_v21 }
 0x4cf   : > { %v5758_v5 = vrot.slane %v5750_v27, %v13732_v38  ;;  %v5765_v4 = vrot.slane %v5751_v7, %v13732_v38  ;;  %v5768_v34 = vcombine.low %v5720_v37, %v5721_v30  ;;  %v5769_v59 = vcombine.high %v5720_v37, %v5721_v30  ;;  %v5689_v33 = vpop.f32.mrb[124].mxu1 }
 0x4d0   : > { %v15325_v61 = vadd.f32 %v5689_v33, %v15312_v45  ;;  %v5691_v52 = vpop.f32.mrb[125].mxu1 }
 0x4d1   : > { %v5766_v56 = vcombine.high %v5758_v5, %v5758_v5  ;;  %v5767_v58 = vcombine.high %v5765_v4, %v5765_v4  ;;  %v5900_v35 = vrot.slane %v5758_v5, %v13732_v38  ;;  %v5916_v53 = vrot.slane %v5765_v4, %v13732_v38  ;;  %v15329_v11 = vpop.f32.mrb[126].mxu1  ;;  %v11964_v5 = vld [vmem:[%s17069_s5 + $0x60] ss:$8 sps:$4 sm:$0xff]  }
 0x4d2   : > { %v15332_v9 = vrot.slane %v5768_v34, %v13732_v38  ;;  %v15335_v29 = vrot.slane %v5769_v59, %v13732_v38  ;;  %v5722_v48 = vmax.f32 %v15325_v61, 0.0  ;;  %v15339_v39 = vadd.f32 %v5691_v52, %v15316_v47  ;;  %v15341_v43 = vpop.f32.mrb[127].mxu1  ;;  %8932 = vmatpush1.bf16.msra.mxu0 %v11964_v5  ;;  %v11987_v61 = vld [vmem:[%s17069_s5 + $0xd4] ss:$8 sps:$4 sm:$0xff]  }
 0x4d3   : > { %v5901_v14 = vcombine.high %v5900_v35, %v5900_v35  ;;  %v5908_v0 = vrot.slane %v5766_v56, %v13732_v38  ;;  %v5917_v55 = vcombine.high %v5916_v53, %v5916_v53  ;;  %v5924_v19 = vrot.slane %v5767_v58, %v13732_v38 }
 0x4d4   : > { %v6214_v36 = vsel %vm3013_vm7, %v5900_v35, -inf  ;;  %v6242_v28 = vsel %vm3013_vm7, %v5916_v53, -inf  ;;  %v5784_v46 = vcombine.high %v15332_v9, %v15332_v9  ;;  %v5785_v16 = vcombine.high %v15335_v29, %v15335_v29 }
 0x4d5   : > { %v5909_v41 = vcombine.high %v5908_v0, %v5908_v0  ;;  %v5925_v54 = vcombine.high %v5924_v19, %v5924_v19  ;;  %v6215_v51 = vrot.slane %v6214_v36, 4  ;;  %v6221_v8 = vsel %vm3013_vm7, %v5901_v14, -inf }
 0x4d6   : > { %v6222_v25 = vrot.slane %v6221_v8, 4  ;;  %v6228_v22 = vsel %vm3013_vm7, %v5908_v0, -inf  ;;  %v6243_v10 = vrot.slane %v6242_v28, 4  ;;  %v6249_v63 = vsel %vm3013_vm7, %v5917_v55, -inf }
 0x4d7   : > { %v6216_v31 = vmax.f32 %v6214_v36, %v6215_v51  ;;  %v6229_v26 = vrot.slane %v6228_v22, 4  ;;  %v6235_v13 = vsel %vm3013_vm7, %v5909_v41, -inf  ;;  %v6250_v17 = vrot.slane %v6249_v63, 4  ;;  %v15355_v15 = vpop.f32.mrb[128].mxu1 }
 0x4d8   : > { %v6223_v6 = vmax.f32 %v6221_v8, %v6222_v25  ;;  %v6236_v12 = vrot.slane %v6235_v13, 4  ;;  %v6244_v20 = vmax.f32 %v6242_v28, %v6243_v10  ;;  %v6256_v62 = vsel %vm3013_vm7, %v5924_v19, -inf  ;;  %v15358_v23 = vpop.f32.mrb[129].mxu1  ;;  %v11969_v19 = vld [vmem:[%s17069_s5 + $0x74] ss:$8 sps:$4 sm:$0xff]  }
 0x4d9   : > { %v6217_v44 = vrot.slane %v6216_v31, 2  ;;  %v6230_v3 = vmax.f32 %v6228_v22, %v6229_v26  ;;  %v6251_v2 = vmax.f32 %v6249_v63, %v6250_v17  ;;  %v6257_v1 = vrot.slane %v6256_v62, 4  ;;  %v15360_v24 = vpop.f32.mrb[130].mxu1  ;;  %v11967_v8 = vld [vmem:[%s17069_s5 + $0x70] ss:$8 sps:$4 sm:$0xff]   ;;  %8933 = vmatprep.subr.bf16.mxu0 %v11969_v19 }
 0x4da   : > { %v6224_v60 = vrot.slane %v6223_v6, 2  ;;  %v6237_v50 = vmax.f32 %v6235_v13, %v6236_v12  ;;  %v6245_v42 = vrot.slane %v6244_v20, 2  ;;  %v6263_v32 = vsel %vm3013_vm7, %v5925_v54, -inf  ;;  %v15363_v49 = vpop.f32.mrb[131].mxu1  ;;  %8934 = vmatpush1.bf16.msra.mxu0 %v11967_v8 }
 0x4db   : > { %v6218_v37 = vmax.f32 %v6216_v31, %v6217_v44  ;;  %v6231_v27 = vrot.slane %v6230_v3, 2  ;;  %v6252_v7 = vrot.slane %v6251_v2, 2  ;;  %v6258_v30 = vmax.f32 %v6256_v62, %v6257_v1  ;;  %v11972_v1 = vld [vmem:[%s17069_s5 + $0x84] ss:$8 sps:$4 sm:$0xff]  }
 0x4dc   : > { %v6225_v4 = vmax.f32 %v6223_v6, %v6224_v60  ;;  %v6238_v34 = vrot.slane %v6237_v50, 2  ;;  %v6246_v59 = vmax.f32 %v6244_v20, %v6245_v42  ;;  %v6264_v33 = vrot.slane %v6263_v32, 4  ;;  %8935 = vmatprep.subr.bf16.mxu0 %v11972_v1 }
 0x4dd   : > { %v6219_v52 = vrot.slane %v6218_v37, 1  ;;  %v6232_v56 = vmax.f32 %v6230_v3, %v6231_v27  ;;  %v6253_v58 = vmax.f32 %v6251_v2, %v6252_v7  ;;  %v6259_v35 = vrot.slane %v6258_v30, 2 }
 0x4de   : > { %v6226_v53 = vrot.slane %v6225_v4, 1  ;;  %v6239_v14 = vmax.f32 %v6237_v50, %v6238_v34  ;;  %v6247_v0 = vrot.slane %v6246_v59, 1  ;;  %v6265_v55 = vmax.f32 %v6263_v32, %v6264_v33  ;;  %v11975_v33 = vld [vmem:[%s17069_s5 + $0x94] ss:$8 sps:$4 sm:$0xff]  }
 0x4df   : > { %v15374_v36 = vmax.f32 %v6218_v37, %v6219_v52  ;;  %v6233_v28 = vrot.slane %v6232_v56, 1  ;;  %v6254_v41 = vrot.slane %v6253_v58, 1  ;;  %v6260_v54 = vmax.f32 %v6258_v30, %v6259_v35  ;;  %v15376_v51 = vpop.f32.mrb[132].mxu1 }
 0x4e0   : > { %v15381_v25 = vmax.f32 %v6225_v4, %v6226_v53  ;;  %v6240_v22 = vrot.slane %v6239_v14, 1  ;;  %v15383_v10 = vmax.f32 %v6246_v59, %v6247_v0  ;;  %v6266_v63 = vrot.slane %v6265_v55, 2  ;;  %v15385_v31 = vpop.f32.mrb[133].mxu1  ;;  %v11973_v53 = vld [vmem:[%s17069_s5 + $0x90] ss:$8 sps:$4 sm:$0xff]  }
 0x4e1   : > { %v15387_v26 = vmax.f32 %v6232_v56, %v6233_v28  ;;  %v15389_v13 = vmax.f32 %v6253_v58, %v6254_v41  ;;  %v6261_v17 = vrot.slane %v6260_v54, 1  ;;  %v5932_v6 = vrot.slane %v15332_v9, %v13732_v38  ;;  %v15393_v12 = vpop.f32.mrb[134].mxu1 }
 0x4e2   : > { %v15395_v20 = vmax.f32 %v6239_v14, %v6240_v22  ;;  %v6267_v62 = vmax.f32 %v6265_v55, %v6266_v63  ;;  %v5940_v44 = vrot.slane %v5784_v46, %v13732_v38  ;;  %v5948_v3 = vrot.slane %v15335_v29, %v13732_v38  ;;  %v15403_v2 = vpop.f32.mrb[135].mxu1  ;;  %v11970_v46 = vld [vmem:[%s17069_s5 + $0x80] ss:$8 sps:$4 sm:$0xff]  }
 0x4e3   : > { %v15408_v60 = vmax.f32 %v6260_v54, %v6261_v17  ;;  %v5933_v50 = vcombine.high %v5932_v6, %v5932_v6  ;;  %v5956_v42 = vrot.slane %v5785_v16, %v13732_v38  ;;  %v6270_v9 = vsel %vm3013_vm7, %v5932_v6, -inf  ;;  %8936 = vmatpush1.bf16.msra.mxu0 %v11970_v46 }
 0x4e4   : > { %v6268_v32 = vrot.slane %v6267_v62, 1  ;;  %v5941_v21 = vcombine.high %v5940_v44, %v5940_v44  ;;  %v5949_v37 = vcombine.high %v5948_v3, %v5948_v3  ;;  %v6271_v27 = vrot.slane %v6270_v9, 4  ;;  %8937 = vmatprep.subr.bf16.mxu0 %v11975_v33 }
 0x4e5   : > { %v5957_v7 = vcombine.high %v5956_v42, %v5956_v42  ;;  %v6277_v30 = vsel %vm3013_vm7, %v5933_v50, -inf  ;;  %v6284_v5 = vsel %vm3013_vm7, %v5940_v44, -inf  ;;  %v6298_v4 = vsel %vm3013_vm7, %v5948_v3, -inf }
 0x4e6   : > { %v15421_v29 = vmax.f32 %v6267_v62, %v6268_v32  ;;  %v6272_v16 = vmax.f32 %v6270_v9, %v6271_v27  ;;  %v6278_v34 = vrot.slane %v6277_v30, 4  ;;  %v6285_v59 = vrot.slane %v6284_v5, 4  ;;  %v11978_v62 = vld [vmem:[%s17069_s5 + $0xa4] ss:$8 sps:$4 sm:$0xff]  }
 0x4e7   : > { %v6291_v52 = vsel %vm3013_vm7, %v5941_v21, -inf  ;;  %v6299_v56 = vrot.slane %v6298_v4, 4  ;;  %v6305_v58 = vsel %vm3013_vm7, %v5949_v37, -inf  ;;  %v6312_v35 = vsel %vm3013_vm7, %v5956_v42, -inf  ;;  %8938 = vmatpush1.bf16.msra.mxu0 %v11973_v53  ;;  %v11976_v42 = vld [vmem:[%s17069_s5 + $0xa0] ss:$8 sps:$4 sm:$0xff]  }
 0x4e8   : > { %v6273_v14 = vrot.slane %v6272_v16, 2  ;;  %v6279_v0 = vmax.f32 %v6277_v30, %v6278_v34  ;;  %v6286_v55 = vmax.f32 %v6284_v5, %v6285_v59  ;;  %v6292_v19 = vrot.slane %v6291_v52, 4  ;;  %8939 = vmatprep.subr.bf16.mxu0 %v11978_v62  ;;  %v11981_v59 = vld [vmem:[%s17069_s5 + $0xb4] ss:$8 sps:$4 sm:$0xff]  }
 0x4e9   : > { %v6300_v28 = vmax.f32 %v6298_v4, %v6299_v56  ;;  %v6306_v41 = vrot.slane %v6305_v58, 4  ;;  %v6313_v54 = vrot.slane %v6312_v35, 4  ;;  %v6319_v8 = vsel %vm3013_vm7, %v5957_v7, -inf }
 0x4ea   : > { %v6274_v22 = vmax.f32 %v6272_v16, %v6273_v14  ;;  %v6280_v63 = vrot.slane %v6279_v0, 2  ;;  %v6287_v17 = vrot.slane %v6286_v55, 2  ;;  %v6293_v6 = vmax.f32 %v6291_v52, %v6292_v19 }
 0x4eb   : > { %v6301_v44 = vrot.slane %v6300_v28, 2  ;;  %v6307_v3 = vmax.f32 %v6305_v58, %v6306_v41  ;;  %v6314_v1 = vmax.f32 %v6312_v35, %v6313_v54  ;;  %v6320_v50 = vrot.slane %v6319_v8, 4  ;;  %8940 = vmatpush1.bf16.msra.mxu0 %v11976_v42  ;;  %v11979_v35 = vld [vmem:[%s17069_s5 + $0xb0] ss:$8 sps:$4 sm:$0xff]  }
 0x4ec   : > { %v6275_v9 = vrot.slane %v6274_v22, 1  ;;  %v6281_v46 = vmax.f32 %v6279_v0, %v6280_v63  ;;  %v6288_v32 = vmax.f32 %v6286_v55, %v6287_v17  ;;  %v6294_v21 = vrot.slane %v6293_v6, 2  ;;  %8941 = vmatprep.subr.bf16.mxu0 %v11981_v59 }
 0x4ed   : > { %v6302_v37 = vmax.f32 %v6300_v28, %v6301_v44  ;;  %v6308_v27 = vrot.slane %v6307_v3, 2  ;;  %v6315_v7 = vrot.slane %v6314_v1, 2  ;;  %v6321_v30 = vmax.f32 %v6319_v8, %v6320_v50 }
 0x4ee   : > { %v6276_v5 = vmax.f32 %v6274_v22, %v6275_v9  ;;  %v6282_v4 = vrot.slane %v6281_v46, 1  ;;  %v6289_v16 = vrot.slane %v6288_v32, 1  ;;  %v6295_v34 = vmax.f32 %v6293_v6, %v6294_v21  ;;  %v11984_v6 = vld [vmem:[%s17069_s5 + $0xc4] ss:$8 sps:$4 sm:$0xff]  }
 0x4ef   : > { %v6303_v33 = vrot.slane %v6302_v37, 1  ;;  %v6309_v52 = vmax.f32 %v6307_v3, %v6308_v27  ;;  %v6316_v56 = vmax.f32 %v6314_v1, %v6315_v7  ;;  %v6322_v58 = vrot.slane %v6321_v30, 2  ;;  %8942 = vmatpush1.bf16.msra.mxu0 %v11979_v35  ;;  %v11982_v1 = vld [vmem:[%s17069_s5 + $0xc0] ss:$8 sps:$4 sm:$0xff]   ;;  %v11985_v7 = vld [vmem:[%s17069_s5 + $0xd0] ss:$8 sps:$4 sm:$0xff]  }
 0x4f0   : > { %v6283_v53 = vmax.f32 %v6281_v46, %v6282_v4  ;;  %v6290_v14 = vmax.f32 %v6288_v32, %v6289_v16  ;;  %v6296_v0 = vrot.slane %v6295_v34, 1  ;;  %v6662_v55 = vmax.f32 %v15374_v36, %v6276_v5  ;;  %8943 = vmatprep.subr.bf16.mxu0 %v11984_v6  ;;  %v11991_v6 = vld [vmem:[%s17069_s5 + $0xf0] ss:$8 sps:$4 sm:$0xff]  }
 0x4f1   : > { %v6304_v19 = vmax.f32 %v6302_v37, %v6303_v33  ;;  %v6310_v28 = vrot.slane %v6309_v52, 1  ;;  %v6317_v41 = vrot.slane %v6316_v56, 1  ;;  %v6323_v54 = vmax.f32 %v6321_v30, %v6322_v58  ;;  %v11988_v33 = vld [vmem:[%s17069_s5 + $0xe0] ss:$8 sps:$4 sm:$0xff]  }
 0x4f2   : > { %v6297_v8 = vmax.f32 %v6295_v34, %v6296_v0  ;;  %v6663_v22 = vmax.f32 %v15381_v25, %v6283_v53  ;;  %v6664_v63 = vmax.f32 %v15387_v26, %v6290_v14  ;;  %v5723_v17 = vmax.f32 %v15339_v39, 0.0  ;;  %v11993_v53 = vld [vmem:[%s17069_s5 + $0xf4] ss:$8 sps:$4 sm:$0xff]  }
 0x4f3   : > { %v6311_v62 = vmax.f32 %v6309_v52, %v6310_v28  ;;  %v6318_v44 = vmax.f32 %v6316_v56, %v6317_v41  ;;  %v6324_v36 = vrot.slane %v6323_v54, 1  ;;  %v6666_v3 = vmax.f32 %v15383_v10, %v6304_v19  ;;  %8944 = vmatpush1.bf16.msra.mxu0 %v11982_v1  ;;  %v11996_v1 = vld [vmem:[%s17069_s5 + $0x104] ss:$8 sps:$4 sm:$0xff]  }
 0x4f4   : > { %v6665_v50 = vmax.f32 %v15395_v20, %v6297_v8  ;;  %v6770_v25 = vsel %vm4065_vm9, %v6664_v63, %v6662_v55  ;;  %v5786_v39 = vcombine.low %v5722_v48, %v5723_v17  ;;  %v5787_v26 = vcombine.high %v5722_v48, %v5723_v17  ;;  %8945 = vmatprep.subr.bf16.mxu0 %v11987_v61 }
 0x4f5   : > { %v6325_v42 = vmax.f32 %v6323_v54, %v6324_v36  ;;  %v6667_v9 = vmax.f32 %v15389_v13, %v6311_v62  ;;  %v6668_v10 = vmax.f32 %v15408_v60, %v6318_v44  ;;  %v6771_v46 = vsel %vm4067_vm10, %v6666_v3, %v6770_v25 }
 0x4f6   : > { %v6773_v32 = vsel %vm4065_vm9, %v6665_v50, %v6663_v22  ;;  %v5794_v20 = vrot.slane %v5786_v39, %v13732_v38  ;;  %v5801_v21 = vrot.slane %v5787_v26, %v13732_v38  ;;  %v11552_v37 = vadd.f32 %v15329_v11, %v15312_v45 }
 0x4f7   : > { %v6669_v48 = vmax.f32 %v15421_v29, %v6325_v42  ;;  %v6772_v13 = vsel %vm4069_vm11, %v6668_v10, %v6771_v46  ;;  %v6774_v60 = vsel %vm4067_vm10, %v6667_v9, %v6773_v32  ;;  %v11553_v27 = vadd.f32 %v15341_v43, %v15316_v47  ;;  %v11990_v29 = vld [vmem:[%s17069_s5 + $0xe4] ss:$8 sps:$4 sm:$0xff]   ;;  %8946 = vmatpush1.bf16.msra.mxu0 %v11985_v7 }
 0x4f8   : > { %6803 = vst [vmem:[#allocation3 + $0x10] sm:$0x1e] %v6772_v13  ;;  %v5802_v30 = vcombine.high %v5794_v20, %v5794_v20  ;;  %v5803_v11 = vcombine.high %v5801_v21, %v5801_v21  ;;  %v5964_v5 = vrot.slane %v5794_v20, %v13732_v38  ;;  %v5980_v4 = vrot.slane %v5801_v21, %v13732_v38 }
 0x4f9   : > { %v6775_v16 = vsel %vm4069_vm11, %v6669_v48, %v6774_v60  ;;  %v5724_v34 = vmax.f32 %v11552_v37, 0.0  ;;  %v5725_v43 = vmax.f32 %v11553_v27, 0.0  ;;  %v15489_v59 = vadd.f32 %v15355_v15, %v15312_v45  ;;  %8947 = vmatprep.subr.bf16.mxu0 %v11990_v29 }
 0x4fa   : > { %6804 = vst [vmem:[#allocation3 + $0x18] sm:$0x1e] %v6775_v16  ;;  %v5965_v52 = vcombine.high %v5964_v5, %v5964_v5  ;;  %v5972_v56 = vrot.slane %v5802_v30, %v13732_v38  ;;  %v5981_v58 = vcombine.high %v5980_v4, %v5980_v4  ;;  %v5988_v35 = vrot.slane %v5803_v11, %v13732_v38 }
 0x4fb   : > { %v6326_v15 = vsel %vm3013_vm7, %v5964_v5, -inf  ;;  %v6354_v14 = vsel %vm3013_vm7, %v5980_v4, -inf  ;;  %v5804_v0 = vcombine.low %v5724_v34, %v5725_v43  ;;  %v5805_v55 = vcombine.high %v5724_v34, %v5725_v43  ;;  %8948 = vmatpush1.bf16.msra.mxu0 %v11988_v33 }
 0x4fc   : > { %v5973_v19 = vcombine.high %v5972_v56, %v5972_v56  ;;  %v5989_v28 = vcombine.high %v5988_v35, %v5988_v35  ;;  %v6327_v41 = vrot.slane %v6326_v15, 4  ;;  %v6333_v54 = vsel %vm3013_vm7, %v5965_v52, -inf  ;;  %8949 = vmatprep.subr.bf16.mxu0 %v11993_v53 }
 0x4fd   : > { %v6334_v8 = vrot.slane %v6333_v54, 4  ;;  %v6340_v22 = vsel %vm3013_vm7, %v5972_v56, -inf  ;;  %v6355_v63 = vrot.slane %v6354_v14, 4  ;;  %v6361_v17 = vsel %vm3013_vm7, %v5981_v58, -inf }
 0x4fe   : > { %v6328_v62 = vmax.f32 %v6326_v15, %v6327_v41  ;;  %v6341_v44 = vrot.slane %v6340_v22, 4  ;;  %v6347_v36 = vsel %vm3013_vm7, %v5973_v19, -inf  ;;  %v6362_v3 = vrot.slane %v6361_v17, 4 }
 0x4ff   : > { %v6335_v50 = vmax.f32 %v6333_v54, %v6334_v8  ;;  %v6348_v25 = vrot.slane %v6347_v36, 4  ;;  %v6356_v39 = vmax.f32 %v6354_v14, %v6355_v63  ;;  %v6368_v26 = vsel %vm3013_vm7, %v5988_v35, -inf  ;;  %8950 = vmatpush1.bf16.msra.mxu0 %v11991_v6 }
 0x500   : > { %v6329_v42 = vrot.slane %v6328_v62, 2  ;;  %v6342_v9 = vmax.f32 %v6340_v22, %v6341_v44  ;;  %v6363_v10 = vmax.f32 %v6361_v17, %v6362_v3  ;;  %v6369_v46 = vrot.slane %v6368_v26, 4  ;;  %8962 = vmatprep.subr.bf16.mxu0 %v11996_v1 }
 0x501   : > { %v6336_v32 = vrot.slane %v6335_v50, 2  ;;  %v6349_v20 = vmax.f32 %v6347_v36, %v6348_v25  ;;  %v6357_v21 = vrot.slane %v6356_v39, 2  ;;  %v6375_v37 = vsel %vm3013_vm7, %v5989_v28, -inf }
 0x502   : > { %v6330_v61 = vmax.f32 %v6328_v62, %v6329_v42  ;;  %v6343_v48 = vrot.slane %v6342_v9, 2  ;;  %v6364_v13 = vrot.slane %v6363_v10, 2  ;;  %v6370_v60 = vmax.f32 %v6368_v26, %v6369_v46 }
 0x503   : > { %v6337_v27 = vmax.f32 %v6335_v50, %v6336_v32  ;;  %v6350_v7 = vrot.slane %v6349_v20, 2  ;;  %v6358_v30 = vmax.f32 %v6356_v39, %v6357_v21  ;;  %v6376_v11 = vrot.slane %v6375_v37, 4 }
 0x504   : > { %v6331_v5 = vrot.slane %v6330_v61, 1  ;;  %v6344_v4 = vmax.f32 %v6342_v9, %v6343_v48  ;;  %v6365_v29 = vmax.f32 %v6363_v10, %v6364_v13  ;;  %v6371_v16 = vrot.slane %v6370_v60, 2 }
 0x505   : > { %v6338_v34 = vrot.slane %v6337_v27, 1  ;;  %v6351_v43 = vmax.f32 %v6349_v20, %v6350_v7  ;;  %v6359_v33 = vrot.slane %v6358_v30, 1  ;;  %v6377_v52 = vmax.f32 %v6375_v37, %v6376_v11 }
 0x506   : > { %v15513_v56 = vmax.f32 %v6330_v61, %v6331_v5  ;;  %v6345_v58 = vrot.slane %v6344_v4, 1  ;;  %v6366_v35 = vrot.slane %v6365_v29, 1  ;;  %v6372_v53 = vmax.f32 %v6370_v60, %v6371_v16 }
 0x507   : > { %v15515_v15 = vmax.f32 %v6337_v27, %v6338_v34  ;;  %v6352_v14 = vrot.slane %v6351_v43, 1  ;;  %v15517_v19 = vmax.f32 %v6358_v30, %v6359_v33  ;;  %v6378_v28 = vrot.slane %v6377_v52, 2 }
 0x508   : > { %v15519_v41 = vmax.f32 %v6344_v4, %v6345_v58  ;;  %v15521_v54 = vmax.f32 %v6365_v29, %v6366_v35  ;;  %v6373_v8 = vrot.slane %v6372_v53, 1  ;;  %v5812_v22 = vrot.slane %v5804_v0, %v13732_v38 }
 0x509   : > { %v15524_v63 = vmax.f32 %v6351_v43, %v6352_v14  ;;  %v6379_v17 = vmax.f32 %v6377_v52, %v6378_v28  ;;  %v5819_v6 = vrot.slane %v5805_v55, %v13732_v38  ;;  %v5726_v62 = vmax.f32 %v15489_v59, 0.0 }
 0x50a   : > { %v15528_v44 = vmax.f32 %v6372_v53, %v6373_v8  ;;  %v5820_v36 = vcombine.high %v5812_v22, %v5812_v22  ;;  %v5996_v3 = vrot.slane %v5812_v22, %v13732_v38  ;;  %v15533_v1 = vadd.f32 %v15358_v23, %v15316_v47 }
 0x50b   : > { %v6380_v50 = vrot.slane %v6379_v17, 1  ;;  %v5821_v25 = vcombine.high %v5819_v6, %v5819_v6  ;;  %v6012_v0 = vrot.slane %v5819_v6, %v13732_v38  ;;  %v15538_v39 = vadd.f32 %v15360_v24, %v15312_v45 }
 0x50c   : > { %v5997_v55 = vcombine.high %v5996_v3, %v5996_v3  ;;  %v6004_v26 = vrot.slane %v5820_v36, %v13732_v38  ;;  %v6382_v42 = vsel %vm3013_vm7, %v5996_v3, -inf  ;;  %v5727_v9 = vmax.f32 %v15533_v1, 0.0 }
 0x50d   : > { %v15543_v10 = vmax.f32 %v6379_v17, %v6380_v50  ;;  %v6013_v46 = vcombine.high %v6012_v0, %v6012_v0  ;;  %v6020_v23 = vrot.slane %v5821_v25, %v13732_v38  ;;  %v6383_v32 = vrot.slane %v6382_v42, 4 }
 0x50e   : > { %v6005_v20 = vcombine.high %v6004_v26, %v6004_v26  ;;  %v6389_v21 = vsel %vm3013_vm7, %v5997_v55, -inf  ;;  %v6396_v37 = vsel %vm3013_vm7, %v6004_v26, -inf  ;;  %v6410_v24 = vsel %vm3013_vm7, %v6012_v0, -inf }
 0x50f   : > { %v6021_v61 = vcombine.high %v6020_v23, %v6020_v23  ;;  %v6384_v48 = vmax.f32 %v6382_v42, %v6383_v32  ;;  %v6390_v13 = vrot.slane %v6389_v21, 4  ;;  %v6397_v60 = vrot.slane %v6396_v37, 4 }
 0x510   : > { %v6403_v27 = vsel %vm3013_vm7, %v6005_v20, -inf  ;;  %v6411_v7 = vrot.slane %v6410_v24, 4  ;;  %v6417_v30 = vsel %vm3013_vm7, %v6013_v46, -inf  ;;  %v6424_v11 = vsel %vm3013_vm7, %v6020_v23, -inf }
 0x511   : > { %v6385_v5 = vrot.slane %v6384_v48, 2  ;;  %v6391_v4 = vmax.f32 %v6389_v21, %v6390_v13  ;;  %v6398_v29 = vmax.f32 %v6396_v37, %v6397_v60  ;;  %v6404_v16 = vrot.slane %v6403_v27, 4 }
 0x512   : > { %v6412_v34 = vmax.f32 %v6410_v24, %v6411_v7  ;;  %v6418_v43 = vrot.slane %v6417_v30, 4  ;;  %v6425_v33 = vrot.slane %v6424_v11, 4  ;;  %v6431_v52 = vsel %vm3013_vm7, %v6021_v61, -inf }
 0x513   : > { %v6386_v58 = vmax.f32 %v6384_v48, %v6385_v5  ;;  %v6392_v35 = vrot.slane %v6391_v4, 2  ;;  %v6399_v53 = vrot.slane %v6398_v29, 2  ;;  %v6405_v14 = vmax.f32 %v6403_v27, %v6404_v16 }
 0x514   : > { %v6413_v28 = vrot.slane %v6412_v34, 2  ;;  %v6419_v8 = vmax.f32 %v6417_v30, %v6418_v43  ;;  %v6426_v22 = vmax.f32 %v6424_v11, %v6425_v33  ;;  %v6432_v17 = vrot.slane %v6431_v52, 4 }
 0x515   : > { %v6387_v6 = vrot.slane %v6386_v58, 1  ;;  %v6393_v36 = vmax.f32 %v6391_v4, %v6392_v35  ;;  %v6400_v3 = vmax.f32 %v6398_v29, %v6399_v53  ;;  %v6406_v50 = vrot.slane %v6405_v14, 2 }
 0x516   : > { %v6414_v25 = vmax.f32 %v6412_v34, %v6413_v28  ;;  %v6420_v0 = vrot.slane %v6419_v8, 2  ;;  %v6427_v55 = vrot.slane %v6426_v22, 2  ;;  %v6433_v26 = vmax.f32 %v6431_v52, %v6432_v17 }
 0x517   : > { %v6388_v42 = vmax.f32 %v6386_v58, %v6387_v6  ;;  %v6394_v46 = vrot.slane %v6393_v36, 1  ;;  %v6401_v23 = vrot.slane %v6400_v3, 1  ;;  %v6407_v32 = vmax.f32 %v6405_v14, %v6406_v50 }
 0x518   : > { %v6415_v20 = vrot.slane %v6414_v25, 1  ;;  %v6421_v21 = vmax.f32 %v6419_v8, %v6420_v0  ;;  %v6428_v37 = vmax.f32 %v6426_v22, %v6427_v55  ;;  %v6434_v24 = vrot.slane %v6433_v26, 2 }
 0x519   : > { %v6395_v61 = vmax.f32 %v6393_v36, %v6394_v46  ;;  %v6402_v48 = vmax.f32 %v6400_v3, %v6401_v23  ;;  %v6408_v13 = vrot.slane %v6407_v32, 1  ;;  %v6670_v60 = vmax.f32 %v15513_v56, %v6388_v42 }
 0x51a   : > { %v6416_v27 = vmax.f32 %v6414_v25, %v6415_v20  ;;  %v6422_v7 = vrot.slane %v6421_v21, 1  ;;  %v6429_v30 = vrot.slane %v6428_v37, 1  ;;  %v6435_v11 = vmax.f32 %v6433_v26, %v6434_v24 }
 0x51b   : > { %v6409_v5 = vmax.f32 %v6407_v32, %v6408_v13  ;;  %v6671_v4 = vmax.f32 %v15515_v15, %v6395_v61  ;;  %v6672_v29 = vmax.f32 %v15519_v41, %v6402_v48  ;;  %v5822_v16 = vcombine.low %v5726_v62, %v5727_v9 }
 0x51c   : > { %v6423_v34 = vmax.f32 %v6421_v21, %v6422_v7  ;;  %v6430_v43 = vmax.f32 %v6428_v37, %v6429_v30  ;;  %v6436_v33 = vrot.slane %v6435_v11, 1  ;;  %v6674_v52 = vmax.f32 %v15517_v19, %v6416_v27 }
 0x51d   : > { %v6673_v56 = vmax.f32 %v15524_v63, %v6409_v5  ;;  %v6776_v58 = vsel %vm4065_vm9, %v6672_v29, %v6670_v60  ;;  %v5823_v15 = vcombine.high %v5726_v62, %v5727_v9  ;;  %v5830_v41 = vrot.slane %v5822_v16, %v13732_v38 }
 0x51e   : > { %v6437_v35 = vmax.f32 %v6435_v11, %v6436_v33  ;;  %v6675_v53 = vmax.f32 %v15521_v54, %v6423_v34  ;;  %v6676_v14 = vmax.f32 %v15528_v44, %v6430_v43  ;;  %v6777_v28 = vsel %vm4067_vm10, %v6674_v52, %v6776_v58 }
 0x51f   : > { %v6779_v19 = vsel %vm4065_vm9, %v6673_v56, %v6671_v4  ;;  %v5837_v63 = vrot.slane %v5823_v15, %v13732_v38  ;;  %v5838_v8 = vcombine.high %v5830_v41, %v5830_v41  ;;  %v6028_v22 = vrot.slane %v5830_v41, %v13732_v38 }
 0x520   : > { %v6677_v1 = vmax.f32 %v15543_v10, %v6437_v35  ;;  %v6778_v59 = vsel %vm4069_vm11, %v6676_v14, %v6777_v28  ;;  %v6780_v62 = vsel %vm4067_vm10, %v6675_v53, %v6779_v19  ;;  %v5728_v9 = vmax.f32 %v15538_v39, 0.0 }
 0x521   : > { %6805 = vst [vmem:[#allocation3 + $0x20] sm:$0x1e] %v6778_v59  ;;  %v5839_v54 = vcombine.high %v5837_v63, %v5837_v63  ;;  %v6029_v44 = vcombine.high %v6028_v22, %v6028_v22  ;;  %v6036_v17 = vrot.slane %v5838_v8, %v13732_v38  ;;  %v6044_v6 = vrot.slane %v5837_v63, %v13732_v38 }
 0x522   : > { %v6781_v36 = vsel %vm4069_vm11, %v6677_v1, %v6780_v62  ;;  %v6438_v3 = vsel %vm3013_vm7, %v6028_v22, -inf  ;;  %v11557_v10 = vadd.f32 %v15363_v49, %v15316_v47  ;;  %v15586_v50 = vadd.f32 %v15376_v51, %v15312_v45 }
 0x523   : > { %6806 = vst [vmem:[#allocation3 + $0x28] sm:$0x1e] %v6781_v36  ;;  %v6037_v25 = vcombine.high %v6036_v17, %v6036_v17  ;;  %v6045_v0 = vcombine.high %v6044_v6, %v6044_v6  ;;  %v6052_v55 = vrot.slane %v5839_v54, %v13732_v38  ;;  %v6439_v26 = vrot.slane %v6438_v3, 4 }
 0x524   : > { %v6445_v42 = vsel %vm3013_vm7, %v6029_v44, -inf  ;;  %v6452_v46 = vsel %vm3013_vm7, %v6036_v17, -inf  ;;  %v6466_v23 = vsel %vm3013_vm7, %v6044_v6, -inf  ;;  %v5729_v32 = vmax.f32 %v11557_v10, 0.0 }
 0x525   : > { %v6053_v20 = vcombine.high %v6052_v55, %v6052_v55  ;;  %v6440_v21 = vmax.f32 %v6438_v3, %v6439_v26  ;;  %v6446_v49 = vrot.slane %v6445_v42, 4  ;;  %v6453_v37 = vrot.slane %v6452_v46, 4 }
 0x526   : > { %v6459_v51 = vsel %vm3013_vm7, %v6037_v25, -inf  ;;  %v6467_v24 = vrot.slane %v6466_v23, 4  ;;  %v6473_v61 = vsel %vm3013_vm7, %v6045_v0, -inf  ;;  %v6480_v48 = vsel %vm3013_vm7, %v6052_v55, -inf }
 0x527   : > { %v6441_v13 = vrot.slane %v6440_v21, 2  ;;  %v6447_v60 = vmax.f32 %v6445_v42, %v6446_v49  ;;  %v6454_v27 = vmax.f32 %v6452_v46, %v6453_v37  ;;  %v6460_v7 = vrot.slane %v6459_v51, 4 }
 0x528   : > { %v6468_v30 = vmax.f32 %v6466_v23, %v6467_v24  ;;  %v6474_v11 = vrot.slane %v6473_v61, 4  ;;  %v6481_v5 = vrot.slane %v6480_v48, 4  ;;  %v6487_v4 = vsel %vm3013_vm7, %v6053_v20, -inf }
 0x529   : > { %v6442_v29 = vmax.f32 %v6440_v21, %v6441_v13  ;;  %v6448_v16 = vrot.slane %v6447_v60, 2  ;;  %v6455_v34 = vrot.slane %v6454_v27, 2  ;;  %v6461_v43 = vmax.f32 %v6459_v51, %v6460_v7 }
 0x52a   : > { %v6469_v33 = vrot.slane %v6468_v30, 2  ;;  %v6475_v52 = vmax.f32 %v6473_v61, %v6474_v11  ;;  %v6482_v56 = vmax.f32 %v6480_v48, %v6481_v5  ;;  %v6488_v58 = vrot.slane %v6487_v4, 4 }
 0x52b   : > { %v6443_v15 = vrot.slane %v6442_v29, 1  ;;  %v6449_v41 = vmax.f32 %v6447_v60, %v6448_v16  ;;  %v6456_v35 = vmax.f32 %v6454_v27, %v6455_v34  ;;  %v6462_v53 = vrot.slane %v6461_v43, 2 }
 0x52c   : > { %v6470_v14 = vmax.f32 %v6468_v30, %v6469_v33  ;;  %v6476_v28 = vrot.slane %v6475_v52, 2  ;;  %v6483_v19 = vrot.slane %v6482_v56, 2  ;;  %v6489_v63 = vmax.f32 %v6487_v4, %v6488_v58 }
 0x52d   : > { %v15596_v8 = vmax.f32 %v6442_v29, %v6443_v15  ;;  %v6450_v22 = vrot.slane %v6449_v41, 1  ;;  %v6457_v1 = vrot.slane %v6456_v35, 1  ;;  %v6463_v59 = vmax.f32 %v6461_v43, %v6462_v53 }
 0x52e   : > { %v6471_v62 = vrot.slane %v6470_v14, 1  ;;  %v6477_v54 = vmax.f32 %v6475_v52, %v6476_v28  ;;  %v6484_v44 = vmax.f32 %v6482_v56, %v6483_v19  ;;  %v6490_v17 = vrot.slane %v6489_v63, 2 }
 0x52f   : > { %v15598_v6 = vmax.f32 %v6449_v41, %v6450_v22  ;;  %v15600_v36 = vmax.f32 %v6456_v35, %v6457_v1  ;;  %v6464_v3 = vrot.slane %v6463_v59, 1  ;;  %v5840_v10 = vcombine.low %v5728_v9, %v5729_v32 }
 0x530   : > { %v15604_v25 = vmax.f32 %v6470_v14, %v6471_v62  ;;  %v6478_v0 = vrot.slane %v6477_v54, 1  ;;  %v6485_v55 = vrot.slane %v6484_v44, 1  ;;  %v6491_v26 = vmax.f32 %v6489_v63, %v6490_v17 }
 0x531   : > { %v15606_v42 = vmax.f32 %v6463_v59, %v6464_v3  ;;  %v5841_v46 = vcombine.high %v5728_v9, %v5729_v32  ;;  %v5848_v23 = vrot.slane %v5840_v10, %v13732_v38  ;;  %v5730_v20 = vmax.f32 %v15586_v50, 0.0 }
 0x532   : > { %v15612_v21 = vmax.f32 %v6477_v54, %v6478_v0  ;;  %v15614_v49 = vmax.f32 %v6484_v44, %v6485_v55  ;;  %v6492_v37 = vrot.slane %v6491_v26, 1  ;;  %v11559_v51 = vadd.f32 %v15385_v31, %v15316_v47 }
 0x533   : > { %v5855_v24 = vrot.slane %v5841_v46, %v13732_v38  ;;  %v5856_v61 = vcombine.high %v5848_v23, %v5848_v23  ;;  %v6060_v48 = vrot.slane %v5848_v23, %v13732_v38  ;;  %v15622_v39 = vadd.f32 %v15393_v12, %v15312_v45 }
 0x534   : > { %v15624_v9 = vmax.f32 %v6491_v26, %v6492_v37  ;;  %v5731_v50 = vmax.f32 %v11559_v51, 0.0  ;;  %v15628_v32 = vadd.f32 %v15403_v2, %v15316_v47  ;;  %v17291_v13 = vlaneseq }
 0x535   : > { %v5857_v31 = vcombine.high %v5855_v24, %v5855_v24  ;;  %v6061_v27 = vcombine.high %v6060_v48, %v6060_v48  ;;  %v6068_v7 = vrot.slane %v5856_v61, %v13732_v38  ;;  %v6076_v30 = vrot.slane %v5855_v24, %v13732_v38 }
 0x536   : > { %vm15631_vm15 = vcmp.lt.s32.totalorder %v17291_v13, 256  ;;  %v17294_v45 = vmov 0.0   ;;  %v6494_v47 = vsel %vm3013_vm7, %v6060_v48, -inf  ;;  %v5858_v12 = vcombine.low %v5730_v20, %v5731_v50 }
 0x537   : > { %6703 = vst.msk [vmem:[#allocation3] ss:$8 sm:$0x3] %vm15631_vm15, %v17294_v45  ;;  %6706 = vst.msk [vmem:[#allocation3 + $0x10] ss:$8 sm:$0x3] %vm15631_vm15, %v17294_v45  ;;  %v5859_v2 = vcombine.high %v5730_v20, %v5731_v50  ;;  %v6069_v5 = vcombine.high %v6068_v7, %v6068_v7  ;;  %v6077_v4 = vcombine.high %v6076_v30, %v6076_v30 }
 0x538   : > { %6709 = vst.msk [vmem:[#allocation3 + $0x20] ss:$8 sm:$0x3] %vm15631_vm15, %v17294_v45  ;;  %6712 = vst.msk [vmem:[#allocation3 + $0x30] ss:$8 sm:$0x3] %vm15631_vm15, %v17294_v45  ;;  %v6084_v29 = vrot.slane %v5857_v31, %v13732_v38  ;;  %v15680_v52 = vrot.slane %v5858_v12, %v13732_v38 }
 0x539   : > { %6721 = vst.msk [vmem:[#allocation3 + $0x5] ss:$8 sm:$0x3] %vm15631_vm15, %v17294_v45  ;;  %6724 = vst.msk [vmem:[#allocation3 + $0x15] ss:$8 sm:$0x3] %vm15631_vm15, %v17294_v45 }
 0x53a   : > { %6727 = vst.msk [vmem:[#allocation3 + $0x25] ss:$8 sm:$0x3] %vm15631_vm15, %v17294_v45  ;;  %6730 = vst.msk [vmem:[#allocation3 + $0x35] ss:$8 sm:$0x3] %vm15631_vm15, %v17294_v45  ;;  %v6085_v56 = vcombine.high %v6084_v29, %v6084_v29 }
 0x53b   : > { %6715 = vst.msk [vmem:[#allocation3 + $0x40] ss:$8 sm:$0x3] %vm15631_vm15, %v17294_v45  ;;  %6718 = vst.msk [vmem:[#allocation3 + $0x50] ss:$8 sm:$0x3] %vm15631_vm15, %v17294_v45 }
 0x53c   : > { %6733 = vst.msk [vmem:[#allocation3 + $0x45] ss:$8 sm:$0x3] %vm15631_vm15, %v17294_v45  ;;  %6736 = vst.msk [vmem:[#allocation3 + $0x55] ss:$8 sm:$0x3] %vm15631_vm15, %v17294_v45 }
 0x53d   : > { %v5732_v11 = vmax.f32 %v15622_v39, 0.0  ;;  %v6495_v16 = vrot.slane %v6494_v47, 4  ;;  %v6501_v34 = vsel %vm3013_vm7, %v6061_v27, -inf  ;;  %v6508_v43 = vsel %vm3013_vm7, %v6068_v7, -inf }
 0x53e   : > { %v6522_v33 = vsel %vm3013_vm7, %v6076_v30, -inf  ;;  %v6502_v15 = vrot.slane %v6501_v34, 4  ;;  %v6509_v41 = vrot.slane %v6508_v43, 4  ;;  %v6515_v35 = vsel %vm3013_vm7, %v6069_v5, -inf }
 0x53f   : > { %v6496_v58 = vmax.f32 %v6494_v47, %v6495_v16  ;;  %v6523_v53 = vrot.slane %v6522_v33, 4  ;;  %v6529_v14 = vsel %vm3013_vm7, %v6077_v4, -inf  ;;  %v6536_v28 = vsel %vm3013_vm7, %v6084_v29, -inf }
 0x540   : > { %v6503_v63 = vmax.f32 %v6501_v34, %v6502_v15  ;;  %v6510_v22 = vmax.f32 %v6508_v43, %v6509_v41  ;;  %v6516_v1 = vrot.slane %v6515_v35, 4  ;;  %v6530_v62 = vrot.slane %v6529_v14, 4 }
 0x541   : > { %v6497_v19 = vrot.slane %v6496_v58, 2  ;;  %v6524_v59 = vmax.f32 %v6522_v33, %v6523_v53  ;;  %v6537_v54 = vrot.slane %v6536_v28, 4  ;;  %v6543_v44 = vsel %vm3013_vm7, %v6085_v56, -inf }
 0x542   : > { %v6504_v3 = vrot.slane %v6503_v63, 2  ;;  %v6511_v10 = vrot.slane %v6510_v22, 2  ;;  %v6517_v0 = vmax.f32 %v6515_v35, %v6516_v1  ;;  %v6531_v26 = vmax.f32 %v6529_v14, %v6530_v62 }
 0x543   : > { %v6498_v17 = vmax.f32 %v6496_v58, %v6497_v19  ;;  %v6525_v55 = vrot.slane %v6524_v59, 2  ;;  %v6538_v46 = vmax.f32 %v6536_v28, %v6537_v54  ;;  %v6544_v23 = vrot.slane %v6543_v44, 4 }
 0x544   : > { %v6505_v37 = vmax.f32 %v6503_v63, %v6504_v3  ;;  %v6512_v51 = vmax.f32 %v6510_v22, %v6511_v10  ;;  %v6518_v24 = vrot.slane %v6517_v0, 2  ;;  %v6532_v48 = vrot.slane %v6531_v26, 2 }
 0x545   : > { %v6499_v20 = vrot.slane %v6498_v17, 1  ;;  %v6526_v61 = vmax.f32 %v6524_v59, %v6525_v55  ;;  %v6539_v50 = vrot.slane %v6538_v46, 2  ;;  %v6545_v13 = vmax.f32 %v6543_v44, %v6544_v23 }
 0x546   : > { %v6506_v31 = vrot.slane %v6505_v37, 1  ;;  %v6513_v27 = vrot.slane %v6512_v51, 1  ;;  %v6519_v7 = vmax.f32 %v6517_v0, %v6518_v24  ;;  %v6533_v45 = vmax.f32 %v6531_v26, %v6532_v48 }
 0x547   : > { %v6500_v60 = vmax.f32 %v6498_v17, %v6499_v20  ;;  %v6527_v30 = vrot.slane %v6526_v61, 1  ;;  %v6540_v47 = vmax.f32 %v6538_v46, %v6539_v50  ;;  %v6546_v12 = vrot.slane %v6545_v13, 2 }
 0x548   : > { %v6507_v5 = vmax.f32 %v6505_v37, %v6506_v31  ;;  %v6514_v4 = vmax.f32 %v6512_v51, %v6513_v27  ;;  %v6520_v29 = vrot.slane %v6519_v7, 1  ;;  %v6534_v43 = vrot.slane %v6533_v45, 1 }
 0x549   : > { %v6678_v16 = vmax.f32 %v15596_v8, %v6500_v60  ;;  %v6528_v34 = vmax.f32 %v6526_v61, %v6527_v30  ;;  %v6541_v33 = vrot.slane %v6540_v47, 1  ;;  %v6547_v56 = vmax.f32 %v6545_v13, %v6546_v12 }
 0x54a   : > { %v6521_v58 = vmax.f32 %v6519_v7, %v6520_v29  ;;  %v6679_v15 = vmax.f32 %v15598_v6, %v6507_v5  ;;  %v6680_v41 = vmax.f32 %v15600_v36, %v6514_v4  ;;  %v5873_v35 = vrot.slane %v5859_v2, %v13732_v38 }
 0x54b   : > { %v6535_v53 = vmax.f32 %v6533_v45, %v6534_v43  ;;  %v6542_v14 = vmax.f32 %v6540_v47, %v6541_v33  ;;  %v6548_v28 = vrot.slane %v6547_v56, 1  ;;  %v6682_v19 = vmax.f32 %v15604_v25, %v6528_v34 }
 0x54c   : > { %v6681_v63 = vmax.f32 %v15606_v42, %v6521_v58  ;;  %v6782_v8 = vsel %vm4065_vm9, %v6680_v41, %v6678_v16  ;;  %v5874_v22 = vcombine.high %v15680_v52, %v15680_v52  ;;  %v5875_v1 = vcombine.high %v5873_v35, %v5873_v35 }
 0x54d   : > { %v6549_v59 = vmax.f32 %v6547_v56, %v6548_v28  ;;  %v6683_v6 = vmax.f32 %v15612_v21, %v6535_v53  ;;  %v6684_v36 = vmax.f32 %v15614_v49, %v6542_v14  ;;  %v6783_v2 = vsel %vm4067_vm10, %v6682_v19, %v6782_v8 }
 0x54e   : > { %v6785_v62 = vsel %vm4065_vm9, %v6681_v63, %v6679_v15  ;;  %v6092_v25 = vrot.slane %v15680_v52, %v13732_v38  ;;  %v6100_v42 = vrot.slane %v5874_v22, %v13732_v38  ;;  %v6108_v54 = vrot.slane %v5873_v35, %v13732_v38 }
 0x54f   : > { %v6685_v44 = vmax.f32 %v15624_v9, %v6549_v59  ;;  %v6784_v17 = vsel %vm4069_vm11, %v6684_v36, %v6783_v2  ;;  %v6786_v3 = vsel %vm4067_vm10, %v6683_v6, %v6785_v62  ;;  %v6116_v21 = vrot.slane %v5875_v1, %v13732_v38  ;;  %v6811_v6 = vld [vmem:[#allocation3] sm:$0x3f]  ;;  %v6812_v36 = vld [vmem:[#allocation3 + $0x8] sm:$0x3f] }
 0x550   : > { %6807 = vst [vmem:[#allocation3 + $0x30] sm:$0x1e] %v6784_v17  ;;  %v6093_v49 = vcombine.high %v6092_v25, %v6092_v25  ;;  %v6101_v10 = vcombine.high %v6100_v42, %v6100_v42  ;;  %v6109_v0 = vcombine.high %v6108_v54, %v6108_v54  ;;  %v6550_v55 = vsel %vm3013_vm7, %v6092_v25, -inf }
 0x551   : > { %v6787_v52 = vsel %vm4069_vm11, %v6685_v44, %v6786_v3  ;;  %v6117_v26 = vcombine.high %v6116_v21, %v6116_v21  ;;  %v6551_v46 = vrot.slane %v6550_v55, 4  ;;  %v6564_v23 = vsel %vm3013_vm7, %v6100_v42, -inf  ;;  %v6816_v44 = vld [vmem:[#allocation3 + $0x28] sm:$0x3f] }
 0x552   : > { %6808 = vst [vmem:[#allocation3 + $0x38] sm:$0x1e] %v6787_v52  ;;  %v6557_v9 = vsel %vm3013_vm7, %v6093_v49, -inf  ;;  %v6565_v20 = vrot.slane %v6564_v23, 4  ;;  %v6571_v37 = vsel %vm3013_vm7, %v6101_v10, -inf  ;;  %v6578_v51 = vsel %vm3013_vm7, %v6108_v54, -inf }
 0x553   : > { %v6552_v24 = vmax.f32 %v6550_v55, %v6551_v46  ;;  %v6558_v61 = vrot.slane %v6557_v9, 4  ;;  %v6572_v48 = vrot.slane %v6571_v37, 4  ;;  %v6579_v50 = vrot.slane %v6578_v51, 4  ;;  %v6814_v54 = vld [vmem:[#allocation3 + $0x18] sm:$0x3f] }
 0x554   : > { %v6566_v13 = vmax.f32 %v6564_v23, %v6565_v20  ;;  %v6585_v60 = vsel %vm3013_vm7, %v6109_v0, -inf  ;;  %v6592_v31 = vsel %vm3013_vm7, %v6116_v21, -inf  ;;  %v6599_v27 = vsel %vm3013_vm7, %v6117_v26, -inf  ;;  %v6813_v49 = vld [vmem:[#allocation3 + $0x10] sm:$0x3f] }
 0x555   : > { %v6553_v7 = vrot.slane %v6552_v24, 2  ;;  %v6559_v30 = vmax.f32 %v6557_v9, %v6558_v61  ;;  %v6573_v45 = vmax.f32 %v6571_v37, %v6572_v48  ;;  %v6580_v47 = vmax.f32 %v6578_v51, %v6579_v50  ;;  %v6815_v52 = vld [vmem:[#allocation3 + $0x20] sm:$0x3f] }
 0x556   : > { %v6567_v12 = vrot.slane %v6566_v13, 2  ;;  %v6586_v5 = vrot.slane %v6585_v60, 4  ;;  %v6593_v4 = vrot.slane %v6592_v31, 4  ;;  %v6600_v29 = vrot.slane %v6599_v27, 4 }
 0x557   : > { %v6554_v16 = vmax.f32 %v6552_v24, %v6553_v7  ;;  %v6560_v34 = vrot.slane %v6559_v30, 2  ;;  %v6574_v43 = vrot.slane %v6573_v45, 2  ;;  %v6581_v33 = vrot.slane %v6580_v47, 2  ;;  %v6817_v39 = vld [vmem:[#allocation3 + $0x30] sm:$0x3f] }
 0x558   : > { %v6568_v56 = vmax.f32 %v6566_v13, %v6567_v12  ;;  %v6587_v58 = vmax.f32 %v6585_v60, %v6586_v5  ;;  %v6594_v15 = vmax.f32 %v6592_v31, %v6593_v4  ;;  %v6601_v41 = vmax.f32 %v6599_v27, %v6600_v29 }
 0x559   : > { %v6555_v35 = vrot.slane %v6554_v16, 1  ;;  %v6561_v53 = vmax.f32 %v6559_v30, %v6560_v34  ;;  %v6575_v14 = vmax.f32 %v6573_v45, %v6574_v43  ;;  %v6582_v28 = vmax.f32 %v6580_v47, %v6581_v33  ;;  %v6818_v9 = vld [vmem:[#allocation3 + $0x38] sm:$0x3f] }
 0x55a   : > { %v6569_v19 = vrot.slane %v6568_v56, 1  ;;  %v6588_v63 = vrot.slane %v6587_v58, 2  ;;  %v6595_v8 = vrot.slane %v6594_v15, 2  ;;  %v6602_v22 = vrot.slane %v6601_v41, 2 }
 0x55b   : > { %v6562_v1 = vrot.slane %v6561_v53, 1  ;;  %v6576_v59 = vrot.slane %v6575_v14, 1  ;;  %v6583_v2 = vrot.slane %v6582_v28, 1  ;;  %v15716_v17 = vmax.f32 %v6554_v16, %v6555_v35 }
 0x55c   : > { %v6589_v62 = vmax.f32 %v6587_v58, %v6588_v63  ;;  %v6596_v25 = vmax.f32 %v6594_v15, %v6595_v8  ;;  %v6603_v42 = vmax.f32 %v6601_v41, %v6602_v22  ;;  %v15718_v3 = vmax.f32 %v6568_v56, %v6569_v19 }
 0x55d   : > { %v5733_v21 = vmax.f32 %v15628_v32, 0.0  ;;  %v10759_v26 = vpack.c.bf16 %v6812_v36, %v6811_v6  ;;  %v10760_v20 = vpack.c.bf16 %v6814_v54, %v6813_v49  ;;  %v10761_v37 = vpack.c.bf16 %v6816_v44, %v6815_v52 }
 0x55e   : > { %v6590_v10 = vrot.slane %v6589_v62, 1  ;;  %v6597_v0 = vrot.slane %v6596_v25, 1  ;;  %v6604_v55 = vrot.slane %v6603_v42, 1  ;;  %v15725_v51 = vmax.f32 %v6561_v53, %v6562_v1 }
 0x55f   : > { %v5876_v46 = vcombine.low %v5732_v11, %v5733_v21  ;;  %v5877_v23 = vcombine.high %v5732_v11, %v5733_v21  ;;  %v15727_v24 = vmax.f32 %v6575_v14, %v6576_v59  ;;  %v15729_v32 = vmax.f32 %v6582_v28, %v6583_v2 }
 0x560   : > { %v15732_v61 = vrot.slane %v10759_v26, %v13732_v38  ;;  %v15734_v48 = vmax.f32 %v6589_v62, %v6590_v10  ;;  %v15739_v11 = vrot.slane %v10760_v20, %v13732_v38  ;;  %v15741_v60 = vmax.f32 %v6596_v25, %v6597_v0 }
 0x561   : > { %v5884_v50 = vrot.slane %v5876_v46, %v13732_v38  ;;  %v5891_v13 = vrot.slane %v5877_v23, %v13732_v38  ;;  %v15743_v31 = vmax.f32 %v6603_v42, %v6604_v55  ;;  %v15746_v27 = vrot.slane %v10761_v37, %v13732_v38 }
 0x562   : > { %v10762_v7 = vpack.c.bf16 %v6818_v9, %v6817_v39  ;;  %v7023_v4 = vcombine.low %v15732_v61, %v15739_v11  ;;  %v15757_v29 = vcombine.high %v15732_v61, %v15732_v61  ;;  %v15761_v16 = vcombine.high %v15739_v11, %v15739_v11 }
 0x563   : > { %v5892_v30 = vcombine.high %v5884_v50, %v5884_v50  ;;  %v5893_v45 = vcombine.high %v5891_v13, %v5891_v13  ;;  %v6124_v47 = vrot.slane %v5884_v50, %v13732_v38  ;;  %v6140_v12 = vrot.slane %v5891_v13, %v13732_v38 }
 0x564   : > { %v15751_v5 = vrot.slane %v10762_v7, %v13732_v38  ;;  %v15770_v35 = vrot.slane %v7023_v4, %v13732_v38 }
 0x565   : > { %v6125_v34 = vcombine.high %v6124_v47, %v6124_v47  ;;  %v6132_v43 = vrot.slane %v5892_v30, %v13732_v38  ;;  %v6141_v33 = vcombine.high %v6140_v12, %v6140_v12  ;;  %v6148_v56 = vrot.slane %v5893_v45, %v13732_v38 }
 0x566   : > { %v6606_v58 = vsel %vm3013_vm7, %v6124_v47, -inf  ;;  %v6634_v15 = vsel %vm3013_vm7, %v6140_v12, -inf  ;;  %v7024_v41 = vcombine.low %v15746_v27, %v15751_v5 }
 0x567   : > { %v6133_v53 = vcombine.high %v6132_v43, %v6132_v43  ;;  %v6149_v14 = vcombine.high %v6148_v56, %v6148_v56  ;;  %v6607_v28 = vrot.slane %v6606_v58, 4  ;;  %v6613_v19 = vsel %vm3013_vm7, %v6125_v34, -inf }
 0x568   : > { %v6614_v63 = vrot.slane %v6613_v19, 4  ;;  %v6620_v8 = vsel %vm3013_vm7, %v6132_v43, -inf  ;;  %v6635_v22 = vrot.slane %v6634_v15, 4  ;;  %v6641_v1 = vsel %vm3013_vm7, %v6141_v33, -inf }
 0x569   : > { %v6608_v59 = vmax.f32 %v6606_v58, %v6607_v28  ;;  %v6621_v6 = vrot.slane %v6620_v8, 4  ;;  %v6627_v36 = vsel %vm3013_vm7, %v6133_v53, -inf  ;;  %v6642_v2 = vrot.slane %v6641_v1, 4 }
 0x56a   : > { %v6615_v62 = vmax.f32 %v6613_v19, %v6614_v63  ;;  %v6628_v25 = vrot.slane %v6627_v36, 4  ;;  %v6636_v42 = vmax.f32 %v6634_v15, %v6635_v22  ;;  %v6648_v54 = vsel %vm3013_vm7, %v6148_v56, -inf }
 0x56b   : > { %v6609_v44 = vrot.slane %v6608_v59, 2  ;;  %v6622_v21 = vmax.f32 %v6620_v8, %v6621_v6  ;;  %v6643_v49 = vmax.f32 %v6641_v1, %v6642_v2  ;;  %v6649_v10 = vrot.slane %v6648_v54, 4 }
 0x56c   : > { %v6616_v0 = vrot.slane %v6615_v62, 2  ;;  %v6629_v55 = vmax.f32 %v6627_v36, %v6628_v25  ;;  %v6637_v52 = vrot.slane %v6636_v42, 2  ;;  %v6655_v26 = vsel %vm3013_vm7, %v6149_v14, -inf }
 0x56d   : > { %v6610_v46 = vmax.f32 %v6608_v59, %v6609_v44  ;;  %v6623_v23 = vrot.slane %v6622_v21, 2  ;;  %v6644_v9 = vrot.slane %v6643_v49, 2  ;;  %v6650_v20 = vmax.f32 %v6648_v54, %v6649_v10 }
 0x56e   : > { %v6617_v37 = vmax.f32 %v6615_v62, %v6616_v0  ;;  %v6630_v50 = vrot.slane %v6629_v55, 2  ;;  %v6638_v13 = vmax.f32 %v6636_v42, %v6637_v52  ;;  %v6656_v39 = vrot.slane %v6655_v26, 4 }
 0x56f   : > { %v6611_v7 = vrot.slane %v6610_v46, 1  ;;  %v6624_v30 = vmax.f32 %v6622_v21, %v6623_v23  ;;  %v6645_v45 = vmax.f32 %v6643_v49, %v6644_v9  ;;  %v6651_v47 = vrot.slane %v6650_v20, 2  ;;  %v11997_v9 = vld [vmem:[%s17069_s5 + $0x110] ss:$8 sps:$4 sm:$0xff]  }
 0x570   : > { %v6618_v12 = vrot.slane %v6617_v37, 1  ;;  %v6631_v4 = vmax.f32 %v6629_v55, %v6630_v50  ;;  %v6639_v34 = vrot.slane %v6638_v13, 1  ;;  %v6657_v43 = vmax.f32 %v6655_v26, %v6656_v39 }
 0x571   : > { %v6612_v33 = vmax.f32 %v6610_v46, %v6611_v7  ;;  %v6625_v56 = vrot.slane %v6624_v30, 1  ;;  %v6646_v58 = vrot.slane %v6645_v45, 1  ;;  %v6652_v15 = vmax.f32 %v6650_v20, %v6651_v47 }
 0x572   : > { %v6619_v53 = vmax.f32 %v6617_v37, %v6618_v12  ;;  %v6632_v14 = vrot.slane %v6631_v4, 1  ;;  %v6640_v28 = vmax.f32 %v6638_v13, %v6639_v34  ;;  %v6658_v19 = vrot.slane %v6657_v43, 2 }
 0x573   : > { %v6626_v63 = vmax.f32 %v6624_v30, %v6625_v56  ;;  %v6647_v8 = vmax.f32 %v6645_v45, %v6646_v58  ;;  %v6653_v22 = vrot.slane %v6652_v15, 1  ;;  %v6686_v1 = vmax.f32 %v15716_v17, %v6612_v33  ;;  %v12002_v45 = vld [vmem:[%s17069_s5 + $0x124] ss:$8 sps:$4 sm:$0xff]  }
 0x574   : > { %v6633_v59 = vmax.f32 %v6631_v4, %v6632_v14  ;;  %v6659_v6 = vmax.f32 %v6657_v43, %v6658_v19  ;;  %v6687_v36 = vmax.f32 %v15725_v51, %v6619_v53  ;;  %v6690_v2 = vmax.f32 %v15729_v32, %v6640_v28  ;;  %v12000_v19 = vld [vmem:[%s17069_s5 + $0x120] ss:$8 sps:$4 sm:$0xff]  }
 0x575   : > { %v6654_v62 = vmax.f32 %v6652_v15, %v6653_v22  ;;  %v6688_v25 = vmax.f32 %v15718_v3, %v6626_v63  ;;  %v6691_v42 = vmax.f32 %v15734_v48, %v6647_v8  ;;  %v15787_v54 = vrot.slane %v7024_v41, %v13732_v38 }
 0x576   : > { %v6660_v44 = vrot.slane %v6659_v6, 1  ;;  %v6689_v17 = vmax.f32 %v15727_v24, %v6633_v59  ;;  %v15792_v21 = vcombine.high %v15746_v27, %v15746_v27  ;;  %v15796_v51 = vcombine.high %v15751_v5, %v15751_v5  ;;  %v11994_v24 = vld [vmem:[%s17069_s5 + $0x100] ss:$8 sps:$4 sm:$0xff]  }
 0x577   : > { %v6692_v3 = vmax.f32 %v15741_v60, %v6654_v62  ;;  %v6788_v32 = vsel %vm4065_vm9, %v6688_v25, %v6686_v1  ;;  %v7039_v48 = vcombine.low %v15770_v35, %v15787_v54  ;;  %v7040_v41 = vcombine.high %v15770_v35, %v15787_v54  ;;  %v11999_v60 = vld [vmem:[%s17069_s5 + $0x114] ss:$8 sps:$4 sm:$0xff]  }
 0x578   : > { %v6661_v49 = vmax.f32 %v6659_v6, %v6660_v44  ;;  %v6789_v10 = vsel %vm4067_vm10, %v6690_v2, %v6788_v32  ;;  %v6791_v0 = vsel %vm4065_vm9, %v6689_v17, %v6687_v36  ;;  %v6887_v26 = vshrl.u32 %v15732_v61, 16  ;;  %v12005_v2 = vld [vmem:[%s17069_s5 + $0x134] ss:$8 sps:$4 sm:$0xff]  }
 0x579   : > { %v6790_v35 = vsel %vm4069_vm11, %v6692_v3, %v6789_v10  ;;  %v6792_v52 = vsel %vm4067_vm10, %v6691_v42, %v6791_v0  ;;  %8951 = vmatprep.mubr.bf16.mxu0 %v7040_v41  ;;  %v6890_v46 = vshll.u32 %v15732_v61, 16  ;;  %v6896_v20 = vshll.u32 %v15757_v29, 16  ;;  %v12008_v10 = vld [vmem:[%s17069_s5 + $0x144] ss:$8 sps:$4 sm:$0xff]  }
 0x57a   : > { %v6693_v23 = vmax.f32 %v15743_v31, %v6661_v49  ;;  %6809 = vst [vmem:[#allocation3 + $0x40] sm:$0x1e] %v6790_v35  ;;  %8952 = vmatmul.mubr.bf16.vlgmr.msra.gmra.mrb[40].mxu0 %v7039_v48  ;;  %v6901_v37 = vshrl.u32 %v15739_v11, 16  ;;  %v6904_v50 = vshll.u32 %v15739_v11, 16  ;;  %v6889_v31 = vrot.slane %v6887_v26, 6 }
 0x57b   : > { %8963 = vmatpush1.bf16.msra.mxu0 %v11994_v24  ;;  %v6892_v39 = vrot.slane %v6890_v46, 7  ;;  %v6915_v7 = vshrl.u32 %v15746_v27, 16  ;;  %v6910_v4 = vshll.u32 %v15761_v16, 16  ;;  %v6898_v43 = vrot.slane %v6896_v20, 7  ;;  %v12003_v48 = vld [vmem:[%s17069_s5 + $0x130] ss:$8 sps:$4 sm:$0xff]  }
 0x57c   : > { %v6793_v30 = vsel %vm4069_vm11, %v6693_v23, %v6792_v52  ;;  %8964 = vmatprep.subr.bf16.mxu0 %v11999_v60  ;;  %v6903_v47 = vrot.slane %v6901_v37, 6  ;;  %v6906_v12 = vrot.slane %v6904_v50, 7  ;;  %v6918_v56 = vshll.u32 %v15746_v27, 16  ;;  %v12006_v37 = vld [vmem:[%s17069_s5 + $0x140] ss:$8 sps:$4 sm:$0xff]  }
 0x57d   : > { %6810 = vst [vmem:[#allocation3 + $0x48] sm:$0x1e] %v6793_v30  ;;  %v6893_v34 = vor.u32 %v6892_v39, %v6889_v31  ;;  %v6917_v33 = vrot.slane %v6915_v7, 6  ;;  %v6924_v53 = vshll.u32 %v15792_v21, 16  ;;  %v6929_v14 = vshrl.u32 %v15751_v5, 16 }
 0x57e   : > { %v6907_v15 = vor.u32 %v6906_v12, %v6903_v47  ;;  %v6932_v28 = vshll.u32 %v15751_v5, 16  ;;  %v6920_v8 = vrot.slane %v6918_v56, 7  ;;  %v6938_v22 = vshll.u32 %v15796_v51, 16  ;;  %v6822_v47 = vld [vmem:[#allocation3 + $0x58] sm:$0x3f] }
 0x57f   : > { %8965 = vmatpush1.bf16.msra.mxu0 %v11997_v9  ;;  %v6894_v63 = vrot.slane %v6893_v34, 2  ;;  %vm6942_vm10 = vcmask 1040384   ;;  %v6912_v59 = vrot.slane %v6910_v4, 7  ;;  %v6931_v6 = vrot.slane %v6929_v14, 6  ;;  %v12011_v12 = vld [vmem:[%s17069_s5 + $0x154] ss:$8 sps:$4 sm:$0xff]  }
 0x580   : > { %8966 = vmatprep.subr.bf16.mxu0 %v12002_v45  ;;  %v6908_v1 = vrot.slane %v6907_v15, 2  ;;  %v6934_v36 = vrot.slane %v6932_v28, 7  ;;  %vm6944_vm12 = vmor %vm6942_vm10, %vm4065_vm9  ;;  %v6921_v25 = vor.u32 %v6920_v8, %v6917_v33  ;;  %v6926_v42 = vrot.slane %v6924_v53, 7  ;;  %v6821_v45 = vld [vmem:[#allocation3 + $0x50] sm:$0x3f] }
 0x581   : > { %v6899_v62 = vsel %vm15845_vm6, %v6894_v63, %v6898_v43  ;;  %vm6946_vm14 = vmor %vm6944_vm12, %vm4069_vm11  ;;  %v10763_v44 = vrot.slane %v15732_v61, 9  ;;  %v6940_v32 = vrot.slane %v6938_v22, 7  ;;  %v6951_v24 = vrot.slane %v15757_v29, 7  ;;  %v6819_v31 = vld [vmem:[#allocation3 + $0x40] sm:$0x3f] }
 0x582   : > { %v15867_v17 = vsel %vm15845_vm6, %v6908_v1, %v6912_v59  ;;  %v6935_v3 = vor.u32 %v6934_v36, %v6931_v6  ;;  %vm15873_vm9 = vmor %vm6946_vm14, %vm4073_vm13  ;;  %v6922_v49 = vrot.slane %v6921_v25, 2  ;;  %v10764_v0 = vrot.slane %v15739_v11, 9  ;;  %v12014_v1 = vld [vmem:[%s17069_s5 + $0x164] ss:$8 sps:$4 sm:$0xff]  }
 0x583   : > { %8967 = vmatpush1.bf16.msra.mxu0 %v12000_v19  ;;  %v7043_v61 = vcombine.low %v6899_v62, %v15867_v17  ;;  %v6955_v60 = vrot.slane %v15761_v16, 7  ;;  %v6952_v35 = vsel %vm15873_vm9, %v10763_v44, %v6951_v24  ;;  %v10765_v52 = vrot.slane %v15746_v27, 9  ;;  %vm15894_vm11 = vmand %vm4063_vm8, %vm6879_vm0  ;;  %v12009_v19 = vld [vmem:[%s17069_s5 + $0x150] ss:$8 sps:$4 sm:$0xff]   ;;  %v12026_v41 = vld [vmem:[%s17069_s5 + $0x1a4] ss:$8 sps:$4 sm:$0xff]  }
 0x584   : > { %v6936_v55 = vrot.slane %v6935_v3, 2  ;;  %8968 = vmatprep.subr.bf16.mxu0 %v12005_v2  ;;  %v6959_v29 = vrot.slane %v15792_v21, 7  ;;  %v6820_v26 = vld [vmem:[#allocation3 + $0x48] sm:$0x3f]  ;;  %v15890_v46 = vsel %vm15845_vm6, %v6922_v49, %v6926_v42  ;;  %v10766_v9 = vrot.slane %v15751_v5, 9 }
 0x585   : > { %v6956_v16 = vsel %vm15873_vm9, %v10764_v0, %v6955_v60  ;;  %v6963_v20 = vrot.slane %v15796_v51, 7  ;;  %vm9570_vm8 = vsmask.f32 256  ;;  %v10767_v7 = vpack.c.bf16 %v6820_v26, %v6819_v31 }
 0x586   : > { %v15904_v21 = vsel %vm15845_vm6, %v6936_v55, %v6940_v32  ;;  %v6960_v50 = vsel %vm15873_vm9, %v10765_v52, %v6959_v29  ;;  %v7063_v13 = vcombine.low %v6952_v35, %v6956_v16  ;;  %vm9571_vm13 = vmand %vm6942_vm10, %vm9570_vm8  ;;  %v7083_v30 = vcombine.low %v15739_v11, %v15746_v27 }
 0x587   : > { %v7044_v39 = vcombine.low %v15890_v46, %v15904_v21  ;;  %8969 = vmatpush1.bf16.msra.mxu0 %v12003_v48  ;;  %v6964_v51 = vsel %vm15873_vm9, %v10766_v9, %v6963_v20  ;;  %vm15923_vm15 = vmor %vm15894_vm11, %vm9571_vm13  ;;  %v7103_v43 = vcombine.low %v15867_v17, %v15890_v46  ;;  %v7123_v33 = vcombine.low %v6956_v16, %v6960_v50  ;;  %v12012_v48 = vld [vmem:[%s17069_s5 + $0x160] ss:$8 sps:$4 sm:$0xff]  }
 0x588   : > { %8970 = vmatprep.subr.bf16.mxu0 %v12008_v10  ;;  %v7064_v4 = vcombine.low %v6960_v50, %v6964_v51  ;;  %v15930_v11 = vrot.slane %v7043_v61, %v13732_v38  ;;  %v6974_v56 = vrot.slane %v10767_v7, %v13732_v38  ;;  %v15937_v15 = vrot.slane %v7063_v13, %v13732_v38  ;;  %v12017_v10 = vld [vmem:[%s17069_s5 + $0x174] ss:$8 sps:$4 sm:$0xff]   ;;  %v12015_v50 = vld [vmem:[%s17069_s5 + $0x170] ss:$8 sps:$4 sm:$0xff]  }
 0x589   : > { %v15933_v27 = vrot.slane %v7044_v39, %v13732_v38  ;;  %v10769_v14 = vpack.c.bf16 %v6822_v47, %v6821_v45  ;;  %v15949_v8 = vrot.slane %v7083_v30, %v13732_v38  ;;  %v15975_v29 = vrot.slane %v7123_v33, %v13732_v38 }
 0x58a   : > { %v15940_v53 = vrot.slane %v7064_v4, %v13732_v38  ;;  %v7084_v63 = vcombine.low %v15751_v5, %v6974_v56  ;;  %v6975_v22 = vcombine.high %v6974_v56, %v6974_v56  ;;  %v6977_v36 = vshrl.u32 %v6974_v56, 16 }
 0x58b   : > { %v7060_v28 = vcombine.high %v15930_v11, %v15933_v27  ;;  %8971 = vmatpush1.bf16.msra.mxu0 %v12006_v37  ;;  %v6980_v2 = vshll.u32 %v6974_v56, 16  ;;  %v10768_v25 = vrot.slane %v6974_v56, 9  ;;  %v7003_v32 = vrot.slane %v10769_v14, %v13732_v38 }
 0x58c   : > { %8972 = vmatprep.subr.bf16.mxu0 %v12011_v12  ;;  %v7080_v59 = vcombine.high %v15937_v15, %v15940_v53  ;;  %v7079_v6 = vcombine.low %v15937_v15, %v15940_v53  ;;  %v15959_v5 = vrot.slane %v7084_v63, %v13732_v38  ;;  %v6986_v62 = vshll.u32 %v6975_v22, 16  ;;  %v12096_v15 = vld [vmem:[%s17069_s5 + $0x320] ss:$8 sps:$4 sm:$0xff]  }
 0x58d   : > { %8994 = vmatprep.mubr.bf16.mxu0 %v7060_v28  ;;  %v6992_v42 = vrot.slane %v6975_v22, 7  ;;  %v6979_v44 = vrot.slane %v6977_v36, 6  ;;  %v6982_v3 = vrot.slane %v6980_v2, 7  ;;  %v7143_v55 = vcombine.low %v6974_v56, %v7003_v32  ;;  %v12018_v28 = vld [vmem:[%s17069_s5 + $0x180] ss:$8 sps:$4 sm:$0xff]  }
 0x58e   : > { %v7100_v24 = vcombine.high %v15949_v8, %v15959_v5  ;;  %v7099_v49 = vcombine.low %v15949_v8, %v15959_v5  ;;  %v7004_v35 = vcombine.high %v7003_v32, %v7003_v32  ;;  %v6988_v52 = vrot.slane %v6986_v62, 7  ;;  %v12023_v22 = vld [vmem:[%s17069_s5 + $0x194] ss:$8 sps:$4 sm:$0xff]   ;;  %v12021_v62 = vld [vmem:[%s17069_s5 + $0x190] ss:$8 sps:$4 sm:$0xff]  }
 0x58f   : > { %8973 = vmatpush1.bf16.msra.mxu0 %v12009_v19  ;;  %v6993_v61 = vsel %vm15873_vm9, %v10768_v25, %v6992_v42  ;;  %v6983_v0 = vor.u32 %v6982_v3, %v6979_v44  ;;  %v7006_v26 = vshrl.u32 %v7003_v32, 16  ;;  %v7009_v23 = vshll.u32 %v7003_v32, 16  ;;  %v12144_v8 = vld [vmem:[%s17069_s5 + $0x420] ss:$8 sps:$4 sm:$0xff]   ;;  %v12149_v5 = vld [vmem:[%s17069_s5 + $0x434] ss:$8 sps:$4 sm:$0xff]  }
 0x590   : > { %8974 = vmatprep.subr.bf16.mxu0 %v12014_v1  ;;  %v7124_v60 = vcombine.low %v6964_v51, %v6993_v61  ;;  %v15981_v20 = vrot.slane %v7143_v55, %v13732_v38  ;;  %v7015_v37 = vshll.u32 %v7004_v35, 16  ;;  %v10770_v39 = vrot.slane %v7003_v32, 9  ;;  %v12020_v51 = vld [vmem:[%s17069_s5 + $0x184] ss:$8 sps:$4 sm:$0xff]   ;;  %v12035_v55 = vld [vmem:[%s17069_s5 + $0x1d4] ss:$8 sps:$4 sm:$0xff]  }
 0x591   : > { %v6984_v16 = vrot.slane %v6983_v0, 2  ;;  %v7008_v13 = vrot.slane %v7006_v26, 6  ;;  %v7011_v31 = vrot.slane %v7009_v23, 7  ;;  %v7021_v14 = vrot.slane %v7004_v35, 7  ;;  %v12032_v0 = vld [vmem:[%s17069_s5 + $0x1c4] ss:$8 sps:$4 sm:$0xff]  }
 0x592   : > { %v15978_v9 = vrot.slane %v7124_v60, %v13732_v38  ;;  %v7152_v47 = vcombine.high %v15787_v54, %v15981_v20  ;;  %v7151_v4 = vcombine.low %v15787_v54, %v15981_v20  ;;  %v7017_v56 = vrot.slane %v7015_v37, 7  ;;  %v12030_v60 = vld [vmem:[%s17069_s5 + $0x1c0] ss:$8 sps:$4 sm:$0xff]   ;;  %v12033_v35 = vld [vmem:[%s17069_s5 + $0x1d0] ss:$8 sps:$4 sm:$0xff]  }
 0x593   : > { %8975 = vmatpush1.bf16.msra.mxu0 %v12012_v48  ;;  %v6989_v7 = vsel %vm15845_vm6, %v6984_v16, %v6988_v52  ;;  %v7012_v33 = vor.u32 %v7011_v31, %v7008_v13  ;;  %v16007_v19 = vrot.slane %v7103_v43, %v13732_v38  ;;  %v7022_v1 = vsel %vm15873_vm9, %v10770_v39, %v7021_v14  ;;  %v12024_v48 = vld [vmem:[%s17069_s5 + $0x1a0] ss:$8 sps:$4 sm:$0xff]   ;;  %v12038_v52 = vld [vmem:[%s17069_s5 + $0x1e4] ss:$8 sps:$4 sm:$0xff]   ;;  %v12041_v23 = vld [vmem:[%s17069_s5 + $0x1f4] ss:$8 sps:$4 sm:$0xff]  }
 0x594   : > { %8976 = vmatprep.subr.bf16.mxu0 %v12017_v10  ;;  %v7140_v30 = vcombine.high %v15975_v29, %v15978_v9  ;;  %v7139_v45 = vcombine.low %v15975_v29, %v15978_v9  ;;  %v7104_v12 = vcombine.low %v15904_v21, %v6989_v7  ;;  %v7167_v43 = vcombine.low %v6993_v61, %v7022_v1  ;;  %v12029_v61 = vld [vmem:[%s17069_s5 + $0x1b4] ss:$8 sps:$4 sm:$0xff]   ;;  %v12027_v10 = vld [vmem:[%s17069_s5 + $0x1b0] ss:$8 sps:$4 sm:$0xff]   ;;  %v12036_v26 = vld [vmem:[%s17069_s5 + $0x1e0] ss:$8 sps:$4 sm:$0xff]  }
 0x595   : > { %v7013_v21 = vrot.slane %v7012_v33, 2  ;;  %v12039_v16 = vld [vmem:[%s17069_s5 + $0x1f0] ss:$8 sps:$4 sm:$0xff]   ;;  %v12044_v37 = vld [vmem:[%s17069_s5 + $0x204] ss:$8 sps:$4 sm:$0xff]   ;;  %v7059_v13 = vcombine.low %v15930_v11, %v15933_v27 }
 0x596   : > { %v16010_v63 = vrot.slane %v7104_v12, %v13732_v38  ;;  %v16027_v25 = vrot.slane %v7167_v43, %v13732_v38  ;;  %v12047_v31 = vld [vmem:[%s17069_s5 + $0x214] ss:$8 sps:$4 sm:$0xff]   ;;  %v12045_v39 = vld [vmem:[%s17069_s5 + $0x210] ss:$8 sps:$4 sm:$0xff]   ;;  %v12050_v11 = vld [vmem:[%s17069_s5 + $0x224] ss:$8 sps:$4 sm:$0xff]  }
 0x597   : > { %8977 = vmatpush1.bf16.msra.mxu0 %v12015_v50  ;;  %v7018_v46 = vsel %vm15845_vm6, %v7013_v21, %v7017_v56  ;;  %v12042_v50 = vld [vmem:[%s17069_s5 + $0x200] ss:$8 sps:$4 sm:$0xff]   ;;  %v12056_v12 = vld [vmem:[%s17069_s5 + $0x244] ss:$8 sps:$4 sm:$0xff]   ;;  %v12059_v56 = vld [vmem:[%s17069_s5 + $0x254] ss:$8 sps:$4 sm:$0xff]  }
 0x598   : > { %8978 = vmatprep.subr.bf16.mxu0 %v12020_v51  ;;  %v7120_v36 = vcombine.high %v16007_v19, %v16010_v63  ;;  %v7119_v17 = vcombine.low %v16007_v19, %v16010_v63  ;;  %v7155_v2 = vcombine.low %v6989_v7, %v7018_v46  ;;  %v7176_v58 = vcombine.high %v15940_v53, %v16027_v25  ;;  %v12048_v51 = vld [vmem:[%s17069_s5 + $0x220] ss:$8 sps:$4 sm:$0xff]   ;;  %v12053_v7 = vld [vmem:[%s17069_s5 + $0x234] ss:$8 sps:$4 sm:$0xff]   ;;  %v12057_v14 = vld [vmem:[%s17069_s5 + $0x250] ss:$8 sps:$4 sm:$0xff]  }
 0x599   : > { %v7175_v44 = vcombine.low %v15940_v53, %v16027_v25  ;;  %v12054_v33 = vld [vmem:[%s17069_s5 + $0x240] ss:$8 sps:$4 sm:$0xff]   ;;  %v12063_v1 = vld [vmem:[%s17069_s5 + $0x270] ss:$8 sps:$4 sm:$0xff]   ;;  %v12068_v46 = vld [vmem:[%s17069_s5 + $0x284] ss:$8 sps:$4 sm:$0xff]  }
 0x59a   : > { %v16033_v42 = vrot.slane %v7155_v2, %v13732_v38  ;;  %v12060_v21 = vld [vmem:[%s17069_s5 + $0x260] ss:$8 sps:$4 sm:$0xff]   ;;  %v12071_v2 = vld [vmem:[%s17069_s5 + $0x294] ss:$8 sps:$4 sm:$0xff]  }
 0x59b   : > { %8979 = vmatpush1.bf16.msra.mxu0 %v12018_v28  ;;  %v12062_v28 = vld [vmem:[%s17069_s5 + $0x264] ss:$8 sps:$4 sm:$0xff]   ;;  %v12066_v43 = vld [vmem:[%s17069_s5 + $0x280] ss:$8 sps:$4 sm:$0xff]   ;;  %v12197_v63 = vld [vmem:[%s17069_s5 + $0x534] ss:$8 sps:$4 sm:$0xff]  }
 0x59c   : > { %8980 = vmatprep.subr.bf16.mxu0 %v12023_v22  ;;  %v7164_v3 = vcombine.high %v15933_v27, %v16033_v42  ;;  %v7163_v32 = vcombine.low %v15933_v27, %v16033_v42  ;;  %v12065_v22 = vld [vmem:[%s17069_s5 + $0x274] ss:$8 sps:$4 sm:$0xff]   ;;  %v12192_v19 = vld [vmem:[%s17069_s5 + $0x520] ss:$8 sps:$4 sm:$0xff]  }
 0x59d   : > { %v12240_v29 = vld [vmem:[%s17069_s5 + $0x620] ss:$8 sps:$4 sm:$0xff]   ;;  %v12245_v9 = vld [vmem:[%s17069_s5 + $0x634] ss:$8 sps:$4 sm:$0xff]  }
 0x59e   : > { %v12288_v54 = vld [vmem:[%s17069_s5 + $0x720] ss:$8 sps:$4 sm:$0xff]   ;;  %v12293_v20 = vld [vmem:[%s17069_s5 + $0x734] ss:$8 sps:$4 sm:$0xff]  }
 0x59f   : > { %8981 = vmatpush1.bf16.msra.mxu0 %v12021_v62  ;;  %v12069_v62 = vld [vmem:[%s17069_s5 + $0x290] ss:$8 sps:$4 sm:$0xff]   ;;  %v12336_v27 = vld [vmem:[%s17069_s5 + $0x820] ss:$8 sps:$4 sm:$0xff]   ;;  %v12341_v42 = vld [vmem:[%s17069_s5 + $0x834] ss:$8 sps:$4 sm:$0xff]  }
 0x5a0   : > { %8982 = vmatprep.subr.bf16.mxu0 %v12026_v41  ;;  %v12074_v41 = vld [vmem:[%s17069_s5 + $0x2a4] ss:$8 sps:$4 sm:$0xff]   ;;  %v12382_v53 = vld [vmem:[%s17071_s7 + $0x50] sm:$0xff]  }
 0x5a1   : > { %v12383_v25 = vld [vmem:[%s17071_s7 + $0x10] sm:$0xff]  }
 0x5a3   : > { %8983 = vmatpush1.bf16.msra.mxu0 %v12024_v48  ;;  %v12072_v48 = vld [vmem:[%s17069_s5 + $0x2a0] ss:$8 sps:$4 sm:$0xff]  }
 0x5a4   : > { %8984 = vmatprep.subr.bf16.mxu0 %v12029_v61  ;;  %v12077_v61 = vld [vmem:[%s17069_s5 + $0x2b4] ss:$8 sps:$4 sm:$0xff]  }
 0x5a7   : > { %8985 = vmatpush1.bf16.msra.mxu0 %v12027_v10  ;;  %v12075_v10 = vld [vmem:[%s17069_s5 + $0x2b0] ss:$8 sps:$4 sm:$0xff]  }
 0x5a8   : > { %8986 = vmatprep.subr.bf16.mxu0 %v12032_v0  ;;  %v12080_v0 = vld [vmem:[%s17069_s5 + $0x2c4] ss:$8 sps:$4 sm:$0xff]  }
 0x5ab   : > { %8987 = vmatpush1.bf16.msra.mxu0 %v12030_v60  ;;  %v12078_v60 = vld [vmem:[%s17069_s5 + $0x2c0] ss:$8 sps:$4 sm:$0xff]  }
 0x5ac   : > { %8988 = vmatprep.subr.bf16.mxu0 %v12035_v55  ;;  %v12083_v55 = vld [vmem:[%s17069_s5 + $0x2d4] ss:$8 sps:$4 sm:$0xff]  }
 0x5af   : > { %8989 = vmatpush1.bf16.msra.mxu0 %v12033_v35  ;;  %v12081_v35 = vld [vmem:[%s17069_s5 + $0x2d0] ss:$8 sps:$4 sm:$0xff]  }
 0x5b0   : > { %8990 = vmatprep.subr.bf16.mxu0 %v12038_v52  ;;  %v12086_v52 = vld [vmem:[%s17069_s5 + $0x2e4] ss:$8 sps:$4 sm:$0xff]  }
 0x5b3   : > { %8991 = vmatpush1.bf16.msra.mxu0 %v12036_v26  ;;  %v12084_v26 = vld [vmem:[%s17069_s5 + $0x2e0] ss:$8 sps:$4 sm:$0xff]  }
 0x5b4   : > { %8992 = vmatprep.subr.bf16.mxu0 %v12041_v23  ;;  %v12089_v23 = vld [vmem:[%s17069_s5 + $0x2f4] ss:$8 sps:$4 sm:$0xff]  }
 0x5b7   : > { %8993 = vmatpush1.bf16.msra.mxu0 %v12039_v16  ;;  %v12087_v16 = vld [vmem:[%s17069_s5 + $0x2f0] ss:$8 sps:$4 sm:$0xff]  }
 0x5b8   : > { %9005 = vmatprep.subr.bf16.mxu0 %v12044_v37  ;;  %v12092_v37 = vld [vmem:[%s17069_s5 + $0x304] ss:$8 sps:$4 sm:$0xff]  }
 0x5ba   : > { %8995 = vmatmul.mubr.bf16.vlgmr.msra.gmra.mrb[40].mxu0 %v7059_v13  ;;  %v12095_v13 = vld [vmem:[%s17069_s5 + $0x314] ss:$8 sps:$4 sm:$0xff]  }
 0x5bb   : > { %9006 = vmatpush1.bf16.msra.mxu0 %v12042_v50  ;;  %9037 = vmatprep.mubr.bf16.mxu0 %v7080_v59  ;;  %v12051_v59 = vld [vmem:[%s17069_s5 + $0x230] ss:$8 sps:$4 sm:$0xff]   ;;  %v12090_v50 = vld [vmem:[%s17069_s5 + $0x300] ss:$8 sps:$4 sm:$0xff]  }
 0x5bc   : > { %9007 = vmatprep.subr.bf16.mxu0 %v12047_v31  ;;  %v12093_v31 = vld [vmem:[%s17069_s5 + $0x310] ss:$8 sps:$4 sm:$0xff]  }
 0x5bf   : > { %9008 = vmatpush1.bf16.msra.mxu0 %v12045_v39  ;;  %v12098_v39 = vld [vmem:[%s17069_s5 + $0x324] ss:$8 sps:$4 sm:$0xff]  }
 0x5c0   : > { %9009 = vmatprep.subr.bf16.mxu0 %v12050_v11  ;;  %v12104_v11 = vld [vmem:[%s17069_s5 + $0x344] ss:$8 sps:$4 sm:$0xff]  }
 0x5c3   : > { %9010 = vmatpush1.bf16.msra.mxu0 %v12048_v51  ;;  %v12102_v51 = vld [vmem:[%s17069_s5 + $0x340] ss:$8 sps:$4 sm:$0xff]  }
 0x5c4   : > { %9011 = vmatprep.subr.bf16.mxu0 %v12053_v7  ;;  %v12107_v7 = vld [vmem:[%s17069_s5 + $0x354] ss:$8 sps:$4 sm:$0xff]  }
 0x5c7   : > { %9012 = vmatpush1.bf16.msra.mxu0 %v12051_v59  ;;  %v12105_v59 = vld [vmem:[%s17069_s5 + $0x350] ss:$8 sps:$4 sm:$0xff]  }
 0x5c8   : > { %9013 = vmatprep.subr.bf16.mxu0 %v12056_v12  ;;  %v12110_v12 = vld [vmem:[%s17069_s5 + $0x364] ss:$8 sps:$4 sm:$0xff]  }
 0x5cb   : > { %9014 = vmatpush1.bf16.msra.mxu0 %v12054_v33  ;;  %v12108_v33 = vld [vmem:[%s17069_s5 + $0x360] ss:$8 sps:$4 sm:$0xff]  }
 0x5cc   : > { %9015 = vmatprep.subr.bf16.mxu0 %v12059_v56  ;;  %v12113_v56 = vld [vmem:[%s17069_s5 + $0x374] ss:$8 sps:$4 sm:$0xff]  }
 0x5cf   : > { %9016 = vmatpush1.bf16.msra.mxu0 %v12057_v14  ;;  %v12111_v14 = vld [vmem:[%s17069_s5 + $0x370] ss:$8 sps:$4 sm:$0xff]  }
 0x5d0   : > { %9017 = vmatprep.subr.bf16.mxu0 %v12062_v28  ;;  %v12116_v28 = vld [vmem:[%s17069_s5 + $0x384] ss:$8 sps:$4 sm:$0xff]  }
 0x5d3   : > { %9018 = vmatpush1.bf16.msra.mxu0 %v12060_v21  ;;  %v12114_v21 = vld [vmem:[%s17069_s5 + $0x380] ss:$8 sps:$4 sm:$0xff]  }
 0x5d4   : > { %9019 = vmatprep.subr.bf16.mxu0 %v12065_v22  ;;  %v12119_v22 = vld [vmem:[%s17069_s5 + $0x394] ss:$8 sps:$4 sm:$0xff]  }
 0x5d7   : > { %9020 = vmatpush1.bf16.msra.mxu0 %v12063_v1  ;;  %v12117_v1 = vld [vmem:[%s17069_s5 + $0x390] ss:$8 sps:$4 sm:$0xff]  }
 0x5d8   : > { %9021 = vmatprep.subr.bf16.mxu0 %v12068_v46  ;;  %v12122_v46 = vld [vmem:[%s17069_s5 + $0x3a4] ss:$8 sps:$4 sm:$0xff]  }
 0x5db   : > { %9022 = vmatpush1.bf16.msra.mxu0 %v12066_v43  ;;  %v12120_v43 = vld [vmem:[%s17069_s5 + $0x3a0] ss:$8 sps:$4 sm:$0xff]  }
 0x5dc   : > { %9023 = vmatprep.subr.bf16.mxu0 %v12071_v2  ;;  %v12125_v2 = vld [vmem:[%s17069_s5 + $0x3b4] ss:$8 sps:$4 sm:$0xff]  }
 0x5df   : > { %9024 = vmatpush1.bf16.msra.mxu0 %v12069_v62  ;;  %v12123_v62 = vld [vmem:[%s17069_s5 + $0x3b0] ss:$8 sps:$4 sm:$0xff]  }
 0x5e0   : > { %9025 = vmatprep.subr.bf16.mxu0 %v12074_v41  ;;  %v12128_v41 = vld [vmem:[%s17069_s5 + $0x3c4] ss:$8 sps:$4 sm:$0xff]  }
 0x5e3   : > { %9026 = vmatpush1.bf16.msra.mxu0 %v12072_v48  ;;  %v12126_v48 = vld [vmem:[%s17069_s5 + $0x3c0] ss:$8 sps:$4 sm:$0xff]  }
 0x5e4   : > { %9027 = vmatprep.subr.bf16.mxu0 %v12077_v61  ;;  %v12131_v61 = vld [vmem:[%s17069_s5 + $0x3d4] ss:$8 sps:$4 sm:$0xff]  }
 0x5e7   : > { %9028 = vmatpush1.bf16.msra.mxu0 %v12075_v10  ;;  %v12129_v10 = vld [vmem:[%s17069_s5 + $0x3d0] ss:$8 sps:$4 sm:$0xff]  }
 0x5e8   : > { %9029 = vmatprep.subr.bf16.mxu0 %v12080_v0  ;;  %v12134_v0 = vld [vmem:[%s17069_s5 + $0x3e4] ss:$8 sps:$4 sm:$0xff]  }
 0x5eb   : > { %9030 = vmatpush1.bf16.msra.mxu0 %v12078_v60  ;;  %v12132_v60 = vld [vmem:[%s17069_s5 + $0x3e0] ss:$8 sps:$4 sm:$0xff]  }
 0x5ec   : > { %9031 = vmatprep.subr.bf16.mxu0 %v12083_v55  ;;  %v12137_v55 = vld [vmem:[%s17069_s5 + $0x3f4] ss:$8 sps:$4 sm:$0xff]  }
 0x5ef   : > { %9032 = vmatpush1.bf16.msra.mxu0 %v12081_v35  ;;  %v12135_v35 = vld [vmem:[%s17069_s5 + $0x3f0] ss:$8 sps:$4 sm:$0xff]  }
 0x5f0   : > { %9033 = vmatprep.subr.bf16.mxu0 %v12086_v52  ;;  %v12140_v52 = vld [vmem:[%s17069_s5 + $0x404] ss:$8 sps:$4 sm:$0xff]  }
 0x5f3   : > { %9034 = vmatpush1.bf16.msra.mxu0 %v12084_v26  ;;  %v12138_v26 = vld [vmem:[%s17069_s5 + $0x400] ss:$8 sps:$4 sm:$0xff]  }
 0x5f4   : > { %9035 = vmatprep.subr.bf16.mxu0 %v12089_v23  ;;  %v12143_v23 = vld [vmem:[%s17069_s5 + $0x414] ss:$8 sps:$4 sm:$0xff]  }
 0x5f7   : > { %9036 = vmatpush1.bf16.msra.mxu0 %v12087_v16  ;;  %v12141_v16 = vld [vmem:[%s17069_s5 + $0x410] ss:$8 sps:$4 sm:$0xff]  }
 0x5f8   : > { %9048 = vmatprep.subr.bf16.mxu0 %v12092_v37  ;;  %v12146_v37 = vld [vmem:[%s17069_s5 + $0x424] ss:$8 sps:$4 sm:$0xff]  }
 0x5fa   : > { %9038 = vmatmul.mubr.bf16.vlgmr.msra.gmra.mrb[40].mxu0 %v7079_v6  ;;  %v12101_v6 = vld [vmem:[%s17069_s5 + $0x334] ss:$8 sps:$4 sm:$0xff]  }
 0x5fb   : > { %9049 = vmatpush1.bf16.msra.mxu0 %v12090_v50  ;;  %9080 = vmatprep.mubr.bf16.mxu0 %v7100_v24  ;;  %v12099_v24 = vld [vmem:[%s17069_s5 + $0x330] ss:$8 sps:$4 sm:$0xff]   ;;  %v12150_v50 = vld [vmem:[%s17069_s5 + $0x440] ss:$8 sps:$4 sm:$0xff]  }
 0x5fc   : > { %9050 = vmatprep.subr.bf16.mxu0 %v12095_v13  ;;  %v12155_v13 = vld [vmem:[%s17069_s5 + $0x454] ss:$8 sps:$4 sm:$0xff]  }
 0x5ff   : > { %9051 = vmatpush1.bf16.msra.mxu0 %v12093_v31  ;;  %v12153_v31 = vld [vmem:[%s17069_s5 + $0x450] ss:$8 sps:$4 sm:$0xff]  }
 0x600   : > { %9052 = vmatprep.subr.bf16.mxu0 %v12098_v39  ;;  %v12158_v39 = vld [vmem:[%s17069_s5 + $0x464] ss:$8 sps:$4 sm:$0xff]  }
 0x603   : > { %9053 = vmatpush1.bf16.msra.mxu0 %v12096_v15  ;;  %v12156_v15 = vld [vmem:[%s17069_s5 + $0x460] ss:$8 sps:$4 sm:$0xff]  }
 0x604   : > { %9054 = vmatprep.subr.bf16.mxu0 %v12101_v6  ;;  %v12161_v6 = vld [vmem:[%s17069_s5 + $0x474] ss:$8 sps:$4 sm:$0xff]  }
 0x607   : > { %9055 = vmatpush1.bf16.msra.mxu0 %v12099_v24  ;;  %v12159_v24 = vld [vmem:[%s17069_s5 + $0x470] ss:$8 sps:$4 sm:$0xff]  }
 0x608   : > { %9056 = vmatprep.subr.bf16.mxu0 %v12104_v11  ;;  %v12164_v11 = vld [vmem:[%s17069_s5 + $0x484] ss:$8 sps:$4 sm:$0xff]  }
 0x60b   : > { %9057 = vmatpush1.bf16.msra.mxu0 %v12102_v51  ;;  %v12162_v51 = vld [vmem:[%s17069_s5 + $0x480] ss:$8 sps:$4 sm:$0xff]  }
 0x60c   : > { %9058 = vmatprep.subr.bf16.mxu0 %v12107_v7  ;;  %v12167_v7 = vld [vmem:[%s17069_s5 + $0x494] ss:$8 sps:$4 sm:$0xff]  }
 0x60f   : > { %9059 = vmatpush1.bf16.msra.mxu0 %v12105_v59  ;;  %v12165_v59 = vld [vmem:[%s17069_s5 + $0x490] ss:$8 sps:$4 sm:$0xff]  }
 0x610   : > { %9060 = vmatprep.subr.bf16.mxu0 %v12110_v12  ;;  %v12170_v12 = vld [vmem:[%s17069_s5 + $0x4a4] ss:$8 sps:$4 sm:$0xff]  }
 0x613   : > { %9061 = vmatpush1.bf16.msra.mxu0 %v12108_v33  ;;  %v12168_v33 = vld [vmem:[%s17069_s5 + $0x4a0] ss:$8 sps:$4 sm:$0xff]  }
 0x614   : > { %9062 = vmatprep.subr.bf16.mxu0 %v12113_v56  ;;  %v12173_v56 = vld [vmem:[%s17069_s5 + $0x4b4] ss:$8 sps:$4 sm:$0xff]  }
 0x617   : > { %9063 = vmatpush1.bf16.msra.mxu0 %v12111_v14  ;;  %v12171_v14 = vld [vmem:[%s17069_s5 + $0x4b0] ss:$8 sps:$4 sm:$0xff]  }
 0x618   : > { %9064 = vmatprep.subr.bf16.mxu0 %v12116_v28  ;;  %v12176_v28 = vld [vmem:[%s17069_s5 + $0x4c4] ss:$8 sps:$4 sm:$0xff]  }
 0x61b   : > { %9065 = vmatpush1.bf16.msra.mxu0 %v12114_v21  ;;  %v12174_v21 = vld [vmem:[%s17069_s5 + $0x4c0] ss:$8 sps:$4 sm:$0xff]  }
 0x61c   : > { %9066 = vmatprep.subr.bf16.mxu0 %v12119_v22  ;;  %v12179_v22 = vld [vmem:[%s17069_s5 + $0x4d4] ss:$8 sps:$4 sm:$0xff]  }
 0x61f   : > { %9067 = vmatpush1.bf16.msra.mxu0 %v12117_v1  ;;  %v12177_v1 = vld [vmem:[%s17069_s5 + $0x4d0] ss:$8 sps:$4 sm:$0xff]  }
 0x620   : > { %9068 = vmatprep.subr.bf16.mxu0 %v12122_v46  ;;  %v12182_v46 = vld [vmem:[%s17069_s5 + $0x4e4] ss:$8 sps:$4 sm:$0xff]  }
 0x623   : > { %9069 = vmatpush1.bf16.msra.mxu0 %v12120_v43  ;;  %v12180_v43 = vld [vmem:[%s17069_s5 + $0x4e0] ss:$8 sps:$4 sm:$0xff]  }
 0x624   : > { %9070 = vmatprep.subr.bf16.mxu0 %v12125_v2  ;;  %v12185_v2 = vld [vmem:[%s17069_s5 + $0x4f4] ss:$8 sps:$4 sm:$0xff]  }
 0x627   : > { %9071 = vmatpush1.bf16.msra.mxu0 %v12123_v62  ;;  %v12183_v62 = vld [vmem:[%s17069_s5 + $0x4f0] ss:$8 sps:$4 sm:$0xff]  }
 0x628   : > { %9072 = vmatprep.subr.bf16.mxu0 %v12128_v41  ;;  %v12188_v41 = vld [vmem:[%s17069_s5 + $0x504] ss:$8 sps:$4 sm:$0xff]  }
 0x62b   : > { %9073 = vmatpush1.bf16.msra.mxu0 %v12126_v48  ;;  %v12186_v48 = vld [vmem:[%s17069_s5 + $0x500] ss:$8 sps:$4 sm:$0xff]  }
 0x62c   : > { %9074 = vmatprep.subr.bf16.mxu0 %v12131_v61  ;;  %v12191_v61 = vld [vmem:[%s17069_s5 + $0x514] ss:$8 sps:$4 sm:$0xff]  }
 0x62f   : > { %9075 = vmatpush1.bf16.msra.mxu0 %v12129_v10  ;;  %v12189_v10 = vld [vmem:[%s17069_s5 + $0x510] ss:$8 sps:$4 sm:$0xff]  }
 0x630   : > { %9076 = vmatprep.subr.bf16.mxu0 %v12134_v0  ;;  %v12194_v0 = vld [vmem:[%s17069_s5 + $0x524] ss:$8 sps:$4 sm:$0xff]  }
 0x633   : > { %9077 = vmatpush1.bf16.msra.mxu0 %v12132_v60  ;;  %v12198_v60 = vld [vmem:[%s17069_s5 + $0x540] ss:$8 sps:$4 sm:$0xff]  }
 0x634   : > { %9078 = vmatprep.subr.bf16.mxu0 %v12137_v55  ;;  %v12203_v55 = vld [vmem:[%s17069_s5 + $0x554] ss:$8 sps:$4 sm:$0xff]  }
 0x637   : > { %9079 = vmatpush1.bf16.msra.mxu0 %v12135_v35  ;;  %v12201_v35 = vld [vmem:[%s17069_s5 + $0x550] ss:$8 sps:$4 sm:$0xff]  }
 0x638   : > { %9091 = vmatprep.subr.bf16.mxu0 %v12140_v52  ;;  %v12206_v52 = vld [vmem:[%s17069_s5 + $0x564] ss:$8 sps:$4 sm:$0xff]  }
 0x63a   : > { %9081 = vmatmul.mubr.bf16.vlgmr.msra.gmra.mrb[40].mxu0 %v7099_v49  ;;  %v12147_v49 = vld [vmem:[%s17069_s5 + $0x430] ss:$8 sps:$4 sm:$0xff]  }
 0x63b   : > { %9092 = vmatpush1.bf16.msra.mxu0 %v12138_v26  ;;  %9123 = vmatprep.mubr.bf16.mxu0 %v7120_v36  ;;  %v12152_v36 = vld [vmem:[%s17069_s5 + $0x444] ss:$8 sps:$4 sm:$0xff]   ;;  %v12204_v26 = vld [vmem:[%s17069_s5 + $0x560] ss:$8 sps:$4 sm:$0xff]  }
 0x63c   : > { %9093 = vmatprep.subr.bf16.mxu0 %v12143_v23  ;;  %v12209_v23 = vld [vmem:[%s17069_s5 + $0x574] ss:$8 sps:$4 sm:$0xff]  }
 0x63f   : > { %9094 = vmatpush1.bf16.msra.mxu0 %v12141_v16  ;;  %v12207_v16 = vld [vmem:[%s17069_s5 + $0x570] ss:$8 sps:$4 sm:$0xff]  }
 0x640   : > { %9095 = vmatprep.subr.bf16.mxu0 %v12146_v37  ;;  %v12212_v37 = vld [vmem:[%s17069_s5 + $0x584] ss:$8 sps:$4 sm:$0xff]  }
 0x643   : > { %9096 = vmatpush1.bf16.msra.mxu0 %v12144_v8  ;;  %v12210_v8 = vld [vmem:[%s17069_s5 + $0x580] ss:$8 sps:$4 sm:$0xff]  }
 0x644   : > { %9097 = vmatprep.subr.bf16.mxu0 %v12149_v5  ;;  %v12215_v5 = vld [vmem:[%s17069_s5 + $0x594] ss:$8 sps:$4 sm:$0xff]  }
 0x647   : > { %9098 = vmatpush1.bf16.msra.mxu0 %v12147_v49  ;;  %v12213_v49 = vld [vmem:[%s17069_s5 + $0x590] ss:$8 sps:$4 sm:$0xff]  }
 0x648   : > { %9099 = vmatprep.subr.bf16.mxu0 %v12152_v36  ;;  %v12218_v36 = vld [vmem:[%s17069_s5 + $0x5a4] ss:$8 sps:$4 sm:$0xff]  }
 0x64b   : > { %9100 = vmatpush1.bf16.msra.mxu0 %v12150_v50  ;;  %v12216_v50 = vld [vmem:[%s17069_s5 + $0x5a0] ss:$8 sps:$4 sm:$0xff]  }
 0x64c   : > { %9101 = vmatprep.subr.bf16.mxu0 %v12155_v13  ;;  %v12221_v13 = vld [vmem:[%s17069_s5 + $0x5b4] ss:$8 sps:$4 sm:$0xff]  }
 0x64f   : > { %9102 = vmatpush1.bf16.msra.mxu0 %v12153_v31  ;;  %v12219_v31 = vld [vmem:[%s17069_s5 + $0x5b0] ss:$8 sps:$4 sm:$0xff]  }
 0x650   : > { %9103 = vmatprep.subr.bf16.mxu0 %v12158_v39  ;;  %v12224_v39 = vld [vmem:[%s17069_s5 + $0x5c4] ss:$8 sps:$4 sm:$0xff]  }
 0x653   : > { %9104 = vmatpush1.bf16.msra.mxu0 %v12156_v15  ;;  %v12222_v15 = vld [vmem:[%s17069_s5 + $0x5c0] ss:$8 sps:$4 sm:$0xff]  }
 0x654   : > { %9105 = vmatprep.subr.bf16.mxu0 %v12161_v6  ;;  %v12227_v6 = vld [vmem:[%s17069_s5 + $0x5d4] ss:$8 sps:$4 sm:$0xff]  }
 0x657   : > { %9106 = vmatpush1.bf16.msra.mxu0 %v12159_v24  ;;  %v12225_v24 = vld [vmem:[%s17069_s5 + $0x5d0] ss:$8 sps:$4 sm:$0xff]  }
 0x658   : > { %9107 = vmatprep.subr.bf16.mxu0 %v12164_v11  ;;  %v12230_v11 = vld [vmem:[%s17069_s5 + $0x5e4] ss:$8 sps:$4 sm:$0xff]  }
 0x65b   : > { %9108 = vmatpush1.bf16.msra.mxu0 %v12162_v51  ;;  %v12228_v51 = vld [vmem:[%s17069_s5 + $0x5e0] ss:$8 sps:$4 sm:$0xff]  }
 0x65c   : > { %9109 = vmatprep.subr.bf16.mxu0 %v12167_v7  ;;  %v12233_v7 = vld [vmem:[%s17069_s5 + $0x5f4] ss:$8 sps:$4 sm:$0xff]  }
 0x65f   : > { %9110 = vmatpush1.bf16.msra.mxu0 %v12165_v59  ;;  %v12231_v59 = vld [vmem:[%s17069_s5 + $0x5f0] ss:$8 sps:$4 sm:$0xff]  }
 0x660   : > { %9111 = vmatprep.subr.bf16.mxu0 %v12170_v12  ;;  %v12236_v12 = vld [vmem:[%s17069_s5 + $0x604] ss:$8 sps:$4 sm:$0xff]  }
 0x663   : > { %9112 = vmatpush1.bf16.msra.mxu0 %v12168_v33  ;;  %v12234_v33 = vld [vmem:[%s17069_s5 + $0x600] ss:$8 sps:$4 sm:$0xff]  }
 0x664   : > { %9113 = vmatprep.subr.bf16.mxu0 %v12173_v56  ;;  %v12239_v56 = vld [vmem:[%s17069_s5 + $0x614] ss:$8 sps:$4 sm:$0xff]  }
 0x667   : > { %9114 = vmatpush1.bf16.msra.mxu0 %v12171_v14  ;;  %v12237_v14 = vld [vmem:[%s17069_s5 + $0x610] ss:$8 sps:$4 sm:$0xff]  }
 0x668   : > { %9115 = vmatprep.subr.bf16.mxu0 %v12176_v28  ;;  %v12242_v28 = vld [vmem:[%s17069_s5 + $0x624] ss:$8 sps:$4 sm:$0xff]  }
 0x66b   : > { %9116 = vmatpush1.bf16.msra.mxu0 %v12174_v21  ;;  %v12246_v21 = vld [vmem:[%s17069_s5 + $0x640] ss:$8 sps:$4 sm:$0xff]  }
 0x66c   : > { %9117 = vmatprep.subr.bf16.mxu0 %v12179_v22  ;;  %v12251_v22 = vld [vmem:[%s17069_s5 + $0x654] ss:$8 sps:$4 sm:$0xff]  }
 0x66f   : > { %9118 = vmatpush1.bf16.msra.mxu0 %v12177_v1  ;;  %v12249_v1 = vld [vmem:[%s17069_s5 + $0x650] ss:$8 sps:$4 sm:$0xff]  }
 0x670   : > { %9119 = vmatprep.subr.bf16.mxu0 %v12182_v46  ;;  %v12254_v46 = vld [vmem:[%s17069_s5 + $0x664] ss:$8 sps:$4 sm:$0xff]  }
 0x673   : > { %9120 = vmatpush1.bf16.msra.mxu0 %v12180_v43  ;;  %v12252_v43 = vld [vmem:[%s17069_s5 + $0x660] ss:$8 sps:$4 sm:$0xff]  }
 0x674   : > { %9121 = vmatprep.subr.bf16.mxu0 %v12185_v2  ;;  %v12257_v2 = vld [vmem:[%s17069_s5 + $0x674] ss:$8 sps:$4 sm:$0xff]  }
 0x677   : > { %9122 = vmatpush1.bf16.msra.mxu0 %v12183_v62  ;;  %v12255_v62 = vld [vmem:[%s17069_s5 + $0x670] ss:$8 sps:$4 sm:$0xff]  }
 0x678   : > { %9134 = vmatprep.subr.bf16.mxu0 %v12188_v41  ;;  %v12260_v41 = vld [vmem:[%s17069_s5 + $0x684] ss:$8 sps:$4 sm:$0xff]  }
 0x67a   : > { %9124 = vmatmul.mubr.bf16.vlgmr.msra.gmra.mrb[40].mxu0 %v7119_v17  ;;  %v12200_v17 = vld [vmem:[%s17069_s5 + $0x544] ss:$8 sps:$4 sm:$0xff]  }
 0x67b   : > { %9135 = vmatpush1.bf16.msra.mxu0 %v12186_v48  ;;  %9166 = vmatprep.mubr.bf16.mxu0 %v7140_v30  ;;  %v12195_v30 = vld [vmem:[%s17069_s5 + $0x530] ss:$8 sps:$4 sm:$0xff]   ;;  %v12258_v48 = vld [vmem:[%s17069_s5 + $0x680] ss:$8 sps:$4 sm:$0xff]  }
 0x67c   : > { %9136 = vmatprep.subr.bf16.mxu0 %v12191_v61  ;;  %v12263_v61 = vld [vmem:[%s17069_s5 + $0x694] ss:$8 sps:$4 sm:$0xff]  }
 0x67f   : > { %9137 = vmatpush1.bf16.msra.mxu0 %v12189_v10  ;;  %v12261_v10 = vld [vmem:[%s17069_s5 + $0x690] ss:$8 sps:$4 sm:$0xff]  }
 0x680   : > { %9138 = vmatprep.subr.bf16.mxu0 %v12194_v0  ;;  %v12266_v0 = vld [vmem:[%s17069_s5 + $0x6a4] ss:$8 sps:$4 sm:$0xff]  }
 0x683   : > { %9139 = vmatpush1.bf16.msra.mxu0 %v12192_v19  ;;  %v12264_v19 = vld [vmem:[%s17069_s5 + $0x6a0] ss:$8 sps:$4 sm:$0xff]  }
 0x684   : > { %9140 = vmatprep.subr.bf16.mxu0 %v12197_v63  ;;  %v12269_v63 = vld [vmem:[%s17069_s5 + $0x6b4] ss:$8 sps:$4 sm:$0xff]  }
 0x687   : > { %9141 = vmatpush1.bf16.msra.mxu0 %v12195_v30  ;;  %v12267_v30 = vld [vmem:[%s17069_s5 + $0x6b0] ss:$8 sps:$4 sm:$0xff]  }
 0x688   : > { %9142 = vmatprep.subr.bf16.mxu0 %v12200_v17  ;;  %v12272_v17 = vld [vmem:[%s17069_s5 + $0x6c4] ss:$8 sps:$4 sm:$0xff]  }
 0x68b   : > { %9143 = vmatpush1.bf16.msra.mxu0 %v12198_v60  ;;  %v12270_v60 = vld [vmem:[%s17069_s5 + $0x6c0] ss:$8 sps:$4 sm:$0xff]  }
 0x68c   : > { %9144 = vmatprep.subr.bf16.mxu0 %v12203_v55  ;;  %v12275_v55 = vld [vmem:[%s17069_s5 + $0x6d4] ss:$8 sps:$4 sm:$0xff]  }
 0x68f   : > { %9145 = vmatpush1.bf16.msra.mxu0 %v12201_v35  ;;  %v12273_v35 = vld [vmem:[%s17069_s5 + $0x6d0] ss:$8 sps:$4 sm:$0xff]  }
 0x690   : > { %9146 = vmatprep.subr.bf16.mxu0 %v12206_v52  ;;  %v12278_v52 = vld [vmem:[%s17069_s5 + $0x6e4] ss:$8 sps:$4 sm:$0xff]  }
 0x693   : > { %9147 = vmatpush1.bf16.msra.mxu0 %v12204_v26  ;;  %v12276_v26 = vld [vmem:[%s17069_s5 + $0x6e0] ss:$8 sps:$4 sm:$0xff]  }
 0x694   : > { %9148 = vmatprep.subr.bf16.mxu0 %v12209_v23  ;;  %v12281_v23 = vld [vmem:[%s17069_s5 + $0x6f4] ss:$8 sps:$4 sm:$0xff]  }
 0x697   : > { %9149 = vmatpush1.bf16.msra.mxu0 %v12207_v16  ;;  %v12279_v16 = vld [vmem:[%s17069_s5 + $0x6f0] ss:$8 sps:$4 sm:$0xff]  }
 0x698   : > { %9150 = vmatprep.subr.bf16.mxu0 %v12212_v37  ;;  %v12284_v37 = vld [vmem:[%s17069_s5 + $0x704] ss:$8 sps:$4 sm:$0xff]  }
 0x69b   : > { %9151 = vmatpush1.bf16.msra.mxu0 %v12210_v8  ;;  %v12282_v8 = vld [vmem:[%s17069_s5 + $0x700] ss:$8 sps:$4 sm:$0xff]  }
 0x69c   : > { %9152 = vmatprep.subr.bf16.mxu0 %v12215_v5  ;;  %v12287_v5 = vld [vmem:[%s17069_s5 + $0x714] ss:$8 sps:$4 sm:$0xff]  }
 0x69f   : > { %9153 = vmatpush1.bf16.msra.mxu0 %v12213_v49  ;;  %v12285_v49 = vld [vmem:[%s17069_s5 + $0x710] ss:$8 sps:$4 sm:$0xff]  }
 0x6a0   : > { %9154 = vmatprep.subr.bf16.mxu0 %v12218_v36  ;;  %v12290_v36 = vld [vmem:[%s17069_s5 + $0x724] ss:$8 sps:$4 sm:$0xff]  }
 0x6a3   : > { %9155 = vmatpush1.bf16.msra.mxu0 %v12216_v50  ;;  %v12294_v50 = vld [vmem:[%s17069_s5 + $0x740] ss:$8 sps:$4 sm:$0xff]  }
 0x6a4   : > { %9156 = vmatprep.subr.bf16.mxu0 %v12221_v13  ;;  %v12299_v13 = vld [vmem:[%s17069_s5 + $0x754] ss:$8 sps:$4 sm:$0xff]  }
 0x6a7   : > { %9157 = vmatpush1.bf16.msra.mxu0 %v12219_v31  ;;  %v12297_v31 = vld [vmem:[%s17069_s5 + $0x750] ss:$8 sps:$4 sm:$0xff]  }
 0x6a8   : > { %9158 = vmatprep.subr.bf16.mxu0 %v12224_v39  ;;  %v12302_v39 = vld [vmem:[%s17069_s5 + $0x764] ss:$8 sps:$4 sm:$0xff]  }
 0x6ab   : > { %9159 = vmatpush1.bf16.msra.mxu0 %v12222_v15  ;;  %v12300_v15 = vld [vmem:[%s17069_s5 + $0x760] ss:$8 sps:$4 sm:$0xff]  }
 0x6ac   : > { %9160 = vmatprep.subr.bf16.mxu0 %v12227_v6  ;;  %v12305_v6 = vld [vmem:[%s17069_s5 + $0x774] ss:$8 sps:$4 sm:$0xff]  }
 0x6af   : > { %9161 = vmatpush1.bf16.msra.mxu0 %v12225_v24  ;;  %v12303_v24 = vld [vmem:[%s17069_s5 + $0x770] ss:$8 sps:$4 sm:$0xff]  }
 0x6b0   : > { %9162 = vmatprep.subr.bf16.mxu0 %v12230_v11  ;;  %v12308_v11 = vld [vmem:[%s17069_s5 + $0x784] ss:$8 sps:$4 sm:$0xff]  }
 0x6b3   : > { %9163 = vmatpush1.bf16.msra.mxu0 %v12228_v51  ;;  %v12306_v51 = vld [vmem:[%s17069_s5 + $0x780] ss:$8 sps:$4 sm:$0xff]  }
 0x6b4   : > { %9164 = vmatprep.subr.bf16.mxu0 %v12233_v7  ;;  %v12311_v7 = vld [vmem:[%s17069_s5 + $0x794] ss:$8 sps:$4 sm:$0xff]  }
 0x6b7   : > { %9165 = vmatpush1.bf16.msra.mxu0 %v12231_v59  ;;  %v12309_v59 = vld [vmem:[%s17069_s5 + $0x790] ss:$8 sps:$4 sm:$0xff]  }
 0x6b8   : > { %9177 = vmatprep.subr.bf16.mxu0 %v12236_v12  ;;  %v12314_v12 = vld [vmem:[%s17069_s5 + $0x7a4] ss:$8 sps:$4 sm:$0xff]  }
 0x6ba   : > { %9167 = vmatmul.mubr.bf16.vlgmr.msra.gmra.mrb[40].mxu0 %v7139_v45  ;;  %v12243_v45 = vld [vmem:[%s17069_s5 + $0x630] ss:$8 sps:$4 sm:$0xff]  }
 0x6bb   : > { %9178 = vmatpush1.bf16.msra.mxu0 %v12234_v33  ;;  %9209 = vmatprep.mubr.bf16.mxu0 %v7152_v47  ;;  %v12248_v47 = vld [vmem:[%s17069_s5 + $0x644] ss:$8 sps:$4 sm:$0xff]   ;;  %v12312_v33 = vld [vmem:[%s17069_s5 + $0x7a0] ss:$8 sps:$4 sm:$0xff]  }
 0x6bc   : > { %9179 = vmatprep.subr.bf16.mxu0 %v12239_v56  ;;  %v12317_v56 = vld [vmem:[%s17069_s5 + $0x7b4] ss:$8 sps:$4 sm:$0xff]  }
 0x6bf   : > { %9180 = vmatpush1.bf16.msra.mxu0 %v12237_v14  ;;  %v12315_v14 = vld [vmem:[%s17069_s5 + $0x7b0] ss:$8 sps:$4 sm:$0xff]  }
 0x6c0   : > { %9181 = vmatprep.subr.bf16.mxu0 %v12242_v28  ;;  %v12320_v28 = vld [vmem:[%s17069_s5 + $0x7c4] ss:$8 sps:$4 sm:$0xff]  }
 0x6c3   : > { %9182 = vmatpush1.bf16.msra.mxu0 %v12240_v29  ;;  %v12318_v29 = vld [vmem:[%s17069_s5 + $0x7c0] ss:$8 sps:$4 sm:$0xff]  }
 0x6c4   : > { %9183 = vmatprep.subr.bf16.mxu0 %v12245_v9  ;;  %v12323_v9 = vld [vmem:[%s17069_s5 + $0x7d4] ss:$8 sps:$4 sm:$0xff]  }
 0x6c7   : > { %9184 = vmatpush1.bf16.msra.mxu0 %v12243_v45  ;;  %v12321_v45 = vld [vmem:[%s17069_s5 + $0x7d0] ss:$8 sps:$4 sm:$0xff]  }
 0x6c8   : > { %9185 = vmatprep.subr.bf16.mxu0 %v12248_v47  ;;  %v12326_v47 = vld [vmem:[%s17069_s5 + $0x7e4] ss:$8 sps:$4 sm:$0xff]  }
 0x6cb   : > { %9186 = vmatpush1.bf16.msra.mxu0 %v12246_v21  ;;  %v12324_v21 = vld [vmem:[%s17069_s5 + $0x7e0] ss:$8 sps:$4 sm:$0xff]  }
 0x6cc   : > { %9187 = vmatprep.subr.bf16.mxu0 %v12251_v22  ;;  %v12329_v22 = vld [vmem:[%s17069_s5 + $0x7f4] ss:$8 sps:$4 sm:$0xff]  }
 0x6cf   : > { %9188 = vmatpush1.bf16.msra.mxu0 %v12249_v1  ;;  %v12327_v1 = vld [vmem:[%s17069_s5 + $0x7f0] ss:$8 sps:$4 sm:$0xff]  }
 0x6d0   : > { %9189 = vmatprep.subr.bf16.mxu0 %v12254_v46  ;;  %v12332_v46 = vld [vmem:[%s17069_s5 + $0x804] ss:$8 sps:$4 sm:$0xff]  }
 0x6d3   : > { %9190 = vmatpush1.bf16.msra.mxu0 %v12252_v43  ;;  %v12330_v43 = vld [vmem:[%s17069_s5 + $0x800] ss:$8 sps:$4 sm:$0xff]  }
 0x6d4   : > { %9191 = vmatprep.subr.bf16.mxu0 %v12257_v2  ;;  %v12335_v2 = vld [vmem:[%s17069_s5 + $0x814] ss:$8 sps:$4 sm:$0xff]  }
 0x6d7   : > { %9192 = vmatpush1.bf16.msra.mxu0 %v12255_v62  ;;  %v12333_v62 = vld [vmem:[%s17069_s5 + $0x810] ss:$8 sps:$4 sm:$0xff]  }
 0x6d8   : > { %9193 = vmatprep.subr.bf16.mxu0 %v12260_v41  ;;  %v12338_v41 = vld [vmem:[%s17069_s5 + $0x824] ss:$8 sps:$4 sm:$0xff]  }
 0x6db   : > { %9194 = vmatpush1.bf16.msra.mxu0 %v12258_v48  ;;  %v12342_v48 = vld [vmem:[%s17069_s5 + $0x840] ss:$8 sps:$4 sm:$0xff]  }
 0x6dc   : > { %9195 = vmatprep.subr.bf16.mxu0 %v12263_v61  ;;  %v12347_v61 = vld [vmem:[%s17069_s5 + $0x854] ss:$8 sps:$4 sm:$0xff]  }
 0x6df   : > { %9196 = vmatpush1.bf16.msra.mxu0 %v12261_v10  ;;  %v12345_v10 = vld [vmem:[%s17069_s5 + $0x850] ss:$8 sps:$4 sm:$0xff]  }
 0x6e0   : > { %9197 = vmatprep.subr.bf16.mxu0 %v12266_v0  ;;  %v12350_v0 = vld [vmem:[%s17069_s5 + $0x864] ss:$8 sps:$4 sm:$0xff]  }
 0x6e3   : > { %9198 = vmatpush1.bf16.msra.mxu0 %v12264_v19  ;;  %v12348_v19 = vld [vmem:[%s17069_s5 + $0x860] ss:$8 sps:$4 sm:$0xff]  }
 0x6e4   : > { %9199 = vmatprep.subr.bf16.mxu0 %v12269_v63  ;;  %v12353_v63 = vld [vmem:[%s17069_s5 + $0x874] ss:$8 sps:$4 sm:$0xff]  }
 0x6e7   : > { %9200 = vmatpush1.bf16.msra.mxu0 %v12267_v30  ;;  %v12351_v30 = vld [vmem:[%s17069_s5 + $0x870] ss:$8 sps:$4 sm:$0xff]  }
 0x6e8   : > { %9201 = vmatprep.subr.bf16.mxu0 %v12272_v17  ;;  %v12356_v17 = vld [vmem:[%s17069_s5 + $0x884] ss:$8 sps:$4 sm:$0xff]  }
 0x6eb   : > { %9202 = vmatpush1.bf16.msra.mxu0 %v12270_v60  ;;  %v12354_v60 = vld [vmem:[%s17069_s5 + $0x880] ss:$8 sps:$4 sm:$0xff]  }
 0x6ec   : > { %9203 = vmatprep.subr.bf16.mxu0 %v12275_v55  ;;  %v12359_v55 = vld [vmem:[%s17069_s5 + $0x894] ss:$8 sps:$4 sm:$0xff]  }
 0x6ef   : > { %9204 = vmatpush1.bf16.msra.mxu0 %v12273_v35  ;;  %v12357_v35 = vld [vmem:[%s17069_s5 + $0x890] ss:$8 sps:$4 sm:$0xff]  }
 0x6f0   : > { %9205 = vmatprep.subr.bf16.mxu0 %v12278_v52  ;;  %v12362_v52 = vld [vmem:[%s17069_s5 + $0x8a4] ss:$8 sps:$4 sm:$0xff]  }
 0x6f3   : > { %9206 = vmatpush1.bf16.msra.mxu0 %v12276_v26  ;;  %v12360_v26 = vld [vmem:[%s17069_s5 + $0x8a0] ss:$8 sps:$4 sm:$0xff]  }
 0x6f4   : > { %9207 = vmatprep.subr.bf16.mxu0 %v12281_v23  ;;  %v12365_v23 = vld [vmem:[%s17069_s5 + $0x8b4] ss:$8 sps:$4 sm:$0xff]  }
 0x6f7   : > { %9208 = vmatpush1.bf16.msra.mxu0 %v12279_v16  ;;  %v12363_v16 = vld [vmem:[%s17069_s5 + $0x8b0] ss:$8 sps:$4 sm:$0xff]  }
 0x6f8   : > { %9220 = vmatprep.subr.bf16.mxu0 %v12284_v37  ;;  %v12368_v37 = vld [vmem:[%s17069_s5 + $0x8c4] ss:$8 sps:$4 sm:$0xff]  }
 0x6fa   : > { %9210 = vmatmul.mubr.bf16.vlgmr.msra.gmra.mrb[40].mxu0 %v7151_v4  ;;  %v12291_v4 = vld [vmem:[%s17069_s5 + $0x730] ss:$8 sps:$4 sm:$0xff]  }
 0x6fb   : > { %9221 = vmatpush1.bf16.msra.mxu0 %v12282_v8  ;;  %9252 = vmatprep.mubr.bf16.mxu0 %v7164_v3  ;;  %v12296_v3 = vld [vmem:[%s17069_s5 + $0x744] ss:$8 sps:$4 sm:$0xff]   ;;  %v12366_v8 = vld [vmem:[%s17069_s5 + $0x8c0] ss:$8 sps:$4 sm:$0xff]  }
 0x6fc   : > { %9222 = vmatprep.subr.bf16.mxu0 %v12287_v5  ;;  %v12371_v5 = vld [vmem:[%s17069_s5 + $0x8d4] ss:$8 sps:$4 sm:$0xff]  }
 0x6ff   : > { %9223 = vmatpush1.bf16.msra.mxu0 %v12285_v49  ;;  %v12369_v49 = vld [vmem:[%s17069_s5 + $0x8d0] ss:$8 sps:$4 sm:$0xff]  }
 0x700   : > { %9224 = vmatprep.subr.bf16.mxu0 %v12290_v36  ;;  %v12374_v36 = vld [vmem:[%s17069_s5 + $0x8e4] ss:$8 sps:$4 sm:$0xff]  }
 0x703   : > { %9225 = vmatpush1.bf16.msra.mxu0 %v12288_v54  ;;  %v12372_v54 = vld [vmem:[%s17069_s5 + $0x8e0] ss:$8 sps:$4 sm:$0xff]  }
 0x704   : > { %9226 = vmatprep.subr.bf16.mxu0 %v12293_v20  ;;  %v12377_v20 = vld [vmem:[%s17069_s5 + $0x8f4] ss:$8 sps:$4 sm:$0xff]  }
 0x707   : > { %9227 = vmatpush1.bf16.msra.mxu0 %v12291_v4  ;;  %v12375_v4 = vld [vmem:[%s17069_s5 + $0x8f0] ss:$8 sps:$4 sm:$0xff]  }
 0x708   : > { %9228 = vmatprep.subr.bf16.mxu0 %v12296_v3  ;;  %v12378_v3 = vld [vmem:[%s17071_s7 + $0x40] sm:$0xff]  }
 0x709   : > { %11402 = vmatprep.subr.bf16.mxu1 %v12378_v3 }
 0x70b   : > { %9229 = vmatpush1.bf16.msra.mxu0 %v12294_v50  ;;  %v12379_v50 = vld [vmem:[%s17071_s7] sm:$0xff]  }
 0x70c   : > { %9230 = vmatprep.subr.bf16.mxu0 %v12299_v13  ;;  %11403 = vmatpush3.bf16.msra.mxu1 %v12379_v50  ;;  %v12380_v13 = vld [vmem:[%s17071_s7 + $0x48] sm:$0xff]  }
 0x70d   : > { %11404 = vmatprep.subr.bf16.mxu1 %v12380_v13 }
 0x70f   : > { %9231 = vmatpush1.bf16.msra.mxu0 %v12297_v31  ;;  %v12381_v31 = vld [vmem:[%s17071_s7 + $0x8] sm:$0xff]  }
 0x710   : > { %9232 = vmatprep.subr.bf16.mxu0 %v12302_v39  ;;  %11405 = vmatpush3.bf16.msra.mxu1 %v12381_v31  ;;  %v12385_v39 = vld [vmem:[%s17071_s7 + $0x18] sm:$0xff]  }
 0x711   : > { %11406 = vmatprep.subr.bf16.mxu1 %v12382_v53 }
 0x713   : > { %9233 = vmatpush1.bf16.msra.mxu0 %v12300_v15  ;;  %v12386_v15 = vld [vmem:[%s17071_s7 + $0x60] sm:$0xff]  }
 0x714   : > { %9234 = vmatprep.subr.bf16.mxu0 %v12305_v6  ;;  %11407 = vmatpush3.bf16.msra.mxu1 %v12383_v25  ;;  %v12387_v6 = vld [vmem:[%s17071_s7 + $0x20] sm:$0xff]  }
 0x717   : > { %9235 = vmatpush1.bf16.msra.mxu0 %v12303_v24  ;;  %v12388_v24 = vld [vmem:[%s17071_s7 + $0x68] sm:$0xff]  }
 0x718   : > { %9236 = vmatprep.subr.bf16.mxu0 %v12308_v11  ;;  %v12389_v11 = vld [vmem:[%s17071_s7 + $0x28] sm:$0xff]  }
 0x71b   : > { %9237 = vmatpush1.bf16.msra.mxu0 %v12306_v51  ;;  %v12390_v51 = vld [vmem:[%s17071_s7 + $0x70] sm:$0xff]  }
 0x71c   : > { %9238 = vmatprep.subr.bf16.mxu0 %v12311_v7  ;;  %v12391_v7 = vld [vmem:[%s17071_s7 + $0x30] sm:$0xff]  }
 0x71f   : > { %9239 = vmatpush1.bf16.msra.mxu0 %v12309_v59  ;;  %v12392_v59 = vld [vmem:[%s17071_s7 + $0x78] sm:$0xff]  }
 0x720   : > { %9240 = vmatprep.subr.bf16.mxu0 %v12314_v12  ;;  %v12393_v12 = vld [vmem:[%s17071_s7 + $0x38] sm:$0xff]  }
 0x723   : > { %9241 = vmatpush1.bf16.msra.mxu0 %v12312_v33  ;;  %v12394_v33 = vld [vmem:[%s17071_s7 + $0xc0] sm:$0xff]  }
 0x724   : > { %9242 = vmatprep.subr.bf16.mxu0 %v12317_v56  ;;  %v7467_v56 = vld [vmem:[%s17070_s6] sm:$0x3] }
 0x727   : > { %9243 = vmatpush1.bf16.msra.mxu0 %v12315_v14  ;;  %v7472_v14 = vrot.slane %v7467_v56, %v4625_v40 }
 0x728   : > { %9244 = vmatprep.subr.bf16.mxu0 %v12320_v28  ;;  %v7476_v28 = vrot.slane %v7467_v56, %v4629_v57 }
 0x72b   : > { %9245 = vmatpush1.bf16.msra.mxu0 %v12318_v29 }
 0x72c   : > { %9246 = vmatprep.subr.bf16.mxu0 %v12323_v9 }
 0x72f   : > { %9247 = vmatpush1.bf16.msra.mxu0 %v12321_v45 }
 0x730   : > { %9248 = vmatprep.subr.bf16.mxu0 %v12326_v47 }
 0x733   : > { %9249 = vmatpush1.bf16.msra.mxu0 %v12324_v21 }
 0x734   : > { %9250 = vmatprep.subr.bf16.mxu0 %v12329_v22 }
 0x737   : > { %9251 = vmatpush1.bf16.msra.mxu0 %v12327_v1  ;;  %v12463_v1 = vmov 1966171168  }
 0x738   : > { %9263 = vmatprep.subr.bf16.mxu0 %v12332_v46  ;;  %v9556_v46 = vunpack.c.l.s4 %v12463_v1 }
 0x73a   : > { %9253 = vmatmul.mubr.bf16.vlgmr.msra.gmra.mrb[40].mxu0 %v7163_v32  ;;  %v12344_v32 = vld [vmem:[%s17069_s5 + $0x844] ss:$8 sps:$4 sm:$0xff]   ;;  %v9557_v40 = vunpack.c.0.s8 %v9556_v46 }
 0x73b   : > { %9264 = vmatpush1.bf16.msra.mxu0 %v12330_v43  ;;  %9295 = vmatprep.mubr.bf16.mxu0 %v7176_v58  ;;  %v12339_v58 = vld [vmem:[%s17069_s5 + $0x830] ss:$8 sps:$4 sm:$0xff]  }
 0x73c   : > { %9265 = vmatprep.subr.bf16.mxu0 %v12335_v2 }
 0x73f   : > { %9266 = vmatpush1.bf16.msra.mxu0 %v12333_v62 }
 0x740   : > { %9267 = vmatprep.subr.bf16.mxu0 %v12338_v41 }
 0x743   : > { %9268 = vmatpush1.bf16.msra.mxu0 %v12336_v27 }
 0x744   : > { %9269 = vmatprep.subr.bf16.mxu0 %v12341_v42 }
 0x747   : > { %9270 = vmatpush1.bf16.msra.mxu0 %v12339_v58 }
 0x748   : > { %9271 = vmatprep.subr.bf16.mxu0 %v12344_v32 }
 0x74b   : > { %9272 = vmatpush1.bf16.msra.mxu0 %v12342_v48 }
 0x74c   : > { %9273 = vmatprep.subr.bf16.mxu0 %v12347_v61 }
 0x74f   : > { %9274 = vmatpush1.bf16.msra.mxu0 %v12345_v10 }
 0x750   : > { %9275 = vmatprep.subr.bf16.mxu0 %v12350_v0 }
 0x753   : > { %9276 = vmatpush1.bf16.msra.mxu0 %v12348_v19 }
 0x754   : > { %9277 = vmatprep.subr.bf16.mxu0 %v12353_v63 }
 0x757   : > { %9278 = vmatpush1.bf16.msra.mxu0 %v12351_v30 }
 0x758   : > { %9279 = vmatprep.subr.bf16.mxu0 %v12356_v17  ;;  %v16855_v17 = vsub.s32 %v9557_v40, %v17290_v18 }
 0x75b   : > { %9280 = vmatpush1.bf16.msra.mxu0 %v12354_v60 }
 0x75c   : > { %9281 = vmatprep.subr.bf16.mxu0 %v12359_v55 }
 0x75f   : > { %9282 = vmatpush1.bf16.msra.mxu0 %v12357_v35 }
 0x760   : > { %9283 = vmatprep.subr.bf16.mxu0 %v12362_v52 }
 0x763   : > { %9284 = vmatpush1.bf16.msra.mxu0 %v12360_v26 }
 0x764   : > { %9285 = vmatprep.subr.bf16.mxu0 %v12365_v23 }
 0x767   : > { %9286 = vmatpush1.bf16.msra.mxu0 %v12363_v16 }
 0x768   : > { %9287 = vmatprep.subr.bf16.mxu0 %v12368_v37 }
 0x76b   : > { %9288 = vmatpush1.bf16.msra.mxu0 %v12366_v8 }
 0x76c   : > { %9289 = vmatprep.subr.bf16.mxu0 %v12371_v5 }
 0x76f   : > { %9290 = vmatpush1.bf16.msra.mxu0 %v12369_v49 }
 0x770   : > { %9291 = vmatprep.subr.bf16.mxu0 %v12374_v36 }
 0x773   : > { %9292 = vmatpush1.bf16.msra.mxu0 %v12372_v54 }
 0x774   : > { %9293 = vmatprep.subr.bf16.mxu0 %v12377_v20 }
 0x777   : > { %9294 = vmatpush1.bf16.msra.mxu0 %v12375_v4 }
 0x77a   : > { %9296 = vmatmul.mubr.bf16.vlgmr.msra.gmra.mrb[40].mxu0 %v7175_v44  ;;  %v12384_v44 = vld [vmem:[%s17071_s7 + $0x58] sm:$0xff]  }
 0x77b   : > { %11408 = vmatprep.subr.bf16.mxu1 %v12384_v44 }
 0x77c   : > { %11409 = vmatpush3.bf16.msra.mxu1 %v12385_v39 }
 0x77d   : > { %11410 = vmatprep.subr.bf16.mxu1 %v12386_v15 }
 0x780   : > { %11411 = vmatpush3.bf16.msra.mxu1 %v12387_v6 }
 0x781   : > { %11412 = vmatprep.subr.bf16.mxu1 %v12388_v24 }
 0x784   : > { %11413 = vmatpush3.bf16.msra.mxu1 %v12389_v11 }
 0x785   : > { %11414 = vmatprep.subr.bf16.mxu1 %v12390_v51 }
 0x788   : > { %11415 = vmatpush3.bf16.msra.mxu1 %v12391_v7 }
 0x789   : > { %11416 = vmatprep.subr.bf16.mxu1 %v12392_v59 }
 0x78c   : > { %11417 = vmatpush3.bf16.msra.mxu1 %v12393_v12 }
 0x78d   : > { %11424 = vmatprep.subr.bf16.mxu1 %v12394_v33 }
 0x84d   : > { %v9297_v29 = vpop.f32.mrb[40].mxu0 }
 0x84e   : > { %v11562_v9 = vadd.f32 %v9297_v29, %v7472_v14  ;;  %v9299_v45 = vpop.f32.mrb[41].mxu0 }
 0x84f   : > { %v11563_v47 = vadd.f32 %v9299_v45, %v7476_v28  ;;  %v9301_v21 = vpop.f32.mrb[42].mxu0 }
 0x850   : > { %v9306_v22 = vmax.f32 %v11562_v9, 0.0  ;;  %v11564_v43 = vadd.f32 %v9301_v21, %v7472_v14  ;;  %v9303_v2 = vpop.f32.mrb[43].mxu0 }
 0x851   : > { %v9307_v62 = vmax.f32 %v11563_v47, 0.0  ;;  %v11565_v41 = vadd.f32 %v9303_v2, %v7476_v28 }
 0x852   : > { %v9308_v27 = vmax.f32 %v11564_v43, 0.0 }
 0x853   : > { %v9314_v42 = vcombine.low %v9306_v22, %v9307_v62  ;;  %v9315_v58 = vcombine.high %v9306_v22, %v9307_v62  ;;  %v9309_v32 = vmax.f32 %v11565_v41, 0.0 }
 0x855   : > { %v9322_v48 = vrot.slane %v9314_v42, %v13732_v38  ;;  %v9329_v57 = vrot.slane %v9315_v58, %v13732_v38  ;;  %v9332_v61 = vcombine.low %v9308_v27, %v9309_v32  ;;  %v9333_v10 = vcombine.high %v9308_v27, %v9309_v32 }
 0x857   : > { %v9330_v0 = vcombine.high %v9322_v48, %v9322_v48  ;;  %v9331_v19 = vcombine.high %v9329_v57, %v9329_v57  ;;  %v9356_v63 = vrot.slane %v9322_v48, %v13732_v38  ;;  %v9372_v30 = vrot.slane %v9329_v57, %v13732_v38 }
 0x858   : > { %v16858_v60 = vrot.slane %v9332_v61, %v13732_v38  ;;  %v16865_v37 = vrot.slane %v9333_v10, %v13732_v38 }
 0x859   : > { %v9357_v55 = vcombine.high %v9356_v63, %v9356_v63  ;;  %v9364_v35 = vrot.slane %v9330_v0, %v13732_v38  ;;  %v9373_v52 = vcombine.high %v9372_v30, %v9372_v30  ;;  %v9380_v26 = vrot.slane %v9331_v19, %v13732_v38 }
 0x85a   : > { %v9430_v23 = vsel %vm3013_vm7, %v9356_v63, -inf  ;;  %v9458_v16 = vsel %vm3013_vm7, %v9372_v30, -inf  ;;  %v9348_v18 = vcombine.high %v16858_v60, %v16858_v60  ;;  %v9388_v30 = vrot.slane %v16858_v60, %v13732_v38 }
 0x85b   : > { %v9365_v8 = vcombine.high %v9364_v35, %v9364_v35  ;;  %v9381_v5 = vcombine.high %v9380_v26, %v9380_v26  ;;  %v9431_v49 = vrot.slane %v9430_v23, 4  ;;  %v9437_v36 = vsel %vm3013_vm7, %v9357_v55, -inf }
 0x85c   : > { %v9438_v54 = vrot.slane %v9437_v36, 4  ;;  %v9444_v20 = vsel %vm3013_vm7, %v9364_v35, -inf  ;;  %v9459_v4 = vrot.slane %v9458_v16, 4  ;;  %v9465_v3 = vsel %vm3013_vm7, %v9373_v52, -inf }
 0x85d   : > { %v9432_v50 = vmax.f32 %v9430_v23, %v9431_v49  ;;  %v9445_v13 = vrot.slane %v9444_v20, 4  ;;  %v9451_v31 = vsel %vm3013_vm7, %v9365_v8, -inf  ;;  %v9466_v53 = vrot.slane %v9465_v3, 4 }
 0x85e   : > { %v9439_v25 = vmax.f32 %v9437_v36, %v9438_v54  ;;  %v9452_v44 = vrot.slane %v9451_v31, 4  ;;  %v9460_v39 = vmax.f32 %v9458_v16, %v9459_v4  ;;  %v9472_v15 = vsel %vm3013_vm7, %v9380_v26, -inf }
 0x85f   : > { %v9433_v6 = vrot.slane %v9432_v50, 2  ;;  %v9446_v24 = vmax.f32 %v9444_v20, %v9445_v13  ;;  %v9467_v11 = vmax.f32 %v9465_v3, %v9466_v53  ;;  %v9473_v51 = vrot.slane %v9472_v15, 4 }
 0x860   : > { %v9440_v7 = vrot.slane %v9439_v25, 2  ;;  %v9453_v59 = vmax.f32 %v9451_v31, %v9452_v44  ;;  %v9461_v12 = vrot.slane %v9460_v39, 2  ;;  %v9479_v33 = vsel %vm3013_vm7, %v9381_v5, -inf }
 0x861   : > { %v9434_v56 = vmax.f32 %v9432_v50, %v9433_v6  ;;  %v9447_v14 = vrot.slane %v9446_v24, 2  ;;  %v9468_v28 = vrot.slane %v9467_v11, 2  ;;  %v9474_v29 = vmax.f32 %v9472_v15, %v9473_v51  ;;  %v9575_v6 = vld [vmem:[#allocation4] sm:$0x3] }
 0x862   : > { %v9441_v9 = vmax.f32 %v9439_v25, %v9440_v7  ;;  %v9454_v45 = vrot.slane %v9453_v59, 2  ;;  %v9462_v47 = vmax.f32 %v9460_v39, %v9461_v12  ;;  %v9480_v21 = vrot.slane %v9479_v33, 4 }
 0x863   : > { %v9435_v22 = vrot.slane %v9434_v56, 1  ;;  %v9448_v1 = vmax.f32 %v9446_v24, %v9447_v14  ;;  %v9469_v46 = vmax.f32 %v9467_v11, %v9468_v28  ;;  %v9475_v43 = vrot.slane %v9474_v29, 2 }
 0x864   : > { %v9442_v2 = vrot.slane %v9441_v9, 1  ;;  %v9455_v62 = vmax.f32 %v9453_v59, %v9454_v45  ;;  %v9463_v41 = vrot.slane %v9462_v47, 1  ;;  %v9481_v27 = vmax.f32 %v9479_v33, %v9480_v21 }
 0x865   : > { %v9436_v42 = vmax.f32 %v9434_v56, %v9435_v22  ;;  %v9449_v58 = vrot.slane %v9448_v1, 1  ;;  %v9470_v32 = vrot.slane %v9469_v46, 1  ;;  %v9476_v40 = vmax.f32 %v9474_v29, %v9475_v43  ;;  %v9598_v43 = vld [vmem:[#allocation4 + $0x2] sm:$0x3] }
 0x866   : > { %v9443_v48 = vmax.f32 %v9441_v9, %v9442_v2  ;;  %v9456_v57 = vrot.slane %v9455_v62, 1  ;;  %v9464_v61 = vmax.f32 %v9462_v47, %v9463_v41  ;;  %v9482_v10 = vrot.slane %v9481_v27, 2 }
 0x867   : > { %v9450_v0 = vmax.f32 %v9448_v1, %v9449_v58  ;;  %v9471_v19 = vmax.f32 %v9469_v46, %v9470_v32  ;;  %v9477_v63 = vrot.slane %v9476_v40, 1  ;;  %v9349_v52 = vcombine.high %v16865_v37, %v16865_v37 }
 0x868   : > { %v9483_v55 = vmax.f32 %v9481_v27, %v9482_v10  ;;  %v9542_v35 = vmax.f32 %v9436_v42, %v9464_v61  ;;  %v9396_v26 = vrot.slane %v9348_v18, %v13732_v38  ;;  %v9389_v8 = vcombine.high %v9388_v30, %v9388_v30 }
 0x869   : > { %v9478_v23 = vmax.f32 %v9476_v40, %v9477_v63  ;;  %v9543_v16 = vmax.f32 %v9443_v48, %v9471_v19  ;;  %v9404_v5 = vrot.slane %v16865_v37, %v13732_v38  ;;  %v9457_v49 = vmax.f32 %v9455_v62, %v9456_v57 }
 0x86a   : > { %v9484_v36 = vrot.slane %v9483_v55, 1  ;;  %v9397_v54 = vcombine.high %v9396_v26, %v9396_v26  ;;  %v9486_v20 = vsel %vm3013_vm7, %v9388_v30, -inf  ;;  %v9412_v31 = vrot.slane %v9349_v52, %v13732_v38 }
 0x86b   : > { %v9544_v4 = vmax.f32 %v9450_v0, %v9478_v23  ;;  %v11059_v60 = vpack.c.bf16 %v9543_v16, %v9542_v35  ;;  %v9405_v3 = vcombine.high %v9404_v5, %v9404_v5  ;;  %v9487_v50 = vrot.slane %v9486_v20, 4 }
 0x86c   : > { %v9485_v13 = vmax.f32 %v9483_v55, %v9484_v36  ;;  %v9493_v18 = vsel %vm3013_vm7, %v9389_v8, -inf  ;;  %v9500_v53 = vsel %vm3013_vm7, %v9396_v26, -inf  ;;  %v9507_v24 = vsel %vm3013_vm7, %v9397_v54, -inf }
 0x86d   : > { %v9561_v25 = vrot.slane %v11059_v60, %v16855_v17  ;;  %v9488_v44 = vmax.f32 %v9486_v20, %v9487_v50  ;;  %v9494_v37 = vrot.slane %v9493_v18, 4  ;;  %v9501_v39 = vrot.slane %v9500_v53, 4 }
 0x86e   : > { %v9545_v15 = vmax.f32 %v9457_v49, %v9485_v13  ;;  %v9514_v11 = vsel %vm3013_vm7, %v9404_v5, -inf  ;;  %v9521_v51 = vsel %vm3013_vm7, %v9405_v3, -inf  ;;  %v9508_v56 = vrot.slane %v9507_v24, 4 }
 0x86f   : > { %v9568_v7 = vrot.slane %v9561_v25, %v16855_v17  ;;  %v9489_v38 = vrot.slane %v9488_v44, 2  ;;  %v9495_v59 = vmax.f32 %v9493_v18, %v9494_v37  ;;  %v9502_v12 = vmax.f32 %v9500_v53, %v9501_v39 }
 0x870   : > { %v11060_v33 = vpack.c.bf16 %v9545_v15, %v9544_v4  ;;  %v9515_v14 = vrot.slane %v9514_v11, 4  ;;  %v9522_v28 = vrot.slane %v9521_v51, 4  ;;  %v9509_v22 = vmax.f32 %v9507_v24, %v9508_v56 }
 0x871   : > { %v9576_v29 = vsel %vm15923_vm15, %v9568_v7, %v9575_v6  ;;  %v9490_v9 = vmax.f32 %v9488_v44, %v9489_v38  ;;  %v9496_v45 = vrot.slane %v9495_v59, 2  ;;  %v9503_v47 = vrot.slane %v9502_v12, 2  ;;  %v9621_v6 = vld [vmem:[#allocation4 + $0x4] sm:$0x3] }
 0x872   : > { %9577 = vst [vmem:[#allocation4] sm:$0x3] %v9576_v29  ;;  %v9589_v21 = vrot.slane %v11060_v33, %v16855_v17  ;;  %v9516_v1 = vmax.f32 %v9514_v11, %v9515_v14  ;;  %v9523_v46 = vmax.f32 %v9521_v51, %v9522_v28  ;;  %v9413_v2 = vcombine.high %v9412_v31, %v9412_v31 }
 0x873   : > { %v9491_v62 = vrot.slane %v9490_v9, 1  ;;  %v9497_v41 = vmax.f32 %v9495_v59, %v9496_v45  ;;  %v9528_v27 = vsel %vm3013_vm7, %v9412_v31, -inf  ;;  %v9510_v58 = vrot.slane %v9509_v22, 2  ;;  %v12395_v45 = vld [vmem:[%s17071_s7 + $0x80] sm:$0xff]  }
 0x874   : > { %v9596_v42 = vrot.slane %v9589_v21, %v16855_v17  ;;  %v9517_v32 = vrot.slane %v9516_v1, 2  ;;  %v9524_v40 = vrot.slane %v9523_v46, 2  ;;  %v9504_v57 = vmax.f32 %v9502_v12, %v9503_v47  ;;  %v9644_v12 = vld [vmem:[#allocation4 + $0x6] sm:$0x3]  ;;  %v12396_v21 = vld [vmem:[%s17071_s7 + $0xc8] sm:$0xff]  }
 0x875   : > { %v9498_v48 = vrot.slane %v9497_v41, 1  ;;  %v9529_v61 = vrot.slane %v9528_v27, 4  ;;  %v9492_v63 = vmax.f32 %v9490_v9, %v9491_v62  ;;  %v9511_v30 = vmax.f32 %v9509_v22, %v9510_v58  ;;  %v12397_v22 = vld [vmem:[%s17071_s7 + $0x88] sm:$0xff]   ;;  %v12402_v62 = vld [vmem:[%s17071_s7 + $0xe0] sm:$0xff]   ;;  %v12406_v58 = vld [vmem:[%s17071_s7 + $0xf0] sm:$0xff]  }
 0x876   : > { %v9599_v10 = vsel %vm15923_vm15, %v9596_v42, %v9598_v43  ;;  %v9518_v0 = vmax.f32 %v9516_v1, %v9517_v32  ;;  %v9525_v19 = vmax.f32 %v9523_v46, %v9524_v40  ;;  %v9535_v35 = vsel %vm3013_vm7, %v9413_v2, -inf  ;;  %v12398_v1 = vld [vmem:[%s17071_s7 + $0xd0] sm:$0xff]   ;;  %v12400_v43 = vld [vmem:[%s17071_s7 + $0xd8] sm:$0xff]   ;;  %v12405_v42 = vld [vmem:[%s17071_s7 + $0xa8] sm:$0xff]  }
 0x877   : > { %9600 = vst [vmem:[#allocation4 + $0x2] sm:$0x3] %v9599_v10  ;;  %v9530_v55 = vmax.f32 %v9528_v27, %v9529_v61  ;;  %v9499_v52 = vmax.f32 %v9497_v41, %v9498_v48  ;;  %v9536_v16 = vrot.slane %v9535_v35, 4  ;;  %v9505_v8 = vrot.slane %v9504_v57, 1  ;;  %v12399_v46 = vld [vmem:[%s17071_s7 + $0x90] sm:$0xff]   ;;  %v12401_v2 = vld [vmem:[%s17071_s7 + $0x98] sm:$0xff]  }
 0x878   : > { %v9519_v26 = vrot.slane %v9518_v0, 1  ;;  %v9526_v23 = vrot.slane %v9525_v19, 1  ;;  %v9512_v4 = vrot.slane %v9511_v30, 1  ;;  %v12403_v41 = vld [vmem:[%s17071_s7 + $0xa0] sm:$0xff]   ;;  %v12404_v27 = vld [vmem:[%s17071_s7 + $0xe8] sm:$0xff]   ;;  %v12407_v40 = vld [vmem:[%s17071_s7 + $0xb0] sm:$0xff]  }
 0x879   : > { %v9531_v5 = vrot.slane %v9530_v55, 2  ;;  %v9537_v54 = vmax.f32 %v9535_v35, %v9536_v16  ;;  %v9506_v13 = vmax.f32 %v9504_v57, %v9505_v8  ;;  %v12408_v48 = vld [vmem:[%s17071_s7 + $0xf8] sm:$0xff]   ;;  %v12410_v10 = vld [vmem:[%s17071_s7 + $0x140] sm:$0xff]   ;;  %v12414_v35 = vld [vmem:[%s17071_s7 + $0x108] sm:$0xff]  }
 0x87a   : > { %v9520_v49 = vmax.f32 %v9518_v0, %v9519_v26  ;;  %v9527_v36 = vmax.f32 %v9525_v19, %v9526_v23  ;;  %v9513_v44 = vmax.f32 %v9511_v30, %v9512_v4  ;;  %v12409_v61 = vld [vmem:[%s17071_s7 + $0xb8] sm:$0xff]   ;;  %v12411_v19 = vld [vmem:[%s17071_s7 + $0x100] sm:$0xff]   ;;  %v12413_v30 = vld [vmem:[%s17071_s7 + $0x148] sm:$0xff]  }
 0x87b   : > { %v9532_v20 = vmax.f32 %v9530_v55, %v9531_v5  ;;  %v9538_v60 = vrot.slane %v9537_v54, 2  ;;  %v12416_v26 = vld [vmem:[%s17071_s7 + $0x110] sm:$0xff]   ;;  %v12417_v23 = vld [vmem:[%s17071_s7 + $0x158] sm:$0xff]   ;;  %v12419_v8 = vld [vmem:[%s17071_s7 + $0x160] sm:$0xff]  }
 0x87c   : > { %v9546_v3 = vmax.f32 %v9492_v63, %v9520_v49  ;;  %v9547_v50 = vmax.f32 %v9499_v52, %v9527_v36  ;;  %v12415_v52 = vld [vmem:[%s17071_s7 + $0x150] sm:$0xff]   ;;  %v12418_v16 = vld [vmem:[%s17071_s7 + $0x118] sm:$0xff]   ;;  %v12420_v5 = vld [vmem:[%s17071_s7 + $0x120] sm:$0xff]  }
 0x87d   : > { %v9533_v31 = vrot.slane %v9532_v20, 1  ;;  %v9539_v18 = vmax.f32 %v9537_v54, %v9538_v60  ;;  %v12421_v49 = vld [vmem:[%s17071_s7 + $0x168] sm:$0xff]   ;;  %v12423_v54 = vld [vmem:[%s17071_s7 + $0x170] sm:$0xff]   ;;  %v12425_v4 = vld [vmem:[%s17071_s7 + $0x178] sm:$0xff]  }
 0x87e   : > { %v11061_v53 = vpack.c.bf16 %v9547_v50, %v9546_v3  ;;  %v12422_v36 = vld [vmem:[%s17071_s7 + $0x128] sm:$0xff]   ;;  %v12426_v60 = vld [vmem:[%s17071_s7 + $0x138] sm:$0xff]   ;;  %v12427_v3 = vld [vmem:[%s17071_s7 + $0x1c0] sm:$0xff]  }
 0x87f   : > { %v9534_v25 = vmax.f32 %v9532_v20, %v9533_v31  ;;  %v9540_v37 = vrot.slane %v9539_v18, 1  ;;  %v12424_v20 = vld [vmem:[%s17071_s7 + $0x130] sm:$0xff]   ;;  %v12428_v50 = vld [vmem:[%s17071_s7 + $0x180] sm:$0xff]   ;;  %v12429_v31 = vld [vmem:[%s17071_s7 + $0x1c8] sm:$0xff]  }
 0x880   : > { %v9612_v39 = vrot.slane %v11061_v53, %v16855_v17  ;;  %v12430_v53 = vld [vmem:[%s17071_s7 + $0x188] sm:$0xff]  }
 0x881   : > { %v9548_v15 = vmax.f32 %v9506_v13, %v9534_v25  ;;  %v9541_v24 = vmax.f32 %v9539_v18, %v9540_v37  ;;  %v12431_v25 = vld [vmem:[%s17071_s7 + $0x1d0] sm:$0xff]   ;;  %v12434_v37 = vld [vmem:[%s17071_s7 + $0x198] sm:$0xff]  }
 0x882   : > { %v9619_v11 = vrot.slane %v9612_v39, %v16855_v17  ;;  %v12435_v39 = vld [vmem:[%s17071_s7 + $0x1e0] sm:$0xff]  }
 0x883   : > { %v9549_v51 = vmax.f32 %v9513_v44, %v9541_v24  ;;  %v12433_v44 = vld [vmem:[%s17071_s7 + $0x1d8] sm:$0xff]   ;;  %v12438_v24 = vld [vmem:[%s17071_s7 + $0x1a8] sm:$0xff]  }
 0x884   : > { %v9622_v7 = vsel %vm15923_vm15, %v9619_v11, %v9621_v6  ;;  %v12437_v6 = vld [vmem:[%s17071_s7 + $0x1e8] sm:$0xff]   ;;  %v12439_v11 = vld [vmem:[%s17071_s7 + $0x1f0] sm:$0xff]  }
 0x885   : > { %9623 = vst [vmem:[#allocation4 + $0x4] sm:$0x3] %v9622_v7  ;;  %v11062_v38 = vpack.c.bf16 %v9549_v51, %v9548_v15  ;;  %v12436_v15 = vld [vmem:[%s17071_s7 + $0x1a0] sm:$0xff]   ;;  %v12440_v51 = vld [vmem:[%s17071_s7 + $0x1b0] sm:$0xff]   ;;  %v12441_v7 = vld [vmem:[%s17071_s7 + $0x1f8] sm:$0xff]  }
 0x887   : > { %v9635_v59 = vrot.slane %v11062_v38, %v16855_v17  ;;  %v12442_v38 = vld [vmem:[%s17071_s7 + $0x1b8] sm:$0xff]  }
 0x889   : > { %v9642_v33 = vrot.slane %v9635_v59, %v16855_v17 }
 0x88b   : > { %v9645_v56 = vsel %vm15923_vm15, %v9642_v33, %v9644_v12 }
 0x88c   : > { %9646 = vst [vmem:[#allocation4 + $0x6] sm:$0x3] %v9645_v56 }
 0x893   : > { %v9647_v14 = vld [vmem:[#allocation4] sm:$0xff] }
 0x894   : > { %v9785_v28 = vrot.slane %v9647_v14, %v16855_v17  ;;  %v9778_v32 = vcombine.high %v9647_v14, %v9647_v14 }
 0x896   : > { %v9793_v29 = vcombine.high %v9785_v28, %v9785_v28  ;;  %v9801_v47 = vrot.slane %v9785_v28, %v16855_v17  ;;  %v9792_v57 = vrot.slane %v9778_v32, %v16855_v17 }
 0x898   : > { %v9815_v9 = vrot.slane %v9793_v29, %v16855_v17  ;;  %v9794_v0 = vcombine.high %v9792_v57, %v9792_v57  ;;  %v9823_v63 = vcombine.high %v9801_v47, %v9801_v47  ;;  %v9808_v13 = vrot.slane %v9792_v57, %v16855_v17  ;;  %v9776_v29 = vld [vmem:[%s17072_s8] sm:$0x1] }
 0x89a   : > { %10251 = vmatprep.mubr.bf16.mxu1 %v9815_v9  ;;  %v9825_v34 = vcombine.high %v9815_v9, %v9815_v9  ;;  %v9822_v55 = vrot.slane %v9794_v0, %v16855_v17  ;;  %v12432_v17 = vld [vmem:[%s17071_s7 + $0x190] sm:$0xff]   ;;  %v9824_v59 = vcombine.high %v9808_v13, %v9808_v13 }
 0x89b   : > { %10252 = vmatmul.mubr.bf16.vlgmr.msra.gmra.mrb[136].mxu1 %v9801_v47 }
 0x89c   : > { %11425 = vmatpush3.bf16.msra.mxu1 %v12395_v45  ;;  %10291 = vmatprep.mubr.bf16.mxu1 %v9825_v34  ;;  %v9826_v18 = vcombine.high %v9822_v55, %v9822_v55 }
 0x89d   : > { %11426 = vmatprep.subr.bf16.mxu1 %v12396_v21 }
 0x8a0   : > { %11427 = vmatpush3.bf16.msra.mxu1 %v12397_v22 }
 0x8a1   : > { %11428 = vmatprep.subr.bf16.mxu1 %v12398_v1 }
 0x8a4   : > { %11429 = vmatpush3.bf16.msra.mxu1 %v12399_v46 }
 0x8a5   : > { %11430 = vmatprep.subr.bf16.mxu1 %v12400_v43 }
 0x8a8   : > { %11431 = vmatpush3.bf16.msra.mxu1 %v12401_v2 }
 0x8a9   : > { %11432 = vmatprep.subr.bf16.mxu1 %v12402_v62 }
 0x8ac   : > { %11433 = vmatpush3.bf16.msra.mxu1 %v12403_v41 }
 0x8ad   : > { %11434 = vmatprep.subr.bf16.mxu1 %v12404_v27 }
 0x8b0   : > { %11435 = vmatpush3.bf16.msra.mxu1 %v12405_v42 }
 0x8b1   : > { %11436 = vmatprep.subr.bf16.mxu1 %v12406_v58 }
 0x8b4   : > { %11437 = vmatpush3.bf16.msra.mxu1 %v12407_v40 }
 0x8b5   : > { %11438 = vmatprep.subr.bf16.mxu1 %v12408_v48 }
 0x8b8   : > { %11439 = vmatpush3.bf16.msra.mxu1 %v12409_v61 }
 0x8b9   : > { %11446 = vmatprep.subr.bf16.mxu1 %v12410_v10 }
 0x8bb   : > { %10292 = vmatmul.mubr.bf16.vlgmr.msra.gmra.mrb[140].mxu1 %v9823_v63 }
 0x8bc   : > { %11447 = vmatpush3.bf16.msra.mxu1 %v12411_v19  ;;  %10331 = vmatprep.mubr.bf16.mxu1 %v9822_v55 }
 0x8bd   : > { %11448 = vmatprep.subr.bf16.mxu1 %v12413_v30 }
 0x8c0   : > { %11449 = vmatpush3.bf16.msra.mxu1 %v12414_v35 }
 0x8c1   : > { %11450 = vmatprep.subr.bf16.mxu1 %v12415_v52 }
 0x8c4   : > { %11451 = vmatpush3.bf16.msra.mxu1 %v12416_v26 }
 0x8c5   : > { %11452 = vmatprep.subr.bf16.mxu1 %v12417_v23 }
 0x8c8   : > { %11453 = vmatpush3.bf16.msra.mxu1 %v12418_v16 }
 0x8c9   : > { %11454 = vmatprep.subr.bf16.mxu1 %v12419_v8 }
 0x8cc   : > { %11455 = vmatpush3.bf16.msra.mxu1 %v12420_v5 }
 0x8cd   : > { %11456 = vmatprep.subr.bf16.mxu1 %v12421_v49 }
 0x8d0   : > { %11457 = vmatpush3.bf16.msra.mxu1 %v12422_v36 }
 0x8d1   : > { %11458 = vmatprep.subr.bf16.mxu1 %v12423_v54 }
 0x8d4   : > { %11459 = vmatpush3.bf16.msra.mxu1 %v12424_v20 }
 0x8d5   : > { %11460 = vmatprep.subr.bf16.mxu1 %v12425_v4 }
 0x8d8   : > { %11461 = vmatpush3.bf16.msra.mxu1 %v12426_v60 }
 0x8d9   : > { %11468 = vmatprep.subr.bf16.mxu1 %v12427_v3 }
 0x8db   : > { %10332 = vmatmul.mubr.bf16.vlgmr.msra.gmra.mrb[144].mxu1 %v9808_v13 }
 0x8dc   : > { %11469 = vmatpush3.bf16.msra.mxu1 %v12428_v50  ;;  %10371 = vmatprep.mubr.bf16.mxu1 %v9826_v18 }
 0x8dd   : > { %11470 = vmatprep.subr.bf16.mxu1 %v12429_v31 }
 0x8e0   : > { %11471 = vmatpush3.bf16.msra.mxu1 %v12430_v53 }
 0x8e1   : > { %11472 = vmatprep.subr.bf16.mxu1 %v12431_v25 }
 0x8e4   : > { %11473 = vmatpush3.bf16.msra.mxu1 %v12432_v17 }
 0x8e5   : > { %11474 = vmatprep.subr.bf16.mxu1 %v12433_v44 }
 0x8e8   : > { %11475 = vmatpush3.bf16.msra.mxu1 %v12434_v37 }
 0x8e9   : > { %11476 = vmatprep.subr.bf16.mxu1 %v12435_v39 }
 0x8ec   : > { %11477 = vmatpush3.bf16.msra.mxu1 %v12436_v15 }
 0x8ed   : > { %11478 = vmatprep.subr.bf16.mxu1 %v12437_v6 }
 0x8f0   : > { %11479 = vmatpush3.bf16.msra.mxu1 %v12438_v24 }
 0x8f1   : > { %11480 = vmatprep.subr.bf16.mxu1 %v12439_v11 }
 0x8f4   : > { %11481 = vmatpush3.bf16.msra.mxu1 %v12440_v51 }
 0x8f5   : > { %11482 = vmatprep.subr.bf16.mxu1 %v12441_v7 }
 0x8f8   : > { %11483 = vmatpush3.bf16.msra.mxu1 %v12442_v38 }
 0x8fb   : > { %10372 = vmatmul.mubr.bf16.vlgmr.msra.gmra.mrb[148].mxu1 %v9824_v59 }
 0x96e   : > { %v11418_v12 = vpop.f32.mrb[136].mxu1 }
 0x96f   : > { %v11419_v33 = vpop.f32.mrb[137].mxu1 }
 0x970   : > { %v11420_v56 = vadd.f32 %v11419_v33, %v11418_v12  ;;  %v11421_v14 = vpop.f32.mrb[138].mxu1 }
 0x971   : > { %v11422_v28 = vpop.f32.mrb[139].mxu1 }
 0x972   : > { %v10254_v47 = vadd.f32 %v11420_v56, %v9776_v29 }
 0x98e   : > { %v11440_v9 = vpop.f32.mrb[140].mxu1 }
 0x98f   : > { %v11441_v45 = vpop.f32.mrb[141].mxu1 }
 0x990   : > { %v11442_v21 = vadd.f32 %v11441_v45, %v11440_v9  ;;  %v11443_v34 = vpop.f32.mrb[142].mxu1 }
 0x991   : > { %v11444_v22 = vpop.f32.mrb[143].mxu1 }
 0x992   : > { %v10294_v1 = vadd.f32 %v11442_v21, %v10254_v47 }
 0x9ae   : > { %v11462_v46 = vpop.f32.mrb[144].mxu1 }
 0x9af   : > { %v11463_v43 = vpop.f32.mrb[145].mxu1 }
 0x9b0   : > { %v11464_v2 = vadd.f32 %v11463_v43, %v11462_v46  ;;  %v11465_v62 = vpop.f32.mrb[146].mxu1 }
 0x9b1   : > { %v11466_v41 = vpop.f32.mrb[147].mxu1 }
 0x9b2   : > { %v10334_v27 = vadd.f32 %v11464_v2, %v10294_v1 }
 0x9ce   : > { %v11484_v42 = vpop.f32.mrb[148].mxu1 }
 0x9cf   : > { %v11485_v58 = vpop.f32.mrb[149].mxu1 }
 0x9d0   : > { %v11486_v32 = vadd.f32 %v11485_v58, %v11484_v42  ;;  %v11487_v40 = vpop.f32.mrb[150].mxu1 }
 0x9d1   : > { %v11488_v48 = vpop.f32.mrb[151].mxu1 }
 0x9d2   : > { %v10374_v57 = vadd.f32 %v11486_v32, %v10334_v27 }
 0x9d4   : > { %10379 = vst [vmem:[%s328_s13] sm:$0x1] %v10374_v57 }
 0x9d5 PF: > { %s19_s30 = sadd.s32 1, %s12457_s30  }
 0x9d6   : > { %p16_p4 = scmp.ge.s32.totalorder %s19_s30, 4  }
 0x9d8   :  { %18 = sbr.rel (!%p16_p4) target bundleno = 1 (0x1), region = 101 }

</bundles_post_ra>
